<compile_context>
chip_gen: v5e
topology: v5e:2x2
jax: 0.10.0
libtpu: 0.0.40
codegen_flags: <defaults>
</compile_context>

<pallas_src>
import math

import jax
import jax.numpy as jnp
from jax.experimental import pallas as pl
from jax.experimental.pallas import tpu as pltpu

EPS = 1e-5          # nn.BatchNorm2d default eps
LANE = 128          # TPU lane width; all channel dims padded to multiples of this


# --------------------------------------------------------------------------
# hardware-derived budgets
# --------------------------------------------------------------------------
def _tpu_vmem_capacity_bytes():
    try:
        info = pltpu.get_tpu_info()
        cap = getattr(info, "vmem_capacity_bytes", None)
        if cap:
            return int(cap)
    except Exception:
        pass
    return 64 * 1024 * 1024            # conservative: v7x per-TensorCore VMEM


_VMEM_CAP = _tpu_vmem_capacity_bytes()
VMEM_LIMIT = min(100 * 1024 * 1024, int(_VMEM_CAP * 0.6))
ROW_CAP = 1024 if _VMEM_CAP >= 100 * 1024 * 1024 else 512


def _cparams(n_parallel_axes):
    return pltpu.CompilerParams(
        dimension_semantics=("parallel",) * n_parallel_axes,
        vmem_limit_bytes=VMEM_LIMIT)


# --------------------------------------------------------------------------
# small helpers
# --------------------------------------------------------------------------
def _round_up(x, m):
    return ((x + m - 1) // m) * m


def _pad128(c):
    return _round_up(c, LANE)


def _row_tiling(m, cap=ROW_CAP):
    """Pick (row tile, padded M). Full-dim block if M <= cap."""
    if m <= cap:
        return m, m
    t = cap - (cap % 8)
    while t >= 8:
        if m % t == 0:
            return t, m
        t -= 8
    return cap, _round_up(m, cap)


def _fold_bn_pad(bn, c_pad):
    """Fold BN into (scale, bias), padded to c_pad lanes (pad: scale=1, bias=0)."""
    scale = bn["gamma"] / jnp.sqrt(bn["var"] + EPS)
    bias = bn["beta"] - bn["mean"] * scale
    c = scale.shape[0]
    scale = jnp.pad(scale, (0, c_pad - c), constant_values=1.0)
    bias = jnp.pad(bias, (0, c_pad - c))
    return (scale.reshape(1, c_pad).astype(jnp.float32),
            bias.reshape(1, c_pad).astype(jnp.float32))


# --------------------------------------------------------------------------
# fused (BN+ReLU) -> 1x1-conv -> (BN+ReLU) matmul over channel chunks
# --------------------------------------------------------------------------
def _make_matmul_kernel(k_sizes, prologue, epilogue):
    nc = len(k_sizes)
    k_offsets = [0]
    for k in k_sizes[:-1]:
        k_offsets.append(k_offsets[-1] + k)

    def kernel(*refs):
        xs = refs[:nc]
        idx = nc
        w_ref = refs[idx]; idx += 1
        if prologue:
            si_ref, bi_ref = refs[idx], refs[idx + 1]; idx += 2
        if epilogue:
            so_ref, bo_ref = refs[idx], refs[idx + 1]; idx += 2
        o_ref = refs[idx]

        acc = None
        for c in range(nc):
            off, k = k_offsets[c], k_sizes[c]
            x = xs[c][...]
            if prologue:
                s = si_ref[:, off:off + k]
                b = bi_ref[:, off:off + k]
                x = jnp.maximum(x.astype(jnp.float32) * s + b,
                                0.0).astype(jnp.bfloat16)
            w = w_ref[off:off + k, :]
            part = jnp.dot(x, w, preferred_element_type=jnp.float32)
            acc = part if acc is None else acc + part
        if epilogue:
            acc = jnp.maximum(acc * so_ref[...] + bo_ref[...], 0.0)
        o_ref[...] = acc.astype(o_ref.dtype)

    return kernel


def dense_matmul(xs, w, si=None, bi=None, so=None, bo=None,
                 out_dtype=jnp.bfloat16):
    """out = [relu(bn_out(] relu(bn_in( concat(xs) )) @ w [))].

    xs: list of (M, K_c) bf16 channel chunks whose widths sum to w.shape[0].
    Single-pass over x: the (K, N) weight and BN vectors stay VMEM-resident
    (constant block index), grid is only over M row tiles.
    """
    M = xs[0].shape[0]
    k_sizes = tuple(int(x.shape[1]) for x in xs)
    K = sum(k_sizes)
    assert w.shape[0] == K
    Np = w.shape[1]
    prologue = si is not None
    epilogue = so is not None

    tm, Mp = _row_tiling(M)
    if Mp != M:
        xs = [jnp.pad(x, ((0, Mp - M), (0, 0))) for x in xs]

    args = list(xs)
    in_specs = [pl.BlockSpec((tm, k), lambda i: (i, 0)) for k in k_sizes]
    args.append(w)
    in_specs.append(pl.BlockSpec((K, Np), lambda i: (0, 0)))
    if prologue:
        args += [si, bi]
        in_specs += [pl.BlockSpec((1, K), lambda i: (0, 0))] * 2
    if epilogue:
        args += [so, bo]
        in_specs += [pl.BlockSpec((1, Np), lambda i: (0, 0))] * 2

    out = pl.pallas_call(
        _make_matmul_kernel(k_sizes, prologue, epilogue),
        out_shape=jax.ShapeDtypeStruct((Mp, Np), out_dtype),
        grid=(Mp // tm,),
        in_specs=in_specs,
        out_specs=pl.BlockSpec((tm, Np), lambda i: (i, 0)),
        compiler_params=_cparams(1),
    )(*args)
    return out[:M] if Mp != M else out


# --------------------------------------------------------------------------
# 3x3 s1 p1 conv: 9 shifted-tap matmuls, output added onto the current chunk
# --------------------------------------------------------------------------
def _make_conv3x3_kernel(H, W, add_base):
    def kernel(*refs):
        x_ref, w_ref = refs[0], refs[1]
        base_ref = refs[2] if add_base else None
        o_ref = refs[-1]
        Cp = x_ref.shape[-1]

        acc = None
        for dj in range(3):
            # one column-shifted view per dj; row taps are cheap row-range slices
            col = x_ref[0, :, dj:dj + W, :]              # (H+2, W, Cp)
            col = col.reshape((H + 2) * W, Cp)
            for di in range(3):
                tap = col[di * W: di * W + H * W, :]     # (H*W, Cp)
                part = jnp.dot(tap, w_ref[di, dj],
                               preferred_element_type=jnp.float32)
                acc = part if acc is None else acc + part
        if add_base:
            acc = acc + base_ref[0].astype(jnp.float32)
        o_ref[0] = acc.astype(o_ref.dtype)

    return kernel


def conv3x3_add(x4, w, base=None):
    """y = conv3x3_s1_p1(x4) [+ base].

    x4:(N,H,W,Cp) bf16 (pre-activated); w:(3,3,Cp,128) bf16 with the real output
    channels already placed at their destination lane offset (zeros elsewhere);
    base:(N*H*W,128) bf16 current chunk (its target lanes are zero) or None.
    """
    N, H, W, Cp = x4.shape
    xp = jnp.pad(x4, ((0, 0), (1, 1), (1, 1), (0, 0)))
    add_base = base is not None
    args = [xp, w]
    in_specs = [
        pl.BlockSpec((1, H + 2, W + 2, Cp), lambda n: (n, 0, 0, 0)),
        pl.BlockSpec((3, 3, Cp, LANE), lambda n: (0, 0, 0, 0)),
    ]
    if add_base:
        args.append(base.reshape(N, H * W, LANE))
        in_specs.append(pl.BlockSpec((1, H * W, LANE), lambda n: (n, 0, 0)))
    # TODO(synk): add an output-row grid axis ("parallel") so v7x's second
    #             TensorCore gets work when batch x channel-tiles < 2.
    out = pl.pallas_call(
        _make_conv3x3_kernel(H, W, add_base),
        out_shape=jax.ShapeDtypeStruct((N, H * W, LANE), jnp.bfloat16),
        grid=(N,),
        in_specs=in_specs,
        out_specs=pl.BlockSpec((1, H * W, LANE), lambda n: (n, 0, 0)),
        compiler_params=_cparams(1),
    )(*args)
    return out.reshape(N * H * W, LANE)


# --------------------------------------------------------------------------
# final norm5 + relu over the chunk list (writes one lane-dense output)
# --------------------------------------------------------------------------
def _make_bnrelu_kernel(nc):
    def kernel(*refs):
        xs = refs[:nc]
        s_ref, b_ref = refs[nc], refs[nc + 1]
        o_ref = refs[nc + 2]
        for c in range(nc):
            v = xs[c][...].astype(jnp.float32)
            s = s_ref[:, c * LANE:(c + 1) * LANE]
            b = b_ref[:, c * LANE:(c + 1) * LANE]
            o_ref[:, c * LANE:(c + 1) * LANE] = jnp.maximum(
                v * s + b, 0.0).astype(o_ref.dtype)
    return kernel


def bn_relu_concat(chunks, s, b, out_dtype=jnp.float32):
    M = chunks[0].shape[0]
    nc = len(chunks)
    tm, Mp = _row_tiling(M)
    xs = chunks
    if Mp != M:
        xs = [jnp.pad(x, ((0, Mp - M), (0, 0))) for x in xs]
    out = pl.pallas_call(
        _make_bnrelu_kernel(nc),
        out_shape=jax.ShapeDtypeStruct((Mp, nc * LANE), out_dtype),
        grid=(Mp // tm,),
        in_specs=[pl.BlockSpec((tm, LANE), lambda i: (i, 0))] * nc
                 + [pl.BlockSpec((1, nc * LANE), lambda i: (0, 0))] * 2,
        out_specs=pl.BlockSpec((tm, nc * LANE), lambda i: (i, 0)),
        compiler_params=_cparams(1),
    )(*xs, s, b)
    return out[:M] if Mp != M else out


# --------------------------------------------------------------------------
# pooling: column parity folded into the lane dim (free reshape in glue),
# decimation done in-kernel with 128-aligned lane slices -- no strided copies.
# --------------------------------------------------------------------------
def _make_maxpool_kernel(Ho, Wo, C):
    def kernel(x_ref, o_ref):
        v = x_ref[0]                              # (2*Ho+2, Wo+1, 2*C)
        e = v[:, :, :C]                           # even padded columns
        o = v[:, :, C:]                           # odd padded columns
        cm = jnp.maximum(jnp.maximum(e[:, :Wo, :], o[:, :Wo, :]),
                         e[:, 1:Wo + 1, :])       # (2*Ho+2, Wo, C)
        out = None
        for di in range(3):
            r = cm[di:di + 2 * Ho]
            r = r.reshape(Ho, 2, Wo, C)[:, 0]
            out = r if out is None else jnp.maximum(out, r)
        o_ref[0] = out.astype(o_ref.dtype)
    return kernel


def maxpool_3x3_s2_p1(x4):
    """nn.MaxPool2d(kernel_size=3, stride=2, padding=1) on NHWC."""
    N, H, W, C = x4.shape
    Ho = (H - 1) // 2 + 1
    Wo = (W - 1) // 2 + 1
    pad_b = 2 * Ho + 1 - H
    pad_r = 2 * Wo + 1 - W
    xp = jnp.pad(x4, ((0, 0), (1, pad_b), (1, pad_r), (0, 0)),
                 constant_values=-jnp.inf)        # inputs are post-ReLU (>= 0)
    Hp = 2 * Ho + 2
    xp = xp.reshape(N, Hp, Wo + 1, 2 * C)         # free column-parity fold
    return pl.pallas_call(
        _make_maxpool_kernel(Ho, Wo, C),
        out_shape=jax.ShapeDtypeStruct((N, Ho, Wo, C), x4.dtype),
        grid=(N,),
        in_specs=[pl.BlockSpec((1, Hp, Wo + 1, 2 * C), lambda n: (n, 0, 0, 0))],
        out_specs=pl.BlockSpec((1, Ho, Wo, C), lambda n: (n, 0, 0, 0)),
        compiler_params=_cparams(1),
    )(xp)


def _make_avgpool_kernel(Ho, Wo, C):
    def kernel(x_ref, o_ref):
        v = x_ref[0].astype(jnp.float32)          # (2*Ho, Wo, 2*C)
        cs = v[:, :, :C] + v[:, :, C:]            # column-pair sum
        cs = cs.reshape(Ho, 2, Wo, C)
        o_ref[0] = ((cs[:, 0] + cs[:, 1]) * 0.25).astype(o_ref.dtype)
    return kernel


def avgpool_2x2_s2(x4):
    """nn.AvgPool2d(kernel_size=2, stride=2) on NHWC (floor mode)."""
    N, H, W, C = x4.shape
    Ho, Wo = H // 2, W // 2
    if H != 2 * Ho or W != 2 * Wo:
        x4 = x4[:, :2 * Ho, :2 * Wo, :]
    x5 = x4.reshape(N, 2 * Ho, Wo, 2 * C)          # free column-parity fold
    return pl.pallas_call(
        _make_avgpool_kernel(Ho, Wo, C),
        out_shape=jax.ShapeDtypeStruct((N, Ho, Wo, C), x4.dtype),
        grid=(N,),
        in_specs=[pl.BlockSpec((1, 2 * Ho, Wo, 2 * C), lambda n: (n, 0, 0, 0))],
        out_specs=pl.BlockSpec((1, Ho, Wo, C), lambda n: (n, 0, 0, 0)),
        compiler_params=_cparams(1),
    )(x5)


# --------------------------------------------------------------------------
# conv0 im2col (glue; see TODO at top)
# --------------------------------------------------------------------------
def _im2col(x, kh, kw, stride, pad):
    n, h, w, c = x.shape
    ho = (h + 2 * pad - kh) // stride + 1
    wo = (w + 2 * pad - kw) // stride + 1
    xp = jnp.pad(x, ((0, 0), (pad, pad), (pad, pad), (0, 0)))
    cols = []
    for di in range(kh):
        for dj in range(kw):
            cols.append(xp[:, di:di + stride * (ho - 1) + 1:stride,
                           dj:dj + stride * (wo - 1) + 1:stride, :])
    patches = jnp.concatenate(cols, axis=-1)              # (N, Ho, Wo, kh*kw*C)
    return patches.reshape(n * ho * wo, kh * kw * c), (n, ho, wo)


# --------------------------------------------------------------------------
# parameter construction (mirrors DenseNetFeatures.__init__, padded layouts)
# --------------------------------------------------------------------------
def _kaiming_conv(key, kh, kw, cin, cout):
    std = math.sqrt(2.0 / (kh * kw * cin))
    return std * jax.random.normal(key, (kh, kw, cin, cout), dtype=jnp.float32)


def _bn_params(c):
    return dict(gamma=jnp.ones((c,), jnp.float32),
                beta=jnp.zeros((c,), jnp.float32),
                mean=jnp.zeros((c,), jnp.float32),
                var=jnp.ones((c,), jnp.float32))


def _pad_mat(w, rows, cols):
    w = jnp.pad(w, ((0, rows - w.shape[0]), (0, cols - w.shape[1])))
    return w.astype(jnp.bfloat16)


def _pad_conv2(w, cinp, lane_offset):
    """(3,3,cin,growth) -> (3,3,cinp,128) with outputs at [lane_offset, +growth)."""
    kh, kw, cin, g = w.shape
    out = jnp.zeros((kh, kw, cinp, LANE), jnp.float32)
    out = out.at[:, :, :cin, lane_offset:lane_offset + g].set(w)
    return out.astype(jnp.bfloat16)


def init_densenet_features(key, growth_rate=32, block_config=(6, 12, 24, 16),
                           num_init_features=64, bn_size=4):
    params = {}
    key, k = jax.random.split(key)
    w0 = _kaiming_conv(k, 7, 7, 3, num_init_features).reshape(
        49 * 3, num_init_features)
    params["conv0_w"] = _pad_mat(w0, 49 * 3, _pad128(num_init_features))
    params["norm0"] = _bn_params(num_init_features)

    num_features = num_init_features
    params["blocks"] = []
    params["transitions"] = []
    for i, num_layers in enumerate(block_config):
        layers = []
        for l in range(num_layers):
            cin = num_features + l * growth_rate
            mid = bn_size * growth_rate
            lane_off = cin % LANE
            if lane_off + growth_rate > LANE:
                # TODO(synk): layer output straddling a 128-lane chunk boundary
                #             is not supported by the in-place chunk writeback
                #             (never happens for standard DenseNet configs).
                raise NotImplementedError("growth placement straddles a lane chunk")
            key, k1, k2 = jax.random.split(key, 3)
            w1 = _kaiming_conv(k1, 1, 1, cin, mid).reshape(cin, mid)
            w2 = _kaiming_conv(k2, 3, 3, mid, growth_rate)
            layers.append(dict(
                norm1=_bn_params(cin),
                conv1_w=_pad_mat(w1, _pad128(cin), _pad128(mid)),
                norm2=_bn_params(mid),
                conv2_w=_pad_conv2(w2, _pad128(mid), lane_off),
            ))
        params["blocks"].append(layers)
        num_features += num_layers * growth_rate
        if i != len(block_config) - 1:
            key, k1 = jax.random.split(key)
            cout = num_features // 2
            wt = _kaiming_conv(k1, 1, 1, num_features, cout).reshape(
                num_features, cout)
            params["transitions"].append(dict(
                norm=_bn_params(num_features),
                conv_w=_pad_mat(wt, _pad128(num_features), _pad128(cout))))
            num_features = cout
    params["norm5"] = _bn_params(num_features)
    return params, num_features


# --------------------------------------------------------------------------
# forward pass (semantics of DenseNetFeatures.forward, eval mode, drop_rate=0)
# --------------------------------------------------------------------------
def _split_chunks(xf, c_pad):
    if c_pad == LANE:
        return [xf]
    return [xf[:, j * LANE:(j + 1) * LANE] for j in range(c_pad // LANE)]


def densenet_features_forward(params, x_nchw, cfg):
    growth = cfg["growth_rate"]
    block_config = cfg["block_config"]

    x = jnp.transpose(x_nchw.astype(jnp.float32), (0, 2, 3, 1))   # NCHW -> NHWC
    x = x.astype(jnp.bfloat16)

    # conv0 (7x7 s2 p3) with fused norm0 + relu0 epilogue
    patches, (N, H, W) = _im2col(x, 7, 7, 2, 3)
    c0p = params["conv0_w"].shape[1]
    s0, b0 = _fold_bn_pad(params["norm0"], c0p)
    y = dense_matmul([patches], params["conv0_w"], so=s0, bo=b0)
    x4 = y.reshape(N, H, W, c0p)

    # pool0 (maxpool 3x3 s2 p1)
    x4 = maxpool_3x3_s2_p1(x4)
    N, H, W, Cp = x4.shape
    chunks = _split_chunks(x4.reshape(N * H * W, Cp), Cp)
    c_real = cfg["num_init_features"]

    for i, num_layers in enumerate(block_config):
        for l in range(num_layers):
            p = params["blocks"][i][l]
            kpad = LANE * len(chunks)
            s1, b1 = _fold_bn_pad(p["norm1"], kpad)
            mid_p = p["conv1_w"].shape[1]
            s2, b2 = _fold_bn_pad(p["norm2"], mid_p)
            # norm1 -> relu1 -> conv1(1x1) -> norm2 -> relu2 (one fused kernel)
            h = dense_matmul(chunks, p["conv1_w"], si=s1, bi=b1, so=s2, bo=b2)
            # conv2 (3x3 p1): accumulate 9 taps in-kernel and add the result
            # straight onto the current 128-lane chunk (dense connectivity
            # without copying the growing feature map).
            co = c_real % LANE
            ci = c_real // LANE
            base = chunks[ci] if co != 0 else None
            g = conv3x3_add(h.reshape(N, H, W, mid_p), p["conv2_w"], base)
            if co == 0:
                chunks.append(g)
            else:
                chunks[ci] = g
            c_real += growth
            # TODO(synk): F.dropout for drop_rate > 0 not implemented.

        if i != len(block_config) - 1:
            t = params["transitions"][i]
            kpad = LANE * len(chunks)
            st, bt = _fold_bn_pad(t["norm"], kpad)
            h = dense_matmul(chunks, t["conv_w"], si=st, bi=bt)   # norm+relu+conv
            c_real = c_real // 2
            cout_p = t["conv_w"].shape[1]
            x4 = avgpool_2x2_s2(h.reshape(N, H, W, cout_p))
            N, H, W, Cp = x4.shape
            chunks = _split_chunks(x4.reshape(N * H * W, Cp), Cp)

    # norm5 -> final_relu
    s5, b5 = _fold_bn_pad(params["norm5"], LANE * len(chunks))
    out = bn_relu_concat(chunks, s5, b5)                          # (M, nc*128) f32
    out = out[:, :c_real].reshape(N, H, W, c_real)
    return jnp.transpose(out, (0, 3, 1, 2))                       # NHWC -> NCHW


# --------------------------------------------------------------------------
if __name__ == "__main__":
    # Small DenseNet-BC-shaped config; 64x64 input keeps W a multiple of 8 at
    # every 3x3-conv stage (relayout-free in-kernel reshapes).
    growth_rate = 8
    block_config = (2, 2)
    num_init_features = 8
    bn_size = 2

    key = jax.random.PRNGKey(0)
    key, pkey, xkey = jax.random.split(key, 3)

    params, final_c = init_densenet_features(
        pkey, growth_rate=growth_rate, block_config=block_config,
        num_init_features=num_init_features, bn_size=bn_size)

    # PyTorch-convention NCHW input.
    x = jax.random.normal(xkey, (2, 3, 64, 64), dtype=jnp.float32)

    cfg = dict(growth_rate=growth_rate, block_config=block_config,
               num_init_features=num_init_features, bn_size=bn_size)
    fwd = jax.jit(lambda p, xx: densenet_features_forward(p, xx, cfg))
    out = jax.block_until_ready(fwd(params, x))

    expected = (2, final_c, 8, 8)   # 64 -> conv0/2 -> pool0/2 -> transition/2
    assert out.shape == expected, (out.shape, expected)
    assert bool(jnp.all(jnp.isfinite(out)))
    assert bool(jnp.all(out >= 0.0))  # final_relu
    print("KERNEL_OK")
</pallas_src>

<mosaic_0001>
module attributes {stable_mosaic.version = 11 : i64} {
  func.func @kernel(%arg0: i32, %arg1: memref<512x147xbf16, #tpu.memory_space<vmem>>, %arg2: memref<147x128xbf16, #tpu.memory_space<vmem>>, %arg3: memref<1x128xf32, #tpu.memory_space<vmem>>, %arg4: memref<1x128xf32, #tpu.memory_space<vmem>>, %arg5: memref<512x128xbf16, #tpu.memory_space<vmem>>) attributes {dimension_semantics = [#tpu.dimension_semantics<parallel>], iteration_bounds = array<i64: 4>, scalar_prefetch = 0 : i64, scratch_operands = 0 : i64, tpu.core_type = #tpu.core_type<tc>, window_params = [{transform_indices = @transform_0, window_bounds = array<i64: 512, 147>}, {pipeline_mode = #tpu.pipeline_mode<synchronous>, transform_indices = @transform_1, window_bounds = array<i64: 147, 128>}, {pipeline_mode = #tpu.pipeline_mode<synchronous>, transform_indices = @transform_2, window_bounds = array<i64: 1, 128>}, {pipeline_mode = #tpu.pipeline_mode<synchronous>, transform_indices = @transform_3, window_bounds = array<i64: 1, 128>}, {transform_indices = @transform_4, window_bounds = array<i64: 512, 128>}]} {
    %c0 = arith.constant 0 : index
    %c0_0 = arith.constant 0 : index
    %0 = vector.load %arg1[%c0, %c0_0] : memref<512x147xbf16, #tpu.memory_space<vmem>>, vector<512x147xbf16>
    %c0_1 = arith.constant 0 : index
    %c0_2 = arith.constant 0 : index
    %1 = vector.load %arg2[%c0_1, %c0_2] : memref<147x128xbf16, #tpu.memory_space<vmem>>, vector<147x128xbf16>
    %cst = arith.constant dense<0.000000e+00> : vector<512x128xf32>
    %2 = tpu.matmul %0, %1, %cst {dimension_numbers = #tpu.dot_dimension_numbers<[1], [0], [0], [1], [0, 0, 1, 1], [], []>} : vector<512x147xbf16>, vector<147x128xbf16>, vector<512x128xf32> -> vector<512x128xf32>
    %c0_3 = arith.constant 0 : index
    %c0_4 = arith.constant 0 : index
    %3 = vector.load %arg3[%c0_3, %c0_4] : memref<1x128xf32, #tpu.memory_space<vmem>>, vector<1x128xf32>
    %4 = vector.broadcast %3 : vector<1x128xf32> to vector<512x128xf32>
    %5 = arith.mulf %2, %4 : vector<512x128xf32>
    %c0_5 = arith.constant 0 : index
    %c0_6 = arith.constant 0 : index
    %6 = vector.load %arg4[%c0_5, %c0_6] : memref<1x128xf32, #tpu.memory_space<vmem>>, vector<1x128xf32>
    %7 = vector.broadcast %6 : vector<1x128xf32> to vector<512x128xf32>
    %8 = arith.addf %5, %7 : vector<512x128xf32>
    %cst_7 = arith.constant 0.000000e+00 : f32
    %9 = vector.broadcast %cst_7 : f32 to vector<512x128xf32>
    %10 = arith.maximumf %8, %9 : vector<512x128xf32>
    %11 = arith.truncf %10 : vector<512x128xf32> to vector<512x128xbf16>
    %c0_8 = arith.constant 0 : index
    %c0_9 = arith.constant 0 : index
    %12 = vector.load %arg5[%c0_8, %c0_9] : memref<512x128xbf16, #tpu.memory_space<vmem>>, vector<512x128xbf16>
    tpu.vector_store %arg5[%c0_8, %c0_9], %11 {strides = array<i32>} : memref<512x128xbf16, #tpu.memory_space<vmem>>, vector<512x128xbf16>,
    return
  }
  func.func @transform_0(%arg0: i32) -> (i32, i32) {
    %c0_i32 = arith.constant 0 : i32
    %c0_i32_0 = arith.constant 0 : i32
    return %arg0, %c0_i32 : i32, i32
  }
  func.func @transform_1(%arg0: i32) -> (i32, i32) {
    %c0_i32 = arith.constant 0 : i32
    %c0_i32_0 = arith.constant 0 : i32
    %c0_i32_1 = arith.constant 0 : i32
    return %c0_i32, %c0_i32_0 : i32, i32
  }
  func.func @transform_2(%arg0: i32) -> (i32, i32) {
    %c0_i32 = arith.constant 0 : i32
    %c0_i32_0 = arith.constant 0 : i32
    %c0_i32_1 = arith.constant 0 : i32
    return %c0_i32, %c0_i32_0 : i32, i32
  }
  func.func @transform_3(%arg0: i32) -> (i32, i32) {
    %c0_i32 = arith.constant 0 : i32
    %c0_i32_0 = arith.constant 0 : i32
    %c0_i32_1 = arith.constant 0 : i32
    return %c0_i32, %c0_i32_0 : i32, i32
  }
  func.func @transform_4(%arg0: i32) -> (i32, i32) {
    %c0_i32 = arith.constant 0 : i32
    %c0_i32_0 = arith.constant 0 : i32
    return %arg0, %c0_i32 : i32, i32
  }
}

module attributes {stable_mosaic.version = 11 : i64} {
  func.func @kernel(%arg0: i32, %arg1: memref<1x34x17x256xbf16, #tpu.memory_space<vmem>>, %arg2: memref<1x16x16x128xbf16, #tpu.memory_space<vmem>>) attributes {dimension_semantics = [#tpu.dimension_semantics<parallel>], iteration_bounds = array<i64: 2>, scalar_prefetch = 0 : i64, scratch_operands = 0 : i64, tpu.core_type = #tpu.core_type<tc>, window_params = [{transform_indices = @transform_0, window_bounds = array<i64: 1, 34, 17, 256>}, {transform_indices = @transform_1, window_bounds = array<i64: 1, 16, 16, 128>}]} {
    %c0 = arith.constant 0 : index
    %c0_0 = arith.constant 0 : index
    %c0_1 = arith.constant 0 : index
    %c0_2 = arith.constant 0 : index
    %0 = vector.load %arg1[%c0, %c0_0, %c0_1, %c0_2] : memref<1x34x17x256xbf16, #tpu.memory_space<vmem>>, vector<1x34x17x256xbf16>
    %1 = vector.shape_cast %0 : vector<1x34x17x256xbf16> to vector<34x17x256xbf16>
    %2 = vector.extract_strided_slice %1 {offsets = [0, 0, 0], sizes = [34, 17, 128], strides = [1, 1, 1]} : vector<34x17x256xbf16> to vector<34x17x128xbf16>
    %3 = vector.extract_strided_slice %1 {offsets = [0, 0, 128], sizes = [34, 17, 128], strides = [1, 1, 1]} : vector<34x17x256xbf16> to vector<34x17x128xbf16>
    %4 = vector.extract_strided_slice %2 {offsets = [0, 0, 0], sizes = [34, 16, 128], strides = [1, 1, 1]} : vector<34x17x128xbf16> to vector<34x16x128xbf16>
    %5 = vector.extract_strided_slice %3 {offsets = [0, 0, 0], sizes = [34, 16, 128], strides = [1, 1, 1]} : vector<34x17x128xbf16> to vector<34x16x128xbf16>
    %6 = arith.maximumf %4, %5 : vector<34x16x128xbf16>
    %7 = vector.extract_strided_slice %2 {offsets = [0, 1, 0], sizes = [34, 16, 128], strides = [1, 1, 1]} : vector<34x17x128xbf16> to vector<34x16x128xbf16>
    %8 = arith.maximumf %6, %7 : vector<34x16x128xbf16>
    %9 = vector.extract_strided_slice %8 {offsets = [0, 0, 0], sizes = [32, 16, 128], strides = [1, 1, 1]} : vector<34x16x128xbf16> to vector<32x16x128xbf16>
    %10 = vector.shape_cast %9 : vector<32x16x128xbf16> to vector<16x2x16x128xbf16>
    %11 = vector.extract_strided_slice %10 {offsets = [0, 0, 0, 0], sizes = [16, 1, 16, 128], strides = [1, 1, 1, 1]} : vector<16x2x16x128xbf16> to vector<16x1x16x128xbf16>
    %12 = vector.shape_cast %11 : vector<16x1x16x128xbf16> to vector<16x16x128xbf16>
    %13 = vector.extract_strided_slice %8 {offsets = [1, 0, 0], sizes = [32, 16, 128], strides = [1, 1, 1]} : vector<34x16x128xbf16> to vector<32x16x128xbf16>
    %14 = vector.shape_cast %13 : vector<32x16x128xbf16> to vector<16x2x16x128xbf16>
    %15 = vector.extract_strided_slice %14 {offsets = [0, 0, 0, 0], sizes = [16, 1, 16, 128], strides = [1, 1, 1, 1]} : vector<16x2x16x128xbf16> to vector<16x1x16x128xbf16>
    %16 = vector.shape_cast %15 : vector<16x1x16x128xbf16> to vector<16x16x128xbf16>
    %17 = arith.maximumf %12, %16 : vector<16x16x128xbf16>
    %18 = vector.extract_strided_slice %8 {offsets = [2, 0, 0], sizes = [32, 16, 128], strides = [1, 1, 1]} : vector<34x16x128xbf16> to vector<32x16x128xbf16>
    %19 = vector.shape_cast %18 : vector<32x16x128xbf16> to vector<16x2x16x128xbf16>
    %20 = vector.extract_strided_slice %19 {offsets = [0, 0, 0, 0], sizes = [16, 1, 16, 128], strides = [1, 1, 1, 1]} : vector<16x2x16x128xbf16> to vector<16x1x16x128xbf16>
    %21 = vector.shape_cast %20 : vector<16x1x16x128xbf16> to vector<16x16x128xbf16>
    %22 = arith.maximumf %17, %21 : vector<16x16x128xbf16>
    %c0_3 = arith.constant 0 : index
    %c0_4 = arith.constant 0 : index
    %c0_5 = arith.constant 0 : index
    %c0_6 = arith.constant 0 : index
    %23 = vector.load %arg2[%c0_3, %c0_4, %c0_5, %c0_6] : memref<1x16x16x128xbf16, #tpu.memory_space<vmem>>, vector<1x16x16x128xbf16>
    %24 = vector.shape_cast %23 : vector<1x16x16x128xbf16> to vector<16x16x128xbf16>
    %25 = vector.shape_cast %22 : vector<16x16x128xbf16> to vector<1x16x16x128xbf16>
    tpu.vector_store %arg2[%c0_3, %c0_4, %c0_5, %c0_6], %25 {strides = array<i32>} : memref<1x16x16x128xbf16, #tpu.memory_space<vmem>>, vector<1x16x16x128xbf16>,
    return
  }
  func.func @transform_0(%arg0: i32) -> (i32, i32, i32, i32) {
    %c0_i32 = arith.constant 0 : i32
    %c0_i32_0 = arith.constant 0 : i32
    %c0_i32_1 = arith.constant 0 : i32
    %c0_i32_2 = arith.constant 0 : i32
    return %arg0, %c0_i32, %c0_i32_0, %c0_i32_1 : i32, i32, i32, i32
  }
  func.func @transform_1(%arg0: i32) -> (i32, i32, i32, i32) {
    %c0_i32 = arith.constant 0 : i32
    %c0_i32_0 = arith.constant 0 : i32
    %c0_i32_1 = arith.constant 0 : i32
    %c0_i32_2 = arith.constant 0 : i32
    return %arg0, %c0_i32, %c0_i32_0, %c0_i32_1 : i32, i32, i32, i32
  }
}

module attributes {stable_mosaic.version = 11 : i64} {
  func.func @kernel(%arg0: i32, %arg1: memref<512x128xbf16, #tpu.memory_space<vmem>>, %arg2: memref<128x128xbf16, #tpu.memory_space<vmem>>, %arg3: memref<1x128xf32, #tpu.memory_space<vmem>>, %arg4: memref<1x128xf32, #tpu.memory_space<vmem>>, %arg5: memref<1x128xf32, #tpu.memory_space<vmem>>, %arg6: memref<1x128xf32, #tpu.memory_space<vmem>>, %arg7: memref<512x128xbf16, #tpu.memory_space<vmem>>) attributes {dimension_semantics = [#tpu.dimension_semantics<parallel>], iteration_bounds = array<i64: 1>, scalar_prefetch = 0 : i64, scratch_operands = 0 : i64, tpu.core_type = #tpu.core_type<tc>, window_params = [{transform_indices = @transform_0, window_bounds = array<i64: 512, 128>}, {pipeline_mode = #tpu.pipeline_mode<synchronous>, transform_indices = @transform_1, window_bounds = array<i64: 128, 128>}, {pipeline_mode = #tpu.pipeline_mode<synchronous>, transform_indices = @transform_2, window_bounds = array<i64: 1, 128>}, {pipeline_mode = #tpu.pipeline_mode<synchronous>, transform_indices = @transform_3, window_bounds = array<i64: 1, 128>}, {pipeline_mode = #tpu.pipeline_mode<synchronous>, transform_indices = @transform_4, window_bounds = array<i64: 1, 128>}, {pipeline_mode = #tpu.pipeline_mode<synchronous>, transform_indices = @transform_5, window_bounds = array<i64: 1, 128>}, {transform_indices = @transform_6, window_bounds = array<i64: 512, 128>}]} {
    %c0 = arith.constant 0 : index
    %c0_0 = arith.constant 0 : index
    %0 = vector.load %arg1[%c0, %c0_0] : memref<512x128xbf16, #tpu.memory_space<vmem>>, vector<512x128xbf16>
    %c0_1 = arith.constant 0 : index
    %c0_2 = arith.constant 0 : index
    %1 = vector.load %arg3[%c0_1, %c0_2] : memref<1x128xf32, #tpu.memory_space<vmem>>, vector<1x128xf32>
    %c0_3 = arith.constant 0 : index
    %c0_4 = arith.constant 0 : index
    %2 = vector.load %arg4[%c0_3, %c0_4] : memref<1x128xf32, #tpu.memory_space<vmem>>, vector<1x128xf32>
    %3 = arith.extf %0 : vector<512x128xbf16> to vector<512x128xf32>
    %4 = vector.broadcast %1 : vector<1x128xf32> to vector<512x128xf32>
    %5 = arith.mulf %3, %4 : vector<512x128xf32>
    %6 = vector.broadcast %2 : vector<1x128xf32> to vector<512x128xf32>
    %7 = arith.addf %5, %6 : vector<512x128xf32>
    %cst = arith.constant 0.000000e+00 : f32
    %8 = vector.broadcast %cst : f32 to vector<512x128xf32>
    %9 = arith.maximumf %7, %8 : vector<512x128xf32>
    %10 = arith.truncf %9 : vector<512x128xf32> to vector<512x128xbf16>
    %c0_5 = arith.constant 0 : index
    %c0_6 = arith.constant 0 : index
    %11 = vector.load %arg2[%c0_5, %c0_6] : memref<128x128xbf16, #tpu.memory_space<vmem>>, vector<128x128xbf16>
    %cst_7 = arith.constant dense<0.000000e+00> : vector<512x128xf32>
    %12 = tpu.matmul %10, %11, %cst_7 {dimension_numbers = #tpu.dot_dimension_numbers<[1], [0], [0], [1], [0, 0, 1, 1], [], []>} : vector<512x128xbf16>, vector<128x128xbf16>, vector<512x128xf32> -> vector<512x128xf32>
    %c0_8 = arith.constant 0 : index
    %c0_9 = arith.constant 0 : index
    %13 = vector.load %arg5[%c0_8, %c0_9] : memref<1x128xf32, #tpu.memory_space<vmem>>, vector<1x128xf32>
    %14 = vector.broadcast %13 : vector<1x128xf32> to vector<512x128xf32>
    %15 = arith.mulf %12, %14 : vector<512x128xf32>
    %c0_10 = arith.constant 0 : index
    %c0_11 = arith.constant 0 : index
    %16 = vector.load %arg6[%c0_10, %c0_11] : memref<1x128xf32, #tpu.memory_space<vmem>>, vector<1x128xf32>
    %17 = vector.broadcast %16 : vector<1x128xf32> to vector<512x128xf32>
    %18 = arith.addf %15, %17 : vector<512x128xf32>
    %cst_12 = arith.constant 0.000000e+00 : f32
    %19 = vector.broadcast %cst_12 : f32 to vector<512x128xf32>
    %20 = arith.maximumf %18, %19 : vector<512x128xf32>
    %21 = arith.truncf %20 : vector<512x128xf32> to vector<512x128xbf16>
    %c0_13 = arith.constant 0 : index
    %c0_14 = arith.constant 0 : index
    %22 = vector.load %arg7[%c0_13, %c0_14] : memref<512x128xbf16, #tpu.memory_space<vmem>>, vector<512x128xbf16>
    tpu.vector_store %arg7[%c0_13, %c0_14], %21 {strides = array<i32>} : memref<512x128xbf16, #tpu.memory_space<vmem>>, vector<512x128xbf16>,
    return
  }
  func.func @transform_0(%arg0: i32) -> (i32, i32) {
    %c0_i32 = arith.constant 0 : i32
    %c0_i32_0 = arith.constant 0 : i32
    return %arg0, %c0_i32 : i32, i32
  }
  func.func @transform_1(%arg0: i32) -> (i32, i32) {
    %c0_i32 = arith.constant 0 : i32
    %c0_i32_0 = arith.constant 0 : i32
    %c0_i32_1 = arith.constant 0 : i32
    return %c0_i32, %c0_i32_0 : i32, i32
  }
  func.func @transform_2(%arg0: i32) -> (i32, i32) {
    %c0_i32 = arith.constant 0 : i32
    %c0_i32_0 = arith.constant 0 : i32
    %c0_i32_1 = arith.constant 0 : i32
    return %c0_i32, %c0_i32_0 : i32, i32
  }
  func.func @transform_3(%arg0: i32) -> (i32, i32) {
    %c0_i32 = arith.constant 0 : i32
    %c0_i32_0 = arith.constant 0 : i32
    %c0_i32_1 = arith.constant 0 : i32
    return %c0_i32, %c0_i32_0 : i32, i32
  }
  func.func @transform_4(%arg0: i32) -> (i32, i32) {
    %c0_i32 = arith.constant 0 : i32
    %c0_i32_0 = arith.constant 0 : i32
    %c0_i32_1 = arith.constant 0 : i32
    return %c0_i32, %c0_i32_0 : i32, i32
  }
  func.func @transform_5(%arg0: i32) -> (i32, i32) {
    %c0_i32 = arith.constant 0 : i32
    %c0_i32_0 = arith.constant 0 : i32
    %c0_i32_1 = arith.constant 0 : i32
    return %c0_i32, %c0_i32_0 : i32, i32
  }
  func.func @transform_6(%arg0: i32) -> (i32, i32) {
    %c0_i32 = arith.constant 0 : i32
    %c0_i32_0 = arith.constant 0 : i32
    return %arg0, %c0_i32 : i32, i32
  }
}

module attributes {stable_mosaic.version = 11 : i64} {
  func.func @kernel(%arg0: i32, %arg1: memref<1x18x18x128xbf16, #tpu.memory_space<vmem>>, %arg2: memref<3x3x128x128xbf16, #tpu.memory_space<vmem>>, %arg3: memref<1x256x128xbf16, #tpu.memory_space<vmem>>, %arg4: memref<1x256x128xbf16, #tpu.memory_space<vmem>>) attributes {dimension_semantics = [#tpu.dimension_semantics<parallel>], iteration_bounds = array<i64: 2>, scalar_prefetch = 0 : i64, scratch_operands = 0 : i64, tpu.core_type = #tpu.core_type<tc>, window_params = [{transform_indices = @transform_0, window_bounds = array<i64: 1, 18, 18, 128>}, {pipeline_mode = #tpu.pipeline_mode<synchronous>, transform_indices = @transform_1, window_bounds = array<i64: 3, 3, 128, 128>}, {transform_indices = @transform_2, window_bounds = array<i64: 1, 256, 128>}, {transform_indices = @transform_3, window_bounds = array<i64: 1, 256, 128>}]} {
    %c0 = arith.constant 0 : index
    %c0_0 = arith.constant 0 : index
    %c0_1 = arith.constant 0 : index
    %c0_2 = arith.constant 0 : index
    %0 = vector.load %arg1[%c0, %c0_0, %c0_1, %c0_2] : memref<1x18x18x128xbf16, #tpu.memory_space<vmem>>, vector<1x18x16x128xbf16>
    %1 = vector.shape_cast %0 : vector<1x18x16x128xbf16> to vector<18x16x128xbf16>
    %2 = vector.shape_cast %1 : vector<18x16x128xbf16> to vector<288x128xbf16>
    %3 = vector.extract_strided_slice %2 {offsets = [0, 0], sizes = [256, 128], strides = [1, 1]} : vector<288x128xbf16> to vector<256x128xbf16>
    %c0_3 = arith.constant 0 : index
    %c0_4 = arith.constant 0 : index
    %c0_5 = arith.constant 0 : index
    %c0_6 = arith.constant 0 : index
    %4 = vector.load %arg2[%c0_3, %c0_4, %c0_5, %c0_6] : memref<3x3x128x128xbf16, #tpu.memory_space<vmem>>, vector<1x1x128x128xbf16>
    %5 = vector.shape_cast %4 : vector<1x1x128x128xbf16> to vector<128x128xbf16>
    %cst = arith.constant dense<0.000000e+00> : vector<256x128xf32>
    %6 = tpu.matmul %3, %5, %cst {dimension_numbers = #tpu.dot_dimension_numbers<[1], [0], [0], [1], [0, 0, 1, 1], [], []>} : vector<256x128xbf16>, vector<128x128xbf16>, vector<256x128xf32> -> vector<256x128xf32>
    %7 = vector.extract_strided_slice %2 {offsets = [16, 0], sizes = [256, 128], strides = [1, 1]} : vector<288x128xbf16> to vector<256x128xbf16>
    %c1 = arith.constant 1 : index
    %c0_7 = arith.constant 0 : index
    %c0_8 = arith.constant 0 : index
    %c0_9 = arith.constant 0 : index
    %8 = vector.load %arg2[%c1, %c0_7, %c0_8, %c0_9] : memref<3x3x128x128xbf16, #tpu.memory_space<vmem>>, vector<1x1x128x128xbf16>
    %9 = vector.shape_cast %8 : vector<1x1x128x128xbf16> to vector<128x128xbf16>
    %cst_10 = arith.constant dense<0.000000e+00> : vector<256x128xf32>
    %10 = tpu.matmul %7, %9, %cst_10 {dimension_numbers = #tpu.dot_dimension_numbers<[1], [0], [0], [1], [0, 0, 1, 1], [], []>} : vector<256x128xbf16>, vector<128x128xbf16>, vector<256x128xf32> -> vector<256x128xf32>
    %11 = arith.addf %6, %10 : vector<256x128xf32>
    %12 = vector.extract_strided_slice %2 {offsets = [32, 0], sizes = [256, 128], strides = [1, 1]} : vector<288x128xbf16> to vector<256x128xbf16>
    %c2 = arith.constant 2 : index
    %c0_11 = arith.constant 0 : index
    %c0_12 = arith.constant 0 : index
    %c0_13 = arith.constant 0 : index
    %13 = vector.load %arg2[%c2, %c0_11, %c0_12, %c0_13] : memref<3x3x128x128xbf16, #tpu.memory_space<vmem>>, vector<1x1x128x128xbf16>
    %14 = vector.shape_cast %13 : vector<1x1x128x128xbf16> to vector<128x128xbf16>
    %cst_14 = arith.constant dense<0.000000e+00> : vector<256x128xf32>
    %15 = tpu.matmul %12, %14, %cst_14 {dimension_numbers = #tpu.dot_dimension_numbers<[1], [0], [0], [1], [0, 0, 1, 1], [], []>} : vector<256x128xbf16>, vector<128x128xbf16>, vector<256x128xf32> -> vector<256x128xf32>
    %16 = arith.addf %11, %15 : vector<256x128xf32>
    %c0_15 = arith.constant 0 : index
    %c0_16 = arith.constant 0 : index
    %c1_17 = arith.constant 1 : index
    %c0_18 = arith.constant 0 : index
    %17 = vector.load %arg1[%c0_15, %c0_16, %c1_17, %c0_18] : memref<1x18x18x128xbf16, #tpu.memory_space<vmem>>, vector<1x18x16x128xbf16>
    %18 = vector.shape_cast %17 : vector<1x18x16x128xbf16> to vector<18x16x128xbf16>
    %19 = vector.shape_cast %18 : vector<18x16x128xbf16> to vector<288x128xbf16>
    %20 = vector.extract_strided_slice %19 {offsets = [0, 0], sizes = [256, 128], strides = [1, 1]} : vector<288x128xbf16> to vector<256x128xbf16>
    %c0_19 = arith.constant 0 : index
    %c1_20 = arith.constant 1 : index
    %c0_21 = arith.constant 0 : index
    %c0_22 = arith.constant 0 : index
    %21 = vector.load %arg2[%c0_19, %c1_20, %c0_21, %c0_22] : memref<3x3x128x128xbf16, #tpu.memory_space<vmem>>, vector<1x1x128x128xbf16>
    %22 = vector.shape_cast %21 : vector<1x1x128x128xbf16> to vector<128x128xbf16>
    %cst_23 = arith.constant dense<0.000000e+00> : vector<256x128xf32>
    %23 = tpu.matmul %20, %22, %cst_23 {dimension_numbers = #tpu.dot_dimension_numbers<[1], [0], [0], [1], [0, 0, 1, 1], [], []>} : vector<256x128xbf16>, vector<128x128xbf16>, vector<256x128xf32> -> vector<256x128xf32>
    %24 = arith.addf %16, %23 : vector<256x128xf32>
    %25 = vector.extract_strided_slice %19 {offsets = [16, 0], sizes = [256, 128], strides = [1, 1]} : vector<288x128xbf16> to vector<256x128xbf16>
    %c1_24 = arith.constant 1 : index
    %c1_25 = arith.constant 1 : index
    %c0_26 = arith.constant 0 : index
    %c0_27 = arith.constant 0 : index
    %26 = vector.load %arg2[%c1_24, %c1_25, %c0_26, %c0_27] : memref<3x3x128x128xbf16, #tpu.memory_space<vmem>>, vector<1x1x128x128xbf16>
    %27 = vector.shape_cast %26 : vector<1x1x128x128xbf16> to vector<128x128xbf16>
    %cst_28 = arith.constant dense<0.000000e+00> : vector<256x128xf32>
    %28 = tpu.matmul %25, %27, %cst_28 {dimension_numbers = #tpu.dot_dimension_numbers<[1], [0], [0], [1], [0, 0, 1, 1], [], []>} : vector<256x128xbf16>, vector<128x128xbf16>, vector<256x128xf32> -> vector<256x128xf32>
    %29 = arith.addf %24, %28 : vector<256x128xf32>
    %30 = vector.extract_strided_slice %19 {offsets = [32, 0], sizes = [256, 128], strides = [1, 1]} : vector<288x128xbf16> to vector<256x128xbf16>
    %c2_29 = arith.constant 2 : index
    %c1_30 = arith.constant 1 : index
    %c0_31 = arith.constant 0 : index
    %c0_32 = arith.constant 0 : index
    %31 = vector.load %arg2[%c2_29, %c1_30, %c0_31, %c0_32] : memref<3x3x128x128xbf16, #tpu.memory_space<vmem>>, vector<1x1x128x128xbf16>
    %32 = vector.shape_cast %31 : vector<1x1x128x128xbf16> to vector<128x128xbf16>
    %cst_33 = arith.constant dense<0.000000e+00> : vector<256x128xf32>
    %33 = tpu.matmul %30, %32, %cst_33 {dimension_numbers = #tpu.dot_dimension_numbers<[1], [0], [0], [1], [0, 0, 1, 1], [], []>} : vector<256x128xbf16>, vector<128x128xbf16>, vector<256x128xf32> -> vector<256x128xf32>
    %34 = arith.addf %29, %33 : vector<256x128xf32>
    %c0_34 = arith.constant 0 : index
    %c0_35 = arith.constant 0 : index
    %c2_36 = arith.constant 2 : index
    %c0_37 = arith.constant 0 : index
    %35 = vector.load %arg1[%c0_34, %c0_35, %c2_36, %c0_37] : memref<1x18x18x128xbf16, #tpu.memory_space<vmem>>, vector<1x18x16x128xbf16>
    %36 = vector.shape_cast %35 : vector<1x18x16x128xbf16> to vector<18x16x128xbf16>
    %37 = vector.shape_cast %36 : vector<18x16x128xbf16> to vector<288x128xbf16>
    %38 = vector.extract_strided_slice %37 {offsets = [0, 0], sizes = [256, 128], strides = [1, 1]} : vector<288x128xbf16> to vector<256x128xbf16>
    %c0_38 = arith.constant 0 : index
    %c2_39 = arith.constant 2 : index
    %c0_40 = arith.constant 0 : index
    %c0_41 = arith.constant 0 : index
    %39 = vector.load %arg2[%c0_38, %c2_39, %c0_40, %c0_41] : memref<3x3x128x128xbf16, #tpu.memory_space<vmem>>, vector<1x1x128x128xbf16>
    %40 = vector.shape_cast %39 : vector<1x1x128x128xbf16> to vector<128x128xbf16>
    %cst_42 = arith.constant dense<0.000000e+00> : vector<256x128xf32>
    %41 = tpu.matmul %38, %40, %cst_42 {dimension_numbers = #tpu.dot_dimension_numbers<[1], [0], [0], [1], [0, 0, 1, 1], [], []>} : vector<256x128xbf16>, vector<128x128xbf16>, vector<256x128xf32> -> vector<256x128xf32>
    %42 = arith.addf %34, %41 : vector<256x128xf32>
    %43 = vector.extract_strided_slice %37 {offsets = [16, 0], sizes = [256, 128], strides = [1, 1]} : vector<288x128xbf16> to vector<256x128xbf16>
    %c1_43 = arith.constant 1 : index
    %c2_44 = arith.constant 2 : index
    %c0_45 = arith.constant 0 : index
    %c0_46 = arith.constant 0 : index
    %44 = vector.load %arg2[%c1_43, %c2_44, %c0_45, %c0_46] : memref<3x3x128x128xbf16, #tpu.memory_space<vmem>>, vector<1x1x128x128xbf16>
    %45 = vector.shape_cast %44 : vector<1x1x128x128xbf16> to vector<128x128xbf16>
    %cst_47 = arith.constant dense<0.000000e+00> : vector<256x128xf32>
    %46 = tpu.matmul %43, %45, %cst_47 {dimension_numbers = #tpu.dot_dimension_numbers<[1], [0], [0], [1], [0, 0, 1, 1], [], []>} : vector<256x128xbf16>, vector<128x128xbf16>, vector<256x128xf32> -> vector<256x128xf32>
    %47 = arith.addf %42, %46 : vector<256x128xf32>
    %48 = vector.extract_strided_slice %37 {offsets = [32, 0], sizes = [256, 128], strides = [1, 1]} : vector<288x128xbf16> to vector<256x128xbf16>
    %c2_48 = arith.constant 2 : index
    %c2_49 = arith.constant 2 : index
    %c0_50 = arith.constant 0 : index
    %c0_51 = arith.constant 0 : index
    %49 = vector.load %arg2[%c2_48, %c2_49, %c0_50, %c0_51] : memref<3x3x128x128xbf16, #tpu.memory_space<vmem>>, vector<1x1x128x128xbf16>
    %50 = vector.shape_cast %49 : vector<1x1x128x128xbf16> to vector<128x128xbf16>
    %cst_52 = arith.constant dense<0.000000e+00> : vector<256x128xf32>
    %51 = tpu.matmul %48, %50, %cst_52 {dimension_numbers = #tpu.dot_dimension_numbers<[1], [0], [0], [1], [0, 0, 1, 1], [], []>} : vector<256x128xbf16>, vector<128x128xbf16>, vector<256x128xf32> -> vector<256x128xf32>
    %52 = arith.addf %47, %51 : vector<256x128xf32>
    %c0_53 = arith.constant 0 : index
    %c0_54 = arith.constant 0 : index
    %c0_55 = arith.constant 0 : index
    %53 = vector.load %arg3[%c0_53, %c0_54, %c0_55] : memref<1x256x128xbf16, #tpu.memory_space<vmem>>, vector<1x256x128xbf16>
    %54 = vector.shape_cast %53 : vector<1x256x128xbf16> to vector<256x128xbf16>
    %55 = arith.extf %54 : vector<256x128xbf16> to vector<256x128xf32>
    %56 = arith.addf %52, %55 : vector<256x128xf32>
    %57 = arith.truncf %56 : vector<256x128xf32> to vector<256x128xbf16>
    %c0_56 = arith.constant 0 : index
    %c0_57 = arith.constant 0 : index
    %c0_58 = arith.constant 0 : index
    %58 = vector.load %arg4[%c0_56, %c0_57, %c0_58] : memref<1x256x128xbf16, #tpu.memory_space<vmem>>, vector<1x256x128xbf16>
    %59 = vector.shape_cast %58 : vector<1x256x128xbf16> to vector<256x128xbf16>
    %60 = vector.shape_cast %57 : vector<256x128xbf16> to vector<1x256x128xbf16>
    tpu.vector_store %arg4[%c0_56, %c0_57, %c0_58], %60 {strides = array<i32>} : memref<1x256x128xbf16, #tpu.memory_space<vmem>>, vector<1x256x128xbf16>,
    return
  }
  func.func @transform_0(%arg0: i32) -> (i32, i32, i32, i32) {
    %c0_i32 = arith.constant 0 : i32
    %c0_i32_0 = arith.constant 0 : i32
    %c0_i32_1 = arith.constant 0 : i32
    %c0_i32_2 = arith.constant 0 : i32
    return %arg0, %c0_i32, %c0_i32_0, %c0_i32_1 : i32, i32, i32, i32
  }
  func.func @transform_1(%arg0: i32) -> (i32, i32, i32, i32) {
    %c0_i32 = arith.constant 0 : i32
    %c0_i32_0 = arith.constant 0 : i32
    %c0_i32_1 = arith.constant 0 : i32
    %c0_i32_2 = arith.constant 0 : i32
    %c0_i32_3 = arith.constant 0 : i32
    return %c0_i32, %c0_i32_0, %c0_i32_1, %c0_i32_2 : i32, i32, i32, i32
  }
  func.func @transform_2(%arg0: i32) -> (i32, i32, i32) {
    %c0_i32 = arith.constant 0 : i32
    %c0_i32_0 = arith.constant 0 : i32
    %c0_i32_1 = arith.constant 0 : i32
    return %arg0, %c0_i32, %c0_i32_0 : i32, i32, i32
  }
  func.func @transform_3(%arg0: i32) -> (i32, i32, i32) {
    %c0_i32 = arith.constant 0 : i32
    %c0_i32_0 = arith.constant 0 : i32
    %c0_i32_1 = arith.constant 0 : i32
    return %arg0, %c0_i32, %c0_i32_0 : i32, i32, i32
  }
}

module attributes {stable_mosaic.version = 11 : i64} {
  func.func @kernel(%arg0: i32, %arg1: memref<512x128xbf16, #tpu.memory_space<vmem>>, %arg2: memref<128x128xbf16, #tpu.memory_space<vmem>>, %arg3: memref<1x128xf32, #tpu.memory_space<vmem>>, %arg4: memref<1x128xf32, #tpu.memory_space<vmem>>, %arg5: memref<512x128xbf16, #tpu.memory_space<vmem>>) attributes {dimension_semantics = [#tpu.dimension_semantics<parallel>], iteration_bounds = array<i64: 1>, scalar_prefetch = 0 : i64, scratch_operands = 0 : i64, tpu.core_type = #tpu.core_type<tc>, window_params = [{transform_indices = @transform_0, window_bounds = array<i64: 512, 128>}, {pipeline_mode = #tpu.pipeline_mode<synchronous>, transform_indices = @transform_1, window_bounds = array<i64: 128, 128>}, {pipeline_mode = #tpu.pipeline_mode<synchronous>, transform_indices = @transform_2, window_bounds = array<i64: 1, 128>}, {pipeline_mode = #tpu.pipeline_mode<synchronous>, transform_indices = @transform_3, window_bounds = array<i64: 1, 128>}, {transform_indices = @transform_4, window_bounds = array<i64: 512, 128>}]} {
    %c0 = arith.constant 0 : index
    %c0_0 = arith.constant 0 : index
    %0 = vector.load %arg1[%c0, %c0_0] : memref<512x128xbf16, #tpu.memory_space<vmem>>, vector<512x128xbf16>
    %c0_1 = arith.constant 0 : index
    %c0_2 = arith.constant 0 : index
    %1 = vector.load %arg3[%c0_1, %c0_2] : memref<1x128xf32, #tpu.memory_space<vmem>>, vector<1x128xf32>
    %c0_3 = arith.constant 0 : index
    %c0_4 = arith.constant 0 : index
    %2 = vector.load %arg4[%c0_3, %c0_4] : memref<1x128xf32, #tpu.memory_space<vmem>>, vector<1x128xf32>
    %3 = arith.extf %0 : vector<512x128xbf16> to vector<512x128xf32>
    %4 = vector.broadcast %1 : vector<1x128xf32> to vector<512x128xf32>
    %5 = arith.mulf %3, %4 : vector<512x128xf32>
    %6 = vector.broadcast %2 : vector<1x128xf32> to vector<512x128xf32>
    %7 = arith.addf %5, %6 : vector<512x128xf32>
    %cst = arith.constant 0.000000e+00 : f32
    %8 = vector.broadcast %cst : f32 to vector<512x128xf32>
    %9 = arith.maximumf %7, %8 : vector<512x128xf32>
    %10 = arith.truncf %9 : vector<512x128xf32> to vector<512x128xbf16>
    %c0_5 = arith.constant 0 : index
    %c0_6 = arith.constant 0 : index
    %11 = vector.load %arg2[%c0_5, %c0_6] : memref<128x128xbf16, #tpu.memory_space<vmem>>, vector<128x128xbf16>
    %cst_7 = arith.constant dense<0.000000e+00> : vector<512x128xf32>
    %12 = tpu.matmul %10, %11, %cst_7 {dimension_numbers = #tpu.dot_dimension_numbers<[1], [0], [0], [1], [0, 0, 1, 1], [], []>} : vector<512x128xbf16>, vector<128x128xbf16>, vector<512x128xf32> -> vector<512x128xf32>
    %13 = arith.truncf %12 : vector<512x128xf32> to vector<512x128xbf16>
    %c0_8 = arith.constant 0 : index
    %c0_9 = arith.constant 0 : index
    %14 = vector.load %arg5[%c0_8, %c0_9] : memref<512x128xbf16, #tpu.memory_space<vmem>>, vector<512x128xbf16>
    tpu.vector_store %arg5[%c0_8, %c0_9], %13 {strides = array<i32>} : memref<512x128xbf16, #tpu.memory_space<vmem>>, vector<512x128xbf16>,
    return
  }
  func.func @transform_0(%arg0: i32) -> (i32, i32) {
    %c0_i32 = arith.constant 0 : i32
    %c0_i32_0 = arith.constant 0 : i32
    return %arg0, %c0_i32 : i32, i32
  }
  func.func @transform_1(%arg0: i32) -> (i32, i32) {
    %c0_i32 = arith.constant 0 : i32
    %c0_i32_0 = arith.constant 0 : i32
    %c0_i32_1 = arith.constant 0 : i32
    return %c0_i32, %c0_i32_0 : i32, i32
  }
  func.func @transform_2(%arg0: i32) -> (i32, i32) {
    %c0_i32 = arith.constant 0 : i32
    %c0_i32_0 = arith.constant 0 : i32
    %c0_i32_1 = arith.constant 0 : i32
    return %c0_i32, %c0_i32_0 : i32, i32
  }
  func.func @transform_3(%arg0: i32) -> (i32, i32) {
    %c0_i32 = arith.constant 0 : i32
    %c0_i32_0 = arith.constant 0 : i32
    %c0_i32_1 = arith.constant 0 : i32
    return %c0_i32, %c0_i32_0 : i32, i32
  }
  func.func @transform_4(%arg0: i32) -> (i32, i32) {
    %c0_i32 = arith.constant 0 : i32
    %c0_i32_0 = arith.constant 0 : i32
    return %arg0, %c0_i32 : i32, i32
  }
}

module attributes {stable_mosaic.version = 11 : i64} {
  func.func @kernel(%arg0: i32, %arg1: memref<1x16x8x256xbf16, #tpu.memory_space<vmem>>, %arg2: memref<1x8x8x128xbf16, #tpu.memory_space<vmem>>) attributes {dimension_semantics = [#tpu.dimension_semantics<parallel>], iteration_bounds = array<i64: 2>, scalar_prefetch = 0 : i64, scratch_operands = 0 : i64, tpu.core_type = #tpu.core_type<tc>, window_params = [{transform_indices = @transform_0, window_bounds = array<i64: 1, 16, 8, 256>}, {transform_indices = @transform_1, window_bounds = array<i64: 1, 8, 8, 128>}]} {
    %c0 = arith.constant 0 : index
    %c0_0 = arith.constant 0 : index
    %c0_1 = arith.constant 0 : index
    %c0_2 = arith.constant 0 : index
    %0 = vector.load %arg1[%c0, %c0_0, %c0_1, %c0_2] : memref<1x16x8x256xbf16, #tpu.memory_space<vmem>>, vector<1x16x8x256xbf16>
    %1 = vector.shape_cast %0 : vector<1x16x8x256xbf16> to vector<16x8x256xbf16>
    %2 = arith.extf %1 : vector<16x8x256xbf16> to vector<16x8x256xf32>
    %3 = vector.extract_strided_slice %2 {offsets = [0, 0, 0], sizes = [16, 8, 128], strides = [1, 1, 1]} : vector<16x8x256xf32> to vector<16x8x128xf32>
    %4 = vector.extract_strided_slice %2 {offsets = [0, 0, 128], sizes = [16, 8, 128], strides = [1, 1, 1]} : vector<16x8x256xf32> to vector<16x8x128xf32>
    %5 = arith.addf %3, %4 : vector<16x8x128xf32>
    %6 = vector.shape_cast %5 : vector<16x8x128xf32> to vector<8x2x8x128xf32>
    %7 = vector.extract_strided_slice %6 {offsets = [0, 0, 0, 0], sizes = [8, 1, 8, 128], strides = [1, 1, 1, 1]} : vector<8x2x8x128xf32> to vector<8x1x8x128xf32>
    %8 = vector.shape_cast %7 : vector<8x1x8x128xf32> to vector<8x8x128xf32>
    %9 = vector.extract_strided_slice %6 {offsets = [0, 1, 0, 0], sizes = [8, 1, 8, 128], strides = [1, 1, 1, 1]} : vector<8x2x8x128xf32> to vector<8x1x8x128xf32>
    %10 = vector.shape_cast %9 : vector<8x1x8x128xf32> to vector<8x8x128xf32>
    %11 = arith.addf %8, %10 : vector<8x8x128xf32>
    %cst = arith.constant 2.500000e-01 : f32
    %12 = vector.broadcast %cst : f32 to vector<8x8x128xf32>
    %13 = arith.mulf %11, %12 : vector<8x8x128xf32>
    %14 = arith.truncf %13 : vector<8x8x128xf32> to vector<8x8x128xbf16>
    %c0_3 = arith.constant 0 : index
    %c0_4 = arith.constant 0 : index
    %c0_5 = arith.constant 0 : index
    %c0_6 = arith.constant 0 : index
    %15 = vector.load %arg2[%c0_3, %c0_4, %c0_5, %c0_6] : memref<1x8x8x128xbf16, #tpu.memory_space<vmem>>, vector<1x8x8x128xbf16>
    %16 = vector.shape_cast %15 : vector<1x8x8x128xbf16> to vector<8x8x128xbf16>
    %17 = vector.shape_cast %14 : vector<8x8x128xbf16> to vector<1x8x8x128xbf16>
    tpu.vector_store %arg2[%c0_3, %c0_4, %c0_5, %c0_6], %17 {strides = array<i32>} : memref<1x8x8x128xbf16, #tpu.memory_space<vmem>>, vector<1x8x8x128xbf16>,
    return
  }
  func.func @transform_0(%arg0: i32) -> (i32, i32, i32, i32) {
    %c0_i32 = arith.constant 0 : i32
    %c0_i32_0 = arith.constant 0 : i32
    %c0_i32_1 = arith.constant 0 : i32
    %c0_i32_2 = arith.constant 0 : i32
    return %arg0, %c0_i32, %c0_i32_0, %c0_i32_1 : i32, i32, i32, i32
  }
  func.func @transform_1(%arg0: i32) -> (i32, i32, i32, i32) {
    %c0_i32 = arith.constant 0 : i32
    %c0_i32_0 = arith.constant 0 : i32
    %c0_i32_1 = arith.constant 0 : i32
    %c0_i32_2 = arith.constant 0 : i32
    return %arg0, %c0_i32, %c0_i32_0, %c0_i32_1 : i32, i32, i32, i32
  }
}

module attributes {stable_mosaic.version = 11 : i64} {
  func.func @kernel(%arg0: i32, %arg1: memref<128x128xbf16, #tpu.memory_space<vmem>>, %arg2: memref<128x128xbf16, #tpu.memory_space<vmem>>, %arg3: memref<1x128xf32, #tpu.memory_space<vmem>>, %arg4: memref<1x128xf32, #tpu.memory_space<vmem>>, %arg5: memref<1x128xf32, #tpu.memory_space<vmem>>, %arg6: memref<1x128xf32, #tpu.memory_space<vmem>>, %arg7: memref<128x128xbf16, #tpu.memory_space<vmem>>) attributes {dimension_semantics = [#tpu.dimension_semantics<parallel>], iteration_bounds = array<i64: 1>, scalar_prefetch = 0 : i64, scratch_operands = 0 : i64, tpu.core_type = #tpu.core_type<tc>, window_params = [{transform_indices = @transform_0, window_bounds = array<i64: 128, 128>}, {pipeline_mode = #tpu.pipeline_mode<synchronous>, transform_indices = @transform_1, window_bounds = array<i64: 128, 128>}, {pipeline_mode = #tpu.pipeline_mode<synchronous>, transform_indices = @transform_2, window_bounds = array<i64: 1, 128>}, {pipeline_mode = #tpu.pipeline_mode<synchronous>, transform_indices = @transform_3, window_bounds = array<i64: 1, 128>}, {pipeline_mode = #tpu.pipeline_mode<synchronous>, transform_indices = @transform_4, window_bounds = array<i64: 1, 128>}, {pipeline_mode = #tpu.pipeline_mode<synchronous>, transform_indices = @transform_5, window_bounds = array<i64: 1, 128>}, {transform_indices = @transform_6, window_bounds = array<i64: 128, 128>}]} {
    %c0 = arith.constant 0 : index
    %c0_0 = arith.constant 0 : index
    %0 = vector.load %arg1[%c0, %c0_0] : memref<128x128xbf16, #tpu.memory_space<vmem>>, vector<128x128xbf16>
    %c0_1 = arith.constant 0 : index
    %c0_2 = arith.constant 0 : index
    %1 = vector.load %arg3[%c0_1, %c0_2] : memref<1x128xf32, #tpu.memory_space<vmem>>, vector<1x128xf32>
    %c0_3 = arith.constant 0 : index
    %c0_4 = arith.constant 0 : index
    %2 = vector.load %arg4[%c0_3, %c0_4] : memref<1x128xf32, #tpu.memory_space<vmem>>, vector<1x128xf32>
    %3 = arith.extf %0 : vector<128x128xbf16> to vector<128x128xf32>
    %4 = vector.broadcast %1 : vector<1x128xf32> to vector<128x128xf32>
    %5 = arith.mulf %3, %4 : vector<128x128xf32>
    %6 = vector.broadcast %2 : vector<1x128xf32> to vector<128x128xf32>
    %7 = arith.addf %5, %6 : vector<128x128xf32>
    %cst = arith.constant 0.000000e+00 : f32
    %8 = vector.broadcast %cst : f32 to vector<128x128xf32>
    %9 = arith.maximumf %7, %8 : vector<128x128xf32>
    %10 = arith.truncf %9 : vector<128x128xf32> to vector<128x128xbf16>
    %c0_5 = arith.constant 0 : index
    %c0_6 = arith.constant 0 : index
    %11 = vector.load %arg2[%c0_5, %c0_6] : memref<128x128xbf16, #tpu.memory_space<vmem>>, vector<128x128xbf16>
    %cst_7 = arith.constant dense<0.000000e+00> : vector<128x128xf32>
    %12 = tpu.matmul %10, %11, %cst_7 {dimension_numbers = #tpu.dot_dimension_numbers<[1], [0], [0], [1], [0, 0, 1, 1], [], []>} : vector<128x128xbf16>, vector<128x128xbf16>, vector<128x128xf32> -> vector<128x128xf32>
    %c0_8 = arith.constant 0 : index
    %c0_9 = arith.constant 0 : index
    %13 = vector.load %arg5[%c0_8, %c0_9] : memref<1x128xf32, #tpu.memory_space<vmem>>, vector<1x128xf32>
    %14 = vector.broadcast %13 : vector<1x128xf32> to vector<128x128xf32>
    %15 = arith.mulf %12, %14 : vector<128x128xf32>
    %c0_10 = arith.constant 0 : index
    %c0_11 = arith.constant 0 : index
    %16 = vector.load %arg6[%c0_10, %c0_11] : memref<1x128xf32, #tpu.memory_space<vmem>>, vector<1x128xf32>
    %17 = vector.broadcast %16 : vector<1x128xf32> to vector<128x128xf32>
    %18 = arith.addf %15, %17 : vector<128x128xf32>
    %cst_12 = arith.constant 0.000000e+00 : f32
    %19 = vector.broadcast %cst_12 : f32 to vector<128x128xf32>
    %20 = arith.maximumf %18, %19 : vector<128x128xf32>
    %21 = arith.truncf %20 : vector<128x128xf32> to vector<128x128xbf16>
    %c0_13 = arith.constant 0 : index
    %c0_14 = arith.constant 0 : index
    %22 = vector.load %arg7[%c0_13, %c0_14] : memref<128x128xbf16, #tpu.memory_space<vmem>>, vector<128x128xbf16>
    tpu.vector_store %arg7[%c0_13, %c0_14], %21 {strides = array<i32>} : memref<128x128xbf16, #tpu.memory_space<vmem>>, vector<128x128xbf16>,
    return
  }
  func.func @transform_0(%arg0: i32) -> (i32, i32) {
    %c0_i32 = arith.constant 0 : i32
    %c0_i32_0 = arith.constant 0 : i32
    return %arg0, %c0_i32 : i32, i32
  }
  func.func @transform_1(%arg0: i32) -> (i32, i32) {
    %c0_i32 = arith.constant 0 : i32
    %c0_i32_0 = arith.constant 0 : i32
    %c0_i32_1 = arith.constant 0 : i32
    return %c0_i32, %c0_i32_0 : i32, i32
  }
  func.func @transform_2(%arg0: i32) -> (i32, i32) {
    %c0_i32 = arith.constant 0 : i32
    %c0_i32_0 = arith.constant 0 : i32
    %c0_i32_1 = arith.constant 0 : i32
    return %c0_i32, %c0_i32_0 : i32, i32
  }
  func.func @transform_3(%arg0: i32) -> (i32, i32) {
    %c0_i32 = arith.constant 0 : i32
    %c0_i32_0 = arith.constant 0 : i32
    %c0_i32_1 = arith.constant 0 : i32
    return %c0_i32, %c0_i32_0 : i32, i32
  }
  func.func @transform_4(%arg0: i32) -> (i32, i32) {
    %c0_i32 = arith.constant 0 : i32
    %c0_i32_0 = arith.constant 0 : i32
    %c0_i32_1 = arith.constant 0 : i32
    return %c0_i32, %c0_i32_0 : i32, i32
  }
  func.func @transform_5(%arg0: i32) -> (i32, i32) {
    %c0_i32 = arith.constant 0 : i32
    %c0_i32_0 = arith.constant 0 : i32
    %c0_i32_1 = arith.constant 0 : i32
    return %c0_i32, %c0_i32_0 : i32, i32
  }
  func.func @transform_6(%arg0: i32) -> (i32, i32) {
    %c0_i32 = arith.constant 0 : i32
    %c0_i32_0 = arith.constant 0 : i32
    return %arg0, %c0_i32 : i32, i32
  }
}

module attributes {stable_mosaic.version = 11 : i64} {
  func.func @kernel(%arg0: i32, %arg1: memref<1x10x10x128xbf16, #tpu.memory_space<vmem>>, %arg2: memref<3x3x128x128xbf16, #tpu.memory_space<vmem>>, %arg3: memref<1x64x128xbf16, #tpu.memory_space<vmem>>, %arg4: memref<1x64x128xbf16, #tpu.memory_space<vmem>>) attributes {dimension_semantics = [#tpu.dimension_semantics<parallel>], iteration_bounds = array<i64: 2>, scalar_prefetch = 0 : i64, scratch_operands = 0 : i64, tpu.core_type = #tpu.core_type<tc>, window_params = [{transform_indices = @transform_0, window_bounds = array<i64: 1, 10, 10, 128>}, {pipeline_mode = #tpu.pipeline_mode<synchronous>, transform_indices = @transform_1, window_bounds = array<i64: 3, 3, 128, 128>}, {transform_indices = @transform_2, window_bounds = array<i64: 1, 64, 128>}, {transform_indices = @transform_3, window_bounds = array<i64: 1, 64, 128>}]} {
    %c0 = arith.constant 0 : index
    %c0_0 = arith.constant 0 : index
    %c0_1 = arith.constant 0 : index
    %c0_2 = arith.constant 0 : index
    %0 = vector.load %arg1[%c0, %c0_0, %c0_1, %c0_2] : memref<1x10x10x128xbf16, #tpu.memory_space<vmem>>, vector<1x10x8x128xbf16>
    %1 = vector.shape_cast %0 : vector<1x10x8x128xbf16> to vector<10x8x128xbf16>
    %2 = vector.shape_cast %1 : vector<10x8x128xbf16> to vector<80x128xbf16>
    %3 = vector.extract_strided_slice %2 {offsets = [0, 0], sizes = [64, 128], strides = [1, 1]} : vector<80x128xbf16> to vector<64x128xbf16>
    %c0_3 = arith.constant 0 : index
    %c0_4 = arith.constant 0 : index
    %c0_5 = arith.constant 0 : index
    %c0_6 = arith.constant 0 : index
    %4 = vector.load %arg2[%c0_3, %c0_4, %c0_5, %c0_6] : memref<3x3x128x128xbf16, #tpu.memory_space<vmem>>, vector<1x1x128x128xbf16>
    %5 = vector.shape_cast %4 : vector<1x1x128x128xbf16> to vector<128x128xbf16>
    %cst = arith.constant dense<0.000000e+00> : vector<64x128xf32>
    %6 = tpu.matmul %3, %5, %cst {dimension_numbers = #tpu.dot_dimension_numbers<[1], [0], [0], [1], [0, 0, 1, 1], [], []>} : vector<64x128xbf16>, vector<128x128xbf16>, vector<64x128xf32> -> vector<64x128xf32>
    %7 = vector.extract_strided_slice %2 {offsets = [8, 0], sizes = [64, 128], strides = [1, 1]} : vector<80x128xbf16> to vector<64x128xbf16>
    %c1 = arith.constant 1 : index
    %c0_7 = arith.constant 0 : index
    %c0_8 = arith.constant 0 : index
    %c0_9 = arith.constant 0 : index
    %8 = vector.load %arg2[%c1, %c0_7, %c0_8, %c0_9] : memref<3x3x128x128xbf16, #tpu.memory_space<vmem>>, vector<1x1x128x128xbf16>
    %9 = vector.shape_cast %8 : vector<1x1x128x128xbf16> to vector<128x128xbf16>
    %cst_10 = arith.constant dense<0.000000e+00> : vector<64x128xf32>
    %10 = tpu.matmul %7, %9, %cst_10 {dimension_numbers = #tpu.dot_dimension_numbers<[1], [0], [0], [1], [0, 0, 1, 1], [], []>} : vector<64x128xbf16>, vector<128x128xbf16>, vector<64x128xf32> -> vector<64x128xf32>
    %11 = arith.addf %6, %10 : vector<64x128xf32>
    %12 = vector.extract_strided_slice %2 {offsets = [16, 0], sizes = [64, 128], strides = [1, 1]} : vector<80x128xbf16> to vector<64x128xbf16>
    %c2 = arith.constant 2 : index
    %c0_11 = arith.constant 0 : index
    %c0_12 = arith.constant 0 : index
    %c0_13 = arith.constant 0 : index
    %13 = vector.load %arg2[%c2, %c0_11, %c0_12, %c0_13] : memref<3x3x128x128xbf16, #tpu.memory_space<vmem>>, vector<1x1x128x128xbf16>
    %14 = vector.shape_cast %13 : vector<1x1x128x128xbf16> to vector<128x128xbf16>
    %cst_14 = arith.constant dense<0.000000e+00> : vector<64x128xf32>
    %15 = tpu.matmul %12, %14, %cst_14 {dimension_numbers = #tpu.dot_dimension_numbers<[1], [0], [0], [1], [0, 0, 1, 1], [], []>} : vector<64x128xbf16>, vector<128x128xbf16>, vector<64x128xf32> -> vector<64x128xf32>
    %16 = arith.addf %11, %15 : vector<64x128xf32>
    %c0_15 = arith.constant 0 : index
    %c0_16 = arith.constant 0 : index
    %c1_17 = arith.constant 1 : index
    %c0_18 = arith.constant 0 : index
    %17 = vector.load %arg1[%c0_15, %c0_16, %c1_17, %c0_18] : memref<1x10x10x128xbf16, #tpu.memory_space<vmem>>, vector<1x10x8x128xbf16>
    %18 = vector.shape_cast %17 : vector<1x10x8x128xbf16> to vector<10x8x128xbf16>
    %19 = vector.shape_cast %18 : vector<10x8x128xbf16> to vector<80x128xbf16>
    %20 = vector.extract_strided_slice %19 {offsets = [0, 0], sizes = [64, 128], strides = [1, 1]} : vector<80x128xbf16> to vector<64x128xbf16>
    %c0_19 = arith.constant 0 : index
    %c1_20 = arith.constant 1 : index
    %c0_21 = arith.constant 0 : index
    %c0_22 = arith.constant 0 : index
    %21 = vector.load %arg2[%c0_19, %c1_20, %c0_21, %c0_22] : memref<3x3x128x128xbf16, #tpu.memory_space<vmem>>, vector<1x1x128x128xbf16>
    %22 = vector.shape_cast %21 : vector<1x1x128x128xbf16> to vector<128x128xbf16>
    %cst_23 = arith.constant dense<0.000000e+00> : vector<64x128xf32>
    %23 = tpu.matmul %20, %22, %cst_23 {dimension_numbers = #tpu.dot_dimension_numbers<[1], [0], [0], [1], [0, 0, 1, 1], [], []>} : vector<64x128xbf16>, vector<128x128xbf16>, vector<64x128xf32> -> vector<64x128xf32>
    %24 = arith.addf %16, %23 : vector<64x128xf32>
    %25 = vector.extract_strided_slice %19 {offsets = [8, 0], sizes = [64, 128], strides = [1, 1]} : vector<80x128xbf16> to vector<64x128xbf16>
    %c1_24 = arith.constant 1 : index
    %c1_25 = arith.constant 1 : index
    %c0_26 = arith.constant 0 : index
    %c0_27 = arith.constant 0 : index
    %26 = vector.load %arg2[%c1_24, %c1_25, %c0_26, %c0_27] : memref<3x3x128x128xbf16, #tpu.memory_space<vmem>>, vector<1x1x128x128xbf16>
    %27 = vector.shape_cast %26 : vector<1x1x128x128xbf16> to vector<128x128xbf16>
    %cst_28 = arith.constant dense<0.000000e+00> : vector<64x128xf32>
    %28 = tpu.matmul %25, %27, %cst_28 {dimension_numbers = #tpu.dot_dimension_numbers<[1], [0], [0], [1], [0, 0, 1, 1], [], []>} : vector<64x128xbf16>, vector<128x128xbf16>, vector<64x128xf32> -> vector<64x128xf32>
    %29 = arith.addf %24, %28 : vector<64x128xf32>
    %30 = vector.extract_strided_slice %19 {offsets = [16, 0], sizes = [64, 128], strides = [1, 1]} : vector<80x128xbf16> to vector<64x128xbf16>
    %c2_29 = arith.constant 2 : index
    %c1_30 = arith.constant 1 : index
    %c0_31 = arith.constant 0 : index
    %c0_32 = arith.constant 0 : index
    %31 = vector.load %arg2[%c2_29, %c1_30, %c0_31, %c0_32] : memref<3x3x128x128xbf16, #tpu.memory_space<vmem>>, vector<1x1x128x128xbf16>
    %32 = vector.shape_cast %31 : vector<1x1x128x128xbf16> to vector<128x128xbf16>
    %cst_33 = arith.constant dense<0.000000e+00> : vector<64x128xf32>
    %33 = tpu.matmul %30, %32, %cst_33 {dimension_numbers = #tpu.dot_dimension_numbers<[1], [0], [0], [1], [0, 0, 1, 1], [], []>} : vector<64x128xbf16>, vector<128x128xbf16>, vector<64x128xf32> -> vector<64x128xf32>
    %34 = arith.addf %29, %33 : vector<64x128xf32>
    %c0_34 = arith.constant 0 : index
    %c0_35 = arith.constant 0 : index
    %c2_36 = arith.constant 2 : index
    %c0_37 = arith.constant 0 : index
    %35 = vector.load %arg1[%c0_34, %c0_35, %c2_36, %c0_37] : memref<1x10x10x128xbf16, #tpu.memory_space<vmem>>, vector<1x10x8x128xbf16>
    %36 = vector.shape_cast %35 : vector<1x10x8x128xbf16> to vector<10x8x128xbf16>
    %37 = vector.shape_cast %36 : vector<10x8x128xbf16> to vector<80x128xbf16>
    %38 = vector.extract_strided_slice %37 {offsets = [0, 0], sizes = [64, 128], strides = [1, 1]} : vector<80x128xbf16> to vector<64x128xbf16>
    %c0_38 = arith.constant 0 : index
    %c2_39 = arith.constant 2 : index
    %c0_40 = arith.constant 0 : index
    %c0_41 = arith.constant 0 : index
    %39 = vector.load %arg2[%c0_38, %c2_39, %c0_40, %c0_41] : memref<3x3x128x128xbf16, #tpu.memory_space<vmem>>, vector<1x1x128x128xbf16>
    %40 = vector.shape_cast %39 : vector<1x1x128x128xbf16> to vector<128x128xbf16>
    %cst_42 = arith.constant dense<0.000000e+00> : vector<64x128xf32>
    %41 = tpu.matmul %38, %40, %cst_42 {dimension_numbers = #tpu.dot_dimension_numbers<[1], [0], [0], [1], [0, 0, 1, 1], [], []>} : vector<64x128xbf16>, vector<128x128xbf16>, vector<64x128xf32> -> vector<64x128xf32>
    %42 = arith.addf %34, %41 : vector<64x128xf32>
    %43 = vector.extract_strided_slice %37 {offsets = [8, 0], sizes = [64, 128], strides = [1, 1]} : vector<80x128xbf16> to vector<64x128xbf16>
    %c1_43 = arith.constant 1 : index
    %c2_44 = arith.constant 2 : index
    %c0_45 = arith.constant 0 : index
    %c0_46 = arith.constant 0 : index
    %44 = vector.load %arg2[%c1_43, %c2_44, %c0_45, %c0_46] : memref<3x3x128x128xbf16, #tpu.memory_space<vmem>>, vector<1x1x128x128xbf16>
    %45 = vector.shape_cast %44 : vector<1x1x128x128xbf16> to vector<128x128xbf16>
    %cst_47 = arith.constant dense<0.000000e+00> : vector<64x128xf32>
    %46 = tpu.matmul %43, %45, %cst_47 {dimension_numbers = #tpu.dot_dimension_numbers<[1], [0], [0], [1], [0, 0, 1, 1], [], []>} : vector<64x128xbf16>, vector<128x128xbf16>, vector<64x128xf32> -> vector<64x128xf32>
    %47 = arith.addf %42, %46 : vector<64x128xf32>
    %48 = vector.extract_strided_slice %37 {offsets = [16, 0], sizes = [64, 128], strides = [1, 1]} : vector<80x128xbf16> to vector<64x128xbf16>
    %c2_48 = arith.constant 2 : index
    %c2_49 = arith.constant 2 : index
    %c0_50 = arith.constant 0 : index
    %c0_51 = arith.constant 0 : index
    %49 = vector.load %arg2[%c2_48, %c2_49, %c0_50, %c0_51] : memref<3x3x128x128xbf16, #tpu.memory_space<vmem>>, vector<1x1x128x128xbf16>
    %50 = vector.shape_cast %49 : vector<1x1x128x128xbf16> to vector<128x128xbf16>
    %cst_52 = arith.constant dense<0.000000e+00> : vector<64x128xf32>
    %51 = tpu.matmul %48, %50, %cst_52 {dimension_numbers = #tpu.dot_dimension_numbers<[1], [0], [0], [1], [0, 0, 1, 1], [], []>} : vector<64x128xbf16>, vector<128x128xbf16>, vector<64x128xf32> -> vector<64x128xf32>
    %52 = arith.addf %47, %51 : vector<64x128xf32>
    %c0_53 = arith.constant 0 : index
    %c0_54 = arith.constant 0 : index
    %c0_55 = arith.constant 0 : index
    %53 = vector.load %arg3[%c0_53, %c0_54, %c0_55] : memref<1x64x128xbf16, #tpu.memory_space<vmem>>, vector<1x64x128xbf16>
    %54 = vector.shape_cast %53 : vector<1x64x128xbf16> to vector<64x128xbf16>
    %55 = arith.extf %54 : vector<64x128xbf16> to vector<64x128xf32>
    %56 = arith.addf %52, %55 : vector<64x128xf32>
    %57 = arith.truncf %56 : vector<64x128xf32> to vector<64x128xbf16>
    %c0_56 = arith.constant 0 : index
    %c0_57 = arith.constant 0 : index
    %c0_58 = arith.constant 0 : index
    %58 = vector.load %arg4[%c0_56, %c0_57, %c0_58] : memref<1x64x128xbf16, #tpu.memory_space<vmem>>, vector<1x64x128xbf16>
    %59 = vector.shape_cast %58 : vector<1x64x128xbf16> to vector<64x128xbf16>
    %60 = vector.shape_cast %57 : vector<64x128xbf16> to vector<1x64x128xbf16>
    tpu.vector_store %arg4[%c0_56, %c0_57, %c0_58], %60 {strides = array<i32>} : memref<1x64x128xbf16, #tpu.memory_space<vmem>>, vector<1x64x128xbf16>,
    return
  }
  func.func @transform_0(%arg0: i32) -> (i32, i32, i32, i32) {
    %c0_i32 = arith.constant 0 : i32
    %c0_i32_0 = arith.constant 0 : i32
    %c0_i32_1 = arith.constant 0 : i32
    %c0_i32_2 = arith.constant 0 : i32
    return %arg0, %c0_i32, %c0_i32_0, %c0_i32_1 : i32, i32, i32, i32
  }
  func.func @transform_1(%arg0: i32) -> (i32, i32, i32, i32) {
    %c0_i32 = arith.constant 0 : i32
    %c0_i32_0 = arith.constant 0 : i32
    %c0_i32_1 = arith.constant 0 : i32
    %c0_i32_2 = arith.constant 0 : i32
    %c0_i32_3 = arith.constant 0 : i32
    return %c0_i32, %c0_i32_0, %c0_i32_1, %c0_i32_2 : i32, i32, i32, i32
  }
  func.func @transform_2(%arg0: i32) -> (i32, i32, i32) {
    %c0_i32 = arith.constant 0 : i32
    %c0_i32_0 = arith.constant 0 : i32
    %c0_i32_1 = arith.constant 0 : i32
    return %arg0, %c0_i32, %c0_i32_0 : i32, i32, i32
  }
  func.func @transform_3(%arg0: i32) -> (i32, i32, i32) {
    %c0_i32 = arith.constant 0 : i32
    %c0_i32_0 = arith.constant 0 : i32
    %c0_i32_1 = arith.constant 0 : i32
    return %arg0, %c0_i32, %c0_i32_0 : i32, i32, i32
  }
}

module attributes {stable_mosaic.version = 11 : i64} {
  func.func @kernel(%arg0: i32, %arg1: memref<128x128xbf16, #tpu.memory_space<vmem>>, %arg2: memref<1x128xf32, #tpu.memory_space<vmem>>, %arg3: memref<1x128xf32, #tpu.memory_space<vmem>>, %arg4: memref<128x128xf32, #tpu.memory_space<vmem>>) attributes {dimension_semantics = [#tpu.dimension_semantics<parallel>], iteration_bounds = array<i64: 1>, scalar_prefetch = 0 : i64, scratch_operands = 0 : i64, tpu.core_type = #tpu.core_type<tc>, window_params = [{transform_indices = @transform_0, window_bounds = array<i64: 128, 128>}, {pipeline_mode = #tpu.pipeline_mode<synchronous>, transform_indices = @transform_1, window_bounds = array<i64: 1, 128>}, {pipeline_mode = #tpu.pipeline_mode<synchronous>, transform_indices = @transform_2, window_bounds = array<i64: 1, 128>}, {transform_indices = @transform_3, window_bounds = array<i64: 128, 128>}]} {
    %c0 = arith.constant 0 : index
    %c0_0 = arith.constant 0 : index
    %0 = vector.load %arg1[%c0, %c0_0] : memref<128x128xbf16, #tpu.memory_space<vmem>>, vector<128x128xbf16>
    %1 = arith.extf %0 : vector<128x128xbf16> to vector<128x128xf32>
    %c0_1 = arith.constant 0 : index
    %c0_2 = arith.constant 0 : index
    %2 = vector.load %arg2[%c0_1, %c0_2] : memref<1x128xf32, #tpu.memory_space<vmem>>, vector<1x128xf32>
    %c0_3 = arith.constant 0 : index
    %c0_4 = arith.constant 0 : index
    %3 = vector.load %arg3[%c0_3, %c0_4] : memref<1x128xf32, #tpu.memory_space<vmem>>, vector<1x128xf32>
    %4 = vector.broadcast %2 : vector<1x128xf32> to vector<128x128xf32>
    %5 = arith.mulf %1, %4 : vector<128x128xf32>
    %6 = vector.broadcast %3 : vector<1x128xf32> to vector<128x128xf32>
    %7 = arith.addf %5, %6 : vector<128x128xf32>
    %cst = arith.constant 0.000000e+00 : f32
    %8 = vector.broadcast %cst : f32 to vector<128x128xf32>
    %9 = arith.maximumf %7, %8 : vector<128x128xf32>
    %c0_5 = arith.constant 0 : index
    %c0_6 = arith.constant 0 : index
    %10 = vector.load %arg4[%c0_5, %c0_6] : memref<128x128xf32, #tpu.memory_space<vmem>>, vector<128x128xf32>
    tpu.vector_store %arg4[%c0_5, %c0_6], %9 {strides = array<i32>} : memref<128x128xf32, #tpu.memory_space<vmem>>, vector<128x128xf32>,
    return
  }
  func.func @transform_0(%arg0: i32) -> (i32, i32) {
    %c0_i32 = arith.constant 0 : i32
    %c0_i32_0 = arith.constant 0 : i32
    return %arg0, %c0_i32 : i32, i32
  }
  func.func @transform_1(%arg0: i32) -> (i32, i32) {
    %c0_i32 = arith.constant 0 : i32
    %c0_i32_0 = arith.constant 0 : i32
    %c0_i32_1 = arith.constant 0 : i32
    return %c0_i32, %c0_i32_0 : i32, i32
  }
  func.func @transform_2(%arg0: i32) -> (i32, i32) {
    %c0_i32 = arith.constant 0 : i32
    %c0_i32_0 = arith.constant 0 : i32
    %c0_i32_1 = arith.constant 0 : i32
    return %c0_i32, %c0_i32_0 : i32, i32
  }
  func.func @transform_3(%arg0: i32) -> (i32, i32) {
    %c0_i32 = arith.constant 0 : i32
    %c0_i32_0 = arith.constant 0 : i32
    return %arg0, %c0_i32 : i32, i32
  }
}

</mosaic_0001>

<bundles_post_ra>
// kernel: _lambda_.13
= control target key start
LH: loop header
LB: loop body
LE: loop exit
PB: predicated region body
PF: predicated region fallthrough
CT: control target
= control target key end

     0   :  { %9 = vsyncpa [#allocation3], 0  ;;  %s2198_s15 = smov 0   ;;  %s2601_s0 = inlined_call_operand.vmem [shape: bf16[2048,147], index: 0, kind: input, shape index: {}]   ;;  %s2602_s1 = inlined_call_operand.hbm [shape: bf16[147,128], index: 1, kind: input, shape index: {}]   ;;  %s2603_s2 = inlined_call_operand.vmem [shape: f32[1,128], index: 2, kind: input, shape index: {}]   ;;  %s2604_s3 = inlined_call_operand.vmem [shape: f32[1,128], index: 3, kind: input, shape index: {}]   ;;  %s2605_s4 = inlined_call_operand.vmem [shape: bf16[2048,128], index: 4, kind: output, shape index: {}]  }
   0x1 LB: > { %s146_s18 = sshll.u32 %s2602_s1, 4  ;;  %s1488_s19 = sadd.s32 4294967295, %s2167_s15   ;;  %s2167_s15 = sphi %s2198_s15, %s15_s15   ;;  %s147_s18 = int_to_ptr.hbm [resolvable:$true] %s146_s18 }
   0x2   : > { %p1490_p0 = scmp.ge.s32.totalorder %s2167_s15, 1  ;;  %p135_p1 = scmp.lt.s32.totalorder %s2167_s15, 5 }
   0x3   : > { %p2109_p2 = scmp.eq.s32.totalorder %s1488_s19, 0  ;;  %s2169_s20 = smov [#allocation2]  }
   0x4   : > { %p136_p3 = pnand %p1490_p0, %p135_p1  ;;  %s148_s21 = sshll.u32 %s2169_s20, 4  ;;  %s149_s21 = int_to_ptr.vmem [resolvable:$true] %s148_s21 }
   0x5   : > { %s2170_s22 = smov 64   ;;  %s2171_s23 = smov 4  }
   0x6   : > { %p2105_p4 = pneg %p136_p3  ;;  %180 = sbr.rel (%p136_p3) target bundleno = 436 (0x1b4), region = 36 }
   0x8   : > { %p2106_p5 = pnand %p2109_p2, %p2105_p4 }
   0xa   : > { %2108 = dma.hbm_to_vmem [thread:$0]  (!%p2106_p5), %s147_s18, 1216, %s149_s21, [#allocation3], %s2170_s22, %s2170_s22, %s2171_s23  }
   0xb   : > { %2162 = dma.done.wait (%p2109_p2), [#allocation3], 1216  }
   0xc   : > { %2164 = vsyncadd (%p2109_p2), [#allocation3], 4294966080  ;;  %s1495_s24 = sshll.u32 %s1488_s19, 6  ;;  %vm747_vm0 = vcmask 1040384   ;;  %vm748_vm1 = vcmask 1041408   ;;  %v2172_v0 = vmov 65535  }
   0xd   : > { %p209_p6 = scmp.lt.s32.totalorder %s1495_s24, 255  ;;  %v749_v1 = vsel %vm747_vm0, 4294967295, %v2172_v0  ;;  %v1898_v2 = vld [vmem:[#allocation2 + $0x38] sm:$0xff]  ;;  %v304_v3 = vld [vmem:[#allocation2 + $0x48] sm:$0x3]  ;;  %v1897_v5 = vld [vmem:[#allocation2 + $0x30] sm:$0xff] }
   0xe   : > { %v630_v4 = vunpack.c.l.b16 %v304_v3  ;;  %754 = vmatpush.bf16.msra.mxu0 %v1898_v2  ;;  %2091 = vmatpush.bf16.msra.mxu2 %v1898_v2  ;;  %v750_v6 = vsel %vm748_vm1, %v749_v1, 0  ;;  %v1896_v9 = vld [vmem:[#allocation2 + $0x28] sm:$0xff]  ;;  %v1899_v10 = vld [vmem:[#allocation2 + $0x40] sm:$0xff]  ;;  %vm650_vm2 = vcmask 154624   ;;  %v1894_v18 = vld [vmem:[#allocation2 + $0x18] sm:$0xff] }
   0xf   : > { %s2607_s24 = smov (!%p209_p6, %s1495_s24), 255  ;;  %v1895_v16 = vld [vmem:[#allocation2 + $0x20] sm:$0xff]  ;;  %v1893_v19 = vld [vmem:[#allocation2 + $0x10] sm:$0xff]  ;;  %v1892_v20 = vld [vmem:[#allocation2 + $0x8] sm:$0xff] }
  0x10   : > { %s1826_s25 = sshll.u32 %s2607_s24, 3  ;;  %v640_v7 = vpack.c.b16 %v630_v4, %v630_v4  ;;  %v1891_v26 = vld [vmem:[#allocation2] sm:$0xff]  ;;  %s1499_s7 = sshll.u32 %s2607_s24, 2 }
  0x11   : > { %s2215_s28 = scalar_lea.vmem %s2601_s0, %s1826_s25  ;;  %s2351_s10 = scalar_lea.vmem %s2605_s4, %s1499_s7 }
  0x12   : > { %v752_v8 = vand.u32 %v750_v6, %v640_v7  ;;  %755 = vmatpush.bf16.msra.mxu0 %v1897_v5  ;;  %2092 = vmatpush.bf16.msra.mxu2 %v1897_v5  ;;  %v1827_v11 = vld [vmem:[%s2215_s28 + $0x4] sm:$0xf]  ;;  %v1504_v12 = vld [vmem:[%s2215_s28 + $0x8] sm:$0xf0]  ;;  %v1861_v13 = vld [vmem:[%s2215_s28 + $0x114] sm:$0xf] }
  0x13   : > { %v1640_v14 = vld [vmem:[%s2215_s28 + $0x118] sm:$0xf0]  ;;  %v1507_v15 = vor.u32 %v1827_v11, %v1504_v12  ;;  %v1829_v21 = vld [vmem:[%s2215_s28 + $0x14] sm:$0xf]  ;;  %v1863_v23 = vld [vmem:[%s2215_s28 + $0x124] sm:$0xf] }
  0x14   : > { %929 = vmatpush.bf16.msra.mxu1 %v752_v8  ;;  %2099 = vmatpush.bf16.msra.mxu3 %v752_v8  ;;  %v1643_v17 = vor.u32 %v1861_v13, %v1640_v14  ;;  %v1512_v22 = vld [vmem:[%s2215_s28 + $0x18] sm:$0xf0]  ;;  %v1648_v24 = vld [vmem:[%s2215_s28 + $0x128] sm:$0xf0]  ;;  %v1502_v27 = vld [vmem:[%s2215_s28] sm:$0xf] }
  0x15   : > { %v1515_v25 = vor.u32 %v1829_v21, %v1512_v22  ;;  %v1828_v28 = vld [vmem:[%s2215_s28 + $0x4] sm:$0xf0]  ;;  %v1630_v29 = vld [vmem:[%s2215_s28 + $0x100] sm:$0xf]  ;;  %v1651_v31 = vor.u32 %v1863_v23, %v1648_v24  ;;  %v1831_v34 = vld [vmem:[%s2215_s28 + $0x24] sm:$0xf] }
  0x16   : > { %756 = vmatpush.bf16.msra.mxu0 %v1896_v9  ;;  %2093 = vmatpush.bf16.msra.mxu2 %v1896_v9  ;;  %v1860_v30 = vld [vmem:[%s2215_s28 + $0x104] sm:$0xf0]  ;;  %v1503_v32 = vor.u32 %v1828_v28, %v1502_v27  ;;  %v1520_v35 = vld [vmem:[%s2215_s28 + $0x28] sm:$0xf0]  ;;  %v1865_v36 = vld [vmem:[%s2215_s28 + $0x134] sm:$0xf] }
  0x17   : > { %v1631_v33 = vor.u32 %v1860_v30, %v1630_v29  ;;  %v1656_v37 = vld [vmem:[%s2215_s28 + $0x138] sm:$0xf0]  ;;  %v1523_v38 = vor.u32 %v1831_v34, %v1520_v35  ;;  %v1510_v39 = vld [vmem:[%s2215_s28 + $0x10] sm:$0xf]  ;;  %v1830_v40 = vld [vmem:[%s2215_s28 + $0x14] sm:$0xf0] }
  0x18   : > { %930 = vmatpush.bf16.msra.mxu1 %v1899_v10  ;;  %2100 = vmatpush.bf16.msra.mxu3 %v1899_v10  ;;  %v1638_v41 = vld [vmem:[%s2215_s28 + $0x110] sm:$0xf]  ;;  %v1862_v42 = vld [vmem:[%s2215_s28 + $0x114] sm:$0xf0]  ;;  %v1659_v43 = vor.u32 %v1865_v36, %v1656_v37  ;;  %v1511_v44 = vor.u32 %v1830_v40, %v1510_v39  ;;  %v1833_v46 = vld [vmem:[%s2215_s28 + $0x34] sm:$0xf] }
  0x19   : > { %v1639_v45 = vor.u32 %v1862_v42, %v1638_v41  ;;  %v1528_v47 = vld [vmem:[%s2215_s28 + $0x38] sm:$0xf0]  ;;  %v1867_v48 = vld [vmem:[%s2215_s28 + $0x144] sm:$0xf]  ;;  %v1664_v49 = vld [vmem:[%s2215_s28 + $0x148] sm:$0xf0] }
  0x1a   : > { %757 = vmatpush.bf16.msra.mxu0 %v1895_v16  ;;  %2094 = vmatpush.bf16.msra.mxu2 %v1895_v16  ;;  %v1531_v50 = vor.u32 %v1833_v46, %v1528_v47  ;;  %v1518_v51 = vld [vmem:[%s2215_s28 + $0x20] sm:$0xf]  ;;  %v1832_v52 = vld [vmem:[%s2215_s28 + $0x24] sm:$0xf0]  ;;  %v1667_v55 = vor.u32 %v1867_v48, %v1664_v49  ;;  %v1835_v58 = vld [vmem:[%s2215_s28 + $0x44] sm:$0xf] }
  0x1b   : > { %1792 = vmatmul.msk.bf16.vlgmr.msra.gmra.mxu1 %vm650_vm2, %v1507_v15  ;;  %1809 = vmatmul.msk.bf16.vlgmr.msra.gmra.mxu3 %vm650_vm2, %v1643_v17  ;;  %v1646_v53 = vld [vmem:[%s2215_s28 + $0x120] sm:$0xf]  ;;  %v1864_v54 = vld [vmem:[%s2215_s28 + $0x124] sm:$0xf0]  ;;  %v1519_v56 = vor.u32 %v1832_v52, %v1518_v51  ;;  %v1536_v59 = vld [vmem:[%s2215_s28 + $0x48] sm:$0xf0] }
  0x1c   : > { %v1647_v57 = vor.u32 %v1864_v54, %v1646_v53  ;;  %v1869_v60 = vld [vmem:[%s2215_s28 + $0x154] sm:$0xf]  ;;  %v1672_v61 = vld [vmem:[%s2215_s28 + $0x158] sm:$0xf0]  ;;  %v1539_v62 = vor.u32 %v1835_v58, %v1536_v59  ;;  %v1526_v63 = vld [vmem:[%s2215_s28 + $0x30] sm:$0xf] }
  0x1d   : > { %v1834_v0 = vld [vmem:[%s2215_s28 + $0x34] sm:$0xf0]  ;;  %v1654_v1 = vld [vmem:[%s2215_s28 + $0x130] sm:$0xf]  ;;  %v1675_v3 = vor.u32 %v1869_v60, %v1672_v61  ;;  %v1837_v6 = vld [vmem:[%s2215_s28 + $0x54] sm:$0xf] }
  0x1e   : > { %758 = vmatpush.bf16.msra.mxu0 %v1894_v18  ;;  %2095 = vmatpush.bf16.msra.mxu2 %v1894_v18  ;;  %v1866_v2 = vld [vmem:[%s2215_s28 + $0x134] sm:$0xf0]  ;;  %v1527_v4 = vor.u32 %v1834_v0, %v1526_v63  ;;  %v1544_v7 = vld [vmem:[%s2215_s28 + $0x58] sm:$0xf0]  ;;  %v1871_v8 = vld [vmem:[%s2215_s28 + $0x164] sm:$0xf] }
  0x1f   : > { %v1655_v5 = vor.u32 %v1866_v2, %v1654_v1  ;;  %v1680_v9 = vld [vmem:[%s2215_s28 + $0x168] sm:$0xf0]  ;;  %v1547_v10 = vor.u32 %v1837_v6, %v1544_v7  ;;  %v1534_v11 = vld [vmem:[%s2215_s28 + $0x40] sm:$0xf]  ;;  %v1836_v12 = vld [vmem:[%s2215_s28 + $0x44] sm:$0xf0] }
  0x20   : > { %v1662_v13 = vld [vmem:[%s2215_s28 + $0x140] sm:$0xf]  ;;  %v1868_v14 = vld [vmem:[%s2215_s28 + $0x144] sm:$0xf0]  ;;  %v1683_v15 = vor.u32 %v1871_v8, %v1680_v9  ;;  %v1535_v16 = vor.u32 %v1836_v12, %v1534_v11  ;;  %v1839_v18 = vld [vmem:[%s2215_s28 + $0x64] sm:$0xf] }
  0x21   : > { %v1663_v17 = vor.u32 %v1868_v14, %v1662_v13  ;;  %v1688_v21 = vld [vmem:[%s2215_s28 + $0x178] sm:$0xf0]  ;;  %v1542_v23 = vld [vmem:[%s2215_s28 + $0x50] sm:$0xf]  ;;  %v1838_v24 = vld [vmem:[%s2215_s28 + $0x54] sm:$0xf0] }
  0x22   : > { %759 = vmatpush.bf16.msra.mxu0 %v1893_v19  ;;  %2096 = vmatpush.bf16.msra.mxu2 %v1893_v19  ;;  %v1552_v19 = vld [vmem:[%s2215_s28 + $0x68] sm:$0xf0]  ;;  %v1543_v28 = vor.u32 %v1838_v24, %v1542_v23  ;;  %v1841_v30 = vld [vmem:[%s2215_s28 + $0x74] sm:$0xf]  ;;  %v1550_v35 = vld [vmem:[%s2215_s28 + $0x60] sm:$0xf] }
  0x23   : > { %v1555_v22 = vor.u32 %v1839_v18, %v1552_v19  ;;  %v1840_v36 = vld [vmem:[%s2215_s28 + $0x64] sm:$0xf0]  ;;  %v1678_v37 = vld [vmem:[%s2215_s28 + $0x160] sm:$0xf]  ;;  %v1843_v42 = vld [vmem:[%s2215_s28 + $0x84] sm:$0xf] }
  0x24   : > { %v1551_v40 = vor.u32 %v1840_v36, %v1550_v35  ;;  %v1558_v47 = vld [vmem:[%s2215_s28 + $0x70] sm:$0xf]  ;;  %v1842_v48 = vld [vmem:[%s2215_s28 + $0x74] sm:$0xf0]  ;;  %v1576_v58 = vld [vmem:[%s2215_s28 + $0x98] sm:$0xf0] }
  0x25   : > { %v1874_v51 = vld [vmem:[%s2215_s28 + $0x174] sm:$0xf0]  ;;  %v1559_v53 = vor.u32 %v1842_v48, %v1558_v47  ;;  %v1879_v59 = vld [vmem:[%s2215_s28 + $0x1a4] sm:$0xf]  ;;  %v1712_v60 = vld [vmem:[%s2215_s28 + $0x1a8] sm:$0xf0] }
  0x26   : > { %760 = vmatpush.bf16.msra.mxu0 %v1892_v20  ;;  %2097 = vmatpush.bf16.msra.mxu2 %v1892_v20  ;;  %v1873_v20 = vld [vmem:[%s2215_s28 + $0x174] sm:$0xf]  ;;  %v1844_v63 = vld [vmem:[%s2215_s28 + $0x84] sm:$0xf0]  ;;  %v1694_v2 = vld [vmem:[%s2215_s28 + $0x180] sm:$0xf] }
  0x27   : > { %v1691_v27 = vor.u32 %v1873_v20, %v1688_v21  ;;  %v2320_v9 = vld [vmem:[%s2603_s2] ss:$0 sm:$0xff]  ;;  %v1584_v18 = vld [vmem:[%s2215_s28 + $0xa8] sm:$0xf0]  ;;  %v1881_v19 = vld [vmem:[%s2215_s28 + $0x1b4] sm:$0xf] }
  0x28   : > { %v2328_v13 = vld [vmem:[%s2604_s3] ss:$0 sm:$0xff]  ;;  %v1720_v20 = vld [vmem:[%s2215_s28 + $0x1b8] sm:$0xf0]  ;;  %v1574_v24 = vld [vmem:[%s2215_s28 + $0x90] sm:$0xf] }
  0x29   : > { %v1592_v47 = vld [vmem:[%s2215_s28 + $0xb8] sm:$0xf0] }
  0x2a   : > { %761 = vmatpush.bf16.msra.mxu0 %v1891_v26  ;;  %2098 = vmatpush.bf16.msra.mxu2 %v1891_v26  ;;  %v1870_v26 = vld [vmem:[%s2215_s28 + $0x154] sm:$0xf0] }
  0x2b   : > { %1793 = vmatmul.msk.bf16.gmra.mxu1 %vm650_vm2, %v1515_v25  ;;  %1810 = vmatmul.msk.bf16.gmra.mxu3 %vm650_vm2, %v1651_v31  ;;  %v1670_v25 = vld [vmem:[%s2215_s28 + $0x150] sm:$0xf]  ;;  %v1560_v31 = vld [vmem:[%s2215_s28 + $0x78] sm:$0xf0] }
  0x2c   : > { %v1671_v29 = vor.u32 %v1870_v26, %v1670_v25  ;;  %v1563_v34 = vor.u32 %v1841_v30, %v1560_v31  ;;  %v1846_v25 = vld [vmem:[%s2215_s28 + $0x94] sm:$0xf0]  ;;  %v1723_v31 = vor.u32 %v1881_v19, %v1720_v20 }
  0x2d   : > { %762 = vmatmul.bf16.vlgmr.msra.gmra.mxu0 %v1503_v32  ;;  %842 = vmatmul.bf16.vlgmr.msra.gmra.mxu2 %v1631_v33  ;;  %v1875_v32 = vld [vmem:[%s2215_s28 + $0x184] sm:$0xf]  ;;  %v1696_v33 = vld [vmem:[%s2215_s28 + $0x188] sm:$0xf0]  ;;  %v1878_v30 = vld [vmem:[%s2215_s28 + $0x194] sm:$0xf0]  ;;  %v1575_v35 = vor.u32 %v1846_v25, %v1574_v24 }
  0x2e   : > { %v1699_v39 = vor.u32 %v1875_v32, %v1696_v33  ;;  %v1851_v24 = vld [vmem:[%s2215_s28 + $0xc4] sm:$0xf]  ;;  %v1600_v25 = vld [vmem:[%s2215_s28 + $0xc8] sm:$0xf0] }
  0x3b   : > { %1794 = vmatmul.msk.bf16.gmra.mxu1 %vm650_vm2, %v1523_v38  ;;  %1811 = vmatmul.msk.bf16.gmra.mxu3 %vm650_vm2, %v1659_v43  ;;  %v1872_v38 = vld [vmem:[%s2215_s28 + $0x164] sm:$0xf0]  ;;  %v1568_v43 = vld [vmem:[%s2215_s28 + $0x88] sm:$0xf0] }
  0x3c   : > { %v1679_v41 = vor.u32 %v1872_v38, %v1678_v37  ;;  %v1571_v46 = vor.u32 %v1843_v42, %v1568_v43 }
  0x3d   : > { %767 = vmatmul.bf16.gmra.mxu0 %v1511_v44  ;;  %847 = vmatmul.bf16.gmra.mxu2 %v1639_v45  ;;  %v1877_v44 = vld [vmem:[%s2215_s28 + $0x194] sm:$0xf]  ;;  %v1704_v45 = vld [vmem:[%s2215_s28 + $0x198] sm:$0xf0] }
  0x3e   : > { %v1707_v52 = vor.u32 %v1877_v44, %v1704_v45 }
  0x4b   : > { %1795 = vmatmul.msk.bf16.gmra.mxu1 %vm650_vm2, %v1531_v50  ;;  %1812 = vmatmul.msk.bf16.gmra.mxu3 %vm650_vm2, %v1667_v55  ;;  %v1686_v50 = vld [vmem:[%s2215_s28 + $0x170] sm:$0xf] }
  0x4c   : > { %v1687_v54 = vor.u32 %v1874_v51, %v1686_v50  ;;  %v1728_v50 = vld [vmem:[%s2215_s28 + $0x1c8] sm:$0xf0] }
  0x4d   : > { %772 = vmatmul.bf16.gmra.mxu0 %v1519_v56  ;;  %852 = vmatmul.bf16.gmra.mxu2 %v1647_v57  ;;  %v1845_v57 = vld [vmem:[%s2215_s28 + $0x94] sm:$0xf] }
  0x4e   : > { %v1579_v61 = vor.u32 %v1845_v57, %v1576_v58 }
  0x5b   : > { %1796 = vmatmul.msk.bf16.gmra.mxu1 %vm650_vm2, %v1539_v62  ;;  %1813 = vmatmul.msk.bf16.gmra.mxu3 %vm650_vm2, %v1675_v3  ;;  %v1566_v62 = vld [vmem:[%s2215_s28 + $0x80] sm:$0xf]  ;;  %v1876_v3 = vld [vmem:[%s2215_s28 + $0x184] sm:$0xf0] }
  0x5c   : > { %v1695_v7 = vor.u32 %v1876_v3, %v1694_v2 }
  0x5d   : > { %777 = vmatmul.bf16.gmra.mxu0 %v1527_v4  ;;  %857 = vmatmul.bf16.gmra.mxu2 %v1655_v5  ;;  %v1715_v4 = vor.u32 %v1879_v59, %v1712_v60  ;;  %v1567_v5 = vor.u32 %v1844_v63, %v1566_v62  ;;  %v1710_v60 = vld [vmem:[%s2215_s28 + $0x1a0] sm:$0xf] }
  0x6b   : > { %1797 = vmatmul.msk.bf16.gmra.mxu1 %vm650_vm2, %v1547_v10  ;;  %1814 = vmatmul.msk.bf16.gmra.mxu3 %vm650_vm2, %v1683_v15 }
  0x6d   : > { %782 = vmatmul.bf16.gmra.mxu0 %v1535_v16  ;;  %862 = vmatmul.bf16.gmra.mxu2 %v1663_v17  ;;  %v1847_v17 = vld [vmem:[%s2215_s28 + $0xa4] sm:$0xf] }
  0x6e   : > { %v1587_v23 = vor.u32 %v1847_v17, %v1584_v18 }
  0x7b   : > { %1798 = vmatmul.msk.bf16.gmra.mxu1 %vm650_vm2, %v1555_v22  ;;  %1815 = vmatmul.msk.bf16.gmra.mxu3 %vm650_vm2, %v1691_v27 }
  0x7d   : > { %787 = vmatmul.bf16.gmra.mxu0 %v1543_v28  ;;  %867 = vmatmul.bf16.gmra.mxu2 %v1671_v29  ;;  %v1702_v29 = vld [vmem:[%s2215_s28 + $0x190] sm:$0xf] }
  0x7e   : > { %v1703_v37 = vor.u32 %v1878_v30, %v1702_v29  ;;  %v1736_v29 = vld [vmem:[%s2215_s28 + $0x1d8] sm:$0xf0] }
  0x8b   : > { %1799 = vmatmul.msk.bf16.gmra.mxu1 %vm650_vm2, %v1563_v34  ;;  %1816 = vmatmul.msk.bf16.gmra.mxu3 %vm650_vm2, %v1699_v39 }
  0x8d   : > { %792 = vmatmul.bf16.gmra.mxu0 %v1551_v40  ;;  %872 = vmatmul.bf16.gmra.mxu2 %v1679_v41 }
  0x98   : > { %v932_v49 = vpop.f32.mrf.mxu1 }
  0x9b   : > { %1800 = vmatmul.msk.bf16.gmra.mxu1 %vm650_vm2, %v1571_v46  ;;  %1817 = vmatmul.msk.bf16.gmra.mxu3 %vm650_vm2, %v1707_v52  ;;  %v1849_v46 = vld [vmem:[%s2215_s28 + $0xb4] sm:$0xf] }
  0x9d   : > { %797 = vmatmul.bf16.gmra.mxu0 %v1559_v53  ;;  %877 = vmatmul.bf16.gmra.mxu2 %v1687_v54  ;;  %v1595_v53 = vor.u32 %v1849_v46, %v1592_v47  ;;  %v1582_v54 = vld [vmem:[%s2215_s28 + $0xa0] sm:$0xf] }
  0x9e   : > { %v2303_v55 = vpop.f32.mrf.mxu3 }
  0xa0   : > { %v934_v56 = vpop.f32.mrf.mxu1 }
  0xa6   : > { %v2311_v0 = vpop.f32.mrf.mxu3 }
  0xa8   : > { %v937_v1 = vpop.f32.mrf.mxu1 }
  0xaa   : > { %v763_v6 = vpop.f32.mrf.mxu0 }
  0xab   : > { %1801 = vmatmul.msk.bf16.gmra.mxu1 %vm650_vm2, %v1579_v61  ;;  %1818 = vmatmul.msk.bf16.gmra.mxu3 %vm650_vm2, %v1715_v4  ;;  %v933_v8 = vadd.f32 %v932_v49, %v763_v6  ;;  %v1883_v49 = vld [vmem:[%s2215_s28 + $0x1c4] sm:$0xf]  ;;  %v1880_v61 = vld [vmem:[%s2215_s28 + $0x1a4] sm:$0xf0] }
  0xac   : > { %v1731_v62 = vor.u32 %v1883_v49, %v1728_v50  ;;  %v1711_v6 = vor.u32 %v1880_v61, %v1710_v60 }
  0xad   : > { %802 = vmatmul.bf16.gmra.mxu0 %v1567_v5  ;;  %882 = vmatmul.bf16.gmra.mxu2 %v1695_v7  ;;  %v1096_v12 = vmul.f32 %v2320_v9, %v933_v8 }
  0xae   : > { %v2322_v10 = vpop.f32.mrf.mxu3 }
  0xaf   : > { %v1164_v21 = vadd.f32 %v2328_v13, %v1096_v12 }
  0xb0   : > { %v939_v11 = vpop.f32.mrf.mxu1  ;;  %v2330_v14 = vpop.f32.mrf.mxu2 }
  0xb1   : > { %v1228_v32 = vmax.f32 %v1164_v21, 0.0 }
  0xb2   : > { %v765_v15 = vpop.f32.mrf.mxu0 }
  0xb3   : > { %v935_v16 = vadd.f32 %v934_v56, %v765_v15  ;;  %v1848_v56 = vld [vmem:[%s2215_s28 + $0xa4] sm:$0xf0] }
  0xb4   : > { %v1583_v3 = vor.u32 %v1848_v56, %v1582_v54 }
  0xb5   : > { %v1097_v22 = vmul.f32 %v2320_v9, %v935_v16 }
  0xb6   : > { %v2340_v26 = vpop.f32.mrf.mxu3 }
  0xb7   : > { %v1165_v27 = vadd.f32 %v2328_v13, %v1097_v22 }
  0xb8   : > { %v942_v28 = vpop.f32.mrf.mxu1  ;;  %v2346_v34 = vpop.f32.mrf.mxu2 }
  0xb9   : > { %v1229_v33 = vmax.f32 %v1165_v27, 0.0 }
  0xba   : > { %v768_v36 = vpop.f32.mrf.mxu0 }
  0xbb   : > { %1802 = vmatmul.msk.bf16.gmra.mxu1 %vm650_vm2, %v1587_v23  ;;  %v1903_v38 = vpack.c.bf16 %v1229_v33, %v1228_v32  ;;  %1819 = vmatmul.msk.bf16.gmra.mxu3 %vm650_vm2, %v1723_v31  ;;  %v938_v39 = vadd.f32 %v937_v1, %v768_v36  ;;  %v1603_v32 = vor.u32 %v1851_v24, %v1600_v25  ;;  %v1590_v33 = vld [vmem:[%s2215_s28 + $0xb0] sm:$0xf] }
  0xbd   : > { %1904 = vst [vmem:[%s2351_s10] sm:$0xff] %v1903_v38   ;;  %807 = vmatmul.bf16.gmra.mxu0 %v1575_v35  ;;  %887 = vmatmul.bf16.gmra.mxu2 %v1703_v37  ;;  %v1098_v42 = vmul.f32 %v2320_v9, %v938_v39  ;;  %v1850_v35 = vld [vmem:[%s2215_s28 + $0xb4] sm:$0xf0]  ;;  %v1718_v39 = vld [vmem:[%s2215_s28 + $0x1b0] sm:$0xf] }
  0xbe   : > { %v2356_v40 = vpop.f32.mrf.mxu3  ;;  %v1591_v46 = vor.u32 %v1850_v35, %v1590_v33 }
  0xbf   : > { %v1166_v51 = vadd.f32 %v2328_v13, %v1098_v42 }
  0xc0   : > { %v944_v41 = vpop.f32.mrf.mxu1  ;;  %v848_v43 = vpop.f32.mrf.mxu2 }
  0xc1   : > { %v1018_v48 = vadd.f32 %v2303_v55, %v848_v43  ;;  %v1230_v63 = vmax.f32 %v1166_v51, 0.0 }
  0xc2   : > { %v770_v44 = vpop.f32.mrf.mxu0 }
  0xc3   : > { %v940_v45 = vadd.f32 %v939_v11, %v770_v44  ;;  %v1130_v55 = vmul.f32 %v2320_v9, %v1018_v48 }
  0xc5   : > { %v1099_v52 = vmul.f32 %v2320_v9, %v940_v45  ;;  %v1198_v8 = vadd.f32 %v2328_v13, %v1130_v55 }
  0xc6   : > { %v2368_v57 = vpop.f32.mrf.mxu3 }
  0xc7   : > { %v1167_v58 = vadd.f32 %v2328_v13, %v1099_v52  ;;  %v1262_v17 = vmax.f32 %v1198_v8, 0.0 }
  0xc8   : > { %v947_v59 = vpop.f32.mrf.mxu1  ;;  %v850_v2 = vpop.f32.mrf.mxu2 }
  0xc9   : > { %v1231_v1 = vmax.f32 %v1167_v58, 0.0  ;;  %v1020_v4 = vadd.f32 %v2311_v0, %v850_v2  ;;  %v1608_v2 = vld [vmem:[%s2215_s28 + $0xd8] sm:$0xf0] }
  0xca   : > { %v773_v5 = vpop.f32.mrf.mxu0 }
  0xcb   : > { %1803 = vmatmul.msk.bf16.gmra.mxu1 %vm650_vm2, %v1595_v53  ;;  %v1908_v7 = vpack.c.bf16 %v1231_v1, %v1230_v63  ;;  %1820 = vmatmul.msk.bf16.gmra.mxu3 %vm650_vm2, %v1731_v62  ;;  %v1131_v11 = vmul.f32 %v2320_v9, %v1020_v4  ;;  %v943_v12 = vadd.f32 %v942_v28, %v773_v5  ;;  %v1885_v28 = vld [vmem:[%s2215_s28 + $0x1d4] sm:$0xf]  ;;  %v1887_v4 = vld [vmem:[%s2215_s28 + $0x1e4] sm:$0xf]  ;;  %v1744_v5 = vld [vmem:[%s2215_s28 + $0x1e8] sm:$0xf0] }
  0xcc   : > { %v1739_v42 = vor.u32 %v1885_v28, %v1736_v29  ;;  %v1853_v1 = vld [vmem:[%s2215_s28 + $0xd4] sm:$0xf] }
  0xcd   : > { %2060 = vst [vmem:[%s2351_s10 + $0x8] sm:$0xff] %v1908_v7   ;;  %812 = vmatmul.bf16.gmra.mxu0 %v1583_v3  ;;  %v1199_v0 = vadd.f32 %v2328_v13, %v1131_v11  ;;  %892 = vmatmul.bf16.gmra.mxu2 %v1711_v6  ;;  %v1100_v19 = vmul.f32 %v2320_v9, %v943_v12  ;;  %v1598_v11 = vld [vmem:[%s2215_s28 + $0xc0] sm:$0xf]  ;;  %v1852_v12 = vld [vmem:[%s2215_s28 + $0xc4] sm:$0xf0] }
  0xce   : > { %v2381_v15 = vpop.f32.mrf.mxu3  ;;  %v1611_v8 = vor.u32 %v1853_v1, %v1608_v2  ;;  %v1599_v24 = vor.u32 %v1852_v12, %v1598_v11 }
  0xcf   : > { %v1263_v18 = vmax.f32 %v1199_v0, 0.0  ;;  %v1168_v30 = vadd.f32 %v2328_v13, %v1100_v19  ;;  %v1884_v19 = vld [vmem:[%s2215_s28 + $0x1c4] sm:$0xf0] }
  0xd0   : > { %v949_v16 = vpop.f32.mrf.mxu1  ;;  %v853_v20 = vpop.f32.mrf.mxu2 }
  0xd1   : > { %v1988_v21 = vpack.c.bf16 %v1263_v18, %v1262_v17  ;;  %v1023_v27 = vadd.f32 %v2322_v10, %v853_v20  ;;  %v1232_v43 = vmax.f32 %v1168_v30, 0.0  ;;  %v1726_v18 = vld [vmem:[%s2215_s28 + $0x1c0] sm:$0xf]  ;;  %v1747_v20 = vor.u32 %v1887_v4, %v1744_v5 }
  0xd2   : > { %v775_v22 = vpop.f32.mrf.mxu0  ;;  %v1727_v28 = vor.u32 %v1884_v19, %v1726_v18 }
  0xd3   : > { %v945_v23 = vadd.f32 %v944_v41, %v775_v22  ;;  %2076 = vst [vmem:[%s2351_s10 + $0x88] sm:$0xff] %v1988_v21   ;;  %v1882_v41 = vld [vmem:[%s2215_s28 + $0x1b4] sm:$0xf0]  ;;  %v1132_v10 = vmul.f32 %v2320_v9, %v1023_v27 }
  0xd4   : > { %v1719_v49 = vor.u32 %v1882_v41, %v1718_v39 }
  0xd5   : > { %v1101_v31 = vmul.f32 %v2320_v9, %v945_v23  ;;  %v1200_v51 = vadd.f32 %v2328_v13, %v1132_v10 }
  0xd6   : > { %v2394_v36 = vpop.f32.mrf.mxu3 }
  0xd7   : > { %v1169_v37 = vadd.f32 %v2328_v13, %v1101_v31  ;;  %v1264_v58 = vmax.f32 %v1200_v51, 0.0 }
  0xd8   : > { %v952_v38 = vpop.f32.mrf.mxu1  ;;  %v855_v45 = vpop.f32.mrf.mxu2 }
  0xd9   : > { %v1233_v44 = vmax.f32 %v1169_v37, 0.0  ;;  %v1025_v47 = vadd.f32 %v2340_v26, %v855_v45  ;;  %v1616_v45 = vld [vmem:[%s2215_s28 + $0xe8] sm:$0xf0] }
  0xda   : > { %v778_v48 = vpop.f32.mrf.mxu0 }
  0xdb   : > { %1804 = vmatmul.msk.bf16.gmra.mxu1 %vm650_vm2, %v1603_v32  ;;  %v1913_v50 = vpack.c.bf16 %v1233_v44, %v1232_v43  ;;  %1821 = vmatmul.msk.bf16.gmra.mxu3 %vm650_vm2, %v1739_v42  ;;  %v1133_v52 = vmul.f32 %v2320_v9, %v1025_v47  ;;  %v948_v53 = vadd.f32 %v947_v59, %v778_v48  ;;  %v1855_v44 = vld [vmem:[%s2215_s28 + $0xe4] sm:$0xf]  ;;  %v1889_v47 = vld [vmem:[%s2215_s28 + $0x1f4] sm:$0xf]  ;;  %v1752_v48 = vld [vmem:[%s2215_s28 + $0x1f8] sm:$0xf0] }
  0xdc   : > { %v1619_v51 = vor.u32 %v1855_v44, %v1616_v45 }
  0xdd   : > { %2061 = vst [vmem:[%s2351_s10 + $0x10] sm:$0xff] %v1913_v50   ;;  %817 = vmatmul.bf16.gmra.mxu0 %v1591_v46  ;;  %v1201_v26 = vadd.f32 %v2328_v13, %v1133_v52  ;;  %897 = vmatmul.bf16.gmra.mxu2 %v1719_v49  ;;  %v1102_v61 = vmul.f32 %v2320_v9, %v948_v53  ;;  %v1606_v52 = vld [vmem:[%s2215_s28 + $0xd0] sm:$0xf]  ;;  %v1854_v53 = vld [vmem:[%s2215_s28 + $0xd4] sm:$0xf0] }
  0xde   : > { %v2407_v54 = vpop.f32.mrf.mxu3  ;;  %v1607_v1 = vor.u32 %v1854_v53, %v1606_v52 }
  0xdf   : > { %v1265_v60 = vmax.f32 %v1201_v26, 0.0  ;;  %v1170_v6 = vadd.f32 %v2328_v13, %v1102_v61  ;;  %v1886_v61 = vld [vmem:[%s2215_s28 + $0x1d4] sm:$0xf0] }
  0xe0   : > { %v954_v56 = vpop.f32.mrf.mxu1  ;;  %v858_v62 = vpop.f32.mrf.mxu2 }
  0xe1   : > { %v1993_v55 = vpack.c.bf16 %v1265_v60, %v1264_v58  ;;  %v1028_v3 = vadd.f32 %v2356_v40, %v858_v62  ;;  %v1234_v21 = vmax.f32 %v1170_v6, 0.0  ;;  %v1734_v60 = vld [vmem:[%s2215_s28 + $0x1d0] sm:$0xf]  ;;  %v1755_v62 = vor.u32 %v1889_v47, %v1752_v48 }
  0xe2   : > { %v780_v63 = vpop.f32.mrf.mxu0  ;;  %v1735_v4 = vor.u32 %v1886_v61, %v1734_v60 }
  0xe3   : > { %v950_v59 = vadd.f32 %v949_v16, %v780_v63  ;;  %2077 = vst [vmem:[%s2351_s10 + $0x90] sm:$0xff] %v1993_v55   ;;  %v1134_v40 = vmul.f32 %v2320_v9, %v1028_v3 }
  0xe5   : > { %v1103_v7 = vmul.f32 %v2320_v9, %v950_v59  ;;  %v1202_v30 = vadd.f32 %v2328_v13, %v1134_v40 }
  0xe6   : > { %v2420_v0 = vpop.f32.mrf.mxu3 }
  0xe7   : > { %v1171_v17 = vadd.f32 %v2328_v13, %v1103_v7  ;;  %v1266_v37 = vmax.f32 %v1202_v30, 0.0  ;;  %v1856_v30 = vld [vmem:[%s2215_s28 + $0xe4] sm:$0xf0] }
  0xe8   : > { %v957_v16 = vpop.f32.mrf.mxu1  ;;  %v860_v23 = vpop.f32.mrf.mxu2 }
  0xe9   : > { %v1235_v22 = vmax.f32 %v1171_v17, 0.0  ;;  %v1030_v25 = vadd.f32 %v2368_v57, %v860_v23  ;;  %v1624_v23 = vld [vmem:[%s2215_s28 + $0xf8] sm:$0xf0] }
  0xea   : > { %v783_v27 = vpop.f32.mrf.mxu0 }
  0xeb   : > { %1805 = vmatmul.msk.bf16.gmra.mxu1 %vm650_vm2, %v1611_v8  ;;  %v1918_v29 = vpack.c.bf16 %v1235_v22, %v1234_v21  ;;  %1822 = vmatmul.msk.bf16.gmra.mxu3 %vm650_vm2, %v1747_v20  ;;  %v1135_v31 = vmul.f32 %v2320_v9, %v1030_v25  ;;  %v953_v32 = vadd.f32 %v952_v38, %v783_v27 }
  0xed   : > { %2062 = vst [vmem:[%s2351_s10 + $0x18] sm:$0xff] %v1918_v29   ;;  %822 = vmatmul.bf16.gmra.mxu0 %v1599_v24  ;;  %v1203_v57 = vadd.f32 %v2328_v13, %v1135_v31  ;;  %902 = vmatmul.bf16.gmra.mxu2 %v1727_v28  ;;  %v1104_v41 = vmul.f32 %v2320_v9, %v953_v32  ;;  %v1614_v29 = vld [vmem:[%s2215_s28 + $0xe0] sm:$0xf] }
  0xee   : > { %v2433_v33 = vpop.f32.mrf.mxu3 }
  0xef   : > { %v1267_v39 = vmax.f32 %v1203_v57, 0.0  ;;  %v1172_v49 = vadd.f32 %v2328_v13, %v1104_v41  ;;  %v1742_v57 = vld [vmem:[%s2215_s28 + $0x1e0] sm:$0xf] }
  0xf0   : > { %v959_v35 = vpop.f32.mrf.mxu1  ;;  %v863_v42 = vpop.f32.mrf.mxu2 }
  0xf1   : > { %v1998_v10 = vpack.c.bf16 %v1267_v39, %v1266_v37  ;;  %v1033_v46 = vadd.f32 %v2381_v15, %v863_v42  ;;  %v1236_v55 = vmax.f32 %v1172_v49, 0.0  ;;  %v1888_v37 = vld [vmem:[%s2215_s28 + $0x1e4] sm:$0xf0] }
  0xf2   : > { %v785_v43 = vpop.f32.mrf.mxu0  ;;  %v1743_v44 = vor.u32 %v1888_v37, %v1742_v57 }
  0xf3   : > { %v955_v38 = vadd.f32 %v954_v56, %v785_v43  ;;  %2078 = vst [vmem:[%s2351_s10 + $0x98] sm:$0xff] %v1998_v10   ;;  %v1136_v15 = vmul.f32 %v2320_v9, %v1033_v46  ;;  %v1615_v10 = vor.u32 %v1856_v30, %v1614_v29 }
  0xf5   : > { %v1105_v50 = vmul.f32 %v2320_v9, %v955_v38  ;;  %v1204_v6 = vadd.f32 %v2328_v13, %v1136_v15  ;;  %v1632_v15 = vld [vmem:[%s2215_s28 + $0x108] sm:$0xf0] }
  0xf6   : > { %v2446_v26 = vpop.f32.mrf.mxu3 }
  0xf7   : > { %v1173_v58 = vadd.f32 %v2328_v13, %v1105_v50  ;;  %v1268_v17 = vmax.f32 %v1204_v6, 0.0  ;;  %v1750_v6 = vld [vmem:[%s2215_s28 + $0x1f0] sm:$0xf] }
  0xf8   : > { %v962_v56 = vpop.f32.mrf.mxu1  ;;  %v865_v59 = vpop.f32.mrf.mxu2 }
  0xf9   : > { %v1237_v63 = vmax.f32 %v1173_v58, 0.0  ;;  %v1035_v2 = vadd.f32 %v2394_v36, %v865_v59 }
  0xfa   : > { %v788_v3 = vpop.f32.mrf.mxu0 }
  0xfb   : > { %1806 = vmatmul.msk.bf16.gmra.mxu1 %vm650_vm2, %v1619_v51  ;;  %v1923_v5 = vpack.c.bf16 %v1237_v63, %v1236_v55  ;;  %1823 = vmatmul.msk.bf16.gmra.mxu3 %vm650_vm2, %v1755_v62  ;;  %v1137_v7 = vmul.f32 %v2320_v9, %v1035_v2  ;;  %v958_v8 = vadd.f32 %v957_v16, %v788_v3  ;;  %v1857_v16 = vld [vmem:[%s2215_s28 + $0xf4] sm:$0xf]  ;;  %v1859_v62 = vld [vmem:[%s2215_s28 + $0x104] sm:$0xf]  ;;  %v1622_v2 = vld [vmem:[%s2215_s28 + $0xf0] sm:$0xf] }
  0xfc   : > { %v1627_v28 = vor.u32 %v1857_v16, %v1624_v23  ;;  %v1858_v3 = vld [vmem:[%s2215_s28 + $0xf4] sm:$0xf0] }
  0xfd   : > { %2063 = vst [vmem:[%s2351_s10 + $0x20] sm:$0xff] %v1923_v5   ;;  %827 = vmatmul.bf16.gmra.mxu0 %v1607_v1  ;;  %v1205_v11 = vadd.f32 %v2328_v13, %v1137_v7  ;;  %907 = vmatmul.bf16.gmra.mxu2 %v1735_v4  ;;  %v1106_v19 = vmul.f32 %v2320_v9, %v958_v8  ;;  %v1890_v7 = vld [vmem:[%s2215_s28 + $0x1f4] sm:$0xf0] }
  0xfe   : > { %v2459_v12 = vpop.f32.mrf.mxu3  ;;  %v1635_v1 = vor.u32 %v1859_v62, %v1632_v15 }
  0xff   : > { %v1269_v18 = vmax.f32 %v1205_v11, 0.0  ;;  %v1174_v25 = vadd.f32 %v2328_v13, %v1106_v19 }
 0x100   : > { %v964_v36 = vpop.f32.mrf.mxu1  ;;  %v868_v20 = vpop.f32.mrf.mxu2 }
 0x101   : > { %v2003_v40 = vpack.c.bf16 %v1269_v18, %v1268_v17  ;;  %v1038_v24 = vadd.f32 %v2407_v54, %v868_v20  ;;  %v1238_v39 = vmax.f32 %v1174_v25, 0.0  ;;  %v1623_v18 = vor.u32 %v1858_v3, %v1622_v2 }
 0x102   : > { %v790_v21 = vpop.f32.mrf.mxu0  ;;  %v1751_v20 = vor.u32 %v1890_v7, %v1750_v6 }
 0x103   : > { %v960_v22 = vadd.f32 %v959_v35, %v790_v21  ;;  %2079 = vst [vmem:[%s2351_s10 + $0xa0] sm:$0xff] %v2003_v40   ;;  %v1138_v35 = vmul.f32 %v2320_v9, %v1038_v24 }
 0x105   : > { %v1107_v27 = vmul.f32 %v2320_v9, %v960_v22  ;;  %v1206_v46 = vadd.f32 %v2328_v13, %v1138_v35 }
 0x106   : > { %v2474_v54 = vpop.f32.mrf.mxu3 }
 0x107   : > { %v1175_v31 = vadd.f32 %v2328_v13, %v1107_v27 }
 0x108   : > { %v967_v32 = vpop.f32.mrf.mxu1  ;;  %v870_v42 = vpop.f32.mrf.mxu2 }
 0x109   : > { %v1239_v41 = vmax.f32 %v1175_v31, 0.0  ;;  %v1040_v43 = vadd.f32 %v2420_v0, %v870_v42  ;;  %v1270_v0 = vmax.f32 %v1206_v46, 0.0 }
 0x10a   : > { %v793_v38 = vpop.f32.mrf.mxu0 }
 0x10b   : > { %1807 = vmatmul.msk.bf16.gmra.mxu1 %vm650_vm2, %v1627_v28  ;;  %v1928_v45 = vpack.c.bf16 %v1239_v41, %v1238_v39  ;;  %v1139_v47 = vmul.f32 %v2320_v9, %v1040_v43  ;;  %v963_v48 = vadd.f32 %v962_v56, %v793_v38 }
 0x10d   : > { %2064 = vst [vmem:[%s2351_s10 + $0x28] sm:$0xff] %v1928_v45   ;;  %832 = vmatmul.bf16.gmra.mxu0 %v1615_v10  ;;  %v1207_v49 = vadd.f32 %v2328_v13, %v1139_v47  ;;  %912 = vmatmul.bf16.gmra.mxu2 %v1743_v44  ;;  %v1108_v52 = vmul.f32 %v2320_v9, %v963_v48 }
 0x10e   : > { %v2485_v56 = vpop.f32.mrf.mxu3 }
 0x10f   : > { %v1271_v51 = vmax.f32 %v1207_v49, 0.0  ;;  %v1176_v63 = vadd.f32 %v2328_v13, %v1108_v52 }
 0x110   : > { %v969_v50 = vpop.f32.mrf.mxu1  ;;  %v873_v53 = vpop.f32.mrf.mxu2 }
 0x111   : > { %v2008_v58 = vpack.c.bf16 %v1271_v51, %v1270_v0  ;;  %v1043_v55 = vadd.f32 %v2433_v33, %v873_v53  ;;  %v1240_v11 = vmax.f32 %v1176_v63, 0.0 }
 0x112   : > { %v795_v60 = vpop.f32.mrf.mxu0 }
 0x113   : > { %v965_v61 = vadd.f32 %v964_v36, %v795_v60  ;;  %2080 = vst [vmem:[%s2351_s10 + $0xa8] sm:$0xff] %v2008_v58   ;;  %v1140_v8 = vmul.f32 %v2320_v9, %v1043_v55 }
 0x115   : > { %v1109_v59 = vmul.f32 %v2320_v9, %v965_v61  ;;  %v1208_v21 = vadd.f32 %v2328_v13, %v1140_v8 }
 0x116   : > { %v1054_v23 = vpop.f32.mrf.mxu3 }
 0x117   : > { %v1177_v4 = vadd.f32 %v2328_v13, %v1109_v59  ;;  %v1272_v27 = vmax.f32 %v1208_v21, 0.0 }
 0x118   : > { %v972_v5 = vpop.f32.mrf.mxu1  ;;  %v875_v17 = vpop.f32.mrf.mxu2 }
 0x119   : > { %v1241_v36 = vmax.f32 %v1177_v4, 0.0  ;;  %v1045_v33 = vadd.f32 %v2446_v26, %v875_v17 }
 0x11a   : > { %v798_v19 = vpop.f32.mrf.mxu0 }
 0x11b   : > { %1808 = vmatmul.msk.bf16.gmra.mxu1 %vm650_vm2, %v1635_v1  ;;  %v1933_v40 = vpack.c.bf16 %v1241_v36, %v1240_v11  ;;  %v1141_v22 = vmul.f32 %v2320_v9, %v1045_v33  ;;  %v968_v16 = vadd.f32 %v967_v32, %v798_v19 }
 0x11d   : > { %2065 = vst [vmem:[%s2351_s10 + $0x30] sm:$0xff] %v1933_v40   ;;  %837 = vmatmul.bf16.gmra.mxu0 %v1623_v18  ;;  %v1209_v24 = vadd.f32 %v2328_v13, %v1141_v22  ;;  %917 = vmatmul.bf16.gmra.mxu2 %v1751_v20  ;;  %v1110_v28 = vmul.f32 %v2320_v9, %v968_v16 }
 0x11e   : > { %v1057_v42 = vpop.f32.mrf.mxu3 }
 0x11f   : > { %v1273_v26 = vmax.f32 %v1209_v24, 0.0  ;;  %v1178_v32 = vadd.f32 %v2328_v13, %v1110_v28 }
 0x120   : > { %v974_v25 = vpop.f32.mrf.mxu1  ;;  %v878_v29 = vpop.f32.mrf.mxu2 }
 0x121   : > { %v2013_v30 = vpack.c.bf16 %v1273_v26, %v1272_v27  ;;  %v1048_v37 = vadd.f32 %v2459_v12, %v878_v29  ;;  %v1242_v43 = vmax.f32 %v1178_v32, 0.0 }
 0x122   : > { %v800_v31 = vpop.f32.mrf.mxu0 }
 0x123   : > { %v970_v57 = vadd.f32 %v969_v50, %v800_v31  ;;  %2081 = vst [vmem:[%s2351_s10 + $0xb0] sm:$0xff] %v2013_v30   ;;  %v1142_v10 = vmul.f32 %v2320_v9, %v1048_v37 }
 0x125   : > { %v1111_v35 = vmul.f32 %v2320_v9, %v970_v57  ;;  %v1210_v12 = vadd.f32 %v2328_v13, %v1142_v10 }
 0x126   : > { %v1059_v60 = vpop.f32.mrf.mxu3 }
 0x127   : > { %v1179_v39 = vadd.f32 %v2328_v13, %v1111_v35  ;;  %v1274_v51 = vmax.f32 %v1210_v12, 0.0 }
 0x128   : > { %v977_v41 = vpop.f32.mrf.mxu1  ;;  %v880_v44 = vpop.f32.mrf.mxu2 }
 0x129   : > { %v1243_v38 = vmax.f32 %v1179_v39, 0.0  ;;  %v1050_v45 = vadd.f32 %v2474_v54, %v880_v44 }
 0x12a   : > { %v803_v46 = vpop.f32.mrf.mxu0 }
 0x12b   : > { %v1938_v47 = vpack.c.bf16 %v1243_v38, %v1242_v43  ;;  %v1143_v48 = vmul.f32 %v2320_v9, %v1050_v45  ;;  %v973_v49 = vadd.f32 %v972_v5, %v803_v46 }
 0x12d   : > { %2066 = vst [vmem:[%s2351_s10 + $0x38] sm:$0xff] %v1938_v47   ;;  %v1211_v50 = vadd.f32 %v2328_v13, %v1143_v48  ;;  %v1112_v53 = vmul.f32 %v2320_v9, %v973_v49 }
 0x12e   : > { %v1062_v11 = vpop.f32.mrf.mxu3 }
 0x12f   : > { %v1275_v52 = vmax.f32 %v1211_v50, 0.0  ;;  %v1180_v55 = vadd.f32 %v2328_v13, %v1112_v53 }
 0x130   : > { %v979_v0 = vpop.f32.mrf.mxu1  ;;  %v883_v58 = vpop.f32.mrf.mxu2 }
 0x131   : > { %v2018_v61 = vpack.c.bf16 %v1275_v52, %v1274_v51  ;;  %v1053_v15 = vadd.f32 %v2485_v56, %v883_v58  ;;  %v1244_v3 = vmax.f32 %v1180_v55, 0.0 }
 0x132   : > { %v805_v54 = vpop.f32.mrf.mxu0 }
 0x133   : > { %v975_v62 = vadd.f32 %v974_v25, %v805_v54  ;;  %2082 = vst [vmem:[%s2351_s10 + $0xb8] sm:$0xff] %v2018_v61   ;;  %v1144_v2 = vmul.f32 %v2320_v9, %v1053_v15 }
 0x135   : > { %v1113_v63 = vmul.f32 %v2320_v9, %v975_v62  ;;  %v1212_v36 = vadd.f32 %v2328_v13, %v1144_v2 }
 0x136   : > { %v1064_v26 = vpop.f32.mrf.mxu3 }
 0x137   : > { %v1181_v59 = vadd.f32 %v2328_v13, %v1113_v63  ;;  %v1276_v19 = vmax.f32 %v1212_v36, 0.0 }
 0x138   : > { %v982_v1 = vpop.f32.mrf.mxu1  ;;  %v885_v5 = vpop.f32.mrf.mxu2 }
 0x139   : > { %v1245_v4 = vmax.f32 %v1181_v59, 0.0  ;;  %v1055_v6 = vadd.f32 %v1054_v23, %v885_v5 }
 0x13a   : > { %v808_v7 = vpop.f32.mrf.mxu0 }
 0x13b   : > { %v1943_v8 = vpack.c.bf16 %v1245_v4, %v1244_v3  ;;  %v1145_v56 = vmul.f32 %v2320_v9, %v1055_v6  ;;  %v978_v17 = vadd.f32 %v977_v41, %v808_v7 }
 0x13d   : > { %2067 = vst [vmem:[%s2351_s10 + $0x40] sm:$0xff] %v1943_v8   ;;  %v1213_v18 = vadd.f32 %v2328_v13, %v1145_v56  ;;  %v1114_v40 = vmul.f32 %v2320_v9, %v978_v17 }
 0x13e   : > { %v1067_v44 = vpop.f32.mrf.mxu3 }
 0x13f   : > { %v1277_v20 = vmax.f32 %v1213_v18, 0.0  ;;  %v1182_v25 = vadd.f32 %v2328_v13, %v1114_v40 }
 0x140   : > { %v984_v33 = vpop.f32.mrf.mxu1  ;;  %v888_v21 = vpop.f32.mrf.mxu2 }
 0x141   : > { %v2023_v22 = vpack.c.bf16 %v1277_v20, %v1276_v19  ;;  %v1058_v24 = vadd.f32 %v1057_v42, %v888_v21  ;;  %v1246_v31 = vmax.f32 %v1182_v25, 0.0 }
 0x142   : > { %v810_v16 = vpop.f32.mrf.mxu0 }
 0x143   : > { %v980_v23 = vadd.f32 %v979_v0, %v810_v16  ;;  %2083 = vst [vmem:[%s2351_s10 + $0xc0] sm:$0xff] %v2023_v22   ;;  %v1146_v30 = vmul.f32 %v2320_v9, %v1058_v24 }
 0x145   : > { %v1115_v27 = vmul.f32 %v2320_v9, %v980_v23  ;;  %v1214_v41 = vadd.f32 %v2328_v13, %v1146_v30 }
 0x146   : > { %v1069_v15 = vpop.f32.mrf.mxu3 }
 0x147   : > { %v1183_v28 = vadd.f32 %v2328_v13, %v1115_v27  ;;  %v1278_v45 = vmax.f32 %v1214_v41, 0.0 }
 0x148   : > { %v987_v29 = vpop.f32.mrf.mxu1  ;;  %v890_v37 = vpop.f32.mrf.mxu2 }
 0x149   : > { %v1247_v57 = vmax.f32 %v1183_v28, 0.0  ;;  %v1060_v32 = vadd.f32 %v1059_v60, %v890_v37 }
 0x14a   : > { %v813_v35 = vpop.f32.mrf.mxu0 }
 0x14b   : > { %v1948_v39 = vpack.c.bf16 %v1247_v57, %v1246_v31  ;;  %v1147_v42 = vmul.f32 %v2320_v9, %v1060_v32  ;;  %v983_v10 = vadd.f32 %v982_v1, %v813_v35 }
 0x14d   : > { %2068 = vst [vmem:[%s2351_s10 + $0x48] sm:$0xff] %v1948_v39   ;;  %v1215_v43 = vadd.f32 %v2328_v13, %v1147_v42  ;;  %v1116_v47 = vmul.f32 %v2320_v9, %v983_v10 }
 0x14e   : > { %v1072_v18 = vpop.f32.mrf.mxu3 }
 0x14f   : > { %v1279_v46 = vmax.f32 %v1215_v43, 0.0  ;;  %v1184_v51 = vadd.f32 %v2328_v13, %v1116_v47 }
 0x150   : > { %v989_v38 = vpop.f32.mrf.mxu1  ;;  %v893_v12 = vpop.f32.mrf.mxu2 }
 0x151   : > { %v2028_v48 = vpack.c.bf16 %v1279_v46, %v1278_v45  ;;  %v1063_v0 = vadd.f32 %v1062_v11, %v893_v12  ;;  %v1248_v61 = vmax.f32 %v1184_v51, 0.0 }
 0x152   : > { %v815_v49 = vpop.f32.mrf.mxu0 }
 0x153   : > { %v985_v50 = vadd.f32 %v984_v33, %v815_v49  ;;  %2084 = vst [vmem:[%s2351_s10 + $0xc8] sm:$0xff] %v2028_v48   ;;  %v1148_v60 = vmul.f32 %v2320_v9, %v1063_v0 }
 0x155   : > { %v1117_v52 = vmul.f32 %v2320_v9, %v985_v50  ;;  %v1216_v1 = vadd.f32 %v2328_v13, %v1148_v60 }
 0x156   : > { %v1074_v31 = vpop.f32.mrf.mxu3 }
 0x157   : > { %v1185_v53 = vadd.f32 %v2328_v13, %v1117_v52  ;;  %v1280_v6 = vmax.f32 %v1216_v1, 0.0 }
 0x158   : > { %v992_v58 = vpop.f32.mrf.mxu1  ;;  %v895_v62 = vpop.f32.mrf.mxu2 }
 0x159   : > { %v1249_v54 = vmax.f32 %v1185_v53, 0.0  ;;  %v1065_v55 = vadd.f32 %v1064_v26, %v895_v62 }
 0x15a   : > { %v818_v63 = vpop.f32.mrf.mxu0 }
 0x15b   : > { %v1953_v59 = vpack.c.bf16 %v1249_v54, %v1248_v61  ;;  %v1149_v2 = vmul.f32 %v2320_v9, %v1065_v55  ;;  %v988_v3 = vadd.f32 %v987_v29, %v818_v63 }
 0x15d   : > { %2069 = vst [vmem:[%s2351_s10 + $0x50] sm:$0xff] %v1953_v59   ;;  %v1217_v4 = vadd.f32 %v2328_v13, %v1149_v2  ;;  %v1118_v8 = vmul.f32 %v2320_v9, %v988_v3 }
 0x15e   : > { %v1077_v12 = vpop.f32.mrf.mxu3 }
 0x15f   : > { %v1281_v7 = vmax.f32 %v1217_v4, 0.0  ;;  %v1186_v19 = vadd.f32 %v2328_v13, %v1118_v8 }
 0x160   : > { %v994_v5 = vpop.f32.mrf.mxu1  ;;  %v898_v11 = vpop.f32.mrf.mxu2 }
 0x161   : > { %v2033_v36 = vpack.c.bf16 %v1281_v7, %v1280_v6  ;;  %v1068_v33 = vadd.f32 %v1067_v44, %v898_v11  ;;  %v1250_v16 = vmax.f32 %v1186_v19, 0.0 }
 0x162   : > { %v820_v56 = vpop.f32.mrf.mxu0 }
 0x163   : > { %v990_v17 = vadd.f32 %v989_v38, %v820_v56  ;;  %2085 = vst [vmem:[%s2351_s10 + $0xd0] sm:$0xff] %v2033_v36   ;;  %v1150_v22 = vmul.f32 %v2320_v9, %v1068_v33 }
 0x165   : > { %v1119_v20 = vmul.f32 %v2320_v9, %v990_v17  ;;  %v1218_v28 = vadd.f32 %v2328_v13, %v1150_v22 }
 0x166   : > { %v1079_v1 = vpop.f32.mrf.mxu3 }
 0x167   : > { %v1187_v40 = vadd.f32 %v2328_v13, %v1119_v20  ;;  %v1282_v32 = vmax.f32 %v1218_v28, 0.0 }
 0x168   : > { %v997_v21 = vpop.f32.mrf.mxu1  ;;  %v900_v24 = vpop.f32.mrf.mxu2 }
 0x169   : > { %v1251_v23 = vmax.f32 %v1187_v40, 0.0  ;;  %v1070_v25 = vadd.f32 %v1069_v15, %v900_v24 }
 0x16a   : > { %v823_v27 = vpop.f32.mrf.mxu0 }
 0x16b   : > { %v1958_v26 = vpack.c.bf16 %v1251_v23, %v1250_v16  ;;  %v1151_v29 = vmul.f32 %v2320_v9, %v1070_v25  ;;  %v993_v30 = vadd.f32 %v992_v58, %v823_v27 }
 0x16d   : > { %2070 = vst [vmem:[%s2351_s10 + $0x58] sm:$0xff] %v1958_v26   ;;  %v1219_v57 = vadd.f32 %v2328_v13, %v1151_v29  ;;  %v1120_v39 = vmul.f32 %v2320_v9, %v993_v30 }
 0x16e   : > { %v1082_v40 = vpop.f32.mrf.mxu3 }
 0x16f   : > { %v1283_v35 = vmax.f32 %v1219_v57, 0.0  ;;  %v1188_v44 = vadd.f32 %v2328_v13, %v1120_v39 }
 0x170   : > { %v999_v37 = vpop.f32.mrf.mxu1  ;;  %v903_v41 = vpop.f32.mrf.mxu2 }
 0x171   : > { %v2038_v42 = vpack.c.bf16 %v1283_v35, %v1282_v32  ;;  %v1073_v38 = vadd.f32 %v1072_v18, %v903_v41  ;;  %v1252_v49 = vmax.f32 %v1188_v44, 0.0 }
 0x172   : > { %v825_v10 = vpop.f32.mrf.mxu0 }
 0x173   : > { %v995_v43 = vadd.f32 %v994_v5, %v825_v10  ;;  %2086 = vst [vmem:[%s2351_s10 + $0xd8] sm:$0xff] %v2038_v42   ;;  %v1152_v48 = vmul.f32 %v2320_v9, %v1073_v38 }
 0x175   : > { %v1121_v45 = vmul.f32 %v2320_v9, %v995_v43  ;;  %v1220_v58 = vadd.f32 %v2328_v13, %v1152_v48 }
 0x176   : > { %v1084_v32 = vpop.f32.mrf.mxu3 }
 0x177   : > { %v1189_v46 = vadd.f32 %v2328_v13, %v1121_v45  ;;  %v1284_v15 = vmax.f32 %v1220_v58, 0.0 }
 0x178   : > { %v1002_v47 = vpop.f32.mrf.mxu1  ;;  %v905_v0 = vpop.f32.mrf.mxu2 }
 0x179   : > { %v1253_v50 = vmax.f32 %v1189_v46, 0.0  ;;  %v1075_v51 = vadd.f32 %v1074_v31, %v905_v0 }
 0x17a   : > { %v828_v52 = vpop.f32.mrf.mxu0 }
 0x17b   : > { %v1963_v53 = vpack.c.bf16 %v1253_v50, %v1252_v49  ;;  %v1153_v60 = vmul.f32 %v2320_v9, %v1075_v51  ;;  %v998_v61 = vadd.f32 %v997_v21, %v828_v52  ;;  %v2125_v50 = vld [vmem:[%s2603_s2] ss:$0 sm:$0xff] }
 0x17d   : > { %2071 = vst [vmem:[%s2351_s10 + $0x60] sm:$0xff] %v1963_v53   ;;  %v1221_v54 = vadd.f32 %v2328_v13, %v1153_v60  ;;  %v1122_v63 = vmul.f32 %v2320_v9, %v998_v61 }
 0x17e   : > { %v1087_v52 = vpop.f32.mrf.mxu3 }
 0x17f   : > { %v1285_v55 = vmax.f32 %v1221_v54, 0.0  ;;  %v1190_v6 = vadd.f32 %v2328_v13, %v1122_v63 }
 0x180   : > { %v1004_v62 = vpop.f32.mrf.mxu1  ;;  %v908_v59 = vpop.f32.mrf.mxu2 }
 0x181   : > { %v2043_v2 = vpack.c.bf16 %v1285_v55, %v1284_v15  ;;  %v1078_v5 = vadd.f32 %v1077_v12, %v908_v59  ;;  %v1254_v56 = vmax.f32 %v1190_v6, 0.0 }
 0x182   : > { %v830_v3 = vpop.f32.mrf.mxu0 }
 0x183   : > { %v1000_v4 = vadd.f32 %v999_v37, %v830_v3  ;;  %2087 = vst [vmem:[%s2351_s10 + $0xe0] sm:$0xff] %v2043_v2   ;;  %v1154_v36 = vmul.f32 %v2320_v9, %v1078_v5 }
 0x185   : > { %v1123_v7 = vmul.f32 %v2320_v9, %v1000_v4  ;;  %v1222_v21 = vadd.f32 %v2328_v13, %v1154_v36 }
 0x187   : > { %v1191_v8 = vadd.f32 %v2328_v13, %v1123_v7  ;;  %v1286_v25 = vmax.f32 %v1222_v21, 0.0 }
 0x188   : > { %v1007_v11 = vpop.f32.mrf.mxu1  ;;  %v910_v18 = vpop.f32.mrf.mxu2 }
 0x189   : > { %v1255_v17 = vmax.f32 %v1191_v8, 0.0  ;;  %v1080_v33 = vadd.f32 %v1079_v1, %v910_v18 }
 0x18a   : > { %v833_v19 = vpop.f32.mrf.mxu0 }
 0x18b   : > { %v1968_v20 = vpack.c.bf16 %v1255_v17, %v1254_v56  ;;  %v1155_v22 = vmul.f32 %v2320_v9, %v1080_v33  ;;  %v1003_v16 = vadd.f32 %v1002_v47, %v833_v19 }
 0x18d   : > { %2072 = vst [vmem:[%s2351_s10 + $0x68] sm:$0xff] %v1968_v20   ;;  %v1223_v23 = vadd.f32 %v2328_v13, %v1155_v22  ;;  %v1124_v26 = vmul.f32 %v2320_v9, %v1003_v16 }
 0x18f   : > { %v1287_v27 = vmax.f32 %v1223_v23, 0.0  ;;  %v1192_v37 = vadd.f32 %v2328_v13, %v1124_v26 }
 0x190   : > { %v1009_v24 = vpop.f32.mrf.mxu1  ;;  %v913_v28 = vpop.f32.mrf.mxu2 }
 0x191   : > { %v2048_v29 = vpack.c.bf16 %v1287_v27, %v1286_v25  ;;  %v1083_v57 = vadd.f32 %v1082_v40, %v913_v28  ;;  %v1256_v10 = vmax.f32 %v1192_v37, 0.0 }
 0x192   : > { %v835_v30 = vpop.f32.mrf.mxu0 }
 0x193   : > { %v1005_v31 = vadd.f32 %v1004_v62, %v835_v30  ;;  %2088 = vst [vmem:[%s2351_s10 + $0xe8] sm:$0xff] %v2048_v29   ;;  %v1156_v42 = vmul.f32 %v2320_v9, %v1083_v57 }
 0x195   : > { %v1125_v35 = vmul.f32 %v2320_v9, %v1005_v31  ;;  %v1224_v12 = vadd.f32 %v2328_v13, %v1156_v42 }
 0x197   : > { %v1193_v39 = vadd.f32 %v2328_v13, %v1125_v35 }
 0x198   : > { %v1012_v41 = vpop.f32.mrf.mxu1  ;;  %v915_v38 = vpop.f32.mrf.mxu2 }
 0x199   : > { %v1257_v43 = vmax.f32 %v1193_v39, 0.0  ;;  %v1013_v44 = vadd.f32 %v1012_v41, %v2330_v14  ;;  %v1085_v45 = vadd.f32 %v1084_v32, %v915_v38  ;;  %v1288_v14 = vmax.f32 %v1224_v12, 0.0 }
 0x19a   : > { %v838_v46 = vpop.f32.mrf.mxu0 }
 0x19b   : > { %v1973_v47 = vpack.c.bf16 %v1257_v43, %v1256_v10  ;;  %v1157_v48 = vmul.f32 %v2320_v9, %v1085_v45  ;;  %v1008_v49 = vadd.f32 %v1007_v11, %v838_v46  ;;  %v1128_v0 = vmul.f32 %v2125_v50, %v1013_v44  ;;  %v2126_v9 = vld [vmem:[%s2604_s3] ss:$0 sm:$0xff]  ;;  %v1089_v11 = vpop.f32.mrf.mxu3 }
 0x19d   : > { %2073 = vst [vmem:[%s2351_s10 + $0x70] sm:$0xff] %v1973_v47   ;;  %v1225_v51 = vadd.f32 %v2328_v13, %v1157_v48  ;;  %v1126_v61 = vmul.f32 %v2125_v50, %v1008_v49  ;;  %v1196_v62 = vadd.f32 %v2126_v9, %v1128_v0 }
 0x19f   : > { %v1289_v58 = vmax.f32 %v1225_v51, 0.0  ;;  %v1194_v2 = vadd.f32 %v2126_v9, %v1126_v61  ;;  %v1260_v4 = vmax.f32 %v1196_v62, 0.0 }
 0x1a0   : > { %v1014_v53 = vpop.f32.mrf.mxu1  ;;  %v918_v54 = vpop.f32.mrf.mxu2 }
 0x1a1   : > { %v1015_v60 = vadd.f32 %v1014_v53, %v2346_v34  ;;  %v2053_v15 = vpack.c.bf16 %v1289_v58, %v1288_v14  ;;  %v1088_v1 = vadd.f32 %v1087_v52, %v918_v54  ;;  %v1258_v8 = vmax.f32 %v1194_v2, 0.0 }
 0x1a2   : > { %v840_v63 = vpop.f32.mrf.mxu0 }
 0x1a3   : > { %v1129_v55 = vmul.f32 %v2125_v50, %v1015_v60  ;;  %v1010_v59 = vadd.f32 %v1009_v24, %v840_v63  ;;  %2089 = vst [vmem:[%s2351_s10 + $0xf0] sm:$0xff] %v2053_v15   ;;  %v1158_v7 = vmul.f32 %v2125_v50, %v1088_v1 }
 0x1a5   : > { %v1197_v13 = vadd.f32 %v2126_v9, %v1129_v55  ;;  %v1127_v3 = vmul.f32 %v2125_v50, %v1010_v59  ;;  %v1226_v33 = vadd.f32 %v2126_v9, %v1158_v7 }
 0x1a7   : > { %v1261_v34 = vmax.f32 %v1197_v13, 0.0  ;;  %v1195_v5 = vadd.f32 %v2126_v9, %v1127_v3  ;;  %v1290_v40 = vmax.f32 %v1226_v33, 0.0 }
 0x1a8   : > { %v920_v56 = vpop.f32.mrf.mxu2 }
 0x1a9   : > { %v1983_v6 = vpack.c.bf16 %v1261_v34, %v1260_v4  ;;  %v1259_v36 = vmax.f32 %v1195_v5, 0.0  ;;  %v1090_v17 = vadd.f32 %v1089_v11, %v920_v56 }
 0x1ab   : > { %2075 = vst [vmem:[%s2351_s10 + $0x80] sm:$0xff] %v1983_v6   ;;  %v1978_v18 = vpack.c.bf16 %v1259_v36, %v1258_v8  ;;  %v1159_v19 = vmul.f32 %v2125_v50, %v1090_v17 }
 0x1ad   : > { %2074 = vst [vmem:[%s2351_s10 + $0x78] sm:$0xff] %v1978_v18   ;;  %v1227_v20 = vadd.f32 %v2126_v9, %v1159_v19 }
 0x1af   : > { %v1291_v21 = vmax.f32 %v1227_v20, 0.0 }
 0x1b1   : > { %v2058_v22 = vpack.c.bf16 %v1291_v21, %v1290_v40 }
 0x1b3   : > { %2090 = vst [vmem:[%s2351_s10 + $0xf8] sm:$0xff] %v2058_v22  }
 0x1b4 PF: > { %s15_s15 = sadd.s32 1, %s2167_s15  }
 0x1b5   : > { %p12_p7 = scmp.ge.s32.totalorder %s15_s15, 6  }
 0x1b7   :  { %14 = sbr.rel (!%p12_p7) target bundleno = 1 (0x1), region = 71 }
 0x1bc   :  { %1442 = vsyncpa [#allocation3], 1 }
 0x1bd   :  { %1444 = vsyncpa [#allocation3 + $0x1], 1 }

// kernel: _lambda_.14
= control target key start
LH: loop header
LB: loop body
LE: loop exit
PB: predicated region body
PF: predicated region fallthrough
CT: control target
= control target key end

     0   :  { %s1686_s6 = smov 0   ;;  %s1892_s0 = inlined_call_operand.vmem [shape: bf16[2,34,17,256], index: 0, kind: input, shape index: {}]   ;;  %s1893_s1 = inlined_call_operand.vmem [shape: bf16[2,16,16,128], index: 1, kind: output, shape index: {}]  }
   0x1 LB: > { %s1553_s7 = sadd.s32 4294967295, %s1674_s6   ;;  %p1557_p0 = scmp.ge.s32.totalorder %s1674_s6, 1  ;;  %s1674_s6 = sphi %s1686_s6, %s11_s6  }
   0x2   : > { %p87_p1 = scmp.lt.s32.totalorder %s1674_s6, 3 }
   0x4   : > { %p88_p2 = pnand %p1557_p0, %p87_p1 }
   0x5   : > { %p107_p3 = scmp.lt.s32.totalorder (!%p88_p2), %s1553_s7, 1 }
   0x6   : > { %91 = sbr.rel (%p88_p2) target bundleno = 175 (0xaf), region = 24 }
   0xb   : > { %s1895_s7 = smov (!%p107_p3, %s1553_s7), 1  ;;  %vm876_vm0 = vcmask 1046528  }
   0xc   : > { %s1659_s8 = smul.u32 816, %s1895_s7  ;;  %s1563_s12 = sshll.u32 %s1895_s7, 7 }
   0xd   : > { %s1727_s15 = scalar_lea.vmem %s1893_s1, %s1563_s12 }
   0xe   : > { %s1700_s11 = scalar_lea.vmem %s1892_s0, %s1659_s8 }
   0xf   : > { %v117_v0 = vld [vmem:[%s1700_s11] sm:$0xff]  ;;  %v118_v1 = vld [vmem:[%s1700_s11 + $0x8] sm:$0xff]  ;;  %v119_v2 = vld [vmem:[%s1700_s11 + $0x10] sm:$0x1] }
  0x10   : > { %v120_v3 = vld [vmem:[%s1700_s11 + $0x18] sm:$0xff]  ;;  %v121_v4 = vld [vmem:[%s1700_s11 + $0x20] sm:$0xff]  ;;  %v216_v5 = vunpack.c.l.bf16 %v117_v0  ;;  %v217_v6 = vunpack.c.l.bf16 %v118_v1  ;;  %v348_v7 = vrot.slane %v117_v0, 4  ;;  %v349_v8 = vrot.slane %v118_v1, 4  ;;  %v122_v9 = vld [vmem:[%s1700_s11 + $0x28] sm:$0x1] }
  0x11   : > { %v123_v10 = vld [vmem:[%s1700_s11 + $0x30] sm:$0xff]  ;;  %v124_v11 = vld [vmem:[%s1700_s11 + $0x38] sm:$0xff]  ;;  %v218_v12 = vunpack.c.l.bf16 %v120_v3  ;;  %v219_v13 = vunpack.c.l.bf16 %v121_v4  ;;  %v350_v14 = vrot.slane %v120_v3, 4  ;;  %v351_v15 = vrot.slane %v121_v4, 4  ;;  %v125_v20 = vld [vmem:[%s1700_s11 + $0x40] sm:$0x1] }
  0x12   : > { %v220_v16 = vunpack.c.l.bf16 %v123_v10  ;;  %v221_v17 = vunpack.c.l.bf16 %v124_v11  ;;  %v352_v18 = vrot.slane %v123_v10, 4  ;;  %v353_v19 = vrot.slane %v124_v11, 4  ;;  %v126_v37 = vld [vmem:[%s1700_s11 + $0x48] sm:$0xff]  ;;  %v127_v49 = vld [vmem:[%s1700_s11 + $0x50] sm:$0xff]  ;;  %v129_v50 = vld [vmem:[%s1700_s11 + $0x60] sm:$0xff] }
  0x13   : > { %v480_v21 = vunpack.c.l.bf16 %v348_v7  ;;  %v481_v22 = vunpack.c.l.bf16 %v349_v8  ;;  %v482_v23 = vunpack.c.l.bf16 %v350_v14  ;;  %v483_v24 = vunpack.c.l.bf16 %v351_v15  ;;  %v130_v51 = vld [vmem:[%s1700_s11 + $0x68] sm:$0xff]  ;;  %v128_v61 = vld [vmem:[%s1700_s11 + $0x58] sm:$0x1]  ;;  %v131_v62 = vld [vmem:[%s1700_s11 + $0x70] sm:$0x1] }
  0x14   : > { %v484_v25 = vunpack.c.l.bf16 %v352_v18  ;;  %v485_v26 = vunpack.c.l.bf16 %v353_v19  ;;  %v744_v27 = vunpack.c.l.bf16 %v119_v2  ;;  %v745_v28 = vunpack.c.l.bf16 %v122_v9 }
  0x15   : > { %v546_v29 = vmax.f32 %v216_v5, %v480_v21  ;;  %v547_v30 = vmax.f32 %v217_v6, %v481_v22  ;;  %v548_v31 = vmax.f32 %v218_v12, %v482_v23  ;;  %v549_v32 = vmax.f32 %v219_v13, %v483_v24  ;;  %v132_v23 = vld [vmem:[%s1700_s11 + $0x78] sm:$0xff]  ;;  %v133_v24 = vld [vmem:[%s1700_s11 + $0x80] sm:$0xff] }
  0x16   : > { %v550_v33 = vmax.f32 %v220_v16, %v484_v25  ;;  %v551_v34 = vmax.f32 %v221_v17, %v485_v26  ;;  %v746_v35 = vunpack.c.l.bf16 %v125_v20  ;;  %v877_v36 = vrot.slane %v216_v5, 1  ;;  %v135_v25 = vld [vmem:[%s1700_s11 + $0x90] sm:$0xff] }
  0x17   : > { %v878_v38 = vrot.slane %v217_v6, 1  ;;  %v880_v39 = vrot.slane %v744_v27, 1  ;;  %v882_v40 = vrot.slane %v218_v12, 1  ;;  %v883_v41 = vrot.slane %v219_v13, 1 }
  0x18   : > { %v885_v42 = vrot.slane %v745_v28, 1  ;;  %v887_v43 = vrot.slane %v220_v16, 1  ;;  %v888_v44 = vrot.slane %v221_v17, 1  ;;  %v890_v45 = vrot.slane %v746_v35, 1 }
  0x19   : > { %v879_v46 = vsel %vm876_vm0, %v877_v36, %v878_v38  ;;  %v881_v47 = vsel %vm876_vm0, %v878_v38, %v880_v39  ;;  %v884_v48 = vsel %vm876_vm0, %v882_v40, %v883_v41  ;;  %v222_v52 = vunpack.c.l.bf16 %v126_v37  ;;  %v134_v36 = vld [vmem:[%s1700_s11 + $0x88] sm:$0x1] }
  0x1a   : > { %v886_v53 = vsel %vm876_vm0, %v883_v41, %v885_v42  ;;  %v889_v54 = vsel %vm876_vm0, %v887_v43, %v888_v44  ;;  %v891_v55 = vsel %vm876_vm0, %v888_v44, %v890_v45  ;;  %v1108_v56 = vmax.f32 %v546_v29, %v879_v46  ;;  %v137_v43 = vld [vmem:[%s1700_s11 + $0xa0] sm:$0x1] }
  0x1b   : > { %v1109_v57 = vmax.f32 %v547_v30, %v881_v47  ;;  %v1110_v58 = vmax.f32 %v548_v31, %v884_v48  ;;  %v1111_v59 = vmax.f32 %v549_v32, %v886_v53  ;;  %v1112_v60 = vmax.f32 %v550_v33, %v889_v54  ;;  %v136_v30 = vld [vmem:[%s1700_s11 + $0x98] sm:$0xff] }
  0x1c   : > { %v1113_v63 = vmax.f32 %v551_v34, %v891_v55  ;;  %v223_v0 = vunpack.c.l.bf16 %v127_v49  ;;  %v224_v1 = vunpack.c.l.bf16 %v129_v50  ;;  %v225_v2 = vunpack.c.l.bf16 %v130_v51 }
  0x1d   : > { %v1304_v3 = vmax.f32 %v1108_v56, %v1110_v58  ;;  %v1305_v4 = vmax.f32 %v1109_v57, %v1111_v59  ;;  %v354_v5 = vrot.slane %v126_v37, 4  ;;  %v355_v6 = vrot.slane %v127_v49, 4 }
  0x1e   : > { %v356_v7 = vrot.slane %v129_v50, 4  ;;  %v357_v8 = vrot.slane %v130_v51, 4  ;;  %v747_v9 = vunpack.c.l.bf16 %v128_v61  ;;  %v748_v10 = vunpack.c.l.bf16 %v131_v62 }
  0x1f   : > { %v1402_v11 = vmax.f32 %v1304_v3, %v1112_v60  ;;  %v1403_v12 = vmax.f32 %v1305_v4, %v1113_v63  ;;  %v486_v13 = vunpack.c.l.bf16 %v354_v5  ;;  %v487_v14 = vunpack.c.l.bf16 %v355_v6 }
  0x20   : > { %v488_v15 = vunpack.c.l.bf16 %v356_v7  ;;  %v489_v16 = vunpack.c.l.bf16 %v357_v8  ;;  %v892_v17 = vrot.slane %v222_v52, 1  ;;  %v893_v18 = vrot.slane %v223_v0, 1  ;;  %v141_v7 = vld [vmem:[%s1700_s11 + $0xc0] sm:$0xff]  ;;  %v142_v8 = vld [vmem:[%s1700_s11 + $0xc8] sm:$0xff] }
  0x21   : > { %v1567_v19 = vpack.c.bf16 %v1403_v12, %v1402_v11  ;;  %v552_v20 = vmax.f32 %v222_v52, %v486_v13  ;;  %v553_v21 = vmax.f32 %v223_v0, %v487_v14  ;;  %v895_v22 = vrot.slane %v747_v9, 1 }
  0x22   : > { %v554_v26 = vmax.f32 %v224_v1, %v488_v15  ;;  %v555_v27 = vmax.f32 %v225_v2, %v489_v16  ;;  %v894_v28 = vsel %vm876_vm0, %v892_v17, %v893_v18  ;;  %v897_v29 = vrot.slane %v224_v1, 1  ;;  %v138_v1 = vld [vmem:[%s1700_s11 + $0xa8] sm:$0xff] }
  0x23   : > { %1568 = vst [vmem:[%s1727_s15] sm:$0xff] %v1567_v19   ;;  %v896_v31 = vsel %vm876_vm0, %v893_v18, %v895_v22  ;;  %v898_v32 = vrot.slane %v225_v2, 1  ;;  %v900_v33 = vrot.slane %v748_v10, 1  ;;  %v1114_v34 = vmax.f32 %v552_v20, %v894_v28  ;;  %v139_v2 = vld [vmem:[%s1700_s11 + $0xb0] sm:$0xff]  ;;  %v140_v19 = vld [vmem:[%s1700_s11 + $0xb8] sm:$0x1] }
  0x24   : > { %v1115_v35 = vmax.f32 %v553_v21, %v896_v31  ;;  %v226_v37 = vunpack.c.l.bf16 %v132_v23  ;;  %v227_v38 = vunpack.c.l.bf16 %v133_v24  ;;  %v228_v39 = vunpack.c.l.bf16 %v135_v25  ;;  %v143_v20 = vld [vmem:[%s1700_s11 + $0xd0] sm:$0x1] }
  0x25   : > { %v899_v40 = vsel %vm876_vm0, %v897_v29, %v898_v32  ;;  %v901_v41 = vsel %vm876_vm0, %v898_v32, %v900_v33  ;;  %v1306_v42 = vmax.f32 %v1112_v60, %v1114_v34  ;;  %v229_v44 = vunpack.c.l.bf16 %v136_v30 }
  0x26   : > { %v1116_v45 = vmax.f32 %v554_v26, %v899_v40  ;;  %v1117_v46 = vmax.f32 %v555_v27, %v901_v41  ;;  %v1307_v47 = vmax.f32 %v1113_v63, %v1115_v35  ;;  %v358_v48 = vrot.slane %v132_v23, 4 }
  0x27   : > { %v359_v49 = vrot.slane %v133_v24, 4  ;;  %v360_v50 = vrot.slane %v135_v25, 4  ;;  %v361_v51 = vrot.slane %v136_v30, 4  ;;  %v749_v52 = vunpack.c.l.bf16 %v134_v36 }
  0x28   : > { %v1404_v53 = vmax.f32 %v1306_v42, %v1116_v45  ;;  %v1405_v54 = vmax.f32 %v1307_v47, %v1117_v46  ;;  %v490_v55 = vunpack.c.l.bf16 %v358_v48  ;;  %v750_v56 = vunpack.c.l.bf16 %v137_v43  ;;  %v144_v43 = vld [vmem:[%s1700_s11 + $0xd8] sm:$0xff]  ;;  %v145_v48 = vld [vmem:[%s1700_s11 + $0xe0] sm:$0xff] }
  0x29   : > { %v491_v57 = vunpack.c.l.bf16 %v359_v49  ;;  %v492_v58 = vunpack.c.l.bf16 %v360_v50  ;;  %v493_v59 = vunpack.c.l.bf16 %v361_v51  ;;  %v902_v60 = vrot.slane %v226_v37, 1  ;;  %v147_v49 = vld [vmem:[%s1700_s11 + $0xf0] sm:$0xff]  ;;  %v148_v50 = vld [vmem:[%s1700_s11 + $0xf8] sm:$0xff] }
  0x2a   : > { %v1572_v61 = vpack.c.bf16 %v1405_v54, %v1404_v53  ;;  %v556_v62 = vmax.f32 %v226_v37, %v490_v55  ;;  %v903_v63 = vrot.slane %v227_v38, 1  ;;  %v905_v0 = vrot.slane %v749_v52, 1 }
  0x2b   : > { %v557_v3 = vmax.f32 %v227_v38, %v491_v57  ;;  %v558_v4 = vmax.f32 %v228_v39, %v492_v58  ;;  %v559_v5 = vmax.f32 %v229_v44, %v493_v59  ;;  %v907_v6 = vrot.slane %v228_v39, 1 }
  0x2c   : > { %1644 = vst [vmem:[%s1727_s15 + $0x8] sm:$0xff] %v1572_v61   ;;  %v904_v9 = vsel %vm876_vm0, %v902_v60, %v903_v63  ;;  %v906_v10 = vsel %vm876_vm0, %v903_v63, %v905_v0  ;;  %v908_v11 = vrot.slane %v229_v44, 1  ;;  %v910_v12 = vrot.slane %v750_v56, 1  ;;  %v146_v60 = vld [vmem:[%s1700_s11 + $0xe8] sm:$0x1] }
  0x2d   : > { %v1118_v13 = vmax.f32 %v556_v62, %v904_v9  ;;  %v1119_v14 = vmax.f32 %v557_v3, %v906_v10  ;;  %v230_v15 = vunpack.c.l.bf16 %v138_v1  ;;  %v231_v16 = vunpack.c.l.bf16 %v139_v2  ;;  %v149_v61 = vld [vmem:[%s1700_s11 + $0x100] sm:$0x1] }
  0x2e   : > { %v909_v17 = vsel %vm876_vm0, %v907_v6, %v908_v11  ;;  %v911_v18 = vsel %vm876_vm0, %v908_v11, %v910_v12  ;;  %v232_v21 = vunpack.c.l.bf16 %v141_v7  ;;  %v233_v22 = vunpack.c.l.bf16 %v142_v8 }
  0x2f   : > { %v1120_v23 = vmax.f32 %v558_v4, %v909_v17  ;;  %v1121_v24 = vmax.f32 %v559_v5, %v911_v18  ;;  %v1308_v25 = vmax.f32 %v1116_v45, %v1118_v13  ;;  %v1309_v26 = vmax.f32 %v1117_v46, %v1119_v14 }
  0x30   : > { %v362_v27 = vrot.slane %v138_v1, 4  ;;  %v363_v28 = vrot.slane %v139_v2, 4  ;;  %v364_v29 = vrot.slane %v141_v7, 4  ;;  %v365_v30 = vrot.slane %v142_v8, 4 }
  0x31   : > { %v1406_v31 = vmax.f32 %v1308_v25, %v1120_v23  ;;  %v1407_v32 = vmax.f32 %v1309_v26, %v1121_v24  ;;  %v751_v33 = vunpack.c.l.bf16 %v140_v19  ;;  %v752_v34 = vunpack.c.l.bf16 %v143_v20  ;;  %v151_v26 = vld [vmem:[%s1700_s11 + $0x110] sm:$0xff] }
  0x32   : > { %v494_v35 = vunpack.c.l.bf16 %v362_v27  ;;  %v495_v36 = vunpack.c.l.bf16 %v363_v28  ;;  %v496_v37 = vunpack.c.l.bf16 %v364_v29  ;;  %v497_v38 = vunpack.c.l.bf16 %v365_v30  ;;  %v153_v27 = vld [vmem:[%s1700_s11 + $0x120] sm:$0xff]  ;;  %v154_v28 = vld [vmem:[%s1700_s11 + $0x128] sm:$0xff] }
  0x33   : > { %v1577_v39 = vpack.c.bf16 %v1407_v32, %v1406_v31  ;;  %v912_v40 = vrot.slane %v230_v15, 1  ;;  %v913_v41 = vrot.slane %v231_v16, 1  ;;  %v915_v42 = vrot.slane %v751_v33, 1 }
  0x34   : > { %v560_v44 = vmax.f32 %v230_v15, %v494_v35  ;;  %v561_v45 = vmax.f32 %v231_v16, %v495_v36  ;;  %v562_v46 = vmax.f32 %v232_v21, %v496_v37  ;;  %v563_v47 = vmax.f32 %v233_v22, %v497_v38  ;;  %v152_v37 = vld [vmem:[%s1700_s11 + $0x118] sm:$0x1]  ;;  %v155_v38 = vld [vmem:[%s1700_s11 + $0x130] sm:$0x1] }
  0x35   : > { %1645 = vst [vmem:[%s1727_s15 + $0x10] sm:$0xff] %v1577_v39   ;;  %v914_v51 = vsel %vm876_vm0, %v912_v40, %v913_v41  ;;  %v916_v52 = vsel %vm876_vm0, %v913_v41, %v915_v42  ;;  %v917_v53 = vrot.slane %v232_v21, 1  ;;  %v918_v54 = vrot.slane %v233_v22, 1  ;;  %v150_v21 = vld [vmem:[%s1700_s11 + $0x108] sm:$0xff] }
  0x36   : > { %v920_v55 = vrot.slane %v752_v34, 1  ;;  %v1122_v56 = vmax.f32 %v560_v44, %v914_v51  ;;  %v1123_v57 = vmax.f32 %v561_v45, %v916_v52  ;;  %v234_v58 = vunpack.c.l.bf16 %v144_v43 }
  0x37   : > { %v919_v59 = vsel %vm876_vm0, %v917_v53, %v918_v54  ;;  %v235_v62 = vunpack.c.l.bf16 %v145_v48  ;;  %v236_v63 = vunpack.c.l.bf16 %v147_v49  ;;  %v237_v0 = vunpack.c.l.bf16 %v148_v50 }
  0x38   : > { %v921_v1 = vsel %vm876_vm0, %v918_v54, %v920_v55  ;;  %v1124_v2 = vmax.f32 %v562_v46, %v919_v59  ;;  %v1310_v3 = vmax.f32 %v1120_v23, %v1122_v56  ;;  %v1311_v4 = vmax.f32 %v1121_v24, %v1123_v57 }
  0x39   : > { %v1125_v5 = vmax.f32 %v563_v47, %v921_v1  ;;  %v366_v6 = vrot.slane %v144_v43, 4  ;;  %v367_v7 = vrot.slane %v145_v48, 4  ;;  %v368_v8 = vrot.slane %v147_v49, 4 }
  0x3a   : > { %v1408_v9 = vmax.f32 %v1310_v3, %v1124_v2  ;;  %v369_v10 = vrot.slane %v148_v50, 4  ;;  %v753_v11 = vunpack.c.l.bf16 %v146_v60  ;;  %v754_v12 = vunpack.c.l.bf16 %v149_v61  ;;  %v156_v3 = vld [vmem:[%s1700_s11 + $0x138] sm:$0xff] }
  0x3b   : > { %v1409_v13 = vmax.f32 %v1311_v4, %v1125_v5  ;;  %v498_v14 = vunpack.c.l.bf16 %v366_v6  ;;  %v499_v15 = vunpack.c.l.bf16 %v367_v7  ;;  %v500_v16 = vunpack.c.l.bf16 %v368_v8  ;;  %v157_v4 = vld [vmem:[%s1700_s11 + $0x140] sm:$0xff] }
  0x3c   : > { %v501_v17 = vunpack.c.l.bf16 %v369_v10  ;;  %v922_v18 = vrot.slane %v234_v58, 1  ;;  %v923_v19 = vrot.slane %v235_v62, 1  ;;  %v925_v20 = vrot.slane %v753_v11, 1  ;;  %v160_v10 = vld [vmem:[%s1700_s11 + $0x158] sm:$0xff] }
  0x3d   : > { %v1582_v22 = vpack.c.bf16 %v1409_v13, %v1408_v9  ;;  %v564_v23 = vmax.f32 %v234_v58, %v498_v14  ;;  %v565_v24 = vmax.f32 %v235_v62, %v499_v15  ;;  %v566_v25 = vmax.f32 %v236_v63, %v500_v16  ;;  %v158_v16 = vld [vmem:[%s1700_s11 + $0x148] sm:$0x1] }
  0x3e   : > { %v567_v29 = vmax.f32 %v237_v0, %v501_v17  ;;  %v924_v30 = vsel %vm876_vm0, %v922_v18, %v923_v19  ;;  %v926_v31 = vsel %vm876_vm0, %v923_v19, %v925_v20  ;;  %v927_v32 = vrot.slane %v236_v63, 1 }
  0x3f   : > { %1646 = vst [vmem:[%s1727_s15 + $0x18] sm:$0xff] %v1582_v22   ;;  %v928_v33 = vrot.slane %v237_v0, 1  ;;  %v930_v34 = vrot.slane %v754_v12, 1  ;;  %v1126_v35 = vmax.f32 %v564_v23, %v924_v30  ;;  %v1127_v36 = vmax.f32 %v565_v24, %v926_v31  ;;  %v161_v23 = vld [vmem:[%s1700_s11 + $0x160] sm:$0x1] }
  0x40   : > { %v238_v39 = vunpack.c.l.bf16 %v150_v21  ;;  %v239_v40 = vunpack.c.l.bf16 %v151_v26  ;;  %v240_v41 = vunpack.c.l.bf16 %v153_v27  ;;  %v241_v42 = vunpack.c.l.bf16 %v154_v28 }
  0x41   : > { %v929_v43 = vsel %vm876_vm0, %v927_v32, %v928_v33  ;;  %v931_v44 = vsel %vm876_vm0, %v928_v33, %v930_v34  ;;  %v1312_v45 = vmax.f32 %v1124_v2, %v1126_v35  ;;  %v1313_v46 = vmax.f32 %v1125_v5, %v1127_v36  ;;  %v159_v5 = vld [vmem:[%s1700_s11 + $0x150] sm:$0xff] }
  0x42   : > { %v1128_v47 = vmax.f32 %v566_v25, %v929_v43  ;;  %v1129_v48 = vmax.f32 %v567_v29, %v931_v44  ;;  %v370_v49 = vrot.slane %v150_v21, 4  ;;  %v371_v50 = vrot.slane %v151_v26, 4 }
  0x43   : > { %v372_v51 = vrot.slane %v153_v27, 4  ;;  %v373_v52 = vrot.slane %v154_v28, 4  ;;  %v755_v53 = vunpack.c.l.bf16 %v152_v37  ;;  %v756_v54 = vunpack.c.l.bf16 %v155_v38 }
  0x44   : > { %v1410_v55 = vmax.f32 %v1312_v45, %v1128_v47  ;;  %v1411_v56 = vmax.f32 %v1313_v46, %v1129_v48  ;;  %v502_v57 = vunpack.c.l.bf16 %v370_v49  ;;  %v503_v58 = vunpack.c.l.bf16 %v371_v50  ;;  %v162_v45 = vld [vmem:[%s1700_s11 + $0x168] sm:$0xff]  ;;  %v163_v46 = vld [vmem:[%s1700_s11 + $0x170] sm:$0xff] }
  0x45   : > { %v504_v59 = vunpack.c.l.bf16 %v372_v51  ;;  %v505_v60 = vunpack.c.l.bf16 %v373_v52  ;;  %v932_v61 = vrot.slane %v238_v39, 1  ;;  %v933_v62 = vrot.slane %v239_v40, 1  ;;  %v165_v51 = vld [vmem:[%s1700_s11 + $0x180] sm:$0xff]  ;;  %v166_v52 = vld [vmem:[%s1700_s11 + $0x188] sm:$0xff] }
  0x46   : > { %v1587_v63 = vpack.c.bf16 %v1411_v56, %v1410_v55  ;;  %v568_v0 = vmax.f32 %v238_v39, %v502_v57  ;;  %v569_v1 = vmax.f32 %v239_v40, %v503_v58  ;;  %v935_v2 = vrot.slane %v755_v53, 1 }
  0x47   : > { %v570_v6 = vmax.f32 %v240_v41, %v504_v59  ;;  %v571_v7 = vmax.f32 %v241_v42, %v505_v60  ;;  %v934_v8 = vsel %vm876_vm0, %v932_v61, %v933_v62  ;;  %v937_v9 = vrot.slane %v240_v41, 1 }
  0x48   : > { %1647 = vst [vmem:[%s1727_s15 + $0x20] sm:$0xff] %v1587_v63   ;;  %v936_v11 = vsel %vm876_vm0, %v933_v62, %v935_v2  ;;  %v938_v12 = vrot.slane %v241_v42, 1  ;;  %v940_v13 = vrot.slane %v756_v54, 1  ;;  %v1130_v14 = vmax.f32 %v568_v0, %v934_v8  ;;  %v164_v63 = vld [vmem:[%s1700_s11 + $0x178] sm:$0x1] }
  0x49   : > { %v1131_v15 = vmax.f32 %v569_v1, %v936_v11  ;;  %v242_v17 = vunpack.c.l.bf16 %v156_v3  ;;  %v243_v18 = vunpack.c.l.bf16 %v157_v4  ;;  %v244_v19 = vunpack.c.l.bf16 %v159_v5  ;;  %v167_v0 = vld [vmem:[%s1700_s11 + $0x190] sm:$0x1] }
  0x4a   : > { %v939_v20 = vsel %vm876_vm0, %v937_v9, %v938_v12  ;;  %v941_v21 = vsel %vm876_vm0, %v938_v12, %v940_v13  ;;  %v1314_v22 = vmax.f32 %v1128_v47, %v1130_v14  ;;  %v245_v24 = vunpack.c.l.bf16 %v160_v10 }
  0x4b   : > { %v1132_v25 = vmax.f32 %v570_v6, %v939_v20  ;;  %v1133_v26 = vmax.f32 %v571_v7, %v941_v21  ;;  %v1315_v27 = vmax.f32 %v1129_v48, %v1131_v15  ;;  %v374_v28 = vrot.slane %v156_v3, 4 }
  0x4c   : > { %v375_v29 = vrot.slane %v157_v4, 4  ;;  %v376_v30 = vrot.slane %v159_v5, 4  ;;  %v377_v31 = vrot.slane %v160_v10, 4  ;;  %v757_v32 = vunpack.c.l.bf16 %v158_v16 }
  0x4d   : > { %v1412_v33 = vmax.f32 %v1314_v22, %v1132_v25  ;;  %v1413_v34 = vmax.f32 %v1315_v27, %v1133_v26  ;;  %v506_v35 = vunpack.c.l.bf16 %v374_v28  ;;  %v758_v36 = vunpack.c.l.bf16 %v161_v23  ;;  %v168_v23 = vld [vmem:[%s1700_s11 + $0x198] sm:$0xff]  ;;  %v169_v28 = vld [vmem:[%s1700_s11 + $0x1a0] sm:$0xff] }
  0x4e   : > { %v507_v37 = vunpack.c.l.bf16 %v375_v29  ;;  %v508_v38 = vunpack.c.l.bf16 %v376_v30  ;;  %v509_v39 = vunpack.c.l.bf16 %v377_v31  ;;  %v942_v40 = vrot.slane %v242_v17, 1  ;;  %v171_v29 = vld [vmem:[%s1700_s11 + $0x1b0] sm:$0xff]  ;;  %v172_v30 = vld [vmem:[%s1700_s11 + $0x1b8] sm:$0xff] }
  0x4f   : > { %v1592_v41 = vpack.c.bf16 %v1413_v34, %v1412_v33  ;;  %v572_v42 = vmax.f32 %v242_v17, %v506_v35  ;;  %v943_v43 = vrot.slane %v243_v18, 1  ;;  %v945_v44 = vrot.slane %v757_v32, 1 }
  0x50   : > { %v573_v47 = vmax.f32 %v243_v18, %v507_v37  ;;  %v574_v48 = vmax.f32 %v244_v19, %v508_v38  ;;  %v575_v49 = vmax.f32 %v245_v24, %v509_v39  ;;  %v947_v50 = vrot.slane %v244_v19, 1 }
  0x51   : > { %1648 = vst [vmem:[%s1727_s15 + $0x28] sm:$0xff] %v1592_v41   ;;  %v944_v53 = vsel %vm876_vm0, %v942_v40, %v943_v43  ;;  %v946_v54 = vsel %vm876_vm0, %v943_v43, %v945_v44  ;;  %v948_v55 = vrot.slane %v245_v24, 1  ;;  %v950_v56 = vrot.slane %v758_v36, 1  ;;  %v170_v40 = vld [vmem:[%s1700_s11 + $0x1a8] sm:$0x1] }
  0x52   : > { %v1134_v57 = vmax.f32 %v572_v42, %v944_v53  ;;  %v1135_v58 = vmax.f32 %v573_v47, %v946_v54  ;;  %v246_v59 = vunpack.c.l.bf16 %v162_v45  ;;  %v247_v60 = vunpack.c.l.bf16 %v163_v46  ;;  %v173_v41 = vld [vmem:[%s1700_s11 + $0x1c0] sm:$0x1] }
  0x53   : > { %v949_v61 = vsel %vm876_vm0, %v947_v50, %v948_v55  ;;  %v951_v62 = vsel %vm876_vm0, %v948_v55, %v950_v56  ;;  %v248_v1 = vunpack.c.l.bf16 %v165_v51  ;;  %v249_v2 = vunpack.c.l.bf16 %v166_v52 }
  0x54   : > { %v1136_v3 = vmax.f32 %v574_v48, %v949_v61  ;;  %v1137_v4 = vmax.f32 %v575_v49, %v951_v62  ;;  %v1316_v5 = vmax.f32 %v1132_v25, %v1134_v57  ;;  %v1317_v6 = vmax.f32 %v1133_v26, %v1135_v58 }
  0x55   : > { %v378_v7 = vrot.slane %v162_v45, 4  ;;  %v379_v8 = vrot.slane %v163_v46, 4  ;;  %v380_v9 = vrot.slane %v165_v51, 4  ;;  %v381_v10 = vrot.slane %v166_v52, 4 }
  0x56   : > { %v1414_v11 = vmax.f32 %v1316_v5, %v1136_v3  ;;  %v1415_v12 = vmax.f32 %v1317_v6, %v1137_v4  ;;  %v759_v13 = vunpack.c.l.bf16 %v164_v63  ;;  %v760_v14 = vunpack.c.l.bf16 %v167_v0  ;;  %v175_v6 = vld [vmem:[%s1700_s11 + $0x1d0] sm:$0xff] }
  0x57   : > { %v510_v15 = vunpack.c.l.bf16 %v378_v7  ;;  %v511_v16 = vunpack.c.l.bf16 %v379_v8  ;;  %v512_v17 = vunpack.c.l.bf16 %v380_v9  ;;  %v513_v18 = vunpack.c.l.bf16 %v381_v10  ;;  %v177_v7 = vld [vmem:[%s1700_s11 + $0x1e0] sm:$0xff]  ;;  %v178_v8 = vld [vmem:[%s1700_s11 + $0x1e8] sm:$0xff] }
  0x58   : > { %v1597_v19 = vpack.c.bf16 %v1415_v12, %v1414_v11  ;;  %v952_v20 = vrot.slane %v246_v59, 1  ;;  %v953_v21 = vrot.slane %v247_v60, 1  ;;  %v955_v22 = vrot.slane %v759_v13, 1 }
  0x59   : > { %v576_v24 = vmax.f32 %v246_v59, %v510_v15  ;;  %v577_v25 = vmax.f32 %v247_v60, %v511_v16  ;;  %v578_v26 = vmax.f32 %v248_v1, %v512_v17  ;;  %v579_v27 = vmax.f32 %v249_v2, %v513_v18  ;;  %v176_v17 = vld [vmem:[%s1700_s11 + $0x1d8] sm:$0x1]  ;;  %v179_v18 = vld [vmem:[%s1700_s11 + $0x1f0] sm:$0x1] }
  0x5a   : > { %1649 = vst [vmem:[%s1727_s15 + $0x30] sm:$0xff] %v1597_v19   ;;  %v954_v31 = vsel %vm876_vm0, %v952_v20, %v953_v21  ;;  %v956_v32 = vsel %vm876_vm0, %v953_v21, %v955_v22  ;;  %v957_v33 = vrot.slane %v248_v1, 1  ;;  %v958_v34 = vrot.slane %v249_v2, 1  ;;  %v174_v1 = vld [vmem:[%s1700_s11 + $0x1c8] sm:$0xff] }
  0x5b   : > { %v960_v35 = vrot.slane %v760_v14, 1  ;;  %v1138_v36 = vmax.f32 %v576_v24, %v954_v31  ;;  %v1139_v37 = vmax.f32 %v577_v25, %v956_v32  ;;  %v250_v38 = vunpack.c.l.bf16 %v168_v23 }
  0x5c   : > { %v959_v39 = vsel %vm876_vm0, %v957_v33, %v958_v34  ;;  %v251_v42 = vunpack.c.l.bf16 %v169_v28  ;;  %v252_v43 = vunpack.c.l.bf16 %v171_v29  ;;  %v253_v44 = vunpack.c.l.bf16 %v172_v30 }
  0x5d   : > { %v961_v45 = vsel %vm876_vm0, %v958_v34, %v960_v35  ;;  %v1140_v46 = vmax.f32 %v578_v26, %v959_v39  ;;  %v1318_v47 = vmax.f32 %v1136_v3, %v1138_v36  ;;  %v1319_v48 = vmax.f32 %v1137_v4, %v1139_v37 }
  0x5e   : > { %v1141_v49 = vmax.f32 %v579_v27, %v961_v45  ;;  %v382_v50 = vrot.slane %v168_v23, 4  ;;  %v383_v51 = vrot.slane %v169_v28, 4  ;;  %v384_v52 = vrot.slane %v171_v29, 4 }
  0x5f   : > { %v1416_v53 = vmax.f32 %v1318_v47, %v1140_v46  ;;  %v385_v54 = vrot.slane %v172_v30, 4  ;;  %v761_v55 = vunpack.c.l.bf16 %v170_v40  ;;  %v762_v56 = vunpack.c.l.bf16 %v173_v41  ;;  %v180_v47 = vld [vmem:[%s1700_s11 + $0x1f8] sm:$0xff] }
  0x60   : > { %v1417_v57 = vmax.f32 %v1319_v48, %v1141_v49  ;;  %v514_v58 = vunpack.c.l.bf16 %v382_v50  ;;  %v515_v59 = vunpack.c.l.bf16 %v383_v51  ;;  %v516_v60 = vunpack.c.l.bf16 %v384_v52  ;;  %v181_v48 = vld [vmem:[%s1700_s11 + $0x200] sm:$0xff] }
  0x61   : > { %v517_v61 = vunpack.c.l.bf16 %v385_v54  ;;  %v962_v62 = vrot.slane %v250_v38, 1  ;;  %v963_v63 = vrot.slane %v251_v42, 1  ;;  %v965_v0 = vrot.slane %v761_v55, 1  ;;  %v184_v54 = vld [vmem:[%s1700_s11 + $0x218] sm:$0xff] }
  0x62   : > { %v1602_v2 = vpack.c.bf16 %v1417_v57, %v1416_v53  ;;  %v580_v3 = vmax.f32 %v250_v38, %v514_v58  ;;  %v581_v4 = vmax.f32 %v251_v42, %v515_v59  ;;  %v582_v5 = vmax.f32 %v252_v43, %v516_v60  ;;  %v182_v60 = vld [vmem:[%s1700_s11 + $0x208] sm:$0x1] }
  0x63   : > { %v583_v9 = vmax.f32 %v253_v44, %v517_v61  ;;  %v964_v10 = vsel %vm876_vm0, %v962_v62, %v963_v63  ;;  %v966_v11 = vsel %vm876_vm0, %v963_v63, %v965_v0  ;;  %v967_v12 = vrot.slane %v252_v43, 1 }
  0x64   : > { %1650 = vst [vmem:[%s1727_s15 + $0x38] sm:$0xff] %v1602_v2   ;;  %v968_v13 = vrot.slane %v253_v44, 1  ;;  %v970_v14 = vrot.slane %v762_v56, 1  ;;  %v1142_v15 = vmax.f32 %v580_v3, %v964_v10  ;;  %v1143_v16 = vmax.f32 %v581_v4, %v966_v11  ;;  %v185_v3 = vld [vmem:[%s1700_s11 + $0x220] sm:$0x1] }
  0x65   : > { %v254_v19 = vunpack.c.l.bf16 %v174_v1  ;;  %v255_v20 = vunpack.c.l.bf16 %v175_v6  ;;  %v256_v21 = vunpack.c.l.bf16 %v177_v7  ;;  %v257_v22 = vunpack.c.l.bf16 %v178_v8 }
  0x66   : > { %v969_v23 = vsel %vm876_vm0, %v967_v12, %v968_v13  ;;  %v971_v24 = vsel %vm876_vm0, %v968_v13, %v970_v14  ;;  %v1320_v25 = vmax.f32 %v1140_v46, %v1142_v15  ;;  %v1321_v26 = vmax.f32 %v1141_v49, %v1143_v16  ;;  %v183_v49 = vld [vmem:[%s1700_s11 + $0x210] sm:$0xff] }
  0x67   : > { %v1144_v27 = vmax.f32 %v582_v5, %v969_v23  ;;  %v1145_v28 = vmax.f32 %v583_v9, %v971_v24  ;;  %v386_v29 = vrot.slane %v174_v1, 4  ;;  %v387_v30 = vrot.slane %v175_v6, 4 }
  0x68   : > { %v388_v31 = vrot.slane %v177_v7, 4  ;;  %v389_v32 = vrot.slane %v178_v8, 4  ;;  %v763_v33 = vunpack.c.l.bf16 %v176_v17  ;;  %v764_v34 = vunpack.c.l.bf16 %v179_v18 }
  0x69   : > { %v1418_v35 = vmax.f32 %v1320_v25, %v1144_v27  ;;  %v1419_v36 = vmax.f32 %v1321_v26, %v1145_v28  ;;  %v518_v37 = vunpack.c.l.bf16 %v386_v29  ;;  %v519_v38 = vunpack.c.l.bf16 %v387_v30  ;;  %v186_v25 = vld [vmem:[%s1700_s11 + $0x228] sm:$0xff]  ;;  %v187_v26 = vld [vmem:[%s1700_s11 + $0x230] sm:$0xff] }
  0x6a   : > { %v520_v39 = vunpack.c.l.bf16 %v388_v31  ;;  %v521_v40 = vunpack.c.l.bf16 %v389_v32  ;;  %v972_v41 = vrot.slane %v254_v19, 1  ;;  %v973_v42 = vrot.slane %v255_v20, 1  ;;  %v189_v31 = vld [vmem:[%s1700_s11 + $0x240] sm:$0xff]  ;;  %v190_v32 = vld [vmem:[%s1700_s11 + $0x248] sm:$0xff] }
  0x6b   : > { %v1607_v43 = vpack.c.bf16 %v1419_v36, %v1418_v35  ;;  %v584_v44 = vmax.f32 %v254_v19, %v518_v37  ;;  %v585_v45 = vmax.f32 %v255_v20, %v519_v38  ;;  %v975_v46 = vrot.slane %v763_v33, 1 }
  0x6c   : > { %v586_v50 = vmax.f32 %v256_v21, %v520_v39  ;;  %v587_v51 = vmax.f32 %v257_v22, %v521_v40  ;;  %v974_v52 = vsel %vm876_vm0, %v972_v41, %v973_v42  ;;  %v977_v53 = vrot.slane %v256_v21, 1 }
  0x6d   : > { %1651 = vst [vmem:[%s1727_s15 + $0x40] sm:$0xff] %v1607_v43   ;;  %v976_v55 = vsel %vm876_vm0, %v973_v42, %v975_v46  ;;  %v978_v56 = vrot.slane %v257_v22, 1  ;;  %v980_v57 = vrot.slane %v764_v34, 1  ;;  %v1146_v58 = vmax.f32 %v584_v44, %v974_v52  ;;  %v188_v43 = vld [vmem:[%s1700_s11 + $0x238] sm:$0x1] }
  0x6e   : > { %v1147_v59 = vmax.f32 %v585_v45, %v976_v55  ;;  %v258_v61 = vunpack.c.l.bf16 %v180_v47  ;;  %v259_v62 = vunpack.c.l.bf16 %v181_v48  ;;  %v260_v63 = vunpack.c.l.bf16 %v183_v49  ;;  %v191_v44 = vld [vmem:[%s1700_s11 + $0x250] sm:$0x1] }
  0x6f   : > { %v979_v0 = vsel %vm876_vm0, %v977_v53, %v978_v56  ;;  %v981_v1 = vsel %vm876_vm0, %v978_v56, %v980_v57  ;;  %v1322_v2 = vmax.f32 %v1144_v27, %v1146_v58  ;;  %v261_v4 = vunpack.c.l.bf16 %v184_v54 }
  0x70   : > { %v1148_v5 = vmax.f32 %v586_v50, %v979_v0  ;;  %v1149_v6 = vmax.f32 %v587_v51, %v981_v1  ;;  %v1323_v7 = vmax.f32 %v1145_v28, %v1147_v59  ;;  %v390_v8 = vrot.slane %v180_v47, 4 }
  0x71   : > { %v391_v9 = vrot.slane %v181_v48, 4  ;;  %v392_v10 = vrot.slane %v183_v49, 4  ;;  %v393_v11 = vrot.slane %v184_v54, 4  ;;  %v765_v12 = vunpack.c.l.bf16 %v182_v60 }
  0x72   : > { %v1420_v13 = vmax.f32 %v1322_v2, %v1148_v5  ;;  %v1421_v14 = vmax.f32 %v1323_v7, %v1149_v6  ;;  %v522_v15 = vunpack.c.l.bf16 %v390_v8  ;;  %v766_v16 = vunpack.c.l.bf16 %v185_v3  ;;  %v192_v3 = vld [vmem:[%s1700_s11 + $0x258] sm:$0xff]  ;;  %v193_v8 = vld [vmem:[%s1700_s11 + $0x260] sm:$0xff] }
  0x73   : > { %v523_v17 = vunpack.c.l.bf16 %v391_v9  ;;  %v524_v18 = vunpack.c.l.bf16 %v392_v10  ;;  %v525_v19 = vunpack.c.l.bf16 %v393_v11  ;;  %v982_v20 = vrot.slane %v258_v61, 1  ;;  %v195_v9 = vld [vmem:[%s1700_s11 + $0x270] sm:$0xff]  ;;  %v196_v10 = vld [vmem:[%s1700_s11 + $0x278] sm:$0xff] }
  0x74   : > { %v1612_v21 = vpack.c.bf16 %v1421_v14, %v1420_v13  ;;  %v588_v22 = vmax.f32 %v258_v61, %v522_v15  ;;  %v983_v23 = vrot.slane %v259_v62, 1  ;;  %v985_v24 = vrot.slane %v765_v12, 1 }
  0x75   : > { %v589_v27 = vmax.f32 %v259_v62, %v523_v17  ;;  %v590_v28 = vmax.f32 %v260_v63, %v524_v18  ;;  %v591_v29 = vmax.f32 %v261_v4, %v525_v19  ;;  %v987_v30 = vrot.slane %v260_v63, 1 }
  0x76   : > { %1652 = vst [vmem:[%s1727_s15 + $0x48] sm:$0xff] %v1612_v21   ;;  %v984_v33 = vsel %vm876_vm0, %v982_v20, %v983_v23  ;;  %v986_v34 = vsel %vm876_vm0, %v983_v23, %v985_v24  ;;  %v988_v35 = vrot.slane %v261_v4, 1  ;;  %v990_v36 = vrot.slane %v766_v16, 1  ;;  %v194_v20 = vld [vmem:[%s1700_s11 + $0x268] sm:$0x1] }
  0x77   : > { %v1150_v37 = vmax.f32 %v588_v22, %v984_v33  ;;  %v1151_v38 = vmax.f32 %v589_v27, %v986_v34  ;;  %v262_v39 = vunpack.c.l.bf16 %v186_v25  ;;  %v263_v40 = vunpack.c.l.bf16 %v187_v26  ;;  %v197_v21 = vld [vmem:[%s1700_s11 + $0x280] sm:$0x1] }
  0x78   : > { %v989_v41 = vsel %vm876_vm0, %v987_v30, %v988_v35  ;;  %v991_v42 = vsel %vm876_vm0, %v988_v35, %v990_v36  ;;  %v264_v45 = vunpack.c.l.bf16 %v189_v31  ;;  %v265_v46 = vunpack.c.l.bf16 %v190_v32 }
  0x79   : > { %v1152_v47 = vmax.f32 %v590_v28, %v989_v41  ;;  %v1153_v48 = vmax.f32 %v591_v29, %v991_v42  ;;  %v1324_v49 = vmax.f32 %v1148_v5, %v1150_v37  ;;  %v1325_v50 = vmax.f32 %v1149_v6, %v1151_v38 }
  0x7a   : > { %v394_v51 = vrot.slane %v186_v25, 4  ;;  %v395_v52 = vrot.slane %v187_v26, 4  ;;  %v396_v53 = vrot.slane %v189_v31, 4  ;;  %v397_v54 = vrot.slane %v190_v32, 4 }
  0x7b   : > { %v1422_v55 = vmax.f32 %v1324_v49, %v1152_v47  ;;  %v1423_v56 = vmax.f32 %v1325_v50, %v1153_v48  ;;  %v767_v57 = vunpack.c.l.bf16 %v188_v43  ;;  %v768_v58 = vunpack.c.l.bf16 %v191_v44  ;;  %v199_v50 = vld [vmem:[%s1700_s11 + $0x290] sm:$0xff] }
  0x7c   : > { %v526_v59 = vunpack.c.l.bf16 %v394_v51  ;;  %v527_v60 = vunpack.c.l.bf16 %v395_v52  ;;  %v528_v61 = vunpack.c.l.bf16 %v396_v53  ;;  %v529_v62 = vunpack.c.l.bf16 %v397_v54  ;;  %v201_v51 = vld [vmem:[%s1700_s11 + $0x2a0] sm:$0xff]  ;;  %v202_v52 = vld [vmem:[%s1700_s11 + $0x2a8] sm:$0xff] }
  0x7d   : > { %v1617_v63 = vpack.c.bf16 %v1423_v56, %v1422_v55  ;;  %v992_v0 = vrot.slane %v262_v39, 1  ;;  %v993_v1 = vrot.slane %v263_v40, 1  ;;  %v995_v2 = vrot.slane %v767_v57, 1 }
  0x7e   : > { %v592_v4 = vmax.f32 %v262_v39, %v526_v59  ;;  %v593_v5 = vmax.f32 %v263_v40, %v527_v60  ;;  %v594_v6 = vmax.f32 %v264_v45, %v528_v61  ;;  %v595_v7 = vmax.f32 %v265_v46, %v529_v62  ;;  %v200_v61 = vld [vmem:[%s1700_s11 + $0x298] sm:$0x1]  ;;  %v203_v62 = vld [vmem:[%s1700_s11 + $0x2b0] sm:$0x1] }
  0x7f   : > { %1653 = vst [vmem:[%s1727_s15 + $0x50] sm:$0xff] %v1617_v63   ;;  %v994_v11 = vsel %vm876_vm0, %v992_v0, %v993_v1  ;;  %v996_v12 = vsel %vm876_vm0, %v993_v1, %v995_v2  ;;  %v997_v13 = vrot.slane %v264_v45, 1  ;;  %v998_v14 = vrot.slane %v265_v46, 1  ;;  %v198_v45 = vld [vmem:[%s1700_s11 + $0x288] sm:$0xff] }
  0x80   : > { %v1000_v15 = vrot.slane %v768_v58, 1  ;;  %v1154_v16 = vmax.f32 %v592_v4, %v994_v11  ;;  %v1155_v17 = vmax.f32 %v593_v5, %v996_v12  ;;  %v266_v18 = vunpack.c.l.bf16 %v192_v3 }
  0x81   : > { %v999_v19 = vsel %vm876_vm0, %v997_v13, %v998_v14  ;;  %v267_v22 = vunpack.c.l.bf16 %v193_v8  ;;  %v268_v23 = vunpack.c.l.bf16 %v195_v9  ;;  %v269_v24 = vunpack.c.l.bf16 %v196_v10 }
  0x82   : > { %v1001_v25 = vsel %vm876_vm0, %v998_v14, %v1000_v15  ;;  %v1156_v26 = vmax.f32 %v594_v6, %v999_v19  ;;  %v1326_v27 = vmax.f32 %v1152_v47, %v1154_v16  ;;  %v1327_v28 = vmax.f32 %v1153_v48, %v1155_v17 }
  0x83   : > { %v1157_v29 = vmax.f32 %v595_v7, %v1001_v25  ;;  %v398_v30 = vrot.slane %v192_v3, 4  ;;  %v399_v31 = vrot.slane %v193_v8, 4  ;;  %v400_v32 = vrot.slane %v195_v9, 4 }
  0x84   : > { %v1424_v33 = vmax.f32 %v1326_v27, %v1156_v26  ;;  %v401_v34 = vrot.slane %v196_v10, 4  ;;  %v769_v35 = vunpack.c.l.bf16 %v194_v20  ;;  %v770_v36 = vunpack.c.l.bf16 %v197_v21  ;;  %v204_v27 = vld [vmem:[%s1700_s11 + $0x2b8] sm:$0xff] }
  0x85   : > { %v1425_v37 = vmax.f32 %v1327_v28, %v1157_v29  ;;  %v530_v38 = vunpack.c.l.bf16 %v398_v30  ;;  %v531_v39 = vunpack.c.l.bf16 %v399_v31  ;;  %v532_v40 = vunpack.c.l.bf16 %v400_v32  ;;  %v205_v28 = vld [vmem:[%s1700_s11 + $0x2c0] sm:$0xff] }
  0x86   : > { %v533_v41 = vunpack.c.l.bf16 %v401_v34  ;;  %v1002_v42 = vrot.slane %v266_v18, 1  ;;  %v1003_v43 = vrot.slane %v267_v22, 1  ;;  %v1005_v44 = vrot.slane %v769_v35, 1  ;;  %v208_v34 = vld [vmem:[%s1700_s11 + $0x2d8] sm:$0xff] }
  0x87   : > { %v1622_v46 = vpack.c.bf16 %v1425_v37, %v1424_v33  ;;  %v596_v47 = vmax.f32 %v266_v18, %v530_v38  ;;  %v597_v48 = vmax.f32 %v267_v22, %v531_v39  ;;  %v598_v49 = vmax.f32 %v268_v23, %v532_v40  ;;  %v206_v40 = vld [vmem:[%s1700_s11 + $0x2c8] sm:$0x1] }
  0x88   : > { %v599_v53 = vmax.f32 %v269_v24, %v533_v41  ;;  %v1004_v54 = vsel %vm876_vm0, %v1002_v42, %v1003_v43  ;;  %v1006_v55 = vsel %vm876_vm0, %v1003_v43, %v1005_v44  ;;  %v1007_v56 = vrot.slane %v268_v23, 1 }
  0x89   : > { %1654 = vst [vmem:[%s1727_s15 + $0x58] sm:$0xff] %v1622_v46   ;;  %v1008_v57 = vrot.slane %v269_v24, 1  ;;  %v1010_v58 = vrot.slane %v770_v36, 1  ;;  %v1158_v59 = vmax.f32 %v596_v47, %v1004_v54  ;;  %v1159_v60 = vmax.f32 %v597_v48, %v1006_v55  ;;  %v209_v47 = vld [vmem:[%s1700_s11 + $0x2e0] sm:$0x1] }
  0x8a   : > { %v270_v63 = vunpack.c.l.bf16 %v198_v45  ;;  %v271_v0 = vunpack.c.l.bf16 %v199_v50  ;;  %v272_v1 = vunpack.c.l.bf16 %v201_v51  ;;  %v273_v2 = vunpack.c.l.bf16 %v202_v52 }
  0x8b   : > { %v1009_v3 = vsel %vm876_vm0, %v1007_v56, %v1008_v57  ;;  %v1011_v4 = vsel %vm876_vm0, %v1008_v57, %v1010_v58  ;;  %v1328_v5 = vmax.f32 %v1156_v26, %v1158_v59  ;;  %v1329_v6 = vmax.f32 %v1157_v29, %v1159_v60  ;;  %v207_v29 = vld [vmem:[%s1700_s11 + $0x2d0] sm:$0xff] }
  0x8c   : > { %v1160_v7 = vmax.f32 %v598_v49, %v1009_v3  ;;  %v1161_v8 = vmax.f32 %v599_v53, %v1011_v4  ;;  %v402_v9 = vrot.slane %v198_v45, 4  ;;  %v403_v10 = vrot.slane %v199_v50, 4 }
  0x8d   : > { %v404_v11 = vrot.slane %v201_v51, 4  ;;  %v405_v12 = vrot.slane %v202_v52, 4  ;;  %v771_v13 = vunpack.c.l.bf16 %v200_v61  ;;  %v772_v14 = vunpack.c.l.bf16 %v203_v62 }
  0x8e   : > { %v1426_v15 = vmax.f32 %v1328_v5, %v1160_v7  ;;  %v1427_v16 = vmax.f32 %v1329_v6, %v1161_v8  ;;  %v534_v17 = vunpack.c.l.bf16 %v402_v9  ;;  %v535_v18 = vunpack.c.l.bf16 %v403_v10  ;;  %v210_v5 = vld [vmem:[%s1700_s11 + $0x2e8] sm:$0xff]  ;;  %v211_v6 = vld [vmem:[%s1700_s11 + $0x2f0] sm:$0xff] }
  0x8f   : > { %v536_v19 = vunpack.c.l.bf16 %v404_v11  ;;  %v537_v20 = vunpack.c.l.bf16 %v405_v12  ;;  %v1012_v21 = vrot.slane %v270_v63, 1  ;;  %v1013_v22 = vrot.slane %v271_v0, 1  ;;  %v213_v11 = vld [vmem:[%s1700_s11 + $0x300] sm:$0xff]  ;;  %v214_v12 = vld [vmem:[%s1700_s11 + $0x308] sm:$0xff] }
  0x90   : > { %v1627_v23 = vpack.c.bf16 %v1427_v16, %v1426_v15  ;;  %v600_v24 = vmax.f32 %v270_v63, %v534_v17  ;;  %v601_v25 = vmax.f32 %v271_v0, %v535_v18  ;;  %v1015_v26 = vrot.slane %v771_v13, 1 }
  0x91   : > { %v602_v30 = vmax.f32 %v272_v1, %v536_v19  ;;  %v603_v31 = vmax.f32 %v273_v2, %v537_v20  ;;  %v1014_v32 = vsel %vm876_vm0, %v1012_v21, %v1013_v22  ;;  %v1017_v33 = vrot.slane %v272_v1, 1 }
  0x92   : > { %1655 = vst [vmem:[%s1727_s15 + $0x60] sm:$0xff] %v1627_v23   ;;  %v1016_v35 = vsel %vm876_vm0, %v1013_v22, %v1015_v26  ;;  %v1018_v36 = vrot.slane %v273_v2, 1  ;;  %v1020_v37 = vrot.slane %v772_v14, 1  ;;  %v1162_v38 = vmax.f32 %v600_v24, %v1014_v32  ;;  %v212_v23 = vld [vmem:[%s1700_s11 + $0x2f8] sm:$0x1] }
  0x93   : > { %v1163_v39 = vmax.f32 %v601_v25, %v1016_v35  ;;  %v274_v41 = vunpack.c.l.bf16 %v204_v27  ;;  %v275_v42 = vunpack.c.l.bf16 %v205_v28  ;;  %v276_v43 = vunpack.c.l.bf16 %v207_v29  ;;  %v215_v24 = vld [vmem:[%s1700_s11 + $0x310] sm:$0x1] }
  0x94   : > { %v1019_v44 = vsel %vm876_vm0, %v1017_v33, %v1018_v36  ;;  %v1021_v45 = vsel %vm876_vm0, %v1018_v36, %v1020_v37  ;;  %v1330_v46 = vmax.f32 %v1160_v7, %v1162_v38  ;;  %v277_v48 = vunpack.c.l.bf16 %v208_v34 }
  0x95   : > { %v1164_v49 = vmax.f32 %v602_v30, %v1019_v44  ;;  %v1165_v50 = vmax.f32 %v603_v31, %v1021_v45  ;;  %v1331_v51 = vmax.f32 %v1161_v8, %v1163_v39  ;;  %v406_v52 = vrot.slane %v204_v27, 4 }
  0x96   : > { %v407_v53 = vrot.slane %v205_v28, 4  ;;  %v408_v54 = vrot.slane %v207_v29, 4  ;;  %v409_v55 = vrot.slane %v208_v34, 4  ;;  %v773_v56 = vunpack.c.l.bf16 %v206_v40 }
  0x97   : > { %v1428_v57 = vmax.f32 %v1330_v46, %v1164_v49  ;;  %v1429_v58 = vmax.f32 %v1331_v51, %v1165_v50  ;;  %v538_v59 = vunpack.c.l.bf16 %v406_v52  ;;  %v774_v60 = vunpack.c.l.bf16 %v209_v47 }
  0x98   : > { %v539_v61 = vunpack.c.l.bf16 %v407_v53  ;;  %v540_v62 = vunpack.c.l.bf16 %v408_v54  ;;  %v541_v63 = vunpack.c.l.bf16 %v409_v55  ;;  %v1022_v0 = vrot.slane %v274_v41, 1 }
  0x99   : > { %v1632_v1 = vpack.c.bf16 %v1429_v58, %v1428_v57  ;;  %v604_v2 = vmax.f32 %v274_v41, %v538_v59  ;;  %v1023_v3 = vrot.slane %v275_v42, 1  ;;  %v1025_v4 = vrot.slane %v773_v56, 1 }
  0x9a   : > { %v605_v7 = vmax.f32 %v275_v42, %v539_v61  ;;  %v606_v8 = vmax.f32 %v276_v43, %v540_v62  ;;  %v607_v9 = vmax.f32 %v277_v48, %v541_v63  ;;  %v1027_v10 = vrot.slane %v276_v43, 1 }
  0x9b   : > { %1656 = vst [vmem:[%s1727_s15 + $0x68] sm:$0xff] %v1632_v1   ;;  %v1024_v13 = vsel %vm876_vm0, %v1022_v0, %v1023_v3  ;;  %v1026_v14 = vsel %vm876_vm0, %v1023_v3, %v1025_v4  ;;  %v1028_v15 = vrot.slane %v277_v48, 1  ;;  %v1030_v16 = vrot.slane %v774_v60, 1 }
  0x9c   : > { %v1166_v17 = vmax.f32 %v604_v2, %v1024_v13  ;;  %v1167_v18 = vmax.f32 %v605_v7, %v1026_v14  ;;  %v278_v19 = vunpack.c.l.bf16 %v210_v5  ;;  %v279_v20 = vunpack.c.l.bf16 %v211_v6 }
  0x9d   : > { %v1029_v21 = vsel %vm876_vm0, %v1027_v10, %v1028_v15  ;;  %v1031_v22 = vsel %vm876_vm0, %v1028_v15, %v1030_v16  ;;  %v280_v25 = vunpack.c.l.bf16 %v213_v11  ;;  %v281_v26 = vunpack.c.l.bf16 %v214_v12 }
  0x9e   : > { %v1168_v27 = vmax.f32 %v606_v8, %v1029_v21  ;;  %v1169_v28 = vmax.f32 %v607_v9, %v1031_v22  ;;  %v1332_v29 = vmax.f32 %v1164_v49, %v1166_v17  ;;  %v1333_v30 = vmax.f32 %v1165_v50, %v1167_v18 }
  0x9f   : > { %v410_v31 = vrot.slane %v210_v5, 4  ;;  %v411_v32 = vrot.slane %v211_v6, 4  ;;  %v412_v33 = vrot.slane %v213_v11, 4  ;;  %v413_v34 = vrot.slane %v214_v12, 4 }
  0xa0   : > { %v1430_v35 = vmax.f32 %v1332_v29, %v1168_v27  ;;  %v1431_v36 = vmax.f32 %v1333_v30, %v1169_v28  ;;  %v775_v37 = vunpack.c.l.bf16 %v212_v23  ;;  %v776_v38 = vunpack.c.l.bf16 %v215_v24 }
  0xa1   : > { %v542_v39 = vunpack.c.l.bf16 %v410_v31  ;;  %v543_v40 = vunpack.c.l.bf16 %v411_v32  ;;  %v544_v41 = vunpack.c.l.bf16 %v412_v33  ;;  %v545_v42 = vunpack.c.l.bf16 %v413_v34 }
  0xa2   : > { %v1637_v43 = vpack.c.bf16 %v1431_v36, %v1430_v35  ;;  %v1032_v44 = vrot.slane %v278_v19, 1  ;;  %v1033_v45 = vrot.slane %v279_v20, 1  ;;  %v1035_v46 = vrot.slane %v775_v37, 1 }
  0xa3   : > { %v608_v47 = vmax.f32 %v278_v19, %v542_v39  ;;  %v609_v48 = vmax.f32 %v279_v20, %v543_v40  ;;  %v610_v49 = vmax.f32 %v280_v25, %v544_v41  ;;  %v611_v50 = vmax.f32 %v281_v26, %v545_v42 }
  0xa4   : > { %1657 = vst [vmem:[%s1727_s15 + $0x70] sm:$0xff] %v1637_v43   ;;  %v1034_v51 = vsel %vm876_vm0, %v1032_v44, %v1033_v45  ;;  %v1036_v52 = vsel %vm876_vm0, %v1033_v45, %v1035_v46  ;;  %v1037_v53 = vrot.slane %v280_v25, 1  ;;  %v1038_v54 = vrot.slane %v281_v26, 1 }
  0xa5   : > { %v1040_v55 = vrot.slane %v776_v38, 1  ;;  %v1170_v56 = vmax.f32 %v608_v47, %v1034_v51  ;;  %v1171_v57 = vmax.f32 %v609_v48, %v1036_v52 }
  0xa6   : > { %v1039_v58 = vsel %vm876_vm0, %v1037_v53, %v1038_v54 }
  0xa7   : > { %v1041_v59 = vsel %vm876_vm0, %v1038_v54, %v1040_v55  ;;  %v1172_v60 = vmax.f32 %v610_v49, %v1039_v58  ;;  %v1334_v61 = vmax.f32 %v1168_v27, %v1170_v56  ;;  %v1335_v62 = vmax.f32 %v1169_v28, %v1171_v57 }
  0xa8   : > { %v1173_v63 = vmax.f32 %v611_v50, %v1041_v59 }
  0xa9   : > { %v1432_v0 = vmax.f32 %v1334_v61, %v1172_v60 }
  0xaa   : > { %v1433_v1 = vmax.f32 %v1335_v62, %v1173_v63 }
  0xac   : > { %v1642_v2 = vpack.c.bf16 %v1433_v1, %v1432_v0 }
  0xae   : > { %1658 = vst [vmem:[%s1727_s15 + $0x78] sm:$0xff] %v1642_v2  }
  0xaf PF: > { %s11_s6 = sadd.s32 1, %s1674_s6  }
  0xb0   : > { %p8_p4 = scmp.ge.s32.totalorder %s11_s6, 4  }
  0xb2   :  { %10 = sbr.rel (!%p8_p4) target bundleno = 1 (0x1), region = 54 }

// kernel: _lambda_.15
= control target key start
LH: loop header
LB: loop body
LE: loop exit
PB: predicated region body
PF: predicated region fallthrough
CT: control target
= control target key end

     0   :  { %11 = vsyncpa [#allocation3], 0  ;;  %s1412_s24 = smov [#allocation2]   ;;  %s1413_s26 = smov 64   ;;  %s1921_s0 = inlined_call_operand.vmem [shape: bf16[512,128], index: 0, kind: input, shape index: {}]   ;;  %s1922_s1 = inlined_call_operand.hbm [shape: bf16[128,128], index: 1, kind: input, shape index: {}]   ;;  %s1923_s2 = inlined_call_operand.vmem [shape: f32[1,128], index: 2, kind: input, shape index: {}]   ;;  %s1924_s3 = inlined_call_operand.vmem [shape: f32[1,128], index: 3, kind: input, shape index: {}]   ;;  %s1925_s4 = inlined_call_operand.vmem [shape: f32[1,128], index: 4, kind: input, shape index: {}]   ;;  %s1926_s5 = inlined_call_operand.vmem [shape: f32[1,128], index: 5, kind: input, shape index: {}]   ;;  %s1927_s6 = inlined_call_operand.vmem [shape: bf16[512,128], index: 6, kind: output, shape index: {}]  }
   0x1   :  { %s18_s23 = sshll.u32 %s1922_s1, 4  ;;  %s20_s25 = sshll.u32 %s1412_s24, 4  ;;  %s19_s23 = int_to_ptr.hbm [resolvable:$true] %s18_s23  ;;  %s21_s25 = int_to_ptr.vmem [resolvable:$true] %s20_s25 }
   0x2   :  { %s1414_s27 = smov 4  }
   0x3   :  { %26 = dma.hbm_to_vmem [thread:$0]  %s19_s23, 1024, %s21_s25, [#allocation3], %s1413_s26, %s1413_s26, %s1414_s27  }
   0x4   :  { %1410 = dma.done.wait [#allocation3], 1024  }
   0x5   :  { %1411 = vsyncadd [#allocation3], 4294966272  ;;  %v1004_v0 = vld [vmem:[#allocation2 + $0x38] sm:$0xff]  ;;  %v1003_v1 = vld [vmem:[#allocation2 + $0x30] sm:$0xff] }
   0x6   :  { %463 = vmatpush.bf16.msra.mxu0 %v1004_v0  ;;  %1355 = vmatpush.bf16.msra.mxu1 %v1004_v0  ;;  %v1002_v2 = vld [vmem:[#allocation2 + $0x28] sm:$0xff]  ;;  %v1006_v3 = vld [vmem:[%s1921_s0] sm:$0xff]   ;;  %v1000_v15 = vld [vmem:[#allocation2 + $0x18] sm:$0xff] }
   0x7   :  { %1356 = vmatpush.bf16.msra.mxu2 %v1004_v0  ;;  %1357 = vmatpush.bf16.msra.mxu3 %v1004_v0  ;;  %v1001_v4 = vld [vmem:[#allocation2 + $0x20] sm:$0xff]  ;;  %v1007_v8 = vunpack.c.l.bf16 %v1006_v3  ;;  %v1008_v9 = vunpack.c.h.bf16 %v1006_v3  ;;  %v999_v25 = vld [vmem:[#allocation2 + $0x10] sm:$0xff]  ;;  %v998_v34 = vld [vmem:[#allocation2 + $0x8] sm:$0xff] }
   0x8   :  { %v1300_v5 = vld [vmem:[%s1921_s0 + $0x40] sm:$0xff]   ;;  %v1293_v43 = vld [vmem:[%s1921_s0 + $0x8] sm:$0xff]  }
   0x9   :  { %v1308_v6 = vld [vmem:[%s1921_s0 + $0x80] sm:$0xff]   ;;  %v1039_v11 = vunpack.c.l.bf16 %v1300_v5  ;;  %v1040_v12 = vunpack.c.h.bf16 %v1300_v5  ;;  %v1301_v44 = vld [vmem:[%s1921_s0 + $0x48] sm:$0xff]   ;;  %v1011_v51 = vunpack.c.l.bf16 %v1293_v43  ;;  %v1012_v52 = vunpack.c.h.bf16 %v1293_v43 }
   0xa   :  { %464 = vmatpush.bf16.msra.mxu0 %v1003_v1  ;;  %1358 = vmatpush.bf16.msra.mxu1 %v1003_v1  ;;  %v1316_v7 = vld [vmem:[%s1921_s0 + $0xc0] sm:$0xff]   ;;  %v1071_v13 = vunpack.c.l.bf16 %v1308_v6  ;;  %v1072_v14 = vunpack.c.h.bf16 %v1308_v6  ;;  %v1309_v48 = vld [vmem:[%s1921_s0 + $0x88] sm:$0xff]   ;;  %v1043_v53 = vunpack.c.l.bf16 %v1301_v44  ;;  %v1044_v56 = vunpack.c.h.bf16 %v1301_v44 }
   0xb   :  { %1359 = vmatpush.bf16.msra.mxu2 %v1003_v1  ;;  %1360 = vmatpush.bf16.msra.mxu3 %v1003_v1  ;;  %v1468_v10 = vld [vmem:[%s1923_s2] ss:$0 sm:$0xff]  ;;  %v1103_v16 = vunpack.c.l.bf16 %v1316_v7  ;;  %v1104_v17 = vunpack.c.h.bf16 %v1316_v7  ;;  %v1317_v49 = vld [vmem:[%s1921_s0 + $0xc8] sm:$0xff]   ;;  %v1075_v57 = vunpack.c.l.bf16 %v1309_v48  ;;  %v1076_v59 = vunpack.c.h.bf16 %v1309_v48 }
   0xc   :  { %v172_v18 = vmul.f32 %v1468_v10, %v1007_v8  ;;  %v173_v19 = vmul.f32 %v1468_v10, %v1008_v9  ;;  %v1475_v20 = vld [vmem:[%s1924_s3] ss:$0 sm:$0xff]  ;;  %v188_v21 = vmul.f32 %v1468_v10, %v1039_v11  ;;  %v189_v22 = vmul.f32 %v1468_v10, %v1040_v12 }
   0xd   :  { %v204_v23 = vmul.f32 %v1468_v10, %v1071_v13  ;;  %v205_v24 = vmul.f32 %v1468_v10, %v1072_v14  ;;  %v220_v26 = vmul.f32 %v1468_v10, %v1103_v16  ;;  %v221_v27 = vmul.f32 %v1468_v10, %v1104_v17  ;;  %v997_v45 = vld [vmem:[#allocation2] sm:$0xff] }
   0xe   :  { %465 = vmatpush.bf16.msra.mxu0 %v1002_v2  ;;  %1361 = vmatpush.bf16.msra.mxu1 %v1002_v2  ;;  %v239_v28 = vadd.f32 %v1475_v20, %v172_v18  ;;  %v240_v29 = vadd.f32 %v1475_v20, %v173_v19  ;;  %v255_v30 = vadd.f32 %v1475_v20, %v188_v21  ;;  %v1107_v60 = vunpack.c.l.bf16 %v1317_v49  ;;  %v1294_v19 = vld [vmem:[%s1921_s0 + $0x10] sm:$0xff]  }
   0xf   :  { %1362 = vmatpush.bf16.msra.mxu2 %v1002_v2  ;;  %1363 = vmatpush.bf16.msra.mxu3 %v1002_v2  ;;  %v256_v31 = vadd.f32 %v1475_v20, %v189_v22  ;;  %v271_v32 = vadd.f32 %v1475_v20, %v204_v23  ;;  %v272_v33 = vadd.f32 %v1475_v20, %v205_v24  ;;  %v1108_v61 = vunpack.c.h.bf16 %v1317_v49  ;;  %v1302_v21 = vld [vmem:[%s1921_s0 + $0x50] sm:$0xff]  }
  0x10   :  { %v287_v35 = vadd.f32 %v1475_v20, %v220_v26  ;;  %v288_v36 = vadd.f32 %v1475_v20, %v221_v27  ;;  %v303_v37 = vmax.f32 %v239_v28, 0.0  ;;  %v304_v38 = vmax.f32 %v240_v29, 0.0  ;;  %v1310_v26 = vld [vmem:[%s1921_s0 + $0x90] sm:$0xff]  }
  0x11   :  { %v319_v39 = vmax.f32 %v255_v30, 0.0  ;;  %v320_v40 = vmax.f32 %v256_v31, 0.0  ;;  %v335_v41 = vmax.f32 %v271_v32, 0.0  ;;  %v336_v42 = vmax.f32 %v272_v33, 0.0  ;;  %v1318_v27 = vld [vmem:[%s1921_s0 + $0xd0] sm:$0xff]  }
  0x12   :  { %466 = vmatpush.bf16.msra.mxu0 %v1001_v4  ;;  %1364 = vmatpush.bf16.msra.mxu1 %v1001_v4  ;;  %v351_v46 = vmax.f32 %v287_v35, 0.0  ;;  %v352_v47 = vmax.f32 %v288_v36, 0.0  ;;  %v367_v50 = vpack.c.bf16 %v304_v38, %v303_v37  ;;  %v174_v62 = vmul.f32 %v1468_v10, %v1011_v51 }
  0x13   :  { %1365 = vmatpush.bf16.msra.mxu2 %v1001_v4  ;;  %1366 = vmatpush.bf16.msra.mxu3 %v1001_v4  ;;  %v375_v54 = vpack.c.bf16 %v320_v40, %v319_v39  ;;  %v383_v55 = vpack.c.bf16 %v336_v42, %v335_v41  ;;  %v175_v63 = vmul.f32 %v1468_v10, %v1012_v52  ;;  %v1015_v28 = vunpack.c.l.bf16 %v1294_v19 }
  0x14   :  { %v391_v58 = vpack.c.bf16 %v352_v47, %v351_v46  ;;  %v190_v0 = vmul.f32 %v1468_v10, %v1043_v53  ;;  %v191_v1 = vmul.f32 %v1468_v10, %v1044_v56  ;;  %v206_v2 = vmul.f32 %v1468_v10, %v1075_v57 }
  0x15   :  { %v207_v3 = vmul.f32 %v1468_v10, %v1076_v59  ;;  %v222_v4 = vmul.f32 %v1468_v10, %v1107_v60  ;;  %v223_v5 = vmul.f32 %v1468_v10, %v1108_v61  ;;  %v241_v6 = vadd.f32 %v1475_v20, %v174_v62  ;;  %v1295_v62 = vld [vmem:[%s1921_s0 + $0x18] sm:$0xff]  }
  0x16   :  { %467 = vmatpush.bf16.msra.mxu0 %v1000_v15  ;;  %1367 = vmatpush.bf16.msra.mxu1 %v1000_v15  ;;  %v242_v7 = vadd.f32 %v1475_v20, %v175_v63  ;;  %v257_v8 = vadd.f32 %v1475_v20, %v190_v0  ;;  %v258_v9 = vadd.f32 %v1475_v20, %v191_v1  ;;  %v1016_v29 = vunpack.c.h.bf16 %v1294_v19  ;;  %v1303_v1 = vld [vmem:[%s1921_s0 + $0x58] sm:$0xff]  }
  0x17   :  { %1368 = vmatpush.bf16.msra.mxu2 %v1000_v15  ;;  %1369 = vmatpush.bf16.msra.mxu3 %v1000_v15  ;;  %v273_v11 = vadd.f32 %v1475_v20, %v206_v2  ;;  %v274_v12 = vadd.f32 %v1475_v20, %v207_v3  ;;  %v289_v13 = vadd.f32 %v1475_v20, %v222_v4  ;;  %v305_v15 = vmax.f32 %v241_v6, 0.0  ;;  %v1311_v2 = vld [vmem:[%s1921_s0 + $0x98] sm:$0xff]  }
  0x18   :  { %v290_v14 = vadd.f32 %v1475_v20, %v223_v5  ;;  %v306_v16 = vmax.f32 %v242_v7, 0.0  ;;  %v321_v17 = vmax.f32 %v257_v8, 0.0  ;;  %v322_v18 = vmax.f32 %v258_v9, 0.0  ;;  %v1319_v3 = vld [vmem:[%s1921_s0 + $0xd8] sm:$0xff]  }
  0x19   :  { %v337_v22 = vmax.f32 %v273_v11, 0.0  ;;  %v338_v23 = vmax.f32 %v274_v12, 0.0  ;;  %v353_v24 = vmax.f32 %v289_v13, 0.0  ;;  %v1047_v30 = vunpack.c.l.bf16 %v1302_v21 }
  0x1a   :  { %468 = vmatpush.bf16.msra.mxu0 %v999_v25  ;;  %1370 = vmatpush.bf16.msra.mxu1 %v999_v25  ;;  %v1048_v31 = vunpack.c.h.bf16 %v1302_v21  ;;  %v368_v32 = vpack.c.bf16 %v306_v16, %v305_v15  ;;  %v376_v33 = vpack.c.bf16 %v322_v18, %v321_v17  ;;  %v1080_v35 = vunpack.c.h.bf16 %v1310_v26 }
  0x1b   :  { %1371 = vmatpush.bf16.msra.mxu2 %v999_v25  ;;  %1372 = vmatpush.bf16.msra.mxu3 %v999_v25  ;;  %v354_v25 = vmax.f32 %v290_v14, 0.0  ;;  %v384_v36 = vpack.c.bf16 %v338_v23, %v337_v22  ;;  %v1111_v38 = vunpack.c.l.bf16 %v1318_v27  ;;  %v1112_v39 = vunpack.c.h.bf16 %v1318_v27 }
  0x1c   :  { %v176_v40 = vmul.f32 %v1468_v10, %v1015_v28  ;;  %v177_v41 = vmul.f32 %v1468_v10, %v1016_v29  ;;  %v192_v42 = vmul.f32 %v1468_v10, %v1047_v30  ;;  %v193_v43 = vmul.f32 %v1468_v10, %v1048_v31 }
  0x1d   :  { %v392_v37 = vpack.c.bf16 %v354_v25, %v353_v24  ;;  %v224_v46 = vmul.f32 %v1468_v10, %v1111_v38  ;;  %v225_v47 = vmul.f32 %v1468_v10, %v1112_v39  ;;  %v1019_v6 = vunpack.c.l.bf16 %v1295_v62  ;;  %v1296_v38 = vld [vmem:[%s1921_s0 + $0x20] sm:$0xff]  }
  0x1e   :  { %469 = vmatpush.bf16.msra.mxu0 %v998_v34  ;;  %1373 = vmatpush.bf16.msra.mxu1 %v998_v34  ;;  %v243_v48 = vadd.f32 %v1475_v20, %v176_v40  ;;  %v244_v49 = vadd.f32 %v1475_v20, %v177_v41  ;;  %v260_v51 = vadd.f32 %v1475_v20, %v193_v43  ;;  %v1020_v7 = vunpack.c.h.bf16 %v1295_v62  ;;  %v1304_v39 = vld [vmem:[%s1921_s0 + $0x60] sm:$0xff]  }
  0x1f   :  { %1374 = vmatpush.bf16.msra.mxu2 %v998_v34  ;;  %1375 = vmatpush.bf16.msra.mxu3 %v998_v34  ;;  %v1079_v34 = vunpack.c.l.bf16 %v1310_v26  ;;  %v1051_v9 = vunpack.c.l.bf16 %v1303_v1  ;;  %v1052_v11 = vunpack.c.h.bf16 %v1303_v1  ;;  %v1083_v12 = vunpack.c.l.bf16 %v1311_v2 }
  0x20   :  { %v307_v56 = vmax.f32 %v243_v48, 0.0  ;;  %v308_v57 = vmax.f32 %v244_v49, 0.0  ;;  %v324_v59 = vmax.f32 %v260_v51, 0.0  ;;  %v1084_v14 = vunpack.c.h.bf16 %v1311_v2 }
  0x21   :  { %v208_v44 = vmul.f32 %v1468_v10, %v1079_v34  ;;  %v1115_v15 = vunpack.c.l.bf16 %v1319_v3  ;;  %v1116_v16 = vunpack.c.h.bf16 %v1319_v3  ;;  %v178_v17 = vmul.f32 %v1468_v10, %v1019_v6 }
  0x22   :  { %470 = vmatpush.bf16.msra.mxu0 %v997_v45  ;;  %1376 = vmatpush.bf16.msra.mxu1 %v997_v45  ;;  %v369_v4 = vpack.c.bf16 %v308_v57, %v307_v56  ;;  %v179_v18 = vmul.f32 %v1468_v10, %v1020_v7  ;;  %v194_v19 = vmul.f32 %v1468_v10, %v1051_v9  ;;  %v1055_v48 = vunpack.c.l.bf16 %v1304_v39 }
  0x23   :  { %1377 = vmatpush.bf16.msra.mxu2 %v997_v45  ;;  %1378 = vmatpush.bf16.msra.mxu3 %v997_v45  ;;  %v209_v45 = vmul.f32 %v1468_v10, %v1080_v35  ;;  %v275_v52 = vadd.f32 %v1475_v20, %v208_v44  ;;  %v195_v21 = vmul.f32 %v1468_v10, %v1052_v11  ;;  %v1312_v44 = vld [vmem:[%s1921_s0 + $0xa0] sm:$0xff]   ;;  %v1056_v49 = vunpack.c.h.bf16 %v1304_v39 }
  0x24   :  { %v210_v22 = vmul.f32 %v1468_v10, %v1083_v12  ;;  %v211_v23 = vmul.f32 %v1468_v10, %v1084_v14  ;;  %v226_v24 = vmul.f32 %v1468_v10, %v1115_v15  ;;  %v227_v25 = vmul.f32 %v1468_v10, %v1116_v16 }
  0x25   :  { %471 = vmatmul.bf16.vlgmr.msra.gmra.mxu0 %v367_v50  ;;  %511 = vmatmul.bf16.vlgmr.msra.gmra.mxu1 %v375_v54  ;;  %v259_v50 = vadd.f32 %v1475_v20, %v192_v42  ;;  %v276_v53 = vadd.f32 %v1475_v20, %v209_v45  ;;  %v291_v54 = vadd.f32 %v1475_v20, %v224_v46  ;;  %v339_v60 = vmax.f32 %v275_v52, 0.0  ;;  %v1320_v45 = vld [vmem:[%s1921_s0 + $0xe0] sm:$0xff]  }
  0x26   :  { %551 = vmatmul.bf16.vlgmr.msra.gmra.mxu2 %v383_v55  ;;  %591 = vmatmul.bf16.vlgmr.msra.gmra.mxu3 %v391_v58  ;;  %v292_v55 = vadd.f32 %v1475_v20, %v225_v47  ;;  %v245_v26 = vadd.f32 %v1475_v20, %v178_v17  ;;  %v246_v27 = vadd.f32 %v1475_v20, %v179_v18  ;;  %v1023_v46 = vunpack.c.l.bf16 %v1296_v38  ;;  %v1297_v17 = vld [vmem:[%s1921_s0 + $0x28] sm:$0xff]  }
  0x27   :  { %v323_v58 = vmax.f32 %v259_v50, 0.0  ;;  %v340_v61 = vmax.f32 %v276_v53, 0.0  ;;  %v355_v63 = vmax.f32 %v291_v54, 0.0  ;;  %v261_v28 = vadd.f32 %v1475_v20, %v194_v19 }
  0x28   :  { %v356_v0 = vmax.f32 %v292_v55, 0.0  ;;  %v262_v29 = vadd.f32 %v1475_v20, %v195_v21  ;;  %v277_v30 = vadd.f32 %v1475_v20, %v210_v22  ;;  %v278_v31 = vadd.f32 %v1475_v20, %v211_v23  ;;  %v1305_v21 = vld [vmem:[%s1921_s0 + $0x68] sm:$0xff]  }
  0x29   :  { %v377_v5 = vpack.c.bf16 %v324_v59, %v323_v58  ;;  %v385_v8 = vpack.c.bf16 %v340_v61, %v339_v60  ;;  %v309_v34 = vmax.f32 %v245_v26, 0.0  ;;  %v310_v35 = vmax.f32 %v246_v27, 0.0  ;;  %v1313_v22 = vld [vmem:[%s1921_s0 + $0xa8] sm:$0xff]  }
  0x2a   :  { %v393_v13 = vpack.c.bf16 %v356_v0, %v355_v63  ;;  %v341_v40 = vmax.f32 %v277_v30, 0.0  ;;  %v342_v41 = vmax.f32 %v278_v31, 0.0  ;;  %v1024_v47 = vunpack.c.h.bf16 %v1296_v38  ;;  %v1321_v23 = vld [vmem:[%s1921_s0 + $0xe8] sm:$0xff]  }
  0x2b   :  { %v370_v50 = vpack.c.bf16 %v310_v35, %v309_v34  ;;  %v1087_v52 = vunpack.c.l.bf16 %v1312_v44  ;;  %v1088_v53 = vunpack.c.h.bf16 %v1312_v44  ;;  %v1119_v56 = vunpack.c.l.bf16 %v1320_v45 }
  0x2c   :  { %v386_v54 = vpack.c.bf16 %v342_v41, %v341_v40  ;;  %v1120_v57 = vunpack.c.h.bf16 %v1320_v45  ;;  %v180_v58 = vmul.f32 %v1468_v10, %v1023_v46  ;;  %v181_v59 = vmul.f32 %v1468_v10, %v1024_v47 }
  0x2d   :  { %v196_v60 = vmul.f32 %v1468_v10, %v1055_v48  ;;  %v197_v61 = vmul.f32 %v1468_v10, %v1056_v49  ;;  %v212_v62 = vmul.f32 %v1468_v10, %v1087_v52  ;;  %v213_v63 = vmul.f32 %v1468_v10, %v1088_v53 }
  0x2e   :  { %v228_v0 = vmul.f32 %v1468_v10, %v1119_v56  ;;  %v229_v1 = vmul.f32 %v1468_v10, %v1120_v57  ;;  %v247_v2 = vadd.f32 %v1475_v20, %v180_v58  ;;  %v248_v3 = vadd.f32 %v1475_v20, %v181_v59  ;;  %v1298_v56 = vld [vmem:[%s1921_s0 + $0x30] sm:$0xff]  }
  0x2f   :  { %v279_v6 = vadd.f32 %v1475_v20, %v212_v62  ;;  %v280_v7 = vadd.f32 %v1475_v20, %v213_v63  ;;  %v1027_v26 = vunpack.c.l.bf16 %v1297_v17  ;;  %v1028_v27 = vunpack.c.h.bf16 %v1297_v17  ;;  %v1306_v57 = vld [vmem:[%s1921_s0 + $0x70] sm:$0xff]  }
  0x30   :  { %v296_v9 = vadd.f32 %v1475_v20, %v229_v1  ;;  %v311_v11 = vmax.f32 %v247_v2, 0.0  ;;  %v312_v12 = vmax.f32 %v248_v3, 0.0  ;;  %v1060_v30 = vunpack.c.h.bf16 %v1305_v21  ;;  %v1314_v62 = vld [vmem:[%s1921_s0 + $0xb0] sm:$0xff]  }
  0x31   :  { %v343_v15 = vmax.f32 %v279_v6, 0.0  ;;  %v344_v16 = vmax.f32 %v280_v7, 0.0  ;;  %v1091_v31 = vunpack.c.l.bf16 %v1313_v22  ;;  %v1123_v34 = vunpack.c.l.bf16 %v1321_v23  ;;  %v1322_v63 = vld [vmem:[%s1921_s0 + $0xf0] sm:$0xff]  }
  0x32   :  { %v360_v19 = vmax.f32 %v296_v9, 0.0  ;;  %v1124_v35 = vunpack.c.h.bf16 %v1321_v23  ;;  %v199_v39 = vmul.f32 %v1468_v10, %v1060_v30  ;;  %v1032_v1 = vunpack.c.h.bf16 %v1298_v56 }
  0x33   :  { %v214_v40 = vmul.f32 %v1468_v10, %v1091_v31  ;;  %v1063_v2 = vunpack.c.l.bf16 %v1306_v57  ;;  %v1064_v3 = vunpack.c.h.bf16 %v1306_v57  ;;  %v1095_v6 = vunpack.c.l.bf16 %v1314_v62 }
  0x34   :  { %v266_v47 = vadd.f32 %v1475_v20, %v199_v39  ;;  %v1096_v7 = vunpack.c.h.bf16 %v1314_v62  ;;  %v1307_v39 = vld [vmem:[%s1921_s0 + $0x78] sm:$0xff]  }
  0x35   :  { %476 = vmatmul.bf16.gmra.mxu0 %v368_v32  ;;  %516 = vmatmul.bf16.gmra.mxu1 %v376_v33  ;;  %v293_v32 = vadd.f32 %v1475_v20, %v226_v24  ;;  %v294_v33 = vadd.f32 %v1475_v20, %v227_v25  ;;  %v371_v24 = vpack.c.bf16 %v312_v12, %v311_v11  ;;  %v1127_v11 = vunpack.c.l.bf16 %v1322_v63 }
  0x36   :  { %556 = vmatmul.bf16.gmra.mxu2 %v384_v36  ;;  %596 = vmatmul.bf16.gmra.mxu3 %v392_v37  ;;  %v325_v36 = vmax.f32 %v261_v28, 0.0  ;;  %v326_v37 = vmax.f32 %v262_v29, 0.0  ;;  %v387_v28 = vpack.c.bf16 %v344_v16, %v343_v15  ;;  %v1059_v29 = vunpack.c.l.bf16 %v1305_v21 }
  0x37   :  { %v357_v42 = vmax.f32 %v293_v32, 0.0  ;;  %v358_v43 = vmax.f32 %v294_v33, 0.0  ;;  %v1092_v33 = vunpack.c.h.bf16 %v1313_v22  ;;  %v281_v48 = vadd.f32 %v1475_v20, %v214_v40  ;;  %v1315_v40 = vld [vmem:[%s1921_s0 + $0xb8] sm:$0xff]  }
  0x38   :  { %v378_v51 = vpack.c.bf16 %v326_v37, %v325_v36  ;;  %v182_v36 = vmul.f32 %v1468_v10, %v1027_v26  ;;  %v183_v37 = vmul.f32 %v1468_v10, %v1028_v27  ;;  %v198_v38 = vmul.f32 %v1468_v10, %v1059_v29 }
  0x39   :  { %v394_v55 = vpack.c.bf16 %v358_v43, %v357_v42  ;;  %v215_v41 = vmul.f32 %v1468_v10, %v1092_v33  ;;  %v230_v42 = vmul.f32 %v1468_v10, %v1123_v34  ;;  %v231_v43 = vmul.f32 %v1468_v10, %v1124_v35 }
  0x3a   :  { %v249_v44 = vadd.f32 %v1475_v20, %v182_v36  ;;  %v250_v45 = vadd.f32 %v1475_v20, %v183_v37  ;;  %v265_v46 = vadd.f32 %v1475_v20, %v198_v38  ;;  %v345_v58 = vmax.f32 %v281_v48, 0.0  ;;  %v1299_v36 = vld [vmem:[%s1921_s0 + $0x38] sm:$0xff]  }
  0x3b   :  { %v282_v49 = vadd.f32 %v1475_v20, %v215_v41  ;;  %v1128_v12 = vunpack.c.h.bf16 %v1322_v63  ;;  %v200_v15 = vmul.f32 %v1468_v10, %v1063_v2  ;;  %v201_v16 = vmul.f32 %v1468_v10, %v1064_v3  ;;  %v1323_v41 = vld [vmem:[%s1921_s0 + $0xf8] sm:$0xff]  }
  0x3c   :  { %v313_v52 = vmax.f32 %v249_v44, 0.0  ;;  %v314_v53 = vmax.f32 %v250_v45, 0.0  ;;  %v216_v17 = vmul.f32 %v1468_v10, %v1095_v6  ;;  %v1035_v44 = vunpack.c.l.bf16 %v1299_v36 }
  0x3d   :  { %v346_v59 = vmax.f32 %v282_v49, 0.0  ;;  %v233_v21 = vmul.f32 %v1468_v10, %v1128_v12  ;;  %v1036_v45 = vunpack.c.h.bf16 %v1299_v36  ;;  %v1068_v48 = vunpack.c.h.bf16 %v1307_v39 }
  0x3e   :  { %v283_v26 = vadd.f32 %v1475_v20, %v216_v17  ;;  %v1099_v49 = vunpack.c.l.bf16 %v1315_v40 }
  0x3f   :  { %v300_v29 = vadd.f32 %v1475_v20, %v233_v21  ;;  %v203_v57 = vmul.f32 %v1468_v10, %v1068_v48 }
  0x40   :  { %v347_v34 = vmax.f32 %v283_v26, 0.0 }
  0x41   :  { %v364_v38 = vmax.f32 %v300_v29, 0.0 }
  0x45   :  { %481 = vmatmul.bf16.gmra.mxu0 %v369_v4  ;;  %521 = vmatmul.bf16.gmra.mxu1 %v377_v5  ;;  %v263_v4 = vadd.f32 %v1475_v20, %v196_v60  ;;  %v264_v5 = vadd.f32 %v1475_v20, %v197_v61 }
  0x46   :  { %561 = vmatmul.bf16.gmra.mxu2 %v385_v8  ;;  %601 = vmatmul.bf16.gmra.mxu3 %v393_v13  ;;  %v295_v8 = vadd.f32 %v1475_v20, %v228_v0  ;;  %v1031_v0 = vunpack.c.l.bf16 %v1298_v56 }
  0x47   :  { %v327_v13 = vmax.f32 %v263_v4, 0.0  ;;  %v328_v14 = vmax.f32 %v264_v5, 0.0  ;;  %v372_v4 = vpack.c.bf16 %v314_v53, %v313_v52  ;;  %v1131_v52 = vunpack.c.l.bf16 %v1323_v41 }
  0x48   :  { %v359_v18 = vmax.f32 %v295_v8, 0.0  ;;  %v388_v8 = vpack.c.bf16 %v346_v59, %v345_v58  ;;  %v1132_v53 = vunpack.c.h.bf16 %v1323_v41  ;;  %v218_v58 = vmul.f32 %v1468_v10, %v1099_v49 }
  0x49   :  { %v379_v25 = vpack.c.bf16 %v328_v14, %v327_v13  ;;  %v184_v13 = vmul.f32 %v1468_v10, %v1031_v0  ;;  %v185_v14 = vmul.f32 %v1468_v10, %v1032_v1  ;;  %v270_v1 = vadd.f32 %v1475_v20, %v203_v57 }
  0x4a   :  { %v395_v32 = vpack.c.bf16 %v360_v19, %v359_v18  ;;  %v217_v18 = vmul.f32 %v1468_v10, %v1096_v7  ;;  %v232_v19 = vmul.f32 %v1468_v10, %v1127_v11  ;;  %v285_v2 = vadd.f32 %v1475_v20, %v218_v58 }
  0x4b   :  { %v251_v22 = vadd.f32 %v1475_v20, %v184_v13  ;;  %v252_v23 = vadd.f32 %v1475_v20, %v185_v14 }
  0x4c   :  { %v284_v27 = vadd.f32 %v1475_v20, %v217_v18 }
  0x4d   :  { %v315_v30 = vmax.f32 %v251_v22, 0.0  ;;  %v316_v31 = vmax.f32 %v252_v23, 0.0  ;;  %v1696_v22 = vld [vmem:[%s1926_s5] ss:$0 sm:$0xff] }
  0x4e   :  { %v348_v35 = vmax.f32 %v284_v27, 0.0 }
  0x55   :  { %486 = vmatmul.bf16.gmra.mxu0 %v370_v50  ;;  %526 = vmatmul.bf16.gmra.mxu1 %v378_v51  ;;  %v297_v50 = vadd.f32 %v1475_v20, %v230_v42  ;;  %v298_v51 = vadd.f32 %v1475_v20, %v231_v43  ;;  %v373_v42 = vpack.c.bf16 %v316_v31, %v315_v30 }
  0x56   :  { %566 = vmatmul.bf16.gmra.mxu2 %v386_v54  ;;  %606 = vmatmul.bf16.gmra.mxu3 %v394_v55  ;;  %v329_v54 = vmax.f32 %v265_v46, 0.0  ;;  %v330_v55 = vmax.f32 %v266_v47, 0.0  ;;  %v389_v46 = vpack.c.bf16 %v348_v35, %v347_v34  ;;  %v1067_v47 = vunpack.c.l.bf16 %v1307_v39 }
  0x57   :  { %v361_v60 = vmax.f32 %v297_v50, 0.0  ;;  %v362_v61 = vmax.f32 %v298_v51, 0.0  ;;  %v1100_v51 = vunpack.c.h.bf16 %v1315_v40 }
  0x58   :  { %v380_v5 = vpack.c.bf16 %v330_v55, %v329_v54  ;;  %v186_v54 = vmul.f32 %v1468_v10, %v1035_v44  ;;  %v187_v55 = vmul.f32 %v1468_v10, %v1036_v45  ;;  %v202_v56 = vmul.f32 %v1468_v10, %v1067_v47 }
  0x59   :  { %v396_v9 = vpack.c.bf16 %v362_v61, %v361_v60  ;;  %v219_v59 = vmul.f32 %v1468_v10, %v1100_v51  ;;  %v234_v60 = vmul.f32 %v1468_v10, %v1131_v52  ;;  %v235_v61 = vmul.f32 %v1468_v10, %v1132_v53 }
  0x5a   :  { %v253_v62 = vadd.f32 %v1475_v20, %v186_v54  ;;  %v254_v63 = vadd.f32 %v1475_v20, %v187_v55  ;;  %v269_v0 = vadd.f32 %v1475_v20, %v202_v56  ;;  %v334_v10 = vmax.f32 %v270_v1, 0.0 }
  0x5b   :  { %v286_v3 = vadd.f32 %v1475_v20, %v219_v59 }
  0x5c   :  { %v317_v6 = vmax.f32 %v253_v62, 0.0  ;;  %v318_v7 = vmax.f32 %v254_v63, 0.0 }
  0x5d   :  { %v350_v11 = vmax.f32 %v286_v3, 0.0 }
  0x5e   :  { %v374_v14 = vpack.c.bf16 %v318_v7, %v317_v6 }
  0x65   :  { %491 = vmatmul.bf16.gmra.mxu0 %v371_v24  ;;  %531 = vmatmul.bf16.gmra.mxu1 %v379_v25  ;;  %v267_v24 = vadd.f32 %v1475_v20, %v200_v15  ;;  %v268_v25 = vadd.f32 %v1475_v20, %v201_v16 }
  0x66   :  { %571 = vmatmul.bf16.gmra.mxu2 %v387_v28  ;;  %611 = vmatmul.bf16.gmra.mxu3 %v395_v32  ;;  %v299_v28 = vadd.f32 %v1475_v20, %v232_v19 }
  0x67   :  { %v331_v32 = vmax.f32 %v267_v24, 0.0  ;;  %v332_v33 = vmax.f32 %v268_v25, 0.0 }
  0x68   :  { %v363_v37 = vmax.f32 %v299_v28, 0.0 }
  0x69   :  { %v381_v43 = vpack.c.bf16 %v332_v33, %v331_v32 }
  0x6a   :  { %v397_v50 = vpack.c.bf16 %v364_v38, %v363_v37 }
  0x75   :  { %496 = vmatmul.bf16.gmra.mxu0 %v372_v4  ;;  %536 = vmatmul.bf16.gmra.mxu1 %v380_v5  ;;  %v301_v4 = vadd.f32 %v1475_v20, %v234_v60  ;;  %v302_v5 = vadd.f32 %v1475_v20, %v235_v61  ;;  %v1690_v20 = vld [vmem:[%s1925_s4] ss:$0 sm:$0xff] }
  0x76   :  { %576 = vmatmul.bf16.gmra.mxu2 %v388_v8  ;;  %616 = vmatmul.bf16.gmra.mxu3 %v396_v9  ;;  %v333_v8 = vmax.f32 %v269_v0, 0.0  ;;  %v349_v9 = vmax.f32 %v285_v2, 0.0 }
  0x77   :  { %v365_v12 = vmax.f32 %v301_v4, 0.0  ;;  %v366_v13 = vmax.f32 %v302_v5, 0.0 }
  0x78   :  { %v382_v15 = vpack.c.bf16 %v334_v10, %v333_v8  ;;  %v390_v16 = vpack.c.bf16 %v350_v11, %v349_v9 }
  0x79   :  { %v398_v17 = vpack.c.bf16 %v366_v13, %v365_v12 }
  0x85   :  { %501 = vmatmul.bf16.gmra.mxu0 %v373_v42  ;;  %541 = vmatmul.bf16.gmra.mxu1 %v381_v43 }
  0x86   :  { %581 = vmatmul.bf16.gmra.mxu2 %v389_v46  ;;  %621 = vmatmul.bf16.gmra.mxu3 %v397_v50 }
  0x95   :  { %506 = vmatmul.bf16.gmra.mxu0 %v374_v14  ;;  %546 = vmatmul.bf16.gmra.mxu1 %v382_v15 }
  0x96   :  { %586 = vmatmul.bf16.gmra.mxu2 %v390_v16  ;;  %626 = vmatmul.bf16.gmra.mxu3 %v398_v17 }
  0xa2   :  { %v472_v18 = vpop.f32.mrf.mxu0  ;;  %v512_v19 = vpop.f32.mrf.mxu1 }
  0xa3   :  { %v636_v21 = vmul.f32 %v1690_v20, %v472_v18  ;;  %v652_v23 = vmul.f32 %v1690_v20, %v512_v19 }
  0xa5   :  { %v704_v28 = vadd.f32 %v1696_v22, %v636_v21  ;;  %v720_v29 = vadd.f32 %v1696_v22, %v652_v23 }
  0xa7   :  { %v768_v36 = vmax.f32 %v704_v28, 0.0  ;;  %v784_v37 = vmax.f32 %v720_v29, 0.0 }
  0xa9   :  { %v552_v24 = vpop.f32.mrf.mxu2  ;;  %v592_v25 = vpop.f32.mrf.mxu3 }
  0xaa   :  { %v474_v26 = vpop.f32.mrf.mxu0  ;;  %v514_v27 = vpop.f32.mrf.mxu1  ;;  %v668_v34 = vmul.f32 %v1690_v20, %v552_v24  ;;  %v684_v35 = vmul.f32 %v1690_v20, %v592_v25 }
  0xab   :  { %v637_v30 = vmul.f32 %v1690_v20, %v474_v26  ;;  %v653_v31 = vmul.f32 %v1690_v20, %v514_v27 }
  0xac   :  { %v736_v44 = vadd.f32 %v1696_v22, %v668_v34  ;;  %v752_v45 = vadd.f32 %v1696_v22, %v684_v35 }
  0xad   :  { %v705_v32 = vadd.f32 %v1696_v22, %v637_v30  ;;  %v721_v33 = vadd.f32 %v1696_v22, %v653_v31 }
  0xae   :  { %v800_v52 = vmax.f32 %v736_v44, 0.0  ;;  %v816_v53 = vmax.f32 %v752_v45, 0.0 }
  0xaf   :  { %v769_v38 = vmax.f32 %v705_v32, 0.0  ;;  %v785_v39 = vmax.f32 %v721_v33, 0.0 }
  0xb1   :  { %v1136_v40 = vpack.c.bf16 %v769_v38, %v768_v36  ;;  %v1176_v41 = vpack.c.bf16 %v785_v39, %v784_v37  ;;  %v554_v42 = vpop.f32.mrf.mxu2  ;;  %v594_v43 = vpop.f32.mrf.mxu3 }
  0xb2   :  { %v669_v46 = vmul.f32 %v1690_v20, %v554_v42  ;;  %v685_v47 = vmul.f32 %v1690_v20, %v594_v43  ;;  %v477_v48 = vpop.f32.mrf.mxu0  ;;  %v517_v49 = vpop.f32.mrf.mxu1 }
  0xb3   :  { %1137 = vst [vmem:[%s1927_s6] sm:$0xff] %v1136_v40   ;;  %v638_v56 = vmul.f32 %v1690_v20, %v477_v48  ;;  %v654_v57 = vmul.f32 %v1690_v20, %v517_v49 }
  0xb4   :  { %1331 = vst [vmem:[%s1927_s6 + $0x40] sm:$0xff] %v1176_v41   ;;  %v737_v50 = vadd.f32 %v1696_v22, %v669_v46  ;;  %v753_v51 = vadd.f32 %v1696_v22, %v685_v47 }
  0xb5   :  { %v706_v0 = vadd.f32 %v1696_v22, %v638_v56  ;;  %v722_v1 = vadd.f32 %v1696_v22, %v654_v57 }
  0xb6   :  { %v801_v54 = vmax.f32 %v737_v50, 0.0  ;;  %v817_v55 = vmax.f32 %v753_v51, 0.0 }
  0xb7   :  { %v770_v8 = vmax.f32 %v706_v0, 0.0  ;;  %v786_v10 = vmax.f32 %v722_v1, 0.0 }
  0xb8   :  { %v1216_v58 = vpack.c.bf16 %v801_v54, %v800_v52  ;;  %v1256_v59 = vpack.c.bf16 %v817_v55, %v816_v53 }
  0xb9   :  { %v557_v60 = vpop.f32.mrf.mxu2  ;;  %v597_v61 = vpop.f32.mrf.mxu3 }
  0xba   :  { %1339 = vst [vmem:[%s1927_s6 + $0x80] sm:$0xff] %v1216_v58   ;;  %v479_v62 = vpop.f32.mrf.mxu0  ;;  %v519_v63 = vpop.f32.mrf.mxu1  ;;  %v670_v6 = vmul.f32 %v1690_v20, %v557_v60  ;;  %v686_v7 = vmul.f32 %v1690_v20, %v597_v61 }
  0xbb   :  { %1347 = vst [vmem:[%s1927_s6 + $0xc0] sm:$0xff] %v1256_v59   ;;  %v639_v2 = vmul.f32 %v1690_v20, %v479_v62  ;;  %v655_v3 = vmul.f32 %v1690_v20, %v519_v63 }
  0xbc   :  { %v738_v16 = vadd.f32 %v1696_v22, %v670_v6  ;;  %v754_v17 = vadd.f32 %v1696_v22, %v686_v7 }
  0xbd   :  { %v707_v4 = vadd.f32 %v1696_v22, %v639_v2  ;;  %v723_v5 = vadd.f32 %v1696_v22, %v655_v3 }
  0xbe   :  { %v802_v26 = vmax.f32 %v738_v16, 0.0  ;;  %v818_v27 = vmax.f32 %v754_v17, 0.0 }
  0xbf   :  { %v771_v9 = vmax.f32 %v707_v4, 0.0  ;;  %v787_v11 = vmax.f32 %v723_v5, 0.0 }
  0xc1   :  { %v1141_v12 = vpack.c.bf16 %v771_v9, %v770_v8  ;;  %v1181_v13 = vpack.c.bf16 %v787_v11, %v786_v10  ;;  %v559_v14 = vpop.f32.mrf.mxu2  ;;  %v599_v15 = vpop.f32.mrf.mxu3 }
  0xc2   :  { %v671_v18 = vmul.f32 %v1690_v20, %v559_v14  ;;  %v687_v19 = vmul.f32 %v1690_v20, %v599_v15  ;;  %v482_v21 = vpop.f32.mrf.mxu0  ;;  %v522_v23 = vpop.f32.mrf.mxu1 }
  0xc3   :  { %1324 = vst [vmem:[%s1927_s6 + $0x8] sm:$0xff] %v1141_v12   ;;  %v640_v30 = vmul.f32 %v1690_v20, %v482_v21  ;;  %v656_v31 = vmul.f32 %v1690_v20, %v522_v23 }
  0xc4   :  { %1332 = vst [vmem:[%s1927_s6 + $0x48] sm:$0xff] %v1181_v13   ;;  %v739_v24 = vadd.f32 %v1696_v22, %v671_v18  ;;  %v755_v25 = vadd.f32 %v1696_v22, %v687_v19 }
  0xc5   :  { %v708_v38 = vadd.f32 %v1696_v22, %v640_v30  ;;  %v724_v39 = vadd.f32 %v1696_v22, %v656_v31 }
  0xc6   :  { %v803_v28 = vmax.f32 %v739_v24, 0.0  ;;  %v819_v29 = vmax.f32 %v755_v25, 0.0 }
  0xc7   :  { %v772_v46 = vmax.f32 %v708_v38, 0.0  ;;  %v788_v47 = vmax.f32 %v724_v39, 0.0 }
  0xc8   :  { %v1221_v32 = vpack.c.bf16 %v803_v28, %v802_v26  ;;  %v1261_v33 = vpack.c.bf16 %v819_v29, %v818_v27 }
  0xc9   :  { %v562_v34 = vpop.f32.mrf.mxu2  ;;  %v602_v35 = vpop.f32.mrf.mxu3 }
  0xca   :  { %1340 = vst [vmem:[%s1927_s6 + $0x88] sm:$0xff] %v1221_v32   ;;  %v484_v36 = vpop.f32.mrf.mxu0  ;;  %v524_v37 = vpop.f32.mrf.mxu1  ;;  %v672_v44 = vmul.f32 %v1690_v20, %v562_v34  ;;  %v688_v45 = vmul.f32 %v1690_v20, %v602_v35 }
  0xcb   :  { %1348 = vst [vmem:[%s1927_s6 + $0xc8] sm:$0xff] %v1261_v33   ;;  %v641_v40 = vmul.f32 %v1690_v20, %v484_v36  ;;  %v657_v41 = vmul.f32 %v1690_v20, %v524_v37 }
  0xcc   :  { %v740_v54 = vadd.f32 %v1696_v22, %v672_v44  ;;  %v756_v55 = vadd.f32 %v1696_v22, %v688_v45 }
  0xcd   :  { %v709_v42 = vadd.f32 %v1696_v22, %v641_v40  ;;  %v725_v43 = vadd.f32 %v1696_v22, %v657_v41 }
  0xce   :  { %v804_v62 = vmax.f32 %v740_v54, 0.0  ;;  %v820_v63 = vmax.f32 %v756_v55, 0.0 }
  0xcf   :  { %v773_v48 = vmax.f32 %v709_v42, 0.0  ;;  %v789_v49 = vmax.f32 %v725_v43, 0.0 }
  0xd1   :  { %v1146_v50 = vpack.c.bf16 %v773_v48, %v772_v46  ;;  %v1186_v51 = vpack.c.bf16 %v789_v49, %v788_v47  ;;  %v564_v52 = vpop.f32.mrf.mxu2  ;;  %v604_v53 = vpop.f32.mrf.mxu3 }
  0xd2   :  { %v673_v56 = vmul.f32 %v1690_v20, %v564_v52  ;;  %v689_v57 = vmul.f32 %v1690_v20, %v604_v53  ;;  %v487_v58 = vpop.f32.mrf.mxu0  ;;  %v527_v59 = vpop.f32.mrf.mxu1 }
  0xd3   :  { %1325 = vst [vmem:[%s1927_s6 + $0x10] sm:$0xff] %v1146_v50   ;;  %v642_v2 = vmul.f32 %v1690_v20, %v487_v58  ;;  %v658_v3 = vmul.f32 %v1690_v20, %v527_v59 }
  0xd4   :  { %1333 = vst [vmem:[%s1927_s6 + $0x50] sm:$0xff] %v1186_v51   ;;  %v741_v60 = vadd.f32 %v1696_v22, %v673_v56  ;;  %v757_v61 = vadd.f32 %v1696_v22, %v689_v57 }
  0xd5   :  { %v710_v9 = vadd.f32 %v1696_v22, %v642_v2  ;;  %v726_v11 = vadd.f32 %v1696_v22, %v658_v3 }
  0xd6   :  { %v805_v0 = vmax.f32 %v741_v60, 0.0  ;;  %v821_v1 = vmax.f32 %v757_v61, 0.0 }
  0xd7   :  { %v774_v18 = vmax.f32 %v710_v9, 0.0  ;;  %v790_v19 = vmax.f32 %v726_v11, 0.0 }
  0xd8   :  { %v1226_v4 = vpack.c.bf16 %v805_v0, %v804_v62  ;;  %v1266_v5 = vpack.c.bf16 %v821_v1, %v820_v63 }
  0xd9   :  { %v567_v6 = vpop.f32.mrf.mxu2  ;;  %v607_v7 = vpop.f32.mrf.mxu3 }
  0xda   :  { %1341 = vst [vmem:[%s1927_s6 + $0x90] sm:$0xff] %v1226_v4   ;;  %v489_v8 = vpop.f32.mrf.mxu0  ;;  %v529_v10 = vpop.f32.mrf.mxu1  ;;  %v674_v16 = vmul.f32 %v1690_v20, %v567_v6  ;;  %v690_v17 = vmul.f32 %v1690_v20, %v607_v7 }
  0xdb   :  { %1349 = vst [vmem:[%s1927_s6 + $0xd0] sm:$0xff] %v1266_v5   ;;  %v643_v12 = vmul.f32 %v1690_v20, %v489_v8  ;;  %v659_v13 = vmul.f32 %v1690_v20, %v529_v10 }
  0xdc   :  { %v742_v28 = vadd.f32 %v1696_v22, %v674_v16  ;;  %v758_v29 = vadd.f32 %v1696_v22, %v690_v17 }
  0xdd   :  { %v711_v14 = vadd.f32 %v1696_v22, %v643_v12  ;;  %v727_v15 = vadd.f32 %v1696_v22, %v659_v13 }
  0xde   :  { %v806_v36 = vmax.f32 %v742_v28, 0.0  ;;  %v822_v37 = vmax.f32 %v758_v29, 0.0 }
  0xdf   :  { %v775_v21 = vmax.f32 %v711_v14, 0.0  ;;  %v791_v23 = vmax.f32 %v727_v15, 0.0 }
  0xe1   :  { %v1151_v24 = vpack.c.bf16 %v775_v21, %v774_v18  ;;  %v1191_v25 = vpack.c.bf16 %v791_v23, %v790_v19  ;;  %v569_v26 = vpop.f32.mrf.mxu2  ;;  %v609_v27 = vpop.f32.mrf.mxu3 }
  0xe2   :  { %v675_v30 = vmul.f32 %v1690_v20, %v569_v26  ;;  %v691_v31 = vmul.f32 %v1690_v20, %v609_v27  ;;  %v492_v32 = vpop.f32.mrf.mxu0  ;;  %v532_v33 = vpop.f32.mrf.mxu1 }
  0xe3   :  { %1326 = vst [vmem:[%s1927_s6 + $0x18] sm:$0xff] %v1151_v24   ;;  %v644_v40 = vmul.f32 %v1690_v20, %v492_v32  ;;  %v660_v41 = vmul.f32 %v1690_v20, %v532_v33 }
  0xe4   :  { %1334 = vst [vmem:[%s1927_s6 + $0x58] sm:$0xff] %v1191_v25   ;;  %v743_v34 = vadd.f32 %v1696_v22, %v675_v30  ;;  %v759_v35 = vadd.f32 %v1696_v22, %v691_v31 }
  0xe5   :  { %v712_v48 = vadd.f32 %v1696_v22, %v644_v40  ;;  %v728_v49 = vadd.f32 %v1696_v22, %v660_v41 }
  0xe6   :  { %v807_v38 = vmax.f32 %v743_v34, 0.0  ;;  %v823_v39 = vmax.f32 %v759_v35, 0.0 }
  0xe7   :  { %v776_v56 = vmax.f32 %v712_v48, 0.0  ;;  %v792_v57 = vmax.f32 %v728_v49, 0.0 }
  0xe8   :  { %v1231_v42 = vpack.c.bf16 %v807_v38, %v806_v36  ;;  %v1271_v43 = vpack.c.bf16 %v823_v39, %v822_v37 }
  0xe9   :  { %v572_v44 = vpop.f32.mrf.mxu2  ;;  %v612_v45 = vpop.f32.mrf.mxu3 }
  0xea   :  { %1342 = vst [vmem:[%s1927_s6 + $0x98] sm:$0xff] %v1231_v42   ;;  %v494_v46 = vpop.f32.mrf.mxu0  ;;  %v534_v47 = vpop.f32.mrf.mxu1  ;;  %v676_v54 = vmul.f32 %v1690_v20, %v572_v44  ;;  %v692_v55 = vmul.f32 %v1690_v20, %v612_v45 }
  0xeb   :  { %1350 = vst [vmem:[%s1927_s6 + $0xd8] sm:$0xff] %v1271_v43   ;;  %v645_v50 = vmul.f32 %v1690_v20, %v494_v46  ;;  %v661_v51 = vmul.f32 %v1690_v20, %v534_v47 }
  0xec   :  { %v744_v0 = vadd.f32 %v1696_v22, %v676_v54  ;;  %v760_v1 = vadd.f32 %v1696_v22, %v692_v55 }
  0xed   :  { %v713_v52 = vadd.f32 %v1696_v22, %v645_v50  ;;  %v729_v53 = vadd.f32 %v1696_v22, %v661_v51 }
  0xee   :  { %v808_v8 = vmax.f32 %v744_v0, 0.0  ;;  %v824_v10 = vmax.f32 %v760_v1, 0.0 }
  0xef   :  { %v777_v58 = vmax.f32 %v713_v52, 0.0  ;;  %v793_v59 = vmax.f32 %v729_v53, 0.0 }
  0xf1   :  { %v1156_v60 = vpack.c.bf16 %v777_v58, %v776_v56  ;;  %v1196_v61 = vpack.c.bf16 %v793_v59, %v792_v57  ;;  %v574_v62 = vpop.f32.mrf.mxu2  ;;  %v614_v63 = vpop.f32.mrf.mxu3 }
  0xf2   :  { %v677_v2 = vmul.f32 %v1690_v20, %v574_v62  ;;  %v693_v3 = vmul.f32 %v1690_v20, %v614_v63  ;;  %v497_v4 = vpop.f32.mrf.mxu0  ;;  %v537_v5 = vpop.f32.mrf.mxu1 }
  0xf3   :  { %1327 = vst [vmem:[%s1927_s6 + $0x20] sm:$0xff] %v1156_v60   ;;  %v646_v12 = vmul.f32 %v1690_v20, %v497_v4  ;;  %v662_v13 = vmul.f32 %v1690_v20, %v537_v5 }
  0xf4   :  { %1335 = vst [vmem:[%s1927_s6 + $0x60] sm:$0xff] %v1196_v61   ;;  %v745_v6 = vadd.f32 %v1696_v22, %v677_v2  ;;  %v761_v7 = vadd.f32 %v1696_v22, %v693_v3 }
  0xf5   :  { %v714_v21 = vadd.f32 %v1696_v22, %v646_v12  ;;  %v730_v23 = vadd.f32 %v1696_v22, %v662_v13 }
  0xf6   :  { %v809_v9 = vmax.f32 %v745_v6, 0.0  ;;  %v825_v11 = vmax.f32 %v761_v7, 0.0 }
  0xf7   :  { %v778_v30 = vmax.f32 %v714_v21, 0.0  ;;  %v794_v31 = vmax.f32 %v730_v23, 0.0 }
  0xf8   :  { %v1236_v14 = vpack.c.bf16 %v809_v9, %v808_v8  ;;  %v1276_v15 = vpack.c.bf16 %v825_v11, %v824_v10 }
  0xf9   :  { %v577_v16 = vpop.f32.mrf.mxu2  ;;  %v617_v17 = vpop.f32.mrf.mxu3 }
  0xfa   :  { %1343 = vst [vmem:[%s1927_s6 + $0xa0] sm:$0xff] %v1236_v14   ;;  %v499_v18 = vpop.f32.mrf.mxu0  ;;  %v539_v19 = vpop.f32.mrf.mxu1  ;;  %v678_v28 = vmul.f32 %v1690_v20, %v577_v16  ;;  %v694_v29 = vmul.f32 %v1690_v20, %v617_v17 }
  0xfb   :  { %1351 = vst [vmem:[%s1927_s6 + $0xe0] sm:$0xff] %v1276_v15   ;;  %v647_v24 = vmul.f32 %v1690_v20, %v499_v18  ;;  %v663_v25 = vmul.f32 %v1690_v20, %v539_v19 }
  0xfc   :  { %v746_v38 = vadd.f32 %v1696_v22, %v678_v28  ;;  %v762_v39 = vadd.f32 %v1696_v22, %v694_v29 }
  0xfd   :  { %v715_v26 = vadd.f32 %v1696_v22, %v647_v24  ;;  %v731_v27 = vadd.f32 %v1696_v22, %v663_v25 }
  0xfe   :  { %v810_v46 = vmax.f32 %v746_v38, 0.0  ;;  %v826_v47 = vmax.f32 %v762_v39, 0.0 }
  0xff   :  { %v779_v32 = vmax.f32 %v715_v26, 0.0  ;;  %v795_v33 = vmax.f32 %v731_v27, 0.0 }
 0x101   :  { %v1161_v34 = vpack.c.bf16 %v779_v32, %v778_v30  ;;  %v1201_v35 = vpack.c.bf16 %v795_v33, %v794_v31  ;;  %v579_v36 = vpop.f32.mrf.mxu2  ;;  %v619_v37 = vpop.f32.mrf.mxu3 }
 0x102   :  { %v679_v40 = vmul.f32 %v1690_v20, %v579_v36  ;;  %v695_v41 = vmul.f32 %v1690_v20, %v619_v37  ;;  %v502_v42 = vpop.f32.mrf.mxu0  ;;  %v542_v43 = vpop.f32.mrf.mxu1 }
 0x103   :  { %1328 = vst [vmem:[%s1927_s6 + $0x28] sm:$0xff] %v1161_v34   ;;  %v648_v50 = vmul.f32 %v1690_v20, %v502_v42  ;;  %v664_v51 = vmul.f32 %v1690_v20, %v542_v43 }
 0x104   :  { %1336 = vst [vmem:[%s1927_s6 + $0x68] sm:$0xff] %v1201_v35   ;;  %v747_v44 = vadd.f32 %v1696_v22, %v679_v40  ;;  %v763_v45 = vadd.f32 %v1696_v22, %v695_v41 }
 0x105   :  { %v716_v58 = vadd.f32 %v1696_v22, %v648_v50  ;;  %v732_v59 = vadd.f32 %v1696_v22, %v664_v51 }
 0x106   :  { %v811_v48 = vmax.f32 %v747_v44, 0.0  ;;  %v827_v49 = vmax.f32 %v763_v45, 0.0 }
 0x107   :  { %v780_v2 = vmax.f32 %v716_v58, 0.0  ;;  %v796_v3 = vmax.f32 %v732_v59, 0.0 }
 0x108   :  { %v1241_v52 = vpack.c.bf16 %v811_v48, %v810_v46  ;;  %v1281_v53 = vpack.c.bf16 %v827_v49, %v826_v47 }
 0x109   :  { %v582_v54 = vpop.f32.mrf.mxu2  ;;  %v622_v55 = vpop.f32.mrf.mxu3 }
 0x10a   :  { %1344 = vst [vmem:[%s1927_s6 + $0xa8] sm:$0xff] %v1241_v52   ;;  %v504_v56 = vpop.f32.mrf.mxu0  ;;  %v544_v57 = vpop.f32.mrf.mxu1  ;;  %v680_v0 = vmul.f32 %v1690_v20, %v582_v54  ;;  %v696_v1 = vmul.f32 %v1690_v20, %v622_v55 }
 0x10b   :  { %1352 = vst [vmem:[%s1927_s6 + $0xe8] sm:$0xff] %v1281_v53   ;;  %v649_v60 = vmul.f32 %v1690_v20, %v504_v56  ;;  %v665_v61 = vmul.f32 %v1690_v20, %v544_v57 }
 0x10c   :  { %v748_v9 = vadd.f32 %v1696_v22, %v680_v0  ;;  %v764_v11 = vadd.f32 %v1696_v22, %v696_v1 }
 0x10d   :  { %v717_v62 = vadd.f32 %v1696_v22, %v649_v60  ;;  %v733_v63 = vadd.f32 %v1696_v22, %v665_v61 }
 0x10e   :  { %v812_v18 = vmax.f32 %v748_v9, 0.0  ;;  %v828_v19 = vmax.f32 %v764_v11, 0.0 }
 0x10f   :  { %v781_v4 = vmax.f32 %v717_v62, 0.0  ;;  %v797_v5 = vmax.f32 %v733_v63, 0.0 }
 0x111   :  { %v1166_v6 = vpack.c.bf16 %v781_v4, %v780_v2  ;;  %v1206_v7 = vpack.c.bf16 %v797_v5, %v796_v3  ;;  %v584_v8 = vpop.f32.mrf.mxu2  ;;  %v624_v10 = vpop.f32.mrf.mxu3 }
 0x112   :  { %v681_v12 = vmul.f32 %v1690_v20, %v584_v8  ;;  %v697_v13 = vmul.f32 %v1690_v20, %v624_v10  ;;  %v507_v14 = vpop.f32.mrf.mxu0  ;;  %v547_v15 = vpop.f32.mrf.mxu1 }
 0x113   :  { %1329 = vst [vmem:[%s1927_s6 + $0x30] sm:$0xff] %v1166_v6   ;;  %v650_v24 = vmul.f32 %v1690_v20, %v507_v14  ;;  %v666_v25 = vmul.f32 %v1690_v20, %v547_v15 }
 0x114   :  { %1337 = vst [vmem:[%s1927_s6 + $0x70] sm:$0xff] %v1206_v7   ;;  %v749_v16 = vadd.f32 %v1696_v22, %v681_v12  ;;  %v765_v17 = vadd.f32 %v1696_v22, %v697_v13 }
 0x115   :  { %v718_v32 = vadd.f32 %v1696_v22, %v650_v24  ;;  %v734_v33 = vadd.f32 %v1696_v22, %v666_v25 }
 0x116   :  { %v813_v21 = vmax.f32 %v749_v16, 0.0  ;;  %v829_v23 = vmax.f32 %v765_v17, 0.0 }
 0x117   :  { %v782_v40 = vmax.f32 %v718_v32, 0.0  ;;  %v798_v41 = vmax.f32 %v734_v33, 0.0 }
 0x118   :  { %v1246_v26 = vpack.c.bf16 %v813_v21, %v812_v18  ;;  %v1286_v27 = vpack.c.bf16 %v829_v23, %v828_v19 }
 0x119   :  { %v587_v28 = vpop.f32.mrf.mxu2  ;;  %v627_v29 = vpop.f32.mrf.mxu3 }
 0x11a   :  { %1345 = vst [vmem:[%s1927_s6 + $0xb0] sm:$0xff] %v1246_v26   ;;  %v509_v30 = vpop.f32.mrf.mxu0  ;;  %v549_v31 = vpop.f32.mrf.mxu1  ;;  %v682_v38 = vmul.f32 %v1690_v20, %v587_v28  ;;  %v698_v39 = vmul.f32 %v1690_v20, %v627_v29 }
 0x11b   :  { %1353 = vst [vmem:[%s1927_s6 + $0xf0] sm:$0xff] %v1286_v27   ;;  %v651_v34 = vmul.f32 %v1690_v20, %v509_v30  ;;  %v667_v35 = vmul.f32 %v1690_v20, %v549_v31 }
 0x11c   :  { %v750_v48 = vadd.f32 %v1696_v22, %v682_v38  ;;  %v766_v49 = vadd.f32 %v1696_v22, %v698_v39 }
 0x11d   :  { %v719_v36 = vadd.f32 %v1696_v22, %v651_v34  ;;  %v735_v37 = vadd.f32 %v1696_v22, %v667_v35 }
 0x11e   :  { %v814_v54 = vmax.f32 %v750_v48, 0.0  ;;  %v830_v55 = vmax.f32 %v766_v49, 0.0 }
 0x11f   :  { %v783_v42 = vmax.f32 %v719_v36, 0.0  ;;  %v799_v43 = vmax.f32 %v735_v37, 0.0 }
 0x121   :  { %v1171_v44 = vpack.c.bf16 %v783_v42, %v782_v40  ;;  %v1211_v45 = vpack.c.bf16 %v799_v43, %v798_v41  ;;  %v589_v46 = vpop.f32.mrf.mxu2  ;;  %v629_v47 = vpop.f32.mrf.mxu3 }
 0x122   :  { %v683_v50 = vmul.f32 %v1690_v20, %v589_v46  ;;  %v699_v51 = vmul.f32 %v1690_v20, %v629_v47 }
 0x123   :  { %1330 = vst [vmem:[%s1927_s6 + $0x38] sm:$0xff] %v1171_v44  }
 0x124   :  { %1338 = vst [vmem:[%s1927_s6 + $0x78] sm:$0xff] %v1211_v45   ;;  %v751_v52 = vadd.f32 %v1696_v22, %v683_v50  ;;  %v767_v53 = vadd.f32 %v1696_v22, %v699_v51 }
 0x126   :  { %v815_v56 = vmax.f32 %v751_v52, 0.0  ;;  %v831_v57 = vmax.f32 %v767_v53, 0.0 }
 0x128   :  { %v1251_v58 = vpack.c.bf16 %v815_v56, %v814_v54  ;;  %v1291_v59 = vpack.c.bf16 %v831_v57, %v830_v55 }
 0x12a   :  { %1346 = vst [vmem:[%s1927_s6 + $0xb8] sm:$0xff] %v1251_v58  }
 0x12b   :  { %1354 = vst [vmem:[%s1927_s6 + $0xf8] sm:$0xff] %v1291_v59  }
 0x12c   :  { %964 = vsyncpa [#allocation3], 1 }

// kernel: _lambda_.19
= control target key start
LH: loop header
LB: loop body
LE: loop exit
PB: predicated region body
PF: predicated region fallthrough
CT: control target
= control target key end

     0   :  { %9 = vsyncpa [#allocation3], 0  ;;  %s1204_s18 = smov [#allocation2]   ;;  %s1205_s20 = smov 64   ;;  %s1565_s0 = inlined_call_operand.vmem [shape: bf16[512,128], index: 0, kind: input, shape index: {}]   ;;  %s1566_s1 = inlined_call_operand.hbm [shape: bf16[128,128], index: 1, kind: input, shape index: {}]   ;;  %s1567_s2 = inlined_call_operand.vmem [shape: f32[1,128], index: 2, kind: input, shape index: {}]   ;;  %s1568_s3 = inlined_call_operand.vmem [shape: f32[1,128], index: 3, kind: input, shape index: {}]   ;;  %s1569_s4 = inlined_call_operand.vmem [shape: bf16[512,128], index: 4, kind: output, shape index: {}]  }
   0x1   :  { %s16_s17 = sshll.u32 %s1566_s1, 4  ;;  %s18_s19 = sshll.u32 %s1204_s18, 4  ;;  %s17_s17 = int_to_ptr.hbm [resolvable:$true] %s16_s17  ;;  %s19_s19 = int_to_ptr.vmem [resolvable:$true] %s18_s19 }
   0x2   :  { %s1206_s21 = smov 4  }
   0x3   :  { %24 = dma.hbm_to_vmem [thread:$0]  %s17_s17, 1024, %s19_s19, [#allocation3], %s1205_s20, %s1205_s20, %s1206_s21  }
   0x4   :  { %1202 = dma.done.wait [#allocation3], 1024  }
   0x5   :  { %1203 = vsyncadd [#allocation3], 4294966272  ;;  %v798_v0 = vld [vmem:[#allocation2 + $0x38] sm:$0xff]  ;;  %v797_v1 = vld [vmem:[#allocation2 + $0x30] sm:$0xff] }
   0x6   :  { %457 = vmatpush.bf16.msra.mxu0 %v798_v0  ;;  %1149 = vmatpush.bf16.msra.mxu1 %v798_v0  ;;  %v796_v2 = vld [vmem:[#allocation2 + $0x28] sm:$0xff]  ;;  %v800_v3 = vld [vmem:[%s1565_s0] sm:$0xff]   ;;  %v794_v15 = vld [vmem:[#allocation2 + $0x18] sm:$0xff] }
   0x7   :  { %1150 = vmatpush.bf16.msra.mxu2 %v798_v0  ;;  %1151 = vmatpush.bf16.msra.mxu3 %v798_v0  ;;  %v795_v4 = vld [vmem:[#allocation2 + $0x20] sm:$0xff]  ;;  %v801_v8 = vunpack.c.l.bf16 %v800_v3  ;;  %v802_v9 = vunpack.c.h.bf16 %v800_v3  ;;  %v793_v25 = vld [vmem:[#allocation2 + $0x10] sm:$0xff]  ;;  %v792_v34 = vld [vmem:[#allocation2 + $0x8] sm:$0xff] }
   0x8   :  { %v1094_v5 = vld [vmem:[%s1565_s0 + $0x40] sm:$0xff]   ;;  %v1087_v43 = vld [vmem:[%s1565_s0 + $0x8] sm:$0xff]  }
   0x9   :  { %v1102_v6 = vld [vmem:[%s1565_s0 + $0x80] sm:$0xff]   ;;  %v833_v11 = vunpack.c.l.bf16 %v1094_v5  ;;  %v834_v12 = vunpack.c.h.bf16 %v1094_v5  ;;  %v1095_v44 = vld [vmem:[%s1565_s0 + $0x48] sm:$0xff]   ;;  %v805_v51 = vunpack.c.l.bf16 %v1087_v43  ;;  %v806_v52 = vunpack.c.h.bf16 %v1087_v43 }
   0xa   :  { %458 = vmatpush.bf16.msra.mxu0 %v797_v1  ;;  %1152 = vmatpush.bf16.msra.mxu1 %v797_v1  ;;  %v1110_v7 = vld [vmem:[%s1565_s0 + $0xc0] sm:$0xff]   ;;  %v865_v13 = vunpack.c.l.bf16 %v1102_v6  ;;  %v866_v14 = vunpack.c.h.bf16 %v1102_v6  ;;  %v1103_v48 = vld [vmem:[%s1565_s0 + $0x88] sm:$0xff]   ;;  %v837_v53 = vunpack.c.l.bf16 %v1095_v44  ;;  %v838_v56 = vunpack.c.h.bf16 %v1095_v44 }
   0xb   :  { %1153 = vmatpush.bf16.msra.mxu2 %v797_v1  ;;  %1154 = vmatpush.bf16.msra.mxu3 %v797_v1  ;;  %v1250_v10 = vld [vmem:[%s1567_s2] ss:$0 sm:$0xff]  ;;  %v897_v16 = vunpack.c.l.bf16 %v1110_v7  ;;  %v898_v17 = vunpack.c.h.bf16 %v1110_v7  ;;  %v1111_v49 = vld [vmem:[%s1565_s0 + $0xc8] sm:$0xff]   ;;  %v869_v57 = vunpack.c.l.bf16 %v1103_v48  ;;  %v870_v59 = vunpack.c.h.bf16 %v1103_v48 }
   0xc   :  { %v166_v18 = vmul.f32 %v1250_v10, %v801_v8  ;;  %v167_v19 = vmul.f32 %v1250_v10, %v802_v9  ;;  %v1257_v20 = vld [vmem:[%s1568_s3] ss:$0 sm:$0xff]  ;;  %v182_v21 = vmul.f32 %v1250_v10, %v833_v11  ;;  %v183_v22 = vmul.f32 %v1250_v10, %v834_v12 }
   0xd   :  { %v198_v23 = vmul.f32 %v1250_v10, %v865_v13  ;;  %v199_v24 = vmul.f32 %v1250_v10, %v866_v14  ;;  %v214_v26 = vmul.f32 %v1250_v10, %v897_v16  ;;  %v215_v27 = vmul.f32 %v1250_v10, %v898_v17  ;;  %v791_v45 = vld [vmem:[#allocation2] sm:$0xff] }
   0xe   :  { %459 = vmatpush.bf16.msra.mxu0 %v796_v2  ;;  %1155 = vmatpush.bf16.msra.mxu1 %v796_v2  ;;  %v233_v28 = vadd.f32 %v1257_v20, %v166_v18  ;;  %v234_v29 = vadd.f32 %v1257_v20, %v167_v19  ;;  %v249_v30 = vadd.f32 %v1257_v20, %v182_v21  ;;  %v901_v60 = vunpack.c.l.bf16 %v1111_v49  ;;  %v1088_v19 = vld [vmem:[%s1565_s0 + $0x10] sm:$0xff]  }
   0xf   :  { %1156 = vmatpush.bf16.msra.mxu2 %v796_v2  ;;  %1157 = vmatpush.bf16.msra.mxu3 %v796_v2  ;;  %v250_v31 = vadd.f32 %v1257_v20, %v183_v22  ;;  %v265_v32 = vadd.f32 %v1257_v20, %v198_v23  ;;  %v266_v33 = vadd.f32 %v1257_v20, %v199_v24  ;;  %v902_v61 = vunpack.c.h.bf16 %v1111_v49  ;;  %v1096_v21 = vld [vmem:[%s1565_s0 + $0x50] sm:$0xff]  }
  0x10   :  { %v281_v35 = vadd.f32 %v1257_v20, %v214_v26  ;;  %v282_v36 = vadd.f32 %v1257_v20, %v215_v27  ;;  %v297_v37 = vmax.f32 %v233_v28, 0.0  ;;  %v298_v38 = vmax.f32 %v234_v29, 0.0  ;;  %v1104_v26 = vld [vmem:[%s1565_s0 + $0x90] sm:$0xff]  }
  0x11   :  { %v313_v39 = vmax.f32 %v249_v30, 0.0  ;;  %v314_v40 = vmax.f32 %v250_v31, 0.0  ;;  %v329_v41 = vmax.f32 %v265_v32, 0.0  ;;  %v330_v42 = vmax.f32 %v266_v33, 0.0  ;;  %v1112_v27 = vld [vmem:[%s1565_s0 + $0xd0] sm:$0xff]  }
  0x12   :  { %460 = vmatpush.bf16.msra.mxu0 %v795_v4  ;;  %1158 = vmatpush.bf16.msra.mxu1 %v795_v4  ;;  %v345_v46 = vmax.f32 %v281_v35, 0.0  ;;  %v346_v47 = vmax.f32 %v282_v36, 0.0  ;;  %v361_v50 = vpack.c.bf16 %v298_v38, %v297_v37  ;;  %v168_v62 = vmul.f32 %v1250_v10, %v805_v51 }
  0x13   :  { %1159 = vmatpush.bf16.msra.mxu2 %v795_v4  ;;  %1160 = vmatpush.bf16.msra.mxu3 %v795_v4  ;;  %v369_v54 = vpack.c.bf16 %v314_v40, %v313_v39  ;;  %v377_v55 = vpack.c.bf16 %v330_v42, %v329_v41  ;;  %v169_v63 = vmul.f32 %v1250_v10, %v806_v52  ;;  %v809_v28 = vunpack.c.l.bf16 %v1088_v19 }
  0x14   :  { %v385_v58 = vpack.c.bf16 %v346_v47, %v345_v46  ;;  %v184_v0 = vmul.f32 %v1250_v10, %v837_v53  ;;  %v185_v1 = vmul.f32 %v1250_v10, %v838_v56  ;;  %v200_v2 = vmul.f32 %v1250_v10, %v869_v57 }
  0x15   :  { %v201_v3 = vmul.f32 %v1250_v10, %v870_v59  ;;  %v216_v4 = vmul.f32 %v1250_v10, %v901_v60  ;;  %v217_v5 = vmul.f32 %v1250_v10, %v902_v61  ;;  %v235_v6 = vadd.f32 %v1257_v20, %v168_v62  ;;  %v1089_v62 = vld [vmem:[%s1565_s0 + $0x18] sm:$0xff]  }
  0x16   :  { %461 = vmatpush.bf16.msra.mxu0 %v794_v15  ;;  %1161 = vmatpush.bf16.msra.mxu1 %v794_v15  ;;  %v236_v7 = vadd.f32 %v1257_v20, %v169_v63  ;;  %v251_v8 = vadd.f32 %v1257_v20, %v184_v0  ;;  %v252_v9 = vadd.f32 %v1257_v20, %v185_v1  ;;  %v810_v29 = vunpack.c.h.bf16 %v1088_v19  ;;  %v1097_v1 = vld [vmem:[%s1565_s0 + $0x58] sm:$0xff]  }
  0x17   :  { %1162 = vmatpush.bf16.msra.mxu2 %v794_v15  ;;  %1163 = vmatpush.bf16.msra.mxu3 %v794_v15  ;;  %v267_v11 = vadd.f32 %v1257_v20, %v200_v2  ;;  %v268_v12 = vadd.f32 %v1257_v20, %v201_v3  ;;  %v283_v13 = vadd.f32 %v1257_v20, %v216_v4  ;;  %v299_v15 = vmax.f32 %v235_v6, 0.0  ;;  %v1105_v2 = vld [vmem:[%s1565_s0 + $0x98] sm:$0xff]  }
  0x18   :  { %v284_v14 = vadd.f32 %v1257_v20, %v217_v5  ;;  %v300_v16 = vmax.f32 %v236_v7, 0.0  ;;  %v315_v17 = vmax.f32 %v251_v8, 0.0  ;;  %v316_v18 = vmax.f32 %v252_v9, 0.0  ;;  %v1113_v3 = vld [vmem:[%s1565_s0 + $0xd8] sm:$0xff]  }
  0x19   :  { %v331_v22 = vmax.f32 %v267_v11, 0.0  ;;  %v332_v23 = vmax.f32 %v268_v12, 0.0  ;;  %v347_v24 = vmax.f32 %v283_v13, 0.0  ;;  %v841_v30 = vunpack.c.l.bf16 %v1096_v21 }
  0x1a   :  { %462 = vmatpush.bf16.msra.mxu0 %v793_v25  ;;  %1164 = vmatpush.bf16.msra.mxu1 %v793_v25  ;;  %v842_v31 = vunpack.c.h.bf16 %v1096_v21  ;;  %v362_v32 = vpack.c.bf16 %v300_v16, %v299_v15  ;;  %v370_v33 = vpack.c.bf16 %v316_v18, %v315_v17  ;;  %v874_v35 = vunpack.c.h.bf16 %v1104_v26 }
  0x1b   :  { %1165 = vmatpush.bf16.msra.mxu2 %v793_v25  ;;  %1166 = vmatpush.bf16.msra.mxu3 %v793_v25  ;;  %v348_v25 = vmax.f32 %v284_v14, 0.0  ;;  %v378_v36 = vpack.c.bf16 %v332_v23, %v331_v22  ;;  %v905_v38 = vunpack.c.l.bf16 %v1112_v27  ;;  %v906_v39 = vunpack.c.h.bf16 %v1112_v27 }
  0x1c   :  { %v170_v40 = vmul.f32 %v1250_v10, %v809_v28  ;;  %v171_v41 = vmul.f32 %v1250_v10, %v810_v29  ;;  %v186_v42 = vmul.f32 %v1250_v10, %v841_v30  ;;  %v187_v43 = vmul.f32 %v1250_v10, %v842_v31 }
  0x1d   :  { %v386_v37 = vpack.c.bf16 %v348_v25, %v347_v24  ;;  %v218_v46 = vmul.f32 %v1250_v10, %v905_v38  ;;  %v219_v47 = vmul.f32 %v1250_v10, %v906_v39  ;;  %v813_v6 = vunpack.c.l.bf16 %v1089_v62  ;;  %v1090_v38 = vld [vmem:[%s1565_s0 + $0x20] sm:$0xff]  }
  0x1e   :  { %463 = vmatpush.bf16.msra.mxu0 %v792_v34  ;;  %1167 = vmatpush.bf16.msra.mxu1 %v792_v34  ;;  %v237_v48 = vadd.f32 %v1257_v20, %v170_v40  ;;  %v238_v49 = vadd.f32 %v1257_v20, %v171_v41  ;;  %v254_v51 = vadd.f32 %v1257_v20, %v187_v43  ;;  %v814_v7 = vunpack.c.h.bf16 %v1089_v62  ;;  %v1098_v39 = vld [vmem:[%s1565_s0 + $0x60] sm:$0xff]  }
  0x1f   :  { %1168 = vmatpush.bf16.msra.mxu2 %v792_v34  ;;  %1169 = vmatpush.bf16.msra.mxu3 %v792_v34  ;;  %v873_v34 = vunpack.c.l.bf16 %v1104_v26  ;;  %v845_v9 = vunpack.c.l.bf16 %v1097_v1  ;;  %v846_v11 = vunpack.c.h.bf16 %v1097_v1  ;;  %v877_v12 = vunpack.c.l.bf16 %v1105_v2 }
  0x20   :  { %v301_v56 = vmax.f32 %v237_v48, 0.0  ;;  %v302_v57 = vmax.f32 %v238_v49, 0.0  ;;  %v318_v59 = vmax.f32 %v254_v51, 0.0  ;;  %v878_v14 = vunpack.c.h.bf16 %v1105_v2 }
  0x21   :  { %v202_v44 = vmul.f32 %v1250_v10, %v873_v34  ;;  %v909_v15 = vunpack.c.l.bf16 %v1113_v3  ;;  %v910_v16 = vunpack.c.h.bf16 %v1113_v3  ;;  %v172_v17 = vmul.f32 %v1250_v10, %v813_v6 }
  0x22   :  { %464 = vmatpush.bf16.msra.mxu0 %v791_v45  ;;  %1170 = vmatpush.bf16.msra.mxu1 %v791_v45  ;;  %v363_v4 = vpack.c.bf16 %v302_v57, %v301_v56  ;;  %v173_v18 = vmul.f32 %v1250_v10, %v814_v7  ;;  %v188_v19 = vmul.f32 %v1250_v10, %v845_v9  ;;  %v849_v48 = vunpack.c.l.bf16 %v1098_v39 }
  0x23   :  { %1171 = vmatpush.bf16.msra.mxu2 %v791_v45  ;;  %1172 = vmatpush.bf16.msra.mxu3 %v791_v45  ;;  %v203_v45 = vmul.f32 %v1250_v10, %v874_v35  ;;  %v269_v52 = vadd.f32 %v1257_v20, %v202_v44  ;;  %v189_v21 = vmul.f32 %v1250_v10, %v846_v11  ;;  %v1106_v44 = vld [vmem:[%s1565_s0 + $0xa0] sm:$0xff]   ;;  %v850_v49 = vunpack.c.h.bf16 %v1098_v39 }
  0x24   :  { %v204_v22 = vmul.f32 %v1250_v10, %v877_v12  ;;  %v205_v23 = vmul.f32 %v1250_v10, %v878_v14  ;;  %v220_v24 = vmul.f32 %v1250_v10, %v909_v15  ;;  %v221_v25 = vmul.f32 %v1250_v10, %v910_v16 }
  0x25   :  { %465 = vmatmul.bf16.vlgmr.msra.gmra.mxu0 %v361_v50  ;;  %505 = vmatmul.bf16.vlgmr.msra.gmra.mxu1 %v369_v54  ;;  %v253_v50 = vadd.f32 %v1257_v20, %v186_v42  ;;  %v270_v53 = vadd.f32 %v1257_v20, %v203_v45  ;;  %v285_v54 = vadd.f32 %v1257_v20, %v218_v46  ;;  %v333_v60 = vmax.f32 %v269_v52, 0.0  ;;  %v1114_v45 = vld [vmem:[%s1565_s0 + $0xe0] sm:$0xff]  }
  0x26   :  { %545 = vmatmul.bf16.vlgmr.msra.gmra.mxu2 %v377_v55  ;;  %585 = vmatmul.bf16.vlgmr.msra.gmra.mxu3 %v385_v58  ;;  %v286_v55 = vadd.f32 %v1257_v20, %v219_v47  ;;  %v239_v26 = vadd.f32 %v1257_v20, %v172_v17  ;;  %v240_v27 = vadd.f32 %v1257_v20, %v173_v18  ;;  %v817_v46 = vunpack.c.l.bf16 %v1090_v38  ;;  %v1091_v17 = vld [vmem:[%s1565_s0 + $0x28] sm:$0xff]  }
  0x27   :  { %v317_v58 = vmax.f32 %v253_v50, 0.0  ;;  %v334_v61 = vmax.f32 %v270_v53, 0.0  ;;  %v349_v63 = vmax.f32 %v285_v54, 0.0  ;;  %v255_v28 = vadd.f32 %v1257_v20, %v188_v19 }
  0x28   :  { %v350_v0 = vmax.f32 %v286_v55, 0.0  ;;  %v256_v29 = vadd.f32 %v1257_v20, %v189_v21  ;;  %v271_v30 = vadd.f32 %v1257_v20, %v204_v22  ;;  %v272_v31 = vadd.f32 %v1257_v20, %v205_v23  ;;  %v1099_v21 = vld [vmem:[%s1565_s0 + $0x68] sm:$0xff]  }
  0x29   :  { %v371_v5 = vpack.c.bf16 %v318_v59, %v317_v58  ;;  %v379_v8 = vpack.c.bf16 %v334_v61, %v333_v60  ;;  %v303_v34 = vmax.f32 %v239_v26, 0.0  ;;  %v304_v35 = vmax.f32 %v240_v27, 0.0  ;;  %v1107_v22 = vld [vmem:[%s1565_s0 + $0xa8] sm:$0xff]  }
  0x2a   :  { %v387_v13 = vpack.c.bf16 %v350_v0, %v349_v63  ;;  %v335_v40 = vmax.f32 %v271_v30, 0.0  ;;  %v336_v41 = vmax.f32 %v272_v31, 0.0  ;;  %v818_v47 = vunpack.c.h.bf16 %v1090_v38  ;;  %v1115_v23 = vld [vmem:[%s1565_s0 + $0xe8] sm:$0xff]  }
  0x2b   :  { %v364_v50 = vpack.c.bf16 %v304_v35, %v303_v34  ;;  %v881_v52 = vunpack.c.l.bf16 %v1106_v44  ;;  %v882_v53 = vunpack.c.h.bf16 %v1106_v44  ;;  %v913_v56 = vunpack.c.l.bf16 %v1114_v45 }
  0x2c   :  { %v380_v54 = vpack.c.bf16 %v336_v41, %v335_v40  ;;  %v914_v57 = vunpack.c.h.bf16 %v1114_v45  ;;  %v174_v58 = vmul.f32 %v1250_v10, %v817_v46  ;;  %v175_v59 = vmul.f32 %v1250_v10, %v818_v47 }
  0x2d   :  { %v190_v60 = vmul.f32 %v1250_v10, %v849_v48  ;;  %v191_v61 = vmul.f32 %v1250_v10, %v850_v49  ;;  %v206_v62 = vmul.f32 %v1250_v10, %v881_v52  ;;  %v207_v63 = vmul.f32 %v1250_v10, %v882_v53 }
  0x2e   :  { %v222_v0 = vmul.f32 %v1250_v10, %v913_v56  ;;  %v223_v1 = vmul.f32 %v1250_v10, %v914_v57  ;;  %v241_v2 = vadd.f32 %v1257_v20, %v174_v58  ;;  %v242_v3 = vadd.f32 %v1257_v20, %v175_v59  ;;  %v1092_v56 = vld [vmem:[%s1565_s0 + $0x30] sm:$0xff]  }
  0x2f   :  { %v273_v6 = vadd.f32 %v1257_v20, %v206_v62  ;;  %v274_v7 = vadd.f32 %v1257_v20, %v207_v63  ;;  %v821_v26 = vunpack.c.l.bf16 %v1091_v17  ;;  %v822_v27 = vunpack.c.h.bf16 %v1091_v17  ;;  %v1100_v57 = vld [vmem:[%s1565_s0 + $0x70] sm:$0xff]  }
  0x30   :  { %v290_v9 = vadd.f32 %v1257_v20, %v223_v1  ;;  %v305_v11 = vmax.f32 %v241_v2, 0.0  ;;  %v306_v12 = vmax.f32 %v242_v3, 0.0  ;;  %v854_v30 = vunpack.c.h.bf16 %v1099_v21  ;;  %v1108_v62 = vld [vmem:[%s1565_s0 + $0xb0] sm:$0xff]  }
  0x31   :  { %v337_v15 = vmax.f32 %v273_v6, 0.0  ;;  %v338_v16 = vmax.f32 %v274_v7, 0.0  ;;  %v885_v31 = vunpack.c.l.bf16 %v1107_v22  ;;  %v917_v34 = vunpack.c.l.bf16 %v1115_v23  ;;  %v1116_v63 = vld [vmem:[%s1565_s0 + $0xf0] sm:$0xff]  }
  0x32   :  { %v354_v19 = vmax.f32 %v290_v9, 0.0  ;;  %v918_v35 = vunpack.c.h.bf16 %v1115_v23  ;;  %v193_v39 = vmul.f32 %v1250_v10, %v854_v30  ;;  %v826_v1 = vunpack.c.h.bf16 %v1092_v56 }
  0x33   :  { %v208_v40 = vmul.f32 %v1250_v10, %v885_v31  ;;  %v857_v2 = vunpack.c.l.bf16 %v1100_v57  ;;  %v858_v3 = vunpack.c.h.bf16 %v1100_v57  ;;  %v889_v6 = vunpack.c.l.bf16 %v1108_v62 }
  0x34   :  { %v260_v47 = vadd.f32 %v1257_v20, %v193_v39  ;;  %v890_v7 = vunpack.c.h.bf16 %v1108_v62  ;;  %v1101_v39 = vld [vmem:[%s1565_s0 + $0x78] sm:$0xff]  }
  0x35   :  { %470 = vmatmul.bf16.gmra.mxu0 %v362_v32  ;;  %510 = vmatmul.bf16.gmra.mxu1 %v370_v33  ;;  %v287_v32 = vadd.f32 %v1257_v20, %v220_v24  ;;  %v288_v33 = vadd.f32 %v1257_v20, %v221_v25  ;;  %v365_v24 = vpack.c.bf16 %v306_v12, %v305_v11  ;;  %v921_v11 = vunpack.c.l.bf16 %v1116_v63 }
  0x36   :  { %550 = vmatmul.bf16.gmra.mxu2 %v378_v36  ;;  %590 = vmatmul.bf16.gmra.mxu3 %v386_v37  ;;  %v319_v36 = vmax.f32 %v255_v28, 0.0  ;;  %v320_v37 = vmax.f32 %v256_v29, 0.0  ;;  %v381_v28 = vpack.c.bf16 %v338_v16, %v337_v15  ;;  %v853_v29 = vunpack.c.l.bf16 %v1099_v21 }
  0x37   :  { %v351_v42 = vmax.f32 %v287_v32, 0.0  ;;  %v352_v43 = vmax.f32 %v288_v33, 0.0  ;;  %v886_v33 = vunpack.c.h.bf16 %v1107_v22  ;;  %v275_v48 = vadd.f32 %v1257_v20, %v208_v40  ;;  %v1109_v40 = vld [vmem:[%s1565_s0 + $0xb8] sm:$0xff]  }
  0x38   :  { %v372_v51 = vpack.c.bf16 %v320_v37, %v319_v36  ;;  %v176_v36 = vmul.f32 %v1250_v10, %v821_v26  ;;  %v177_v37 = vmul.f32 %v1250_v10, %v822_v27  ;;  %v192_v38 = vmul.f32 %v1250_v10, %v853_v29 }
  0x39   :  { %v388_v55 = vpack.c.bf16 %v352_v43, %v351_v42  ;;  %v209_v41 = vmul.f32 %v1250_v10, %v886_v33  ;;  %v224_v42 = vmul.f32 %v1250_v10, %v917_v34  ;;  %v225_v43 = vmul.f32 %v1250_v10, %v918_v35 }
  0x3a   :  { %v243_v44 = vadd.f32 %v1257_v20, %v176_v36  ;;  %v244_v45 = vadd.f32 %v1257_v20, %v177_v37  ;;  %v259_v46 = vadd.f32 %v1257_v20, %v192_v38  ;;  %v339_v58 = vmax.f32 %v275_v48, 0.0  ;;  %v1093_v36 = vld [vmem:[%s1565_s0 + $0x38] sm:$0xff]  }
  0x3b   :  { %v276_v49 = vadd.f32 %v1257_v20, %v209_v41  ;;  %v922_v12 = vunpack.c.h.bf16 %v1116_v63  ;;  %v194_v15 = vmul.f32 %v1250_v10, %v857_v2  ;;  %v195_v16 = vmul.f32 %v1250_v10, %v858_v3  ;;  %v1117_v41 = vld [vmem:[%s1565_s0 + $0xf8] sm:$0xff]  }
  0x3c   :  { %v307_v52 = vmax.f32 %v243_v44, 0.0  ;;  %v308_v53 = vmax.f32 %v244_v45, 0.0  ;;  %v210_v17 = vmul.f32 %v1250_v10, %v889_v6  ;;  %v829_v44 = vunpack.c.l.bf16 %v1093_v36 }
  0x3d   :  { %v340_v59 = vmax.f32 %v276_v49, 0.0  ;;  %v227_v21 = vmul.f32 %v1250_v10, %v922_v12  ;;  %v830_v45 = vunpack.c.h.bf16 %v1093_v36  ;;  %v862_v48 = vunpack.c.h.bf16 %v1101_v39 }
  0x3e   :  { %v277_v26 = vadd.f32 %v1257_v20, %v210_v17  ;;  %v893_v49 = vunpack.c.l.bf16 %v1109_v40 }
  0x3f   :  { %v294_v29 = vadd.f32 %v1257_v20, %v227_v21  ;;  %v197_v57 = vmul.f32 %v1250_v10, %v862_v48 }
  0x40   :  { %v341_v34 = vmax.f32 %v277_v26, 0.0 }
  0x41   :  { %v358_v38 = vmax.f32 %v294_v29, 0.0 }
  0x45   :  { %475 = vmatmul.bf16.gmra.mxu0 %v363_v4  ;;  %515 = vmatmul.bf16.gmra.mxu1 %v371_v5  ;;  %v257_v4 = vadd.f32 %v1257_v20, %v190_v60  ;;  %v258_v5 = vadd.f32 %v1257_v20, %v191_v61 }
  0x46   :  { %555 = vmatmul.bf16.gmra.mxu2 %v379_v8  ;;  %595 = vmatmul.bf16.gmra.mxu3 %v387_v13  ;;  %v289_v8 = vadd.f32 %v1257_v20, %v222_v0  ;;  %v825_v0 = vunpack.c.l.bf16 %v1092_v56 }
  0x47   :  { %v321_v13 = vmax.f32 %v257_v4, 0.0  ;;  %v322_v14 = vmax.f32 %v258_v5, 0.0  ;;  %v366_v4 = vpack.c.bf16 %v308_v53, %v307_v52  ;;  %v925_v52 = vunpack.c.l.bf16 %v1117_v41 }
  0x48   :  { %v353_v18 = vmax.f32 %v289_v8, 0.0  ;;  %v382_v8 = vpack.c.bf16 %v340_v59, %v339_v58  ;;  %v926_v53 = vunpack.c.h.bf16 %v1117_v41  ;;  %v212_v58 = vmul.f32 %v1250_v10, %v893_v49 }
  0x49   :  { %v373_v25 = vpack.c.bf16 %v322_v14, %v321_v13  ;;  %v178_v13 = vmul.f32 %v1250_v10, %v825_v0  ;;  %v179_v14 = vmul.f32 %v1250_v10, %v826_v1  ;;  %v264_v1 = vadd.f32 %v1257_v20, %v197_v57 }
  0x4a   :  { %v389_v32 = vpack.c.bf16 %v354_v19, %v353_v18  ;;  %v211_v18 = vmul.f32 %v1250_v10, %v890_v7  ;;  %v226_v19 = vmul.f32 %v1250_v10, %v921_v11  ;;  %v279_v2 = vadd.f32 %v1257_v20, %v212_v58 }
  0x4b   :  { %v245_v22 = vadd.f32 %v1257_v20, %v178_v13  ;;  %v246_v23 = vadd.f32 %v1257_v20, %v179_v14 }
  0x4c   :  { %v278_v27 = vadd.f32 %v1257_v20, %v211_v18 }
  0x4d   :  { %v309_v30 = vmax.f32 %v245_v22, 0.0  ;;  %v310_v31 = vmax.f32 %v246_v23, 0.0 }
  0x4e   :  { %v342_v35 = vmax.f32 %v278_v27, 0.0 }
  0x55   :  { %480 = vmatmul.bf16.gmra.mxu0 %v364_v50  ;;  %520 = vmatmul.bf16.gmra.mxu1 %v372_v51  ;;  %v291_v50 = vadd.f32 %v1257_v20, %v224_v42  ;;  %v292_v51 = vadd.f32 %v1257_v20, %v225_v43  ;;  %v367_v42 = vpack.c.bf16 %v310_v31, %v309_v30 }
  0x56   :  { %560 = vmatmul.bf16.gmra.mxu2 %v380_v54  ;;  %600 = vmatmul.bf16.gmra.mxu3 %v388_v55  ;;  %v323_v54 = vmax.f32 %v259_v46, 0.0  ;;  %v324_v55 = vmax.f32 %v260_v47, 0.0  ;;  %v383_v46 = vpack.c.bf16 %v342_v35, %v341_v34  ;;  %v861_v47 = vunpack.c.l.bf16 %v1101_v39 }
  0x57   :  { %v355_v60 = vmax.f32 %v291_v50, 0.0  ;;  %v356_v61 = vmax.f32 %v292_v51, 0.0  ;;  %v894_v51 = vunpack.c.h.bf16 %v1109_v40 }
  0x58   :  { %v374_v5 = vpack.c.bf16 %v324_v55, %v323_v54  ;;  %v180_v54 = vmul.f32 %v1250_v10, %v829_v44  ;;  %v181_v55 = vmul.f32 %v1250_v10, %v830_v45  ;;  %v196_v56 = vmul.f32 %v1250_v10, %v861_v47 }
  0x59   :  { %v390_v9 = vpack.c.bf16 %v356_v61, %v355_v60  ;;  %v213_v59 = vmul.f32 %v1250_v10, %v894_v51  ;;  %v228_v60 = vmul.f32 %v1250_v10, %v925_v52  ;;  %v229_v61 = vmul.f32 %v1250_v10, %v926_v53 }
  0x5a   :  { %v247_v62 = vadd.f32 %v1257_v20, %v180_v54  ;;  %v248_v63 = vadd.f32 %v1257_v20, %v181_v55  ;;  %v263_v0 = vadd.f32 %v1257_v20, %v196_v56  ;;  %v328_v10 = vmax.f32 %v264_v1, 0.0 }
  0x5b   :  { %v280_v3 = vadd.f32 %v1257_v20, %v213_v59 }
  0x5c   :  { %v311_v6 = vmax.f32 %v247_v62, 0.0  ;;  %v312_v7 = vmax.f32 %v248_v63, 0.0 }
  0x5d   :  { %v344_v11 = vmax.f32 %v280_v3, 0.0 }
  0x5e   :  { %v368_v14 = vpack.c.bf16 %v312_v7, %v311_v6 }
  0x65   :  { %485 = vmatmul.bf16.gmra.mxu0 %v365_v24  ;;  %525 = vmatmul.bf16.gmra.mxu1 %v373_v25  ;;  %v261_v24 = vadd.f32 %v1257_v20, %v194_v15  ;;  %v262_v25 = vadd.f32 %v1257_v20, %v195_v16 }
  0x66   :  { %565 = vmatmul.bf16.gmra.mxu2 %v381_v28  ;;  %605 = vmatmul.bf16.gmra.mxu3 %v389_v32  ;;  %v293_v28 = vadd.f32 %v1257_v20, %v226_v19 }
  0x67   :  { %v325_v32 = vmax.f32 %v261_v24, 0.0  ;;  %v326_v33 = vmax.f32 %v262_v25, 0.0 }
  0x68   :  { %v357_v37 = vmax.f32 %v293_v28, 0.0 }
  0x69   :  { %v375_v43 = vpack.c.bf16 %v326_v33, %v325_v32 }
  0x6a   :  { %v391_v50 = vpack.c.bf16 %v358_v38, %v357_v37 }
  0x75   :  { %490 = vmatmul.bf16.gmra.mxu0 %v366_v4  ;;  %530 = vmatmul.bf16.gmra.mxu1 %v374_v5  ;;  %v295_v4 = vadd.f32 %v1257_v20, %v228_v60  ;;  %v296_v5 = vadd.f32 %v1257_v20, %v229_v61 }
  0x76   :  { %570 = vmatmul.bf16.gmra.mxu2 %v382_v8  ;;  %610 = vmatmul.bf16.gmra.mxu3 %v390_v9  ;;  %v327_v8 = vmax.f32 %v263_v0, 0.0  ;;  %v343_v9 = vmax.f32 %v279_v2, 0.0 }
  0x77   :  { %v359_v12 = vmax.f32 %v295_v4, 0.0  ;;  %v360_v13 = vmax.f32 %v296_v5, 0.0 }
  0x78   :  { %v376_v15 = vpack.c.bf16 %v328_v10, %v327_v8  ;;  %v384_v16 = vpack.c.bf16 %v344_v11, %v343_v9 }
  0x79   :  { %v392_v17 = vpack.c.bf16 %v360_v13, %v359_v12 }
  0x85   :  { %495 = vmatmul.bf16.gmra.mxu0 %v367_v42  ;;  %535 = vmatmul.bf16.gmra.mxu1 %v375_v43 }
  0x86   :  { %575 = vmatmul.bf16.gmra.mxu2 %v383_v46  ;;  %615 = vmatmul.bf16.gmra.mxu3 %v391_v50 }
  0x95   :  { %500 = vmatmul.bf16.gmra.mxu0 %v368_v14  ;;  %540 = vmatmul.bf16.gmra.mxu1 %v376_v15 }
  0x96   :  { %580 = vmatmul.bf16.gmra.mxu2 %v384_v16  ;;  %620 = vmatmul.bf16.gmra.mxu3 %v392_v17 }
  0xa2   :  { %v466_v18 = vpop.f32.mrf.mxu0  ;;  %v506_v19 = vpop.f32.mrf.mxu1 }
  0xa9   :  { %v546_v21 = vpop.f32.mrf.mxu2  ;;  %v586_v20 = vpop.f32.mrf.mxu3 }
  0xaa   :  { %v468_v22 = vpop.f32.mrf.mxu0  ;;  %v508_v23 = vpop.f32.mrf.mxu1 }
  0xab   :  { %v930_v24 = vpack.c.bf16 %v468_v22, %v466_v18  ;;  %v970_v25 = vpack.c.bf16 %v508_v23, %v506_v19 }
  0xad   :  { %931 = vst [vmem:[%s1569_s4] sm:$0xff] %v930_v24  }
  0xae   :  { %1125 = vst [vmem:[%s1569_s4 + $0x40] sm:$0xff] %v970_v25  }
  0xb1   :  { %v548_v26 = vpop.f32.mrf.mxu2  ;;  %v588_v27 = vpop.f32.mrf.mxu3 }
  0xb2   :  { %v1010_v28 = vpack.c.bf16 %v548_v26, %v546_v21  ;;  %v1050_v29 = vpack.c.bf16 %v588_v27, %v586_v20  ;;  %v471_v30 = vpop.f32.mrf.mxu0  ;;  %v511_v31 = vpop.f32.mrf.mxu1 }
  0xb4   :  { %1133 = vst [vmem:[%s1569_s4 + $0x80] sm:$0xff] %v1010_v28  }
  0xb5   :  { %1141 = vst [vmem:[%s1569_s4 + $0xc0] sm:$0xff] %v1050_v29  }
  0xb9   :  { %v551_v32 = vpop.f32.mrf.mxu2  ;;  %v591_v33 = vpop.f32.mrf.mxu3 }
  0xba   :  { %v473_v34 = vpop.f32.mrf.mxu0  ;;  %v513_v35 = vpop.f32.mrf.mxu1 }
  0xbb   :  { %v935_v36 = vpack.c.bf16 %v473_v34, %v471_v30  ;;  %v975_v37 = vpack.c.bf16 %v513_v35, %v511_v31 }
  0xbd   :  { %1118 = vst [vmem:[%s1569_s4 + $0x8] sm:$0xff] %v935_v36  }
  0xbe   :  { %1126 = vst [vmem:[%s1569_s4 + $0x48] sm:$0xff] %v975_v37  }
  0xc1   :  { %v553_v38 = vpop.f32.mrf.mxu2  ;;  %v593_v39 = vpop.f32.mrf.mxu3 }
  0xc2   :  { %v1015_v40 = vpack.c.bf16 %v553_v38, %v551_v32  ;;  %v1055_v41 = vpack.c.bf16 %v593_v39, %v591_v33  ;;  %v476_v42 = vpop.f32.mrf.mxu0  ;;  %v516_v43 = vpop.f32.mrf.mxu1 }
  0xc4   :  { %1134 = vst [vmem:[%s1569_s4 + $0x88] sm:$0xff] %v1015_v40  }
  0xc5   :  { %1142 = vst [vmem:[%s1569_s4 + $0xc8] sm:$0xff] %v1055_v41  }
  0xc9   :  { %v556_v44 = vpop.f32.mrf.mxu2  ;;  %v596_v45 = vpop.f32.mrf.mxu3 }
  0xca   :  { %v478_v46 = vpop.f32.mrf.mxu0  ;;  %v518_v47 = vpop.f32.mrf.mxu1 }
  0xcb   :  { %v940_v48 = vpack.c.bf16 %v478_v46, %v476_v42  ;;  %v980_v49 = vpack.c.bf16 %v518_v47, %v516_v43 }
  0xcd   :  { %1119 = vst [vmem:[%s1569_s4 + $0x10] sm:$0xff] %v940_v48  }
  0xce   :  { %1127 = vst [vmem:[%s1569_s4 + $0x50] sm:$0xff] %v980_v49  }
  0xd1   :  { %v558_v50 = vpop.f32.mrf.mxu2  ;;  %v598_v51 = vpop.f32.mrf.mxu3 }
  0xd2   :  { %v1020_v52 = vpack.c.bf16 %v558_v50, %v556_v44  ;;  %v1060_v53 = vpack.c.bf16 %v598_v51, %v596_v45  ;;  %v481_v54 = vpop.f32.mrf.mxu0  ;;  %v521_v55 = vpop.f32.mrf.mxu1 }
  0xd4   :  { %1135 = vst [vmem:[%s1569_s4 + $0x90] sm:$0xff] %v1020_v52  }
  0xd5   :  { %1143 = vst [vmem:[%s1569_s4 + $0xd0] sm:$0xff] %v1060_v53  }
  0xd9   :  { %v561_v56 = vpop.f32.mrf.mxu2  ;;  %v601_v57 = vpop.f32.mrf.mxu3 }
  0xda   :  { %v483_v58 = vpop.f32.mrf.mxu0  ;;  %v523_v59 = vpop.f32.mrf.mxu1 }
  0xdb   :  { %v945_v60 = vpack.c.bf16 %v483_v58, %v481_v54  ;;  %v985_v61 = vpack.c.bf16 %v523_v59, %v521_v55 }
  0xdd   :  { %1120 = vst [vmem:[%s1569_s4 + $0x18] sm:$0xff] %v945_v60  }
  0xde   :  { %1128 = vst [vmem:[%s1569_s4 + $0x58] sm:$0xff] %v985_v61  }
  0xe1   :  { %v563_v62 = vpop.f32.mrf.mxu2  ;;  %v603_v63 = vpop.f32.mrf.mxu3 }
  0xe2   :  { %v1025_v0 = vpack.c.bf16 %v563_v62, %v561_v56  ;;  %v1065_v1 = vpack.c.bf16 %v603_v63, %v601_v57  ;;  %v486_v2 = vpop.f32.mrf.mxu0  ;;  %v526_v3 = vpop.f32.mrf.mxu1 }
  0xe4   :  { %1136 = vst [vmem:[%s1569_s4 + $0x98] sm:$0xff] %v1025_v0  }
  0xe5   :  { %1144 = vst [vmem:[%s1569_s4 + $0xd8] sm:$0xff] %v1065_v1  }
  0xe9   :  { %v566_v4 = vpop.f32.mrf.mxu2  ;;  %v606_v5 = vpop.f32.mrf.mxu3 }
  0xea   :  { %v488_v6 = vpop.f32.mrf.mxu0  ;;  %v528_v7 = vpop.f32.mrf.mxu1 }
  0xeb   :  { %v950_v8 = vpack.c.bf16 %v488_v6, %v486_v2  ;;  %v990_v10 = vpack.c.bf16 %v528_v7, %v526_v3 }
  0xed   :  { %1121 = vst [vmem:[%s1569_s4 + $0x20] sm:$0xff] %v950_v8  }
  0xee   :  { %1129 = vst [vmem:[%s1569_s4 + $0x60] sm:$0xff] %v990_v10  }
  0xf1   :  { %v568_v9 = vpop.f32.mrf.mxu2  ;;  %v608_v11 = vpop.f32.mrf.mxu3 }
  0xf2   :  { %v1030_v12 = vpack.c.bf16 %v568_v9, %v566_v4  ;;  %v1070_v13 = vpack.c.bf16 %v608_v11, %v606_v5  ;;  %v491_v14 = vpop.f32.mrf.mxu0  ;;  %v531_v15 = vpop.f32.mrf.mxu1 }
  0xf4   :  { %1137 = vst [vmem:[%s1569_s4 + $0xa0] sm:$0xff] %v1030_v12  }
  0xf5   :  { %1145 = vst [vmem:[%s1569_s4 + $0xe0] sm:$0xff] %v1070_v13  }
  0xf9   :  { %v571_v16 = vpop.f32.mrf.mxu2  ;;  %v611_v17 = vpop.f32.mrf.mxu3 }
  0xfa   :  { %v493_v18 = vpop.f32.mrf.mxu0  ;;  %v533_v19 = vpop.f32.mrf.mxu1 }
  0xfb   :  { %v955_v21 = vpack.c.bf16 %v493_v18, %v491_v14  ;;  %v995_v20 = vpack.c.bf16 %v533_v19, %v531_v15 }
  0xfd   :  { %1122 = vst [vmem:[%s1569_s4 + $0x28] sm:$0xff] %v955_v21  }
  0xfe   :  { %1130 = vst [vmem:[%s1569_s4 + $0x68] sm:$0xff] %v995_v20  }
 0x101   :  { %v573_v22 = vpop.f32.mrf.mxu2  ;;  %v613_v23 = vpop.f32.mrf.mxu3 }
 0x102   :  { %v1035_v24 = vpack.c.bf16 %v573_v22, %v571_v16  ;;  %v1075_v25 = vpack.c.bf16 %v613_v23, %v611_v17  ;;  %v496_v26 = vpop.f32.mrf.mxu0  ;;  %v536_v27 = vpop.f32.mrf.mxu1 }
 0x104   :  { %1138 = vst [vmem:[%s1569_s4 + $0xa8] sm:$0xff] %v1035_v24  }
 0x105   :  { %1146 = vst [vmem:[%s1569_s4 + $0xe8] sm:$0xff] %v1075_v25  }
 0x109   :  { %v576_v28 = vpop.f32.mrf.mxu2  ;;  %v616_v29 = vpop.f32.mrf.mxu3 }
 0x10a   :  { %v498_v30 = vpop.f32.mrf.mxu0  ;;  %v538_v31 = vpop.f32.mrf.mxu1 }
 0x10b   :  { %v960_v32 = vpack.c.bf16 %v498_v30, %v496_v26  ;;  %v1000_v33 = vpack.c.bf16 %v538_v31, %v536_v27 }
 0x10d   :  { %1123 = vst [vmem:[%s1569_s4 + $0x30] sm:$0xff] %v960_v32  }
 0x10e   :  { %1131 = vst [vmem:[%s1569_s4 + $0x70] sm:$0xff] %v1000_v33  }
 0x111   :  { %v578_v34 = vpop.f32.mrf.mxu2  ;;  %v618_v35 = vpop.f32.mrf.mxu3 }
 0x112   :  { %v1040_v36 = vpack.c.bf16 %v578_v34, %v576_v28  ;;  %v1080_v37 = vpack.c.bf16 %v618_v35, %v616_v29  ;;  %v501_v38 = vpop.f32.mrf.mxu0  ;;  %v541_v39 = vpop.f32.mrf.mxu1 }
 0x114   :  { %1139 = vst [vmem:[%s1569_s4 + $0xb0] sm:$0xff] %v1040_v36  }
 0x115   :  { %1147 = vst [vmem:[%s1569_s4 + $0xf0] sm:$0xff] %v1080_v37  }
 0x119   :  { %v581_v40 = vpop.f32.mrf.mxu2  ;;  %v621_v41 = vpop.f32.mrf.mxu3 }
 0x11a   :  { %v503_v42 = vpop.f32.mrf.mxu0  ;;  %v543_v43 = vpop.f32.mrf.mxu1 }
 0x11b   :  { %v965_v44 = vpack.c.bf16 %v503_v42, %v501_v38  ;;  %v1005_v45 = vpack.c.bf16 %v543_v43, %v541_v39 }
 0x11d   :  { %1124 = vst [vmem:[%s1569_s4 + $0x38] sm:$0xff] %v965_v44  }
 0x11e   :  { %1132 = vst [vmem:[%s1569_s4 + $0x78] sm:$0xff] %v1005_v45  }
 0x121   :  { %v583_v46 = vpop.f32.mrf.mxu2  ;;  %v623_v47 = vpop.f32.mrf.mxu3 }
 0x122   :  { %v1045_v48 = vpack.c.bf16 %v583_v46, %v581_v40  ;;  %v1085_v49 = vpack.c.bf16 %v623_v47, %v621_v41 }
 0x124   :  { %1140 = vst [vmem:[%s1569_s4 + $0xb8] sm:$0xff] %v1045_v48  }
 0x125   :  { %1148 = vst [vmem:[%s1569_s4 + $0xf8] sm:$0xff] %v1085_v49  }
 0x126   :  { %758 = vsyncpa [#allocation3], 1 }

// kernel: _lambda_.20
= control target key start
LH: loop header
LB: loop body
LE: loop exit
PB: predicated region body
PF: predicated region fallthrough
CT: control target
= control target key end

     0   :  { %s330_s6 = smov 0   ;;  %s375_s0 = inlined_call_operand.vmem [shape: bf16[2,16,8,256], index: 0, kind: input, shape index: {}]   ;;  %s376_s1 = inlined_call_operand.vmem [shape: bf16[2,8,8,128], index: 1, kind: output, shape index: {}]  }
   0x1 LB: > { %s268_s7 = sadd.s32 4294967295, %s318_s6   ;;  %p272_p0 = scmp.ge.s32.totalorder %s318_s6, 1  ;;  %s318_s6 = sphi %s330_s6, %s11_s6  }
   0x2   : > { %p87_p1 = scmp.lt.s32.totalorder %s318_s6, 3 }
   0x4   : > { %p88_p2 = pnand %p272_p0, %p87_p1 }
   0x5   : > { %p107_p3 = scmp.lt.s32.totalorder (!%p88_p2), %s268_s7, 1 }
   0x6   : > { %91 = sbr.rel (%p88_p2) target bundleno = 39 (0x27), region = 24 }
   0xb   : > { %s378_s7 = smov (!%p107_p3, %s268_s7), 1 }
   0xc   : > { %s279_s8 = sshll.u32 %s378_s7, 7  ;;  %s280_s12 = sshll.u32 %s378_s7, 5 }
   0xd   : > { %s344_s11 = scalar_lea.vmem %s375_s0, %s279_s8  ;;  %s363_s15 = scalar_lea.vmem %s376_s1, %s280_s12 }
   0xe   : > { %v117_v0 = vld [vmem:[%s344_s11] sm:$0xff]  ;;  %v118_v1 = vld [vmem:[%s344_s11 + $0x8] sm:$0xff]  ;;  %v119_v2 = vld [vmem:[%s344_s11 + $0x10] sm:$0xff] }
   0xf   : > { %v120_v3 = vld [vmem:[%s344_s11 + $0x18] sm:$0xff]  ;;  %v133_v4 = vunpack.c.l.bf16 %v117_v0  ;;  %v134_v5 = vunpack.c.h.bf16 %v117_v0  ;;  %v135_v6 = vunpack.c.l.bf16 %v118_v1  ;;  %v136_v7 = vunpack.c.h.bf16 %v118_v1  ;;  %v121_v8 = vld [vmem:[%s344_s11 + $0x20] sm:$0xff]  ;;  %v122_v9 = vld [vmem:[%s344_s11 + $0x28] sm:$0xff] }
  0x10   : > { %v137_v10 = vunpack.c.l.bf16 %v119_v2  ;;  %v138_v11 = vunpack.c.h.bf16 %v119_v2  ;;  %v139_v12 = vunpack.c.l.bf16 %v120_v3  ;;  %v140_v13 = vunpack.c.h.bf16 %v120_v3  ;;  %v123_v14 = vld [vmem:[%s344_s11 + $0x30] sm:$0xff]  ;;  %v124_v15 = vld [vmem:[%s344_s11 + $0x38] sm:$0xff]  ;;  %v125_v24 = vld [vmem:[%s344_s11 + $0x40] sm:$0xff] }
  0x11   : > { %v165_v16 = vadd.f32 %v134_v5, %v133_v4  ;;  %v166_v17 = vadd.f32 %v136_v7, %v135_v6  ;;  %v141_v18 = vunpack.c.l.bf16 %v121_v8  ;;  %v142_v19 = vunpack.c.h.bf16 %v121_v8  ;;  %v126_v29 = vld [vmem:[%s344_s11 + $0x48] sm:$0xff]  ;;  %v127_v34 = vld [vmem:[%s344_s11 + $0x50] sm:$0xff]  ;;  %v128_v35 = vld [vmem:[%s344_s11 + $0x58] sm:$0xff] }
  0x12   : > { %v167_v20 = vadd.f32 %v138_v11, %v137_v10  ;;  %v168_v21 = vadd.f32 %v140_v13, %v139_v12  ;;  %v143_v22 = vunpack.c.l.bf16 %v122_v9  ;;  %v144_v23 = vunpack.c.h.bf16 %v122_v9  ;;  %v129_v44 = vld [vmem:[%s344_s11 + $0x60] sm:$0xff]  ;;  %v130_v49 = vld [vmem:[%s344_s11 + $0x68] sm:$0xff]  ;;  %v131_v54 = vld [vmem:[%s344_s11 + $0x70] sm:$0xff] }
  0x13   : > { %v181_v25 = vadd.f32 %v166_v17, %v165_v16  ;;  %v145_v26 = vunpack.c.l.bf16 %v123_v14  ;;  %v146_v27 = vunpack.c.h.bf16 %v123_v14  ;;  %v147_v28 = vunpack.c.l.bf16 %v124_v15  ;;  %v132_v58 = vld [vmem:[%s344_s11 + $0x78] sm:$0xff] }
  0x14   : > { %v182_v30 = vadd.f32 %v168_v21, %v167_v20  ;;  %v148_v31 = vunpack.c.h.bf16 %v124_v15  ;;  %v169_v32 = vadd.f32 %v142_v19, %v141_v18  ;;  %v170_v33 = vadd.f32 %v144_v23, %v143_v22 }
  0x15   : > { %v189_v36 = vmul.f32 0.25, %v181_v25  ;;  %v171_v37 = vadd.f32 %v146_v27, %v145_v26  ;;  %v149_v38 = vunpack.c.l.bf16 %v125_v24  ;;  %v150_v39 = vunpack.c.h.bf16 %v125_v24 }
  0x16   : > { %v190_v40 = vmul.f32 0.25, %v182_v30  ;;  %v172_v41 = vadd.f32 %v148_v31, %v147_v28  ;;  %v183_v42 = vadd.f32 %v170_v33, %v169_v32  ;;  %v151_v43 = vunpack.c.l.bf16 %v126_v29 }
  0x17   : > { %v152_v45 = vunpack.c.h.bf16 %v126_v29  ;;  %v153_v46 = vunpack.c.l.bf16 %v127_v34  ;;  %v154_v47 = vunpack.c.h.bf16 %v127_v34  ;;  %v155_v48 = vunpack.c.l.bf16 %v128_v35 }
  0x18   : > { %v284_v50 = vpack.c.bf16 %v190_v40, %v189_v36  ;;  %v184_v51 = vadd.f32 %v172_v41, %v171_v37  ;;  %v191_v52 = vmul.f32 0.25, %v183_v42  ;;  %v156_v53 = vunpack.c.h.bf16 %v128_v35 }
  0x19   : > { %v173_v55 = vadd.f32 %v150_v39, %v149_v38  ;;  %v174_v56 = vadd.f32 %v152_v45, %v151_v43  ;;  %v175_v57 = vadd.f32 %v154_v47, %v153_v46  ;;  %v157_v59 = vunpack.c.l.bf16 %v129_v44 }
  0x1a   : > { %285 = vst [vmem:[%s363_s15] sm:$0xff] %v284_v50   ;;  %v192_v60 = vmul.f32 0.25, %v184_v51  ;;  %v176_v61 = vadd.f32 %v156_v53, %v155_v48  ;;  %v158_v62 = vunpack.c.h.bf16 %v129_v44  ;;  %v159_v63 = vunpack.c.l.bf16 %v130_v49 }
  0x1b   : > { %v185_v0 = vadd.f32 %v174_v56, %v173_v55  ;;  %v160_v1 = vunpack.c.h.bf16 %v130_v49  ;;  %v161_v2 = vunpack.c.l.bf16 %v131_v54  ;;  %v162_v3 = vunpack.c.h.bf16 %v131_v54 }
  0x1c   : > { %v289_v4 = vpack.c.bf16 %v192_v60, %v191_v52  ;;  %v186_v5 = vadd.f32 %v176_v61, %v175_v57  ;;  %v163_v6 = vunpack.c.l.bf16 %v132_v58  ;;  %v164_v7 = vunpack.c.h.bf16 %v132_v58 }
  0x1d   : > { %v193_v8 = vmul.f32 0.25, %v185_v0  ;;  %v177_v9 = vadd.f32 %v158_v62, %v157_v59  ;;  %v178_v10 = vadd.f32 %v160_v1, %v159_v63  ;;  %v179_v11 = vadd.f32 %v162_v3, %v161_v2 }
  0x1e   : > { %301 = vst [vmem:[%s363_s15 + $0x8] sm:$0xff] %v289_v4   ;;  %v194_v12 = vmul.f32 0.25, %v186_v5  ;;  %v180_v13 = vadd.f32 %v164_v7, %v163_v6 }
  0x1f   : > { %v187_v14 = vadd.f32 %v178_v10, %v177_v9 }
  0x20   : > { %v294_v15 = vpack.c.bf16 %v194_v12, %v193_v8  ;;  %v188_v16 = vadd.f32 %v180_v13, %v179_v11 }
  0x21   : > { %v195_v17 = vmul.f32 0.25, %v187_v14 }
  0x22   : > { %302 = vst [vmem:[%s363_s15 + $0x10] sm:$0xff] %v294_v15   ;;  %v196_v18 = vmul.f32 0.25, %v188_v16 }
  0x24   : > { %v299_v19 = vpack.c.bf16 %v196_v18, %v195_v17 }
  0x26   : > { %303 = vst [vmem:[%s363_s15 + $0x18] sm:$0xff] %v299_v19  }
  0x27 PF: > { %s11_s6 = sadd.s32 1, %s318_s6  }
  0x28   : > { %p8_p4 = scmp.ge.s32.totalorder %s11_s6, 4  }
  0x2a   :  { %10 = sbr.rel (!%p8_p4) target bundleno = 1 (0x1), region = 54 }

// kernel: _lambda_.16
= control target key start
LH: loop header
LB: loop body
LE: loop exit
PB: predicated region body
PF: predicated region fallthrough
CT: control target
= control target key end

     0   :  { %8 = vsyncpa [#allocation3], 0  ;;  %s3841_s12 = smov 0   ;;  %s4611_s0 = inlined_call_operand.vmem [shape: bf16[2,18,18,128], index: 0, kind: input, shape index: {}]   ;;  %s4612_s1 = inlined_call_operand.hbm [shape: bf16[3,3,128,128], index: 1, kind: input, shape index: {}]   ;;  %s4613_s2 = inlined_call_operand.vmem [shape: bf16[2,256,128], index: 2, kind: input, shape index: {}]   ;;  %s4614_s3 = inlined_call_operand.vmem [shape: bf16[2,256,128], index: 3, kind: output, shape index: {}]  }
   0x1 LB: > { %s129_s15 = sshll.u32 %s4612_s1, 4  ;;  %s3850_s16 = sadd.s32 4294967295, %s3816_s12   ;;  %s3816_s12 = sphi %s3841_s12, %s14_s12   ;;  %s130_s15 = int_to_ptr.hbm [resolvable:$true] %s129_s15 }
   0x2   : > { %p3036_p0 = scmp.ge.s32.totalorder %s3816_s12, 1  ;;  %p118_p1 = scmp.lt.s32.totalorder %s3816_s12, 3 }
   0x3   : > { %p3725_p2 = scmp.eq.s32.totalorder %s3850_s16, 0  ;;  %s3818_s17 = smov [#allocation2]  }
   0x4   : > { %p119_p3 = pnand %p3036_p0, %p118_p1  ;;  %s131_s18 = sshll.u32 %s3818_s17, 4  ;;  %s132_s18 = int_to_ptr.vmem [resolvable:$true] %s131_s18 }
   0x5   : > { %s3819_s19 = smov 64   ;;  %s3820_s20 = smov 4  }
   0x6   : > { %p3721_p4 = pneg %p119_p3  ;;  %163 = sbr.rel (%p119_p3) target bundleno = 755 (0x2f3), region = 32 }
   0x8   : > { %p3722_p5 = pnand %p3725_p2, %p3721_p4 }
   0xa   : > { %3724 = dma.hbm_to_vmem [thread:$0]  (!%p3722_p5), %s130_s15, 9216, %s132_s18, [#allocation3], %s3819_s19, %s3819_s19, %s3820_s20  }
   0xb   : > { %3811 = dma.done.wait (%p3725_p2), [#allocation3], 9216  }
   0xc   : > { %3813 = vsyncadd (%p3725_p2), [#allocation3], 4294958080  ;;  %v3461_v0 = vld [vmem:[#allocation2 + $0xf8] sm:$0xff]  ;;  %v3460_v1 = vld [vmem:[#allocation2 + $0xf0] sm:$0xff]  ;;  %p193_p6 = scmp.lt.s32.totalorder %s3850_s16, 1  ;;  %vm2036_vm3 = vcmask 1042432  }
   0xd   : > { %3692 = vmatpush.bf16.msra.mxu1 %v3461_v0  ;;  %3693 = vmatpush.bf16.msra.mxu2 %v3461_v0  ;;  %v3459_v2 = vld [vmem:[#allocation2 + $0xe8] sm:$0xff]  ;;  %v3458_v3 = vld [vmem:[#allocation2 + $0xe0] sm:$0xff]  ;;  %v3457_v4 = vld [vmem:[#allocation2 + $0xd8] sm:$0xff]  ;;  %vm899_vm0 = vsmask.f32 3328  ;;  %vm2037_vm4 = vcmask 1046532  }
   0xe   : > { %3694 = vmatpush.bf16.msra.mxu3 %v3461_v0  ;;  %421 = vmatpush.bf16.msra.mxu0 %v3461_v0  ;;  %v3456_v5 = vld [vmem:[#allocation2 + $0xd0] sm:$0xff]  ;;  %s4657_s16 = smov (!%p193_p6, %s3850_s16), 1  ;;  %v3455_v6 = vld [vmem:[#allocation2 + $0xc8] sm:$0xff]  ;;  %v3454_v7 = vld [vmem:[#allocation2 + $0xc0] sm:$0xff]  ;;  %vm900_vm1 = vsmask.f32 7440 }
   0xf   : > { %s3716_s21 = smul.u32 216, %s4657_s16  ;;  %v3469_v8 = vld [vmem:[#allocation2 + $0x1b8] sm:$0xff]  ;;  %v3468_v16 = vld [vmem:[#allocation2 + $0x1b0] sm:$0xff]  ;;  %v3467_v20 = vld [vmem:[#allocation2 + $0x1a8] sm:$0xff]  ;;  %s3426_s25 = sshll.u32 %s4657_s16, 7 }
  0x10   : > { %v3477_v9 = vld [vmem:[#allocation2 + $0x78] sm:$0xff]  ;;  %v3476_v17 = vld [vmem:[#allocation2 + $0x70] sm:$0xff]  ;;  %v3475_v21 = vld [vmem:[#allocation2 + $0x68] sm:$0xff]  ;;  %s4450_s28 = scalar_lea.vmem %s4613_s2, %s3426_s25  ;;  %s4468_s4 = scalar_lea.vmem %s4614_s3, %s3426_s25 }
  0x11   : > { %3695 = vmatpush.bf16.msra.mxu1 %v3460_v1  ;;  %3696 = vmatpush.bf16.msra.mxu2 %v3460_v1  ;;  %s3863_s24 = scalar_lea.vmem %s4611_s0, %s3716_s21  ;;  %v3453_v14 = vld [vmem:[#allocation2 + $0x38] sm:$0xff]  ;;  %v3452_v18 = vld [vmem:[#allocation2 + $0x30] sm:$0xff]  ;;  %v3451_v22 = vld [vmem:[#allocation2 + $0x28] sm:$0xff] }
  0x12   : > { %3697 = vmatpush.bf16.msra.mxu3 %v3460_v1  ;;  %422 = vmatpush.bf16.msra.mxu0 %v3460_v1  ;;  %v3866_v10 = vld [vmem:[%s3863_s24 + $0x3c] sm:$0xff]  ;;  %v3869_v11 = vld [vmem:[%s3863_s24 + $0x6c] sm:$0xff]  ;;  %v3892_v48 = vld [vmem:[%s3863_s24 + $0x54] sm:$0xff] }
  0x13   : > { %v3441_v12 = vld [vmem:[%s3863_s24 + $0x9c] sm:$0xff]  ;;  %v3873_v13 = vld [vmem:[%s3863_s24 + $0xc] sm:$0xff]  ;;  %v3895_v49 = vld [vmem:[%s3863_s24 + $0x84] sm:$0xff] }
  0x14   : > { %v3485_v15 = vld [vmem:[#allocation2 + $0x138] sm:$0xff]  ;;  %v3484_v19 = vld [vmem:[#allocation2 + $0x130] sm:$0xff]  ;;  %v3483_v23 = vld [vmem:[#allocation2 + $0x128] sm:$0xff] }
  0x15   : > { %3698 = vmatpush.bf16.msra.mxu1 %v3459_v2  ;;  %3699 = vmatpush.bf16.msra.mxu2 %v3459_v2  ;;  %v3466_v24 = vld [vmem:[#allocation2 + $0x1a0] sm:$0xff]  ;;  %v3465_v28 = vld [vmem:[#allocation2 + $0x198] sm:$0xff]  ;;  %v3879_v30 = vld [vmem:[%s3863_s24 + $0x48] sm:$0xff] }
  0x16   : > { %3700 = vmatpush.bf16.msra.mxu3 %v3459_v2  ;;  %423 = vmatpush.bf16.msra.mxu0 %v3459_v2  ;;  %v3474_v25 = vld [vmem:[#allocation2 + $0x60] sm:$0xff]  ;;  %v3473_v29 = vld [vmem:[#allocation2 + $0x58] sm:$0xff]  ;;  %v3442_v32 = vld [vmem:[%s3863_s24 + $0xa8] sm:$0xff] }
  0x17   : > { %v3450_v26 = vld [vmem:[#allocation2 + $0x20] sm:$0xff]  ;;  %v3882_v31 = vld [vmem:[%s3863_s24 + $0x78] sm:$0xff]  ;;  %v3464_v36 = vld [vmem:[#allocation2 + $0x190] sm:$0xff] }
  0x18   : > { %v3482_v27 = vld [vmem:[#allocation2 + $0x120] sm:$0xff]  ;;  %v3886_v33 = vld [vmem:[%s3863_s24 + $0x18] sm:$0xff]  ;;  %v3472_v37 = vld [vmem:[#allocation2 + $0x50] sm:$0xff] }
  0x19   : > { %3701 = vmatpush.bf16.msra.mxu1 %v3458_v3  ;;  %3702 = vmatpush.bf16.msra.mxu2 %v3458_v3  ;;  %v3449_v34 = vld [vmem:[#allocation2 + $0x18] sm:$0xff]  ;;  %v3448_v38 = vld [vmem:[#allocation2 + $0x10] sm:$0xff]  ;;  %v3463_v40 = vld [vmem:[#allocation2 + $0x188] sm:$0xff] }
  0x1a   : > { %3703 = vmatpush.bf16.msra.mxu3 %v3458_v3  ;;  %424 = vmatpush.bf16.msra.mxu0 %v3458_v3  ;;  %v3481_v35 = vld [vmem:[#allocation2 + $0x118] sm:$0xff]  ;;  %v3480_v39 = vld [vmem:[#allocation2 + $0x110] sm:$0xff]  ;;  %v3471_v41 = vld [vmem:[#allocation2 + $0x48] sm:$0xff] }
  0x1b   : > { %v3447_v42 = vld [vmem:[#allocation2 + $0x8] sm:$0xff]  ;;  %v3462_v44 = vld [vmem:[#allocation2 + $0x180] sm:$0xff]  ;;  %v3443_v50 = vld [vmem:[%s3863_s24 + $0xb4] sm:$0xff] }
  0x1c   : > { %v3479_v43 = vld [vmem:[#allocation2 + $0x108] sm:$0xff]  ;;  %v3470_v45 = vld [vmem:[#allocation2 + $0x40] sm:$0xff]  ;;  %v3501_v54 = vld [vmem:[#allocation2 + $0xb8] sm:$0xff] }
  0x1d   : > { %3704 = vmatpush.bf16.msra.mxu1 %v3457_v4  ;;  %3705 = vmatpush.bf16.msra.mxu2 %v3457_v4  ;;  %v3446_v46 = vld [vmem:[#allocation2] sm:$0xff]  ;;  %v3509_v55 = vld [vmem:[#allocation2 + $0x178] sm:$0xff]  ;;  %v848_v57 = vld [vmem:[%s3863_s24 + $0xc] sm:$0xf] }
  0x1e   : > { %3706 = vmatpush.bf16.msra.mxu3 %v3457_v4  ;;  %425 = vmatpush.bf16.msra.mxu0 %v3457_v4  ;;  %v3478_v47 = vld [vmem:[#allocation2 + $0x100] sm:$0xff]  ;;  %v3493_v56 = vld [vmem:[#allocation2 + $0x1f8] sm:$0xff]  ;;  %v849_v58 = vld [vmem:[%s3863_s24 + $0x10] sm:$0xf]  ;;  %v927_v0 = vshrl.u32 %v848_v57, 16  ;;  %v930_v1 = vshll.u32 %v848_v57, 16 }
  0x1f   : > { %v3899_v51 = vld [vmem:[%s3863_s24 + $0x24] sm:$0xff]  ;;  %v845_v52 = vld [vmem:[%s3863_s24] sm:$0xf]  ;;  %v3517_v59 = vld [vmem:[#allocation2 + $0x238] sm:$0xff]  ;;  %v936_v2 = vshll.u32 %v849_v58, 16  ;;  %v940_v3 = vshrl.u32 %v849_v58, 16 }
  0x20   : > { %v846_v53 = vld [vmem:[%s3863_s24 + $0x4] sm:$0xf]  ;;  %v903_v60 = vshrl.u32 %v845_v52, 16  ;;  %v906_v61 = vshll.u32 %v845_v52, 16  ;;  %vm3923_vm2 = vmor %vm899_vm0, %vm900_vm1  ;;  %v853_v58 = vld [vmem:[%s3863_s24 + $0x20] sm:$0x1] }
  0x21   : > { %3707 = vmatpush.bf16.msra.mxu1 %v3456_v5  ;;  %3708 = vmatpush.bf16.msra.mxu2 %v3456_v5  ;;  %v912_v62 = vshll.u32 %v846_v53, 16  ;;  %v916_v63 = vshrl.u32 %v846_v53, 16  ;;  %vm4232_vm5 = vmor %vm2036_vm3, %vm2037_vm4 }
  0x22   : > { %3709 = vmatpush.bf16.msra.mxu3 %v3456_v5  ;;  %426 = vmatpush.bf16.msra.mxu0 %v3456_v5  ;;  %v905_v4 = vrot.slane %v903_v60, 4  ;;  %v908_v5 = vrot.slane %v906_v61, 5 }
  0x25   : > { %3710 = vmatpush.bf16.msra.mxu1 %v3455_v6  ;;  %3711 = vmatpush.bf16.msra.mxu2 %v3455_v6 }
  0x26   : > { %3712 = vmatpush.bf16.msra.mxu3 %v3455_v6  ;;  %427 = vmatpush.bf16.msra.mxu0 %v3455_v6  ;;  %v914_v6 = vrot.slane %v912_v62, 5 }
  0x29   : > { %3713 = vmatpush.bf16.msra.mxu1 %v3454_v7  ;;  %3714 = vmatpush.bf16.msra.mxu2 %v3454_v7 }
  0x2a   : > { %3715 = vmatpush.bf16.msra.mxu3 %v3454_v7  ;;  %428 = vmatpush.bf16.msra.mxu0 %v3454_v7  ;;  %v918_v7 = vrot.slane %v916_v63, 4 }
  0x2c   : > { %449 = vmatmul.bf16.vlgmr.msra.gmra.mxu1 %v3866_v10  ;;  %469 = vmatmul.bf16.vlgmr.msra.gmra.mxu2 %v3869_v11 }
  0x2d   : > { %724 = vmatpush.bf16.msrb.mxu2 %v3469_v8  ;;  %489 = vmatmul.bf16.vlgmr.msra.gmra.mxu3 %v3441_v12  ;;  %v847_v8 = vld [vmem:[%s3863_s24 + $0x8] sm:$0x1]  ;;  %v932_v12 = vrot.slane %v930_v1, 5  ;;  %v854_v1 = vld [vmem:[%s3863_s24 + $0x24] sm:$0xf] }
  0x2e   : > { %1463 = vmatpush.bf16.msrb.mxu3 %v3477_v9  ;;  %429 = vmatmul.bf16.vlgmr.msra.gmra.mxu0 %v3873_v13  ;;  %v929_v9 = vrot.slane %v927_v0, 4  ;;  %v970_v0 = vshll.u32 %v853_v58, 16 }
  0x2f   : > { %564 = vmatpush.bf16.msrb.mxu1 %v3453_v14  ;;  %1653 = vmatpush.bf16.msrb.mxu0 %v3485_v15  ;;  %v938_v14 = vrot.slane %v936_v2, 5  ;;  %v942_v15 = vrot.slane %v940_v3, 4  ;;  %v855_v2 = vld [vmem:[%s3863_s24 + $0x28] sm:$0xf]  ;;  %v3500_v3 = vld [vmem:[#allocation2 + $0xb0] sm:$0xff] }
  0x31   : > { %725 = vmatpush.bf16.msrb.mxu2 %v3468_v16  ;;  %v850_v16 = vld [vmem:[%s3863_s24 + $0x14] sm:$0x1] }
  0x32   : > { %1464 = vmatpush.bf16.msrb.mxu3 %v3476_v17  ;;  %v3911_v17 = vld [vmem:[%s3863_s24 + $0x60] sm:$0xff] }
  0x33   : > { %565 = vmatpush.bf16.msrb.mxu1 %v3452_v18  ;;  %1654 = vmatpush.bf16.msrb.mxu0 %v3484_v19  ;;  %v3914_v18 = vld [vmem:[%s3863_s24 + $0x90] sm:$0xff]  ;;  %v909_v19 = vor.u32 %v908_v5, %v905_v4 }
  0x34   : > { %v3508_v4 = vld [vmem:[#allocation2 + $0x170] sm:$0xff] }
  0x35   : > { %726 = vmatpush.bf16.msrb.mxu2 %v3467_v20  ;;  %v922_v20 = vshll.u32 %v847_v8, 16  ;;  %v3492_v5 = vld [vmem:[#allocation2 + $0x1f0] sm:$0xff]  ;;  %v972_v8 = vrot.slane %v970_v0, 5  ;;  %v3499_v0 = vld [vmem:[#allocation2 + $0xa8] sm:$0xff] }
  0x36   : > { %1465 = vmatpush.bf16.msrb.mxu3 %v3475_v21  ;;  %v3444_v21 = vld [vmem:[%s3863_s24 + $0xc0] sm:$0xff] }
  0x37   : > { %566 = vmatpush.bf16.msrb.mxu1 %v3451_v22  ;;  %1655 = vmatpush.bf16.msrb.mxu0 %v3483_v23  ;;  %v3918_v22 = vld [vmem:[%s3863_s24 + $0x30] sm:$0xff]  ;;  %v919_v23 = vor.u32 %v918_v7, %v914_v6 }
  0x39   : > { %727 = vmatpush.bf16.msrb.mxu2 %v3466_v24  ;;  %v933_v24 = vor.u32 %v932_v12, %v929_v9  ;;  %v3516_v9 = vld [vmem:[#allocation2 + $0x230] sm:$0xff]  ;;  %v975_v12 = vshrl.u32 %v854_v1, 16 }
  0x3a   : > { %1466 = vmatpush.bf16.msrb.mxu3 %v3474_v25  ;;  %v943_v25 = vor.u32 %v942_v15, %v938_v14  ;;  %v984_v15 = vshll.u32 %v855_v2, 16 }
  0x3b   : > { %567 = vmatpush.bf16.msrb.mxu1 %v3450_v26  ;;  %1656 = vmatpush.bf16.msrb.mxu0 %v3482_v27  ;;  %v946_v26 = vshll.u32 %v850_v16, 16  ;;  %v910_v27 = vrot.slane %v909_v19, 4  ;;  %v988_v16 = vshrl.u32 %v855_v2, 16  ;;  %v860_v2 = vld [vmem:[%s3863_s24 + $0x3c] sm:$0xf] }
  0x3c   : > { %454 = vmatmul.bf16.gmra.mxu1 %v3879_v30  ;;  %474 = vmatmul.bf16.gmra.mxu2 %v3882_v31 }
  0x3d   : > { %728 = vmatpush.bf16.msrb.mxu2 %v3465_v28  ;;  %494 = vmatmul.bf16.gmra.mxu3 %v3442_v32  ;;  %v924_v28 = vrot.slane %v922_v20, 5  ;;  %v934_v32 = vrot.slane %v933_v24, 4  ;;  %v986_v24 = vrot.slane %v984_v15, 5 }
  0x3e   : > { %1467 = vmatpush.bf16.msrb.mxu3 %v3473_v29  ;;  %434 = vmatmul.bf16.gmra.mxu0 %v3886_v33  ;;  %v920_v29 = vrot.slane %v919_v23, 4 }
  0x3f   : > { %568 = vmatpush.bf16.msrb.mxu1 %v3449_v34  ;;  %1657 = vmatpush.bf16.msrb.mxu0 %v3481_v35  ;;  %v944_v34 = vrot.slane %v943_v25, 4  ;;  %v948_v35 = vrot.slane %v946_v26, 5  ;;  %v990_v25 = vrot.slane %v988_v16, 4 }
  0x41   : > { %729 = vmatpush.bf16.msrb.mxu2 %v3464_v36 }
  0x42   : > { %1468 = vmatpush.bf16.msrb.mxu3 %v3472_v37  ;;  %v851_v37 = vld [vmem:[%s3863_s24 + $0x18] sm:$0xf] }
  0x43   : > { %569 = vmatpush.bf16.msrb.mxu1 %v3448_v38  ;;  %1658 = vmatpush.bf16.msrb.mxu0 %v3480_v39  ;;  %v852_v38 = vld [vmem:[%s3863_s24 + $0x1c] sm:$0xf]  ;;  %v915_v39 = vsel %vm3923_vm2, %v910_v27, %v914_v6 }
  0x45   : > { %730 = vmatpush.bf16.msrb.mxu2 %v3463_v40  ;;  %v925_v40 = vsel %vm3923_vm2, %v920_v29, %v924_v28  ;;  %v856_v28 = vld [vmem:[%s3863_s24 + $0x2c] sm:$0x1] }
  0x46   : > { %1469 = vmatpush.bf16.msrb.mxu3 %v3471_v41  ;;  %v939_v41 = vsel %vm3923_vm2, %v934_v32, %v938_v14  ;;  %v978_v14 = vshll.u32 %v854_v1, 16  ;;  %v991_v32 = vor.u32 %v990_v25, %v986_v24  ;;  %v3507_v1 = vld [vmem:[#allocation2 + $0x168] sm:$0xff] }
  0x47   : > { %570 = vmatpush.bf16.msrb.mxu1 %v3447_v42  ;;  %1659 = vmatpush.bf16.msrb.mxu0 %v3479_v43  ;;  %v949_v42 = vsel %vm3923_vm2, %v944_v34, %v948_v35  ;;  %v951_v43 = vshrl.u32 %v851_v37, 16  ;;  %v1353_v52 = vunpack.c.l.b16 %v939_v41  ;;  %v994_v34 = vshll.u32 %v856_v28, 16  ;;  %v858_v41 = vld [vmem:[%s3863_s24 + $0x34] sm:$0xf]  ;;  %v863_v28 = vld [vmem:[%s3863_s24 + $0x48] sm:$0xf] }
  0x48   : > { %v1354_v53 = vunpack.c.l.b16 %v949_v42  ;;  %v980_v23 = vrot.slane %v978_v14, 5 }
  0x49   : > { %731 = vmatpush.bf16.msrb.mxu2 %v3462_v44  ;;  %v954_v44 = vshll.u32 %v851_v37, 16 }
  0x4a   : > { %1470 = vmatpush.bf16.msrb.mxu3 %v3470_v45  ;;  %v960_v45 = vshll.u32 %v852_v38, 16  ;;  %v1384_v61 = vpack.c.b16 %v1354_v53, %v1353_v52 }
  0x4b   : > { %571 = vmatpush.bf16.msrb.mxu1 %v3446_v46  ;;  %1660 = vmatpush.bf16.msrb.mxu0 %v3478_v47  ;;  %v964_v46 = vshrl.u32 %v852_v38, 16  ;;  %v1351_v47 = vunpack.c.l.b16 %v915_v39  ;;  %v992_v38 = vrot.slane %v991_v32, 4  ;;  %v996_v39 = vrot.slane %v994_v34, 5 }
  0x4c   : > { %459 = vmatmul.bf16.gmra.mxu1 %v3892_v48  ;;  %479 = vmatmul.bf16.gmra.mxu2 %v3895_v49 }
  0x4d   : > { %499 = vmatmul.bf16.gmra.mxu3 %v3443_v50  ;;  %2294 = vmatpush.bf16.msra.mxu2 %v3501_v54  ;;  %v1352_v50 = vunpack.c.l.b16 %v925_v40  ;;  %v953_v54 = vrot.slane %v951_v43, 4  ;;  %v966_v57 = vrot.slane %v964_v46, 4  ;;  %v857_v40 = vld [vmem:[%s3863_s24 + $0x30] sm:$0xf]  ;;  %v997_v43 = vsel %vm3923_vm2, %v992_v38, %v996_v39 }
  0x4e   : > { %439 = vmatmul.bf16.gmra.mxu0 %v3899_v51  ;;  %2484 = vmatpush.bf16.msra.mxu3 %v3509_v55  ;;  %v956_v55 = vrot.slane %v954_v44, 5  ;;  %v999_v44 = vshrl.u32 %v857_v40, 16  ;;  %v1012_v46 = vshrl.u32 %v858_v41, 16  ;;  %v1047_v38 = vshrl.u32 %v863_v28, 16 }
  0x4f   : > { %1843 = vmatpush.bf16.msra.mxu1 %v3493_v56  ;;  %2674 = vmatpush.bf16.msra.mxu0 %v3517_v59  ;;  %v962_v56 = vrot.slane %v960_v45, 5  ;;  %v3428_v59 = vld [vmem:[%s3863_s24] sm:$0xff]  ;;  %v1383_v60 = vpack.c.b16 %v1352_v50, %v1351_v47  ;;  %v1002_v45 = vshll.u32 %v857_v40, 16  ;;  %v1358_v50 = vunpack.c.l.b16 %v997_v43 }
  0x50   : > { %v957_v62 = vor.u32 %v956_v55, %v953_v54  ;;  %v1001_v52 = vrot.slane %v999_v44, 4  ;;  %v1014_v55 = vrot.slane %v1012_v46, 4  ;;  %v1050_v39 = vshll.u32 %v863_v28, 16 }
  0x51   : > { %v967_v63 = vor.u32 %v966_v57, %v962_v56  ;;  %2295 = vmatpush.bf16.msra.mxu2 %v3500_v3  ;;  %v1004_v53 = vrot.slane %v1002_v45, 5  ;;  %v861_v3 = vld [vmem:[%s3863_s24 + $0x40] sm:$0xf]  ;;  %v1049_v43 = vrot.slane %v1047_v38, 4 }
  0x52   : > { %v958_v6 = vrot.slane %v957_v62, 4  ;;  %2485 = vmatpush.bf16.msra.mxu3 %v3508_v4  ;;  %v3491_v4 = vld [vmem:[#allocation2 + $0x1e8] sm:$0xff]  ;;  %v1052_v44 = vrot.slane %v1050_v39, 5 }
  0x53   : > { %v968_v7 = vrot.slane %v967_v63, 4  ;;  %1844 = vmatpush.bf16.msra.mxu1 %v3492_v5  ;;  %2675 = vmatpush.bf16.msra.mxu0 %v3516_v9  ;;  %v1005_v58 = vor.u32 %v1004_v53, %v1001_v52  ;;  %v1036_v9 = vshrl.u32 %v861_v3, 16 }
  0x54   : > { %v963_v19 = vsel %vm3923_vm2, %v958_v6, %v962_v56  ;;  %v859_v56 = vld [vmem:[%s3863_s24 + $0x38] sm:$0x1]  ;;  %v1023_v6 = vshrl.u32 %v860_v2, 16  ;;  %v1053_v52 = vor.u32 %v1052_v44, %v1049_v43  ;;  %v870_v43 = vld [vmem:[%s3863_s24 + $0x64] sm:$0xf] }
  0x55   : > { %v973_v20 = vsel %vm3923_vm2, %v968_v7, %v972_v8  ;;  %v1355_v26 = vunpack.c.l.b16 %v963_v19  ;;  %2296 = vmatpush.bf16.msra.mxu2 %v3499_v0  ;;  %v1026_v7 = vshll.u32 %v860_v2, 16  ;;  %v1032_v8 = vshll.u32 %v861_v3, 16  ;;  %v866_v0 = vld [vmem:[%s3863_s24 + $0x54] sm:$0xf] }
  0x56   : > { %v1356_v27 = vunpack.c.l.b16 %v973_v20  ;;  %2486 = vmatpush.bf16.msra.mxu3 %v3507_v1  ;;  %v1025_v16 = vrot.slane %v1023_v6, 4  ;;  %v867_v1 = vld [vmem:[%s3863_s24 + $0x58] sm:$0xf]  ;;  %v1071_v6 = vshrl.u32 %v866_v0, 16 }
  0x57   : > { %1845 = vmatpush.bf16.msra.mxu1 %v3491_v4  ;;  %v1028_v19 = vrot.slane %v1026_v7, 5  ;;  %v1034_v20 = vrot.slane %v1032_v8, 5  ;;  %v1074_v7 = vshll.u32 %v866_v0, 16  ;;  %v1080_v8 = vshll.u32 %v867_v1, 16 }
  0x58   : > { %v3947_v35 = vpack.c.b16 %v1356_v27, %v1355_v26 }
  0x59   : > { %v1029_v25 = vor.u32 %v1028_v19, %v1025_v16  ;;  %v1073_v19 = vrot.slane %v1071_v6, 4 }
  0x5b   : > { %v1030_v32 = vrot.slane %v1029_v25, 4  ;;  %v868_v25 = vld [vmem:[%s3863_s24 + $0x5c] sm:$0x1] }
  0x5c   : > { %464 = vmatmul.bf16.gmra.mxu1 %v3911_v17  ;;  %484 = vmatmul.bf16.gmra.mxu2 %v3914_v18 }
  0x5d   : > { %504 = vmatmul.bf16.gmra.mxu3 %v3444_v21  ;;  %v977_v21 = vrot.slane %v975_v12, 4  ;;  %v3515_v12 = vld [vmem:[#allocation2 + $0x228] sm:$0xff] }
  0x5e   : > { %444 = vmatmul.bf16.gmra.mxu0 %v3918_v22 }
  0x5f   : > { %v981_v29 = vor.u32 %v980_v23, %v977_v21  ;;  %2676 = vmatpush.bf16.msra.mxu0 %v3515_v12  ;;  %v1038_v21 = vrot.slane %v1036_v9, 4  ;;  %v862_v23 = vld [vmem:[%s3863_s24 + $0x44] sm:$0x1]  ;;  %v1084_v9 = vshrl.u32 %v867_v1, 16  ;;  %v871_v1 = vld [vmem:[%s3863_s24 + $0x68] sm:$0x1] }
  0x60   : > { %v1042_v27 = vshll.u32 %v862_v23, 16 }
  0x61   : > { %v982_v37 = vrot.slane %v981_v29, 4  ;;  %v1039_v26 = vor.u32 %v1038_v21, %v1034_v20  ;;  %v864_v29 = vld [vmem:[%s3863_s24 + $0x4c] sm:$0xf]  ;;  %v1082_v21 = vrot.slane %v1080_v8, 5  ;;  %v1086_v23 = vrot.slane %v1084_v9, 4 }
  0x62   : > { %v1056_v40 = vshll.u32 %v864_v29, 16  ;;  %v1114_v9 = vshll.u32 %v871_v1, 16 }
  0x63   : > { %v987_v42 = vsel %vm3923_vm2, %v982_v37, %v986_v24  ;;  %v1040_v34 = vrot.slane %v1039_v26, 4  ;;  %v1044_v37 = vrot.slane %v1042_v27, 5 }
  0x64   : > { %v1357_v47 = vunpack.c.l.b16 %v987_v42  ;;  %v1035_v42 = vsel %vm3923_vm2, %v1030_v32, %v1034_v20  ;;  %v1058_v45 = vrot.slane %v1056_v40, 5  ;;  %v1076_v20 = vrot.slane %v1074_v7, 5 }
  0x65   : > { %v1361_v46 = vunpack.c.l.b16 %v1035_v42 }
  0x66   : > { %v3959_v57 = vpack.c.b16 %v1358_v50, %v1357_v47  ;;  %v865_v50 = vld [vmem:[%s3863_s24 + $0x50] sm:$0x1]  ;;  %v1077_v32 = vor.u32 %v1076_v20, %v1073_v19  ;;  %v3505_v19 = vld [vmem:[#allocation2 + $0x158] sm:$0xff] }
  0x68   : > { %v1078_v39 = vrot.slane %v1077_v32, 4 }
  0x6c   : > { %572 = vmatmul.bf16.vlgmr.msrb.gmra.mxu1 %v3428_v59  ;;  %732 = vmatmul.bf16.vlgmr.msrb.gmra.mxu2 %v3886_v33 }
  0x6d   : > { %1471 = vmatmul.bf16.vlgmr.msrb.gmra.mxu3 %v1383_v60  ;;  %v1018_v60 = vshll.u32 %v859_v56, 16 }
  0x6e   : > { %1661 = vmatmul.bf16.vlgmr.msrb.gmra.mxu0 %v1384_v61 }
  0x6f   : > { %v1020_v63 = vrot.slane %v1018_v60, 5 }
  0x7c   : > { %577 = vmatmul.bf16.gmra.mxu1 %v3873_v13  ;;  %737 = vmatmul.bf16.gmra.mxu2 %v3899_v51  ;;  %v1008_v13 = vshll.u32 %v858_v41, 16  ;;  %v1060_v41 = vshrl.u32 %v864_v29, 16 }
  0x7d   : > { %1476 = vmatmul.bf16.gmra.mxu3 %v1384_v61  ;;  %v1006_v61 = vrot.slane %v1005_v58, 4 }
  0x7e   : > { %1666 = vmatmul.bf16.gmra.mxu0 %v3947_v35  ;;  %v1010_v54 = vrot.slane %v1008_v13, 5  ;;  %v1062_v13 = vrot.slane %v1060_v41, 4 }
  0x80   : > { %v1015_v59 = vor.u32 %v1014_v55, %v1010_v54  ;;  %v1063_v53 = vor.u32 %v1062_v13, %v1058_v45 }
  0x82   : > { %v1016_v62 = vrot.slane %v1015_v59, 4  ;;  %v1054_v59 = vrot.slane %v1053_v52, 4  ;;  %v1064_v60 = vrot.slane %v1063_v53, 4  ;;  %v1104_v52 = vshll.u32 %v870_v43, 16 }
  0x83   : > { %v1108_v53 = vshrl.u32 %v870_v43, 16 }
  0x84   : > { %v1021_v5 = vsel %vm3923_vm2, %v1016_v62, %v1020_v63  ;;  %v3498_v62 = vld [vmem:[#allocation2 + $0xa0] sm:$0xff] }
  0x85   : > { %v1360_v15 = vunpack.c.l.b16 %v1021_v5  ;;  %v3506_v63 = vld [vmem:[#allocation2 + $0x160] sm:$0xff]  ;;  %2297 = vmatpush.bf16.msra.mxu2 %v3498_v62  ;;  %v1106_v62 = vrot.slane %v1104_v52, 5 }
  0x86   : > { %2487 = vmatpush.bf16.msra.mxu3 %v3506_v63  ;;  %v1110_v63 = vrot.slane %v1108_v53, 4 }
  0x88   : > { %v1111_v8 = vor.u32 %v1110_v63, %v1106_v62 }
  0x8a   : > { %2488 = vmatpush.bf16.msra.mxu3 %v3505_v19 }
  0x8c   : > { %582 = vmatmul.bf16.gmra.mxu1 %v3886_v33  ;;  %742 = vmatmul.bf16.gmra.mxu2 %v3918_v22  ;;  %v1011_v33 = vsel %vm3923_vm2, %v1006_v61, %v1010_v54  ;;  %v1066_v54 = vshll.u32 %v865_v50, 16 }
  0x8d   : > { %1481 = vmatmul.bf16.gmra.mxu3 %v3947_v35  ;;  %v1359_v14 = vunpack.c.l.b16 %v1011_v33  ;;  %v3490_v33 = vld [vmem:[#allocation2 + $0x1e0] sm:$0xff] }
  0x8e   : > { %1671 = vmatmul.bf16.gmra.mxu0 %v3959_v57  ;;  %v1068_v61 = vrot.slane %v1066_v54, 5  ;;  %1846 = vmatpush.bf16.msra.mxu1 %v3490_v33 }
  0x8f   : > { %v3972_v24 = vpack.c.b16 %v1360_v15, %v1359_v14  ;;  %v3514_v14 = vld [vmem:[#allocation2 + $0x220] sm:$0xff] }
  0x90   : > { %v1069_v4 = vsel %vm3923_vm2, %v1064_v60, %v1068_v61  ;;  %2677 = vmatpush.bf16.msra.mxu0 %v3514_v14  ;;  %v872_v14 = vld [vmem:[%s3863_s24 + $0x6c] sm:$0xf] }
  0x91   : > { %v1364_v16 = vunpack.c.l.b16 %v1069_v4 }
  0x9c   : > { %587 = vmatmul.bf16.gmra.mxu1 %v3899_v51  ;;  %747 = vmatmul.bf16.gmra.mxu2 %v3866_v10  ;;  %v1045_v51 = vsel %vm3923_vm2, %v1040_v34, %v1044_v37  ;;  %v1087_v34 = vor.u32 %v1086_v23, %v1082_v21  ;;  %v1090_v37 = vshll.u32 %v868_v25, 16  ;;  %v1116_v23 = vrot.slane %v1114_v9, 5 }
  0x9d   : > { %1486 = vmatmul.bf16.gmra.mxu3 %v3959_v57  ;;  %v1362_v47 = vunpack.c.l.b16 %v1045_v51  ;;  %v869_v51 = vld [vmem:[%s3863_s24 + $0x60] sm:$0xf] }
  0x9e   : > { %1676 = vmatmul.bf16.gmra.mxu0 %v3972_v24  ;;  %v1088_v40 = vrot.slane %v1087_v34, 4  ;;  %v1092_v41 = vrot.slane %v1090_v37, 5  ;;  %v1098_v50 = vshll.u32 %v869_v51, 16  ;;  %v1122_v34 = vshll.u32 %v872_v14, 16 }
  0x9f   : > { %v3987_v56 = vpack.c.b16 %v1362_v47, %v1361_v46  ;;  %v1095_v47 = vshrl.u32 %v869_v51, 16 }
  0xa0   : > { %v1093_v13 = vsel %vm3923_vm2, %v1088_v40, %v1092_v41  ;;  %v1100_v61 = vrot.slane %v1098_v50, 5  ;;  %v1124_v50 = vrot.slane %v1122_v34, 5 }
  0xa1   : > { %v1097_v60 = vrot.slane %v1095_v47, 4 }
  0xa3   : > { %v1101_v7 = vor.u32 %v1100_v61, %v1097_v60  ;;  %v874_v60 = vld [vmem:[%s3863_s24 + $0x74] sm:$0x1] }
  0xa5   : > { %v1102_v20 = vrot.slane %v1101_v7, 4  ;;  %v1138_v7 = vshll.u32 %v874_v60, 16 }
  0xa7   : > { %v1107_v51 = vsel %vm3923_vm2, %v1102_v20, %v1106_v62  ;;  %v1140_v19 = vrot.slane %v1138_v7, 5  ;;  %v875_v20 = vld [vmem:[%s3863_s24 + $0x78] sm:$0xf] }
  0xa9   : > { %v3985_v55 = vpop.f32.mrf.mxu1 }
  0xab   : > { %v3989_v58 = vpop.f32.mrf.mxu0 }
  0xac   : > { %592 = vmatmul.bf16.gmra.mxu1 %v3918_v22  ;;  %752 = vmatmul.bf16.gmra.mxu2 %v3879_v30  ;;  %v1059_v22 = vsel %vm3923_vm2, %v1054_v59, %v1058_v45  ;;  %v1366_v59 = vunpack.c.l.b16 %v1093_v13  ;;  %v3513_v13 = vld [vmem:[#allocation2 + $0x218] sm:$0xff] }
  0xad   : > { %1491 = vmatmul.bf16.gmra.mxu3 %v3972_v24  ;;  %v1363_v15 = vunpack.c.l.b16 %v1059_v22  ;;  %2678 = vmatpush.bf16.msra.mxu0 %v3513_v13 }
  0xae   : > { %1681 = vmatmul.bf16.gmra.mxu0 %v3987_v56 }
  0xaf   : > { %v3997_v2 = vpop.f32.mrf.mxu2  ;;  %v4016_v29 = vpack.c.b16 %v1364_v16, %v1363_v15  ;;  %v3497_v15 = vld [vmem:[#allocation2 + $0x98] sm:$0xff]  ;;  %v873_v16 = vld [vmem:[%s3863_s24 + $0x70] sm:$0xf] }
  0xb0   : > { %v3999_v3 = vpop.f32.mrf.mxu3  ;;  %2298 = vmatpush.bf16.msra.mxu2 %v3497_v15  ;;  %v1128_v37 = vshll.u32 %v873_v16, 16 }
  0xb1   : > { %v4005_v5 = vpop.f32.mrf.mxu1 }
  0xb2   : > { %v1130_v52 = vrot.slane %v1128_v37, 5 }
  0xb3   : > { %v4007_v12 = vpop.f32.mrf.mxu0 }
  0xb7   : > { %v4010_v26 = vpop.f32.mrf.mxu2 }
  0xb8   : > { %v4012_v27 = vpop.f32.mrf.mxu3 }
  0xb9   : > { %v4014_v28 = vpop.f32.mrf.mxu1 }
  0xbb   : > { %v4018_v38 = vpop.f32.mrf.mxu0 }
  0xbc   : > { %597 = vmatmul.bf16.gmra.mxu1 %v3866_v10  ;;  %757 = vmatmul.bf16.gmra.mxu2 %v3892_v48  ;;  %v1083_v10 = vsel %vm3923_vm2, %v1078_v39, %v1082_v21  ;;  %v1112_v21 = vrot.slane %v1111_v8, 4  ;;  %v1132_v39 = vshrl.u32 %v873_v16, 16 }
  0xbd   : > { %1496 = vmatmul.bf16.gmra.mxu3 %v3987_v56  ;;  %v1365_v54 = vunpack.c.l.b16 %v1083_v10  ;;  %v3489_v10 = vld [vmem:[#allocation2 + $0x1d8] sm:$0xff] }
  0xbe   : > { %1686 = vmatmul.bf16.gmra.mxu0 %v4016_v29  ;;  %v1117_v43 = vsel %vm3923_vm2, %v1112_v21, %v1116_v23  ;;  %v1134_v53 = vrot.slane %v1132_v39, 4  ;;  %1847 = vmatpush.bf16.msra.mxu1 %v3489_v10  ;;  %v876_v21 = vld [vmem:[%s3863_s24 + $0x7c] sm:$0xf]  ;;  %v1143_v39 = vshrl.u32 %v875_v20, 16 }
  0xbf   : > { %v4024_v42 = vpop.f32.mrf.mxu2  ;;  %v4045_v33 = vpack.c.b16 %v1366_v59, %v1365_v54  ;;  %v1367_v54 = vunpack.c.l.b16 %v1107_v51  ;;  %v1368_v59 = vunpack.c.l.b16 %v1117_v43  ;;  %v1146_v51 = vshll.u32 %v875_v20, 16 }
  0xc0   : > { %v4028_v44 = vpop.f32.mrf.mxu3  ;;  %v1135_v1 = vor.u32 %v1134_v53, %v1130_v52  ;;  %v1152_v43 = vshll.u32 %v876_v21, 16  ;;  %v1156_v10 = vshrl.u32 %v876_v21, 16  ;;  %v1145_v53 = vrot.slane %v1143_v39, 4 }
  0xc1   : > { %v4030_v45 = vpop.f32.mrf.mxu1  ;;  %v4074_v9 = vpack.c.b16 %v1368_v59, %v1367_v54  ;;  %v1148_v54 = vrot.slane %v1146_v51, 5 }
  0xc2   : > { %v1136_v16 = vrot.slane %v1135_v1, 4  ;;  %v1154_v59 = vrot.slane %v1152_v43, 5  ;;  %v1158_v60 = vrot.slane %v1156_v10, 4  ;;  %v3496_v43 = vld [vmem:[#allocation2 + $0x90] sm:$0xff] }
  0xc3   : > { %v4036_v46 = vpop.f32.mrf.mxu0  ;;  %4622 = vst [vmem:[#allocation7_spill] sm:$0xff] %v4074_v9  ;;  %v3504_v10 = vld [vmem:[#allocation2 + $0x150] sm:$0xff]  ;;  %2299 = vmatpush.bf16.msra.mxu2 %v3496_v43 }
  0xc4   : > { %2489 = vmatpush.bf16.msra.mxu3 %v3504_v10  ;;  %v3512_v10 = vld [vmem:[#allocation2 + $0x210] sm:$0xff] }
  0xc5   : > { %2679 = vmatpush.bf16.msra.mxu0 %v3512_v10 }
  0xc7   : > { %v4038_v0 = vpop.f32.mrf.mxu2 }
  0xc8   : > { %v4041_v22 = vpop.f32.mrf.mxu3 }
  0xc9   : > { %v4043_v4 = vpop.f32.mrf.mxu1 }
  0xcb   : > { %v4047_v6 = vpop.f32.mrf.mxu0 }
  0xcc   : > { %602 = vmatmul.bf16.gmra.mxu1 %v3879_v30  ;;  %762 = vmatmul.bf16.gmra.mxu2 %v3911_v17  ;;  %v1119_v30 = vshrl.u32 %v872_v14, 16 }
  0xcd   : > { %1501 = vmatmul.bf16.gmra.mxu3 %v4016_v29 }
  0xce   : > { %1691 = vmatmul.bf16.gmra.mxu0 %v4045_v33  ;;  %v1121_v47 = vrot.slane %v1119_v30, 4 }
  0xcf   : > { %v4055_v25 = vpop.f32.mrf.mxu2 }
  0xd0   : > { %v4057_v32 = vpop.f32.mrf.mxu3  ;;  %v1125_v62 = vor.u32 %v1124_v50, %v1121_v47 }
  0xd1   : > { %4620 = vst [vmem:[#allocation5_spill] sm:$0xff] %v4057_v32  ;;  %v4059_v40 = vpop.f32.mrf.mxu1 }
  0xd2   : > { %v1126_v15 = vrot.slane %v1125_v62, 4  ;;  %v877_v62 = vld [vmem:[%s3863_s24 + $0x80] sm:$0x1] }
  0xd3   : > { %v4061_v41 = vpop.f32.mrf.mxu0  ;;  %v1162_v20 = vshll.u32 %v877_v62, 16 }
  0xd4   : > { %v1131_v34 = vsel %vm3923_vm2, %v1126_v15, %v1130_v52 }
  0xd5   : > { %v1369_v47 = vunpack.c.l.b16 %v1131_v34  ;;  %v1164_v51 = vrot.slane %v1162_v20, 5 }
  0xd7   : > { %v4068_v61 = vpop.f32.mrf.mxu2 }
  0xd8   : > { %v4070_v63 = vpop.f32.mrf.mxu3 }
  0xd9   : > { %4621 = vst [vmem:[#allocation6_spill] sm:$0xff] %v4070_v63  ;;  %v4072_v8 = vpop.f32.mrf.mxu1  ;;  %v3488_v63 = vld [vmem:[#allocation2 + $0x1d0] sm:$0xff] }
  0xda   : > { %1848 = vmatpush.bf16.msra.mxu1 %v3488_v63 }
  0xdb   : > { %v4076_v14 = vpop.f32.mrf.mxu0 }
  0xdc   : > { %607 = vmatmul.bf16.gmra.mxu1 %v3892_v48  ;;  %767 = vmatmul.bf16.gmra.mxu2 %v3869_v11  ;;  %v1141_v48 = vsel %vm3923_vm2, %v1136_v16, %v1140_v19  ;;  %v1149_v16 = vor.u32 %v1148_v54, %v1145_v53  ;;  %v1159_v19 = vor.u32 %v1158_v60, %v1154_v59  ;;  %v879_v53 = vld [vmem:[%s3863_s24 + $0x88] sm:$0xf] }
  0xdd   : > { %1506 = vmatmul.bf16.gmra.mxu3 %v4045_v33  ;;  %v1370_v50 = vunpack.c.l.b16 %v1141_v48  ;;  %v1180_v43 = vshrl.u32 %v879_v53, 16 }
  0xde   : > { %1696 = vmatmul.bf16.gmra.mxu0 %v4074_v9  ;;  %v1150_v48 = vrot.slane %v1149_v16, 4  ;;  %v1160_v39 = vrot.slane %v1159_v19, 4 }
  0xdf   : > { %v4084_v23 = vpop.f32.mrf.mxu2  ;;  %v4101_v15 = vpack.c.b16 %v1370_v50, %v1369_v47  ;;  %v878_v47 = vld [vmem:[%s3863_s24 + $0x84] sm:$0xf] }
  0xe0   : > { %v4086_v30 = vpop.f32.mrf.mxu3  ;;  %v1165_v62 = vsel %vm3923_vm2, %v1160_v39, %v1164_v51  ;;  %v1170_v16 = vshll.u32 %v878_v47, 16  ;;  %v1182_v51 = vrot.slane %v1180_v43, 4 }
  0xe1   : > { %4623 = vst [vmem:[#allocation8_spill] sm:$0xff] %v4086_v30  ;;  %v4092_v37 = vpop.f32.mrf.mxu1  ;;  %v1176_v30 = vshll.u32 %v879_v53, 16 }
  0xe2   : > { %v1172_v32 = vrot.slane %v1170_v16, 5  ;;  %v882_v16 = vld [vmem:[%s3863_s24 + $0x94] sm:$0xf] }
  0xe3   : > { %v4094_v13 = vpop.f32.mrf.mxu0  ;;  %v1178_v39 = vrot.slane %v1176_v30, 5  ;;  %v881_v30 = vld [vmem:[%s3863_s24 + $0x90] sm:$0xf] }
  0xe7   : > { %v4097_v1 = vpop.f32.mrf.mxu2 }
  0xe8   : > { %v4099_v52 = vpop.f32.mrf.mxu3 }
  0xe9   : > { %4624 = vst [vmem:[#allocation9_spill] sm:$0xff] %v4099_v52  ;;  %v573_v7 = vpop.f32.mrf.mxu1 }
  0xea   : > { %v574_v21 = vadd.f32 %v573_v7, %v3989_v58  ;;  %v1167_v7 = vshrl.u32 %v878_v47, 16 }
  0xeb   : > { %v1662_v34 = vpop.f32.mrf.mxu0 }
  0xec   : > { %612 = vmatmul.bf16.gmra.mxu1 %v3911_v17  ;;  %772 = vmatmul.bf16.gmra.mxu2 %v3882_v31  ;;  %v1155_v17 = vsel %vm3923_vm2, %v1150_v48, %v1154_v59  ;;  %v1372_v59 = vunpack.c.l.b16 %v1165_v62  ;;  %v1169_v48 = vrot.slane %v1167_v7, 4 }
  0xed   : > { %1511 = vmatmul.bf16.gmra.mxu3 %v4074_v9 }
  0xee   : > { %1701 = vmatmul.bf16.gmra.mxu0 %v4101_v15  ;;  %v1173_v9 = vor.u32 %v1172_v32, %v1169_v48  ;;  %v1194_v48 = vshll.u32 %v881_v30, 16 }
  0xef   : > { %v733_v50 = vpop.f32.mrf.mxu2 }
  0xf0   : > { %v813_v58 = vadd.f32 %v733_v50, %v574_v21  ;;  %v1472_v54 = vpop.f32.mrf.mxu3  ;;  %v1371_v50 = vunpack.c.l.b16 %v1155_v17  ;;  %v1183_v17 = vor.u32 %v1182_v51, %v1178_v39  ;;  %v1204_v51 = vshrl.u32 %v882_v16, 16 }
  0xf1   : > { %v575_v60 = vpop.f32.mrf.mxu1 }
  0xf2   : > { %v1552_v19 = vadd.f32 %v1472_v54, %v813_v58  ;;  %v576_v20 = vadd.f32 %v575_v60, %v4007_v12  ;;  %v880_v58 = vld [vmem:[%s3863_s24 + $0x8c] sm:$0x1]  ;;  %v4118_v53 = vpack.c.b16 %v1372_v59, %v1371_v50  ;;  %v1184_v32 = vrot.slane %v1183_v17, 4 }
  0xf3   : > { %v1664_v52 = vpop.f32.mrf.mxu0  ;;  %v1186_v62 = vshll.u32 %v880_v58, 16 }
  0xf4   : > { %v4115_v21 = vadd.f32 %v1662_v34, %v1552_v19 }
  0xf5   : > { %v1188_v43 = vrot.slane %v1186_v62, 5 }
  0xf6   : > { %4625 = vst [vmem:[#allocation10_spill] sm:$0xff] %v4115_v21 }
  0xf7   : > { %v735_v47 = vpop.f32.mrf.mxu2 }
  0xf8   : > { %v814_v12 = vadd.f32 %v735_v47, %v576_v20  ;;  %v1474_v54 = vpop.f32.mrf.mxu3  ;;  %v1174_v20 = vrot.slane %v1173_v9, 4  ;;  %v1189_v9 = vsel %vm3923_vm2, %v1184_v32, %v1188_v43 }
  0xf9   : > { %v578_v60 = vpop.f32.mrf.mxu1 }
  0xfa   : > { %v1553_v63 = vadd.f32 %v1474_v54, %v814_v12  ;;  %v579_v34 = vadd.f32 %v578_v60, %v4018_v38  ;;  %v1191_v38 = vshrl.u32 %v881_v30, 16  ;;  %v1179_v54 = vsel %vm3923_vm2, %v1174_v20, %v1178_v39 }
  0xfb   : > { %v1667_v19 = vpop.f32.mrf.mxu0  ;;  %v1373_v30 = vunpack.c.l.b16 %v1179_v54  ;;  %v885_v54 = vld [vmem:[%s3863_s24 + $0xa0] sm:$0xf] }
  0xfc   : > { %617 = vmatmul.bf16.gmra.mxu1 %v3869_v11  ;;  %777 = vmatmul.bf16.gmra.mxu2 %v3895_v49  ;;  %v4124_v7 = vadd.f32 %v1664_v52, %v1553_v63  ;;  %v1200_v11 = vshll.u32 %v882_v16, 16  ;;  %v1193_v60 = vrot.slane %v1191_v38, 4  ;;  %v1196_v63 = vrot.slane %v1194_v48, 5  ;;  %v883_v16 = vld [vmem:[%s3863_s24 + $0x98] sm:$0x1] }
  0xfd   : > { %1516 = vmatmul.bf16.gmra.mxu3 %v4101_v15  ;;  %v1210_v21 = vshll.u32 %v883_v16, 16 }
  0xfe   : > { %4626 = vst [vmem:[#allocation11_spill] sm:$0xff] %v4124_v7  ;;  %1706 = vmatmul.bf16.gmra.mxu0 %v4118_v53  ;;  %v1202_v17 = vrot.slane %v1200_v11, 5 }
  0xff   : > { %v738_v10 = vpop.f32.mrf.mxu2 }
 0x100   : > { %v815_v50 = vadd.f32 %v738_v10, %v579_v34  ;;  %v1477_v59 = vpop.f32.mrf.mxu3  ;;  %v1206_v34 = vrot.slane %v1204_v51, 4  ;;  %v1374_v10 = vunpack.c.l.b16 %v1189_v9  ;;  %v3495_v51 = vld [vmem:[#allocation2 + $0x88] sm:$0xff] }
 0x101   : > { %v580_v47 = vpop.f32.mrf.mxu1  ;;  %2300 = vmatpush.bf16.msra.mxu2 %v3495_v51  ;;  %v886_v51 = vld [vmem:[%s3863_s24 + $0xa4] sm:$0x1] }
 0x102   : > { %v1554_v58 = vadd.f32 %v1477_v59, %v815_v50  ;;  %v581_v52 = vadd.f32 %v580_v47, %v4036_v46  ;;  %v1197_v46 = vor.u32 %v1196_v63, %v1193_v60  ;;  %v1207_v47 = vor.u32 %v1206_v34, %v1202_v17 }
 0x103   : > { %v1669_v12 = vpop.f32.mrf.mxu0  ;;  %v4137_v20 = vpack.c.b16 %v1374_v10, %v1373_v30  ;;  %v1224_v30 = vshll.u32 %v885_v54, 16  ;;  %v1228_v10 = vshrl.u32 %v885_v54, 16 }
 0x104   : > { %v4134_v62 = vadd.f32 %v1667_v19, %v1554_v58  ;;  %v1198_v19 = vrot.slane %v1197_v46, 4  ;;  %v1208_v48 = vrot.slane %v1207_v47, 4  ;;  %v3503_v58 = vld [vmem:[#allocation2 + $0x148] sm:$0xff] }
 0x105   : > { %2490 = vmatpush.bf16.msra.mxu3 %v3503_v58  ;;  %v3487_v46 = vld [vmem:[#allocation2 + $0x1c8] sm:$0xff] }
 0x106   : > { %v1203_v60 = vsel %vm3923_vm2, %v1198_v19, %v1202_v17  ;;  %v3511_v47 = vld [vmem:[#allocation2 + $0x208] sm:$0xff]  ;;  %1849 = vmatpush.bf16.msra.mxu1 %v3487_v46 }
 0x107   : > { %v740_v7 = vpop.f32.mrf.mxu2  ;;  %2680 = vmatpush.bf16.msra.mxu0 %v3511_v47  ;;  %v888_v47 = vld [vmem:[%s3863_s24 + $0xac] sm:$0xf] }
 0x108   : > { %v816_v50 = vadd.f32 %v740_v7, %v581_v52  ;;  %v1479_v59 = vpop.f32.mrf.mxu3  ;;  %v1212_v7 = vrot.slane %v1210_v21, 5  ;;  %v884_v52 = vld [vmem:[%s3863_s24 + $0x9c] sm:$0xf] }
 0x109   : > { %v583_v39 = vpop.f32.mrf.mxu1  ;;  %v1215_v63 = vshrl.u32 %v884_v52, 16  ;;  %v1218_v34 = vshll.u32 %v884_v52, 16 }
 0x10a   : > { %v1555_v32 = vadd.f32 %v1479_v59, %v816_v50  ;;  %v584_v43 = vadd.f32 %v583_v39, %v4047_v6  ;;  %v1213_v21 = vsel %vm3923_vm2, %v1208_v48, %v1212_v7  ;;  %v1375_v39 = vunpack.c.l.b16 %v1203_v60 }
 0x10b   : > { %v1672_v38 = vpop.f32.mrf.mxu0  ;;  %v1220_v19 = vrot.slane %v1218_v34, 5  ;;  %v1226_v48 = vrot.slane %v1224_v30, 5  ;;  %v1230_v7 = vrot.slane %v1228_v10, 4  ;;  %v1234_v60 = vshll.u32 %v886_v51, 16 }
 0x10c   : > { %622 = vmatmul.bf16.gmra.mxu1 %v3882_v31  ;;  %782 = vmatmul.bf16.gmra.mxu2 %v3914_v18  ;;  %v4142_v11 = vadd.f32 %v1669_v12, %v1555_v32  ;;  %v1376_v32 = vunpack.c.l.b16 %v1213_v21 }
 0x10d   : > { %1521 = vmatmul.bf16.gmra.mxu3 %v4118_v53 }
 0x10e   : > { %4627 = vst [vmem:[#allocation12_spill] sm:$0xff] %v4142_v11  ;;  %1711 = vmatmul.bf16.gmra.mxu0 %v4137_v20 }
 0x10f   : > { %v743_v9 = vpop.f32.mrf.mxu2 }
 0x110   : > { %v817_v6 = vadd.f32 %v743_v9, %v584_v43  ;;  %v1482_v31 = vpop.f32.mrf.mxu3  ;;  %v1217_v43 = vrot.slane %v1215_v63, 4  ;;  %v4161_v63 = vld [vmem:[%s3863_s24 + $0x9c] sm:$0xff] }
 0x111   : > { %v585_v12 = vpop.f32.mrf.mxu1 }
 0x112   : > { %v1556_v16 = vadd.f32 %v1482_v31, %v817_v6  ;;  %v586_v50 = vadd.f32 %v585_v12, %v4061_v41  ;;  %v4156_v41 = vpack.c.b16 %v1376_v32, %v1375_v39  ;;  %v1221_v6 = vor.u32 %v1220_v19, %v1217_v43 }
 0x113   : > { %v1674_v59 = vpop.f32.mrf.mxu0  ;;  %v1231_v31 = vor.u32 %v1230_v7, %v1226_v48 }
 0x114   : > { %v4153_v17 = vadd.f32 %v1672_v38, %v1556_v16  ;;  %4629 = vst [vmem:[#allocation14_spill] sm:$0xff] %v4156_v41  ;;  %v1222_v30 = vrot.slane %v1221_v6, 4  ;;  %v1236_v16 = vrot.slane %v1234_v60, 5 }
 0x115   : > { %v1232_v10 = vrot.slane %v1231_v31, 4 }
 0x116   : > { %4628 = vst [vmem:[#allocation13_spill] sm:$0xff] %v4153_v17  ;;  %v1964_v17 = vld [vmem:[%s3863_s24] sm:$0xe] }
 0x117   : > { %v745_v58 = vpop.f32.mrf.mxu2 }
 0x118   : > { %v818_v52 = vadd.f32 %v745_v58, %v586_v50  ;;  %v1484_v54 = vpop.f32.mrf.mxu3  ;;  %v887_v50 = vld [vmem:[%s3863_s24 + $0xa8] sm:$0xf] }
 0x119   : > { %v588_v9 = vpop.f32.mrf.mxu1  ;;  %v1239_v43 = vshrl.u32 %v887_v50, 16  ;;  %v1242_v19 = vshll.u32 %v887_v50, 16 }
 0x11a   : > { %v1557_v21 = vadd.f32 %v1484_v54, %v818_v52  ;;  %v589_v38 = vadd.f32 %v588_v9, %v4076_v14  ;;  %v1248_v52 = vshll.u32 %v888_v47, 16  ;;  %v1252_v54 = vshrl.u32 %v888_v47, 16 }
 0x11b   : > { %v1677_v12 = vpop.f32.mrf.mxu0  ;;  %v1241_v60 = vrot.slane %v1239_v43, 4 }
 0x11c   : > { %627 = vmatmul.bf16.gmra.mxu1 %v3895_v49  ;;  %787 = vmatmul.bf16.gmra.mxu2 %v4161_v63  ;;  %v4164_v34 = vadd.f32 %v1674_v59, %v1557_v21  ;;  %v1227_v49 = vsel %vm3923_vm2, %v1222_v30, %v1226_v48  ;;  %v1237_v59 = vsel %vm3923_vm2, %v1232_v10, %v1236_v16  ;;  %v1244_v21 = vrot.slane %v1242_v19, 5  ;;  %v889_v10 = vld [vmem:[%s3863_s24 + $0xb0] sm:$0x1]  ;;  %v3494_v19 = vld [vmem:[#allocation2 + $0x80] sm:$0xff] }
 0x11d   : > { %1526 = vmatmul.bf16.gmra.mxu3 %v4137_v20  ;;  %v1377_v6 = vunpack.c.l.b16 %v1227_v49  ;;  %v1378_v31 = vunpack.c.l.b16 %v1237_v59  ;;  %v1250_v48 = vrot.slane %v1248_v52, 5  ;;  %v4182_v49 = vld [vmem:[%s3863_s24 + $0xa8] sm:$0xff]  ;;  %v890_v59 = vld [vmem:[%s3863_s24 + $0xb4] sm:$0xf]  ;;  %2301 = vmatpush.bf16.msra.mxu2 %v3494_v19 }
 0x11e   : > { %4630 = vst [vmem:[#allocation15_spill] sm:$0xff] %v4164_v34  ;;  %1716 = vmatmul.bf16.gmra.mxu0 %v4156_v41 }
 0x11f   : > { %v748_v46 = vpop.f32.mrf.mxu2 }
 0x120   : > { %v819_v14 = vadd.f32 %v748_v46, %v589_v38  ;;  %v1487_v39 = vpop.f32.mrf.mxu3  ;;  %v1254_v38 = vrot.slane %v1252_v54, 4 }
 0x121   : > { %v590_v32 = vpop.f32.mrf.mxu1 }
 0x122   : > { %v1558_v7 = vadd.f32 %v1487_v39, %v819_v14  ;;  %v591_v51 = vadd.f32 %v590_v32, %v4094_v13  ;;  %v4178_v13 = vpack.c.b16 %v1378_v31, %v1377_v6  ;;  %v1255_v39 = vor.u32 %v1254_v38, %v1250_v48 }
 0x123   : > { %v1679_v58 = vpop.f32.mrf.mxu0  ;;  %v1258_v32 = vshll.u32 %v889_v10, 16 }
 0x124   : > { %v4175_v9 = vadd.f32 %v1677_v12, %v1558_v7  ;;  %4632 = vst [vmem:[#allocation17_spill] sm:$0xff] %v4178_v13  ;;  %v1245_v12 = vor.u32 %v1244_v21, %v1241_v60  ;;  %v891_v7 = vld [vmem:[%s3863_s24 + $0xb8] sm:$0xf]  ;;  %v1256_v6 = vrot.slane %v1255_v39, 4  ;;  %v1263_v60 = vshrl.u32 %v890_v59, 16 }
 0x125   : > { %v1260_v31 = vrot.slane %v1258_v32, 5  ;;  %v1276_v10 = vshrl.u32 %v891_v7, 16 }
 0x126   : > { %4631 = vst [vmem:[#allocation16_spill] sm:$0xff] %v4175_v9  ;;  %v1246_v54 = vrot.slane %v1245_v12, 4  ;;  %v3510_v12 = vld [vmem:[#allocation2 + $0x200] sm:$0xff]  ;;  %v1265_v39 = vrot.slane %v1263_v60, 4 }
 0x127   : > { %v750_v30 = vpop.f32.mrf.mxu2  ;;  %2681 = vmatpush.bf16.msra.mxu0 %v3510_v12  ;;  %v3746_v9 = vld [vmem:[%s3863_s24 + $0x20] sm:$0x1] }
 0x128   : > { %v820_v16 = vadd.f32 %v750_v30, %v591_v51  ;;  %v1489_v50 = vpop.f32.mrf.mxu3  ;;  %v3502_v51 = vld [vmem:[#allocation2 + $0x140] sm:$0xff]  ;;  %v1272_v30 = vshll.u32 %v891_v7, 16 }
 0x129   : > { %v593_v46 = vpop.f32.mrf.mxu1  ;;  %2491 = vmatpush.bf16.msra.mxu3 %v3502_v51  ;;  %v1278_v51 = vrot.slane %v1276_v10, 4 }
 0x12a   : > { %v1559_v14 = vadd.f32 %v1489_v50, %v820_v16  ;;  %v594_v52 = vadd.f32 %v593_v46, %v3985_v55  ;;  %v1261_v55 = vsel %vm3923_vm2, %v1256_v6, %v1260_v31  ;;  %v3486_v46 = vld [vmem:[#allocation2 + $0x1c0] sm:$0xff]  ;;  %v1274_v19 = vrot.slane %v1272_v30, 5 }
 0x12b   : > { %v1682_v47 = vpop.f32.mrf.mxu0  ;;  %1850 = vmatpush.bf16.msra.mxu1 %v3486_v46 }
 0x12c   : > { %632 = vmatmul.bf16.gmra.mxu1 %v3914_v18  ;;  %792 = vmatmul.bf16.gmra.mxu2 %v4182_v49  ;;  %v4186_v43 = vadd.f32 %v1679_v58, %v1559_v14  ;;  %v1266_v58 = vshll.u32 %v890_v59, 16 }
 0x12d   : > { %1531 = vmatmul.bf16.gmra.mxu3 %v4156_v41 }
 0x12e   : > { %4633 = vst [vmem:[#allocation18_spill] sm:$0xff] %v4186_v43  ;;  %1721 = vmatmul.bf16.gmra.mxu0 %v4178_v13  ;;  %v1251_v43 = vsel %vm3923_vm2, %v1246_v54, %v1250_v48  ;;  %v1268_v32 = vrot.slane %v1266_v58, 5 }
 0x12f   : > { %v753_v18 = vpop.f32.mrf.mxu2  ;;  %v1379_v7 = vunpack.c.l.b16 %v1251_v43  ;;  %v4204_v43 = vld [vmem:[%s3863_s24 + $0xb4] sm:$0xff] }
 0x130   : > { %v821_v21 = vadd.f32 %v753_v18, %v594_v52  ;;  %v1492_v38 = vpop.f32.mrf.mxu3  ;;  %v1380_v52 = vunpack.c.l.b16 %v1261_v55  ;;  %v892_v18 = vld [vmem:[%s3863_s24 + $0xbc] sm:$0x1]  ;;  %v1269_v31 = vor.u32 %v1268_v32, %v1265_v39  ;;  %v893_v55 = vld [vmem:[%s3863_s24 + $0xc0] sm:$0xf]  ;;  %v894_v39 = vld [vmem:[%s3863_s24 + $0xc4] sm:$0xf] }
 0x131   : > { %v595_v16 = vpop.f32.mrf.mxu1  ;;  %v1282_v60 = vshll.u32 %v892_v18, 16  ;;  %v3742_v18 = vld [vmem:[%s3863_s24 + $0x10] sm:$0xf] }
 0x132   : > { %v1560_v50 = vadd.f32 %v1492_v38, %v821_v21  ;;  %v596_v21 = vadd.f32 %v595_v16, %v4005_v5  ;;  %v1279_v38 = vor.u32 %v1278_v51, %v1274_v19  ;;  %v4200_v30 = vpack.c.b16 %v1380_v52, %v1379_v7 }
 0x133   : > { %v1684_v14 = vpop.f32.mrf.mxu0  ;;  %v1270_v5 = vrot.slane %v1269_v31, 4  ;;  %v1287_v7 = vshrl.u32 %v893_v55, 16  ;;  %v1290_v52 = vshll.u32 %v893_v55, 16  ;;  %v1296_v31 = vshll.u32 %v894_v39, 16  ;;  %v3745_v55 = vld [vmem:[%s3863_s24 + $0x1c] sm:$0xf] }
 0x134   : > { %v4196_v59 = vadd.f32 %v1682_v47, %v1560_v50  ;;  %v1280_v16 = vrot.slane %v1279_v38, 4  ;;  %v1284_v50 = vrot.slane %v1282_v60, 5  ;;  %v1300_v38 = vshrl.u32 %v894_v39, 16  ;;  %v3743_v60 = vld [vmem:[%s3863_s24 + $0x8] sm:$0x1] }
 0x135   : > { %v895_v39 = vld [vmem:[%s3863_s24 + $0xc8] sm:$0x1] }
 0x136   : > { %4634 = vst [vmem:[#allocation19_spill] sm:$0xff] %v4196_v59  ;;  %v1292_v59 = vrot.slane %v1290_v52, 5 }
 0x137   : > { %v755_v48 = vpop.f32.mrf.mxu2 }
 0x138   : > { %v822_v54 = vadd.f32 %v755_v48, %v596_v21  ;;  %v1494_v6 = vpop.f32.mrf.mxu3  ;;  %v2048_v21 = vrot.slane %v3742_v18, 5 }
 0x139   : > { %v598_v58 = vpop.f32.mrf.mxu1 }
 0x13a   : > { %v1561_v47 = vadd.f32 %v1494_v6, %v822_v54  ;;  %v599_v12 = vadd.f32 %v598_v58, %v4014_v28  ;;  %v1275_v54 = vsel %vm3923_vm2, %v1270_v5, %v1274_v19  ;;  %v1285_v6 = vsel %vm3923_vm2, %v1280_v16, %v1284_v50 }
 0x13b   : > { %v1687_v10 = vpop.f32.mrf.mxu0  ;;  %v2044_v58 = vrot.slane %v3743_v60, 5  ;;  %v1381_v18 = vunpack.c.l.b16 %v1275_v54  ;;  %v1382_v19 = vunpack.c.l.b16 %v1285_v6  ;;  %v1289_v5 = vrot.slane %v1287_v7, 4 }
 0x13c   : > { %637 = vmatmul.bf16.gmra.mxu1 %v4161_v63  ;;  %797 = vmatmul.bf16.gmra.mxu2 %v4204_v43  ;;  %v4208_v46 = vadd.f32 %v1684_v14, %v1561_v47  ;;  %v3741_v63 = vld [vmem:[%s3863_s24 + $0x4] sm:$0xf]  ;;  %v3744_v47 = vld [vmem:[%s3863_s24 + $0x14] sm:$0x1]  ;;  %v2050_v50 = vrot.slane %v2048_v21, 4 }
 0x13d   : > { %1536 = vmatmul.bf16.gmra.mxu3 %v4178_v13  ;;  %v2041_v32 = vrot.slane %v3741_v63, 5  ;;  %v2051_v63 = vrot.slane %v3744_v47, 5  ;;  %v2058_v13 = vrot.slane %v3746_v9, 5  ;;  %v1298_v47 = vrot.slane %v1296_v31, 5 }
 0x13e   : > { %4635 = vst [vmem:[#allocation20_spill] sm:$0xff] %v4208_v46  ;;  %1726 = vmatmul.bf16.gmra.mxu0 %v4200_v30  ;;  %v2055_v46 = vrot.slane %v3745_v55, 5  ;;  %v1302_v55 = vrot.slane %v1300_v38, 4  ;;  %v4230_v6 = vpack.c.b16 %v1382_v19, %v1381_v18  ;;  %v1293_v41 = vor.u32 %v1292_v59, %v1289_v5 }
 0x13f   : > { %v758_v51 = vpop.f32.mrf.mxu2  ;;  %v2043_v16 = vrot.slane %v2041_v32, 4  ;;  %v1306_v9 = vshll.u32 %v895_v39, 16  ;;  %v2052_v5 = vsel %vm4232_vm5, %v2050_v50, %v2051_v63 }
 0x140   : > { %v823_v48 = vadd.f32 %v758_v51, %v599_v12  ;;  %v1497_v14 = vpop.f32.mrf.mxu3  ;;  %v2057_v7 = vrot.slane %v2055_v46, 4 }
 0x141   : > { %v600_v28 = vpop.f32.mrf.mxu1 }
 0x142   : > { %v1562_v12 = vadd.f32 %v1497_v14, %v823_v48  ;;  %v601_v60 = vadd.f32 %v600_v28, %v4030_v45  ;;  %v1965_v48 = vld [vmem:[%s3863_s24 + $0xc] sm:$0xe]  ;;  %v3310_v14 = vrot.slane %v1964_v17, 9  ;;  %v2045_v17 = vsel %vm4232_vm5, %v2043_v16, %v2044_v58  ;;  %v3747_v58 = vld [vmem:[%s3863_s24 + $0xc0] sm:$0xff] }
 0x143   : > { %v1689_v51 = vpop.f32.mrf.mxu0  ;;  %v3311_v54 = vrot.slane %v1965_v48, 9  ;;  %v2183_v19 = vunpack.c.l.b16 %v2045_v17 }
 0x144   : > { %v4225_v34 = vadd.f32 %v1687_v10, %v1562_v12  ;;  %v1966_v12 = vld [vmem:[%s3863_s24 + $0x18] sm:$0xe]  ;;  %v2042_v31 = vsel %vm4232_vm5, %v3310_v14, %v2041_v32  ;;  %v2059_v14 = vsel %vm4232_vm5, %v2057_v7, %v2058_v13  ;;  %v1294_v13 = vrot.slane %v1293_v41, 4 }
 0x145   : > { %v2049_v38 = vsel %vm4232_vm5, %v3311_v54, %v2048_v21  ;;  %v2182_v59 = vunpack.c.l.b16 %v2042_v31  ;;  %v3312_v11 = vrot.slane %v1966_v12, 9  ;;  %v2187_v63 = vunpack.c.l.b16 %v2059_v14 }
 0x146   : > { %4636 = vst [vmem:[#allocation21_spill] sm:$0xff] %v4225_v34  ;;  %v2184_v39 = vunpack.c.l.b16 %v2049_v38  ;;  %v2185_v34 = vunpack.c.l.b16 %v2052_v5  ;;  %v1299_v31 = vsel %vm3923_vm2, %v1294_v13, %v1298_v47  ;;  %v3445_v5 = vld [vmem:[%s3863_s24 + $0xcc] sm:$0xff] }
 0x147   : > { %v760_v52 = vpop.f32.mrf.mxu2  ;;  %v2214_v32 = vpack.c.b16 %v2183_v19, %v2182_v59  ;;  %v2056_v16 = vsel %vm4232_vm5, %v3312_v11, %v2055_v46 }
 0x148   : > { %v824_v45 = vadd.f32 %v760_v52, %v601_v60  ;;  %v1499_v28 = vpop.f32.mrf.mxu3  ;;  %v1303_v52 = vor.u32 %v1302_v55, %v1298_v47  ;;  %v4249_v21 = vpack.c.b16 %v2185_v34, %v2184_v39  ;;  %v2186_v55 = vunpack.c.l.b16 %v2056_v16 }
 0x149   : > { %v603_v18 = vpop.f32.mrf.mxu1 }
 0x14a   : > { %v1563_v48 = vadd.f32 %v1499_v28, %v824_v45  ;;  %v604_v54 = vadd.f32 %v603_v18, %v4043_v4  ;;  %v1304_v7 = vrot.slane %v1303_v52, 4  ;;  %v4258_v34 = vpack.c.b16 %v2187_v63, %v2186_v55 }
 0x14b   : > { %v1692_v60 = vpop.f32.mrf.mxu0  ;;  %v1601_v4 = vunpack.c.l.b16 %v1299_v31 }
 0x14c   : > { %642 = vmatmul.bf16.gmra.mxu1 %v4182_v49  ;;  %802 = vmatmul.bf16.gmra.mxu2 %v3747_v58  ;;  %v4253_v50 = vadd.f32 %v1689_v51, %v1563_v48  ;;  %v1308_v49 = vrot.slane %v1306_v9, 5 }
 0x14d   : > { %1541 = vmatmul.bf16.gmra.mxu3 %v4200_v30 }
 0x14e   : > { %1731 = vmatmul.bf16.gmra.mxu0 %v4230_v6  ;;  %v1309_v17 = vsel %vm3923_vm2, %v1304_v7, %v1308_v49 }
 0x14f   : > { %v763_v12 = vpop.f32.mrf.mxu2  ;;  %v1602_v41 = vunpack.c.l.b16 %v1309_v17 }
 0x150   : > { %v825_v45 = vadd.f32 %v763_v12, %v604_v54  ;;  %v1502_v28 = vpop.f32.mrf.mxu3 }
 0x151   : > { %v605_v11 = vpop.f32.mrf.mxu1  ;;  %v4268_v48 = vpack.c.b16 %v1602_v41, %v1601_v4  ;;  %v3749_v41 = vld [vmem:[%s3863_s24 + $0x2c] sm:$0x1] }
 0x152   : > { %v1564_v46 = vadd.f32 %v1502_v28, %v825_v45  ;;  %v606_v9 = vadd.f32 %v605_v11, %v4059_v40 }
 0x153   : > { %v1694_v51 = vpop.f32.mrf.mxu0 }
 0x154   : > { %v4264_v38 = vadd.f32 %v1692_v60, %v1564_v46  ;;  %v3748_v46 = vld [vmem:[%s3863_s24 + $0x28] sm:$0xf] }
 0x157   : > { %v765_v18 = vpop.f32.mrf.mxu2 }
 0x158   : > { %v826_v59 = vadd.f32 %v765_v18, %v606_v9  ;;  %v1504_v19 = vpop.f32.mrf.mxu3  ;;  %v2065_v9 = vrot.slane %v3749_v41, 5 }
 0x159   : > { %v608_v39 = vpop.f32.mrf.mxu1 }
 0x15a   : > { %v1565_v52 = vadd.f32 %v1504_v19, %v826_v59  ;;  %v609_v40 = vadd.f32 %v608_v39, %v4072_v8  ;;  %v2062_v8 = vrot.slane %v3748_v46, 5 }
 0x15b   : > { %v1697_v14 = vpop.f32.mrf.mxu0 }
 0x15c   : > { %647 = vmatmul.bf16.gmra.mxu1 %v4204_v43  ;;  %807 = vmatmul.bf16.gmra.mxu2 %v3445_v5  ;;  %v4271_v47 = vadd.f32 %v1694_v51, %v1565_v52  ;;  %v1967_v51 = vld [vmem:[%s3863_s24 + $0x24] sm:$0xe]  ;;  %v2064_v4 = vrot.slane %v2062_v8, 4 }
 0x15d   : > { %1546 = vmatmul.bf16.gmra.mxu3 %v4230_v6  ;;  %v3313_v17 = vrot.slane %v1967_v51, 9 }
 0x15e   : > { %1736 = vmatmul.bf16.gmra.mxu0 %v4268_v48  ;;  %v2066_v52 = vsel %vm4232_vm5, %v2064_v4, %v2065_v9 }
 0x15f   : > { %v768_v60 = vpop.f32.mrf.mxu2 }
 0x160   : > { %v827_v58 = vadd.f32 %v768_v60, %v609_v40  ;;  %v1507_v16 = vpop.f32.mrf.mxu3  ;;  %v2189_v40 = vunpack.c.l.b16 %v2066_v52 }
 0x161   : > { %v610_v63 = vpop.f32.mrf.mxu1 }
 0x162   : > { %v1566_v55 = vadd.f32 %v1507_v16, %v827_v58  ;;  %v611_v43 = vadd.f32 %v610_v63, %v4092_v37 }
 0x163   : > { %v1699_v54 = vpop.f32.mrf.mxu0 }
 0x164   : > { %v4276_v13 = vadd.f32 %v1697_v14, %v1566_v55 }
 0x167   : > { %v770_v7 = vpop.f32.mrf.mxu2 }
 0x168   : > { %v828_v49 = vadd.f32 %v770_v7, %v611_v43  ;;  %v1509_v12 = vpop.f32.mrf.mxu3 }
 0x169   : > { %v613_v45 = vpop.f32.mrf.mxu1 }
 0x16a   : > { %v1567_v28 = vadd.f32 %v1509_v12, %v828_v49  ;;  %v614_v37 = vadd.f32 %v613_v45, %v3997_v2  ;;  %v3750_v49 = vld [vmem:[%s3863_s24 + $0x34] sm:$0xf]  ;;  %v1968_v45 = vld [vmem:[%s3863_s24 + $0x30] sm:$0xe] }
 0x16b   : > { %v1702_v11 = vpop.f32.mrf.mxu0  ;;  %v2069_v12 = vrot.slane %v3750_v49, 5  ;;  %v3753_v49 = vld [vmem:[%s3863_s24 + $0x44] sm:$0x1] }
 0x16c   : > { %1851 = vmatmul.bf16.vlgmr.msra.gmra.mxu1 %v3947_v35  ;;  %2302 = vmatmul.bf16.vlgmr.msra.gmra.mxu2 %v2214_v32  ;;  %v4282_v31 = vadd.f32 %v1699_v54, %v1567_v28  ;;  %v2063_v32 = vsel %vm4232_vm5, %v3313_v17, %v2062_v8  ;;  %v3751_v8 = vld [vmem:[%s3863_s24 + $0x38] sm:$0x1] }
 0x16d   : > { %2492 = vmatmul.bf16.vlgmr.msra.gmra.mxu3 %v4249_v21  ;;  %v2188_v2 = vunpack.c.l.b16 %v2063_v32  ;;  %v2071_v46 = vrot.slane %v2069_v12, 4  ;;  %v2072_v51 = vrot.slane %v3751_v8, 5 }
 0x16e   : > { %2682 = vmatmul.bf16.vlgmr.msra.gmra.mxu0 %v4258_v34 }
 0x16f   : > { %v773_v18 = vpop.f32.mrf.mxu2  ;;  %v4295_v54 = vpack.c.b16 %v2189_v40, %v2188_v2 }
 0x170   : > { %v829_v59 = vadd.f32 %v773_v18, %v614_v37  ;;  %v1512_v19 = vpop.f32.mrf.mxu3  ;;  %v2073_v18 = vsel %vm4232_vm5, %v2071_v46, %v2072_v51 }
 0x171   : > { %v615_v5 = vpop.f32.mrf.mxu1 }
 0x172   : > { %v1568_v39 = vadd.f32 %v1512_v19, %v829_v59  ;;  %v616_v60 = vadd.f32 %v615_v5, %v4010_v26  ;;  %v2191_v19 = vunpack.c.l.b16 %v2073_v18 }
 0x173   : > { %v1704_v35 = vpop.f32.mrf.mxu0 }
 0x174   : > { %v4292_v14 = vadd.f32 %v1702_v11, %v1568_v39  ;;  %v3314_v11 = vrot.slane %v1968_v45, 9 }
 0x177   : > { %v775_v58 = vpop.f32.mrf.mxu2 }
 0x178   : > { %v830_v16 = vadd.f32 %v775_v58, %v616_v60  ;;  %v1514_v63 = vpop.f32.mrf.mxu3  ;;  %v3752_v58 = vld [vmem:[%s3863_s24 + $0x40] sm:$0xf] }
 0x179   : > { %v618_v55 = vpop.f32.mrf.mxu1 }
 0x17a   : > { %v1569_v43 = vadd.f32 %v1514_v63, %v830_v16  ;;  %v619_v26 = vadd.f32 %v618_v55, %v4024_v42  ;;  %v2076_v16 = vrot.slane %v3752_v58, 5  ;;  %v1969_v63 = vld [vmem:[%s3863_s24 + $0x3c] sm:$0xe] }
 0x17b   : > { %v1707_v7 = vpop.f32.mrf.mxu0 }
 0x17c   : > { %1856 = vmatmul.bf16.gmra.mxu1 %v3959_v57  ;;  %2307 = vmatmul.bf16.gmra.mxu2 %v4249_v21  ;;  %v4301_v28 = vadd.f32 %v1704_v35, %v1569_v43  ;;  %v2070_v21 = vsel %vm4232_vm5, %v3314_v11, %v2069_v12  ;;  %v3315_v43 = vrot.slane %v1969_v63, 9  ;;  %v2079_v12 = vrot.slane %v3753_v49, 5 }
 0x17d   : > { %2497 = vmatmul.bf16.gmra.mxu3 %v4258_v34  ;;  %v2190_v42 = vunpack.c.l.b16 %v2070_v21 }
 0x17e   : > { %2687 = vmatmul.bf16.gmra.mxu0 %v4295_v54 }
 0x17f   : > { %v778_v37 = vpop.f32.mrf.mxu2  ;;  %v4314_v2 = vpack.c.b16 %v2191_v19, %v2190_v42 }
 0x180   : > { %v831_v17 = vadd.f32 %v778_v37, %v619_v26  ;;  %v1517_v4 = vpop.f32.mrf.mxu3 }
 0x181   : > { %v620_v41 = vpop.f32.mrf.mxu1 }
 0x182   : > { %v1570_v57 = vadd.f32 %v1517_v4, %v831_v17  ;;  %v621_v5 = vadd.f32 %v620_v41, %v4038_v0 }
 0x183   : > { %v1709_v9 = vpop.f32.mrf.mxu0 }
 0x184   : > { %v4311_v59 = vadd.f32 %v1707_v7, %v1570_v57  ;;  %v2078_v7 = vrot.slane %v2076_v16, 4 }
 0x186   : > { %v2080_v51 = vsel %vm4232_vm5, %v2078_v7, %v2079_v12 }
 0x187   : > { %v780_v39 = vpop.f32.mrf.mxu2  ;;  %v2193_v17 = vunpack.c.l.b16 %v2080_v51 }
 0x188   : > { %v832_v35 = vadd.f32 %v780_v39, %v621_v5  ;;  %v1519_v32 = vpop.f32.mrf.mxu3  ;;  %v3754_v5 = vld [vmem:[%s3863_s24 + $0x4c] sm:$0xf] }
 0x189   : > { %v623_v52 = vpop.f32.mrf.mxu1  ;;  %v2083_v39 = vrot.slane %v3754_v5, 5 }
 0x18a   : > { %v1571_v40 = vadd.f32 %v1519_v32, %v832_v35  ;;  %v624_v0 = vadd.f32 %v623_v52, %v4055_v25  ;;  %v1970_v35 = vld [vmem:[%s3863_s24 + $0x48] sm:$0xe] }
 0x18b   : > { %v1712_v60 = vpop.f32.mrf.mxu0  ;;  %v3316_v52 = vrot.slane %v1970_v35, 9 }
 0x18c   : > { %1861 = vmatmul.bf16.gmra.mxu1 %v3972_v24  ;;  %2312 = vmatmul.bf16.gmra.mxu2 %v4258_v34  ;;  %v4320_v55 = vadd.f32 %v1709_v9, %v1571_v40  ;;  %v2077_v34 = vsel %vm4232_vm5, %v3315_v43, %v2076_v16  ;;  %v2085_v40 = vrot.slane %v2083_v39, 4 }
 0x18d   : > { %2502 = vmatmul.bf16.gmra.mxu3 %v4295_v54  ;;  %v2192_v25 = vunpack.c.l.b16 %v2077_v34 }
 0x18e   : > { %2692 = vmatmul.bf16.gmra.mxu0 %v4314_v2 }
 0x18f   : > { %v783_v45 = vpop.f32.mrf.mxu2  ;;  %v4333_v18 = vpack.c.b16 %v2193_v17, %v2192_v25  ;;  %v3756_v17 = vld [vmem:[%s3863_s24 + $0x58] sm:$0xf] }
 0x190   : > { %v833_v26 = vadd.f32 %v783_v45, %v624_v0  ;;  %v1522_v11 = vpop.f32.mrf.mxu3 }
 0x191   : > { %v625_v46 = vpop.f32.mrf.mxu1 }
 0x192   : > { %v1572_v24 = vadd.f32 %v1522_v11, %v833_v26  ;;  %v626_v4 = vadd.f32 %v625_v46, %v4068_v61 }
 0x193   : > { %v1714_v8 = vpop.f32.mrf.mxu0 }
 0x194   : > { %v4330_v37 = vadd.f32 %v1712_v60, %v1572_v24  ;;  %v3755_v60 = vld [vmem:[%s3863_s24 + $0x50] sm:$0x1] }
 0x195   : > { %v2086_v58 = vrot.slane %v3755_v60, 5 }
 0x197   : > { %v785_v41 = vpop.f32.mrf.mxu2  ;;  %v2087_v49 = vsel %vm4232_vm5, %v2085_v40, %v2086_v58 }
 0x198   : > { %v834_v57 = vadd.f32 %v785_v41, %v626_v4  ;;  %v1524_v9 = vpop.f32.mrf.mxu3  ;;  %v2195_v45 = vunpack.c.l.b16 %v2087_v49  ;;  %v2090_v4 = vrot.slane %v3756_v17, 5  ;;  %v1971_v41 = vld [vmem:[%s3863_s24 + $0x54] sm:$0xe] }
 0x199   : > { %v628_v21 = vpop.f32.mrf.mxu1 }
 0x19a   : > { %v1573_v42 = vadd.f32 %v1524_v9, %v834_v57  ;;  %v629_v61 = vadd.f32 %v628_v21, %v4084_v23  ;;  %v3317_v9 = vrot.slane %v1971_v41, 9  ;;  %v2092_v21 = vrot.slane %v2090_v4, 4 }
 0x19b   : > { %v1717_v19 = vpop.f32.mrf.mxu0 }
 0x19c   : > { %1866 = vmatmul.bf16.gmra.mxu1 %v3987_v56  ;;  %2317 = vmatmul.bf16.gmra.mxu2 %v4295_v54  ;;  %v4339_v32 = vadd.f32 %v1714_v8, %v1573_v42  ;;  %v2084_v54 = vsel %vm4232_vm5, %v3316_v52, %v2083_v39  ;;  %v3757_v42 = vld [vmem:[%s3863_s24 + $0x5c] sm:$0x1] }
 0x19d   : > { %2507 = vmatmul.bf16.gmra.mxu3 %v4314_v2  ;;  %v2194_v23 = vunpack.c.l.b16 %v2084_v54 }
 0x19e   : > { %2697 = vmatmul.bf16.gmra.mxu0 %v4333_v18 }
 0x19f   : > { %v788_v16 = vpop.f32.mrf.mxu2  ;;  %v4352_v34 = vpack.c.b16 %v2195_v45, %v2194_v23  ;;  %v3758_v23 = vld [vmem:[%s3863_s24 + $0x64] sm:$0xf] }
 0x1a0   : > { %v835_v63 = vadd.f32 %v788_v16, %v629_v61  ;;  %v1527_v0 = vpop.f32.mrf.mxu3  ;;  %v2097_v45 = vrot.slane %v3758_v23, 5 }
 0x1a1   : > { %v630_v43 = vpop.f32.mrf.mxu1 }
 0x1a2   : > { %v1574_v56 = vadd.f32 %v1527_v0, %v835_v63  ;;  %v631_v26 = vadd.f32 %v630_v43, %v4097_v1 }
 0x1a3   : > { %v1719_v7 = vpop.f32.mrf.mxu0 }
 0x1a4   : > { %v4349_v12 = vadd.f32 %v1717_v19, %v1574_v56  ;;  %v2093_v19 = vrot.slane %v3757_v42, 5 }
 0x1a6   : > { %v2094_v40 = vsel %vm4232_vm5, %v2092_v21, %v2093_v19 }
 0x1a7   : > { %v790_v11 = vpop.f32.mrf.mxu2  ;;  %v2197_v58 = vunpack.c.l.b16 %v2094_v40  ;;  %v3760_v40 = vld [vmem:[%s3863_s24 + $0x70] sm:$0xf] }
 0x1a8   : > { %v836_v46 = vadd.f32 %v790_v11, %v631_v26  ;;  %v1529_v24 = vpop.f32.mrf.mxu3  ;;  %v1972_v26 = vld [vmem:[%s3863_s24 + $0x60] sm:$0xe] }
 0x1a9   : > { %v633_v8 = vpop.f32.mrf.mxu1 }
 0x1aa   : > { %v1575_v51 = vadd.f32 %v1529_v24, %v836_v46  ;;  %v634_v1 = vadd.f32 %v633_v8, %v3999_v3  ;;  %v3318_v46 = vrot.slane %v1972_v26, 9  ;;  %v2099_v24 = vrot.slane %v2097_v45, 4  ;;  %v3759_v8 = vld [vmem:[%s3863_s24 + $0x68] sm:$0x1] }
 0x1ab   : > { %v1722_v25 = vpop.f32.mrf.mxu0 }
 0x1ac   : > { %1871 = vmatmul.bf16.gmra.mxu1 %v4016_v29  ;;  %2322 = vmatmul.bf16.gmra.mxu2 %v4314_v2  ;;  %v4358_v57 = vadd.f32 %v1719_v7, %v1575_v51  ;;  %v2091_v2 = vsel %vm4232_vm5, %v3317_v9, %v2090_v4  ;;  %v2100_v51 = vrot.slane %v3759_v8, 5 }
 0x1ad   : > { %2512 = vmatmul.bf16.gmra.mxu3 %v4333_v18  ;;  %v2196_v3 = vunpack.c.l.b16 %v2091_v2 }
 0x1ae   : > { %2702 = vmatmul.bf16.gmra.mxu0 %v4352_v34  ;;  %v2101_v9 = vsel %vm4232_vm5, %v2099_v24, %v2100_v51 }
 0x1af   : > { %v793_v5 = vpop.f32.mrf.mxu2  ;;  %v4371_v7 = vpack.c.b16 %v2197_v58, %v2196_v3  ;;  %v2199_v42 = vunpack.c.l.b16 %v2101_v9  ;;  %v2104_v3 = vrot.slane %v3760_v40, 5  ;;  %v1973_v58 = vld [vmem:[%s3863_s24 + $0x6c] sm:$0xe] }
 0x1b0   : > { %v837_v39 = vadd.f32 %v793_v5, %v634_v1  ;;  %v1532_v35 = vpop.f32.mrf.mxu3 }
 0x1b1   : > { %v635_v61 = vpop.f32.mrf.mxu1 }
 0x1b2   : > { %v1576_v29 = vadd.f32 %v1532_v35, %v837_v39  ;;  %v636_v16 = vadd.f32 %v635_v61, %v4012_v27 }
 0x1b3   : > { %v1724_v52 = vpop.f32.mrf.mxu0 }
 0x1b4   : > { %v4368_v60 = vadd.f32 %v1722_v25, %v1576_v29 }
 0x1b7   : > { %v795_v63 = vpop.f32.mrf.mxu2 }
 0x1b8   : > { %v838_v0 = vadd.f32 %v795_v63, %v636_v16  ;;  %v1534_v43 = vpop.f32.mrf.mxu3  ;;  %v4639_v16 = vld [vmem:[#allocation7_spill] sm:$0xff] }
 0x1b9   : > { %v638_v56 = vpop.f32.mrf.mxu1 }
 0x1ba   : > { %v1577_v54 = vadd.f32 %v1534_v43, %v838_v0  ;;  %v639_v27 = vadd.f32 %v638_v56, %v4028_v44  ;;  %v3319_v43 = vrot.slane %v1973_v58, 9  ;;  %v2106_v56 = vrot.slane %v2104_v3, 4  ;;  %v3763_v58 = vld [vmem:[%s3863_s24 + $0x80] sm:$0x1] }
 0x1bb   : > { %v1727_v49 = vpop.f32.mrf.mxu0 }
 0x1bc   : > { %1876 = vmatmul.bf16.gmra.mxu1 %v4045_v33  ;;  %2327 = vmatmul.bf16.gmra.mxu2 %v4333_v18  ;;  %v4377_v11 = vadd.f32 %v1724_v52, %v1577_v54  ;;  %v2098_v18 = vsel %vm4232_vm5, %v3318_v46, %v2097_v45  ;;  %v3761_v54 = vld [vmem:[%s3863_s24 + $0x74] sm:$0x1] }
 0x1bd   : > { %2517 = vmatmul.bf16.gmra.mxu3 %v4352_v34  ;;  %v2198_v44 = vunpack.c.l.b16 %v2098_v18 }
 0x1be   : > { %2707 = vmatmul.bf16.gmra.mxu0 %v4371_v7 }
 0x1bf   : > { %v798_v25 = vpop.f32.mrf.mxu2  ;;  %v4390_v29 = vpack.c.b16 %v2199_v42, %v2198_v44 }
 0x1c0   : > { %v839_v17 = vadd.f32 %v798_v25, %v639_v27  ;;  %v1537_v4 = vpop.f32.mrf.mxu3 }
 0x1c1   : > { %v640_v41 = vpop.f32.mrf.mxu1 }
 0x1c2   : > { %v1578_v33 = vadd.f32 %v1537_v4, %v839_v17  ;;  %v641_v19 = vadd.f32 %v640_v41, %v4041_v22  ;;  %v4640_v22 = vld [vmem:[#allocation5_spill] sm:$0xff]  ;;  %v4641_v4 = vld [vmem:[#allocation6_spill] sm:$0xff] }
 0x1c3   : > { %v1729_v1 = vpop.f32.mrf.mxu0 }
 0x1c4   : > { %v4387_v21 = vadd.f32 %v1727_v49, %v1578_v33  ;;  %v2107_v49 = vrot.slane %v3761_v54, 5 }
 0x1c6   : > { %v2108_v8 = vsel %vm4232_vm5, %v2106_v56, %v2107_v49 }
 0x1c7   : > { %v800_v5 = vpop.f32.mrf.mxu2  ;;  %v2201_v17 = vunpack.c.l.b16 %v2108_v8 }
 0x1c8   : > { %v840_v39 = vadd.f32 %v800_v5, %v641_v19  ;;  %v1539_v35 = vpop.f32.mrf.mxu3  ;;  %v3762_v5 = vld [vmem:[%s3863_s24 + $0x7c] sm:$0xf] }
 0x1c9   : > { %v643_v61 = vpop.f32.mrf.mxu1 }
 0x1ca   : > { %v1579_v52 = vadd.f32 %v1539_v35, %v840_v39  ;;  %v644_v0 = vadd.f32 %v643_v61, %v4640_v22  ;;  %v2111_v39 = vrot.slane %v3762_v5, 5  ;;  %v1974_v35 = vld [vmem:[%s3863_s24 + $0x78] sm:$0xe]  ;;  %v3765_v5 = vld [vmem:[%s3863_s24 + $0x8c] sm:$0x1] }
 0x1cb   : > { %v1732_v2 = vpop.f32.mrf.mxu0  ;;  %v3320_v40 = vrot.slane %v1974_v35, 9 }
 0x1cc   : > { %1881 = vmatmul.bf16.gmra.mxu1 %v4639_v16  ;;  %2332 = vmatmul.bf16.gmra.mxu2 %v4352_v34  ;;  %v4396_v63 = vadd.f32 %v1729_v1, %v1579_v52  ;;  %v2105_v34 = vsel %vm4232_vm5, %v3319_v43, %v2104_v3  ;;  %v4642_v52 = vld [vmem:[#allocation8_spill] sm:$0xff]  ;;  %v2113_v3 = vrot.slane %v2111_v39, 4  ;;  %v2114_v16 = vrot.slane %v3763_v58, 5 }
 0x1cd   : > { %2522 = vmatmul.bf16.gmra.mxu3 %v4371_v7  ;;  %v2200_v25 = vunpack.c.l.b16 %v2105_v34 }
 0x1ce   : > { %2712 = vmatmul.bf16.gmra.mxu0 %v4390_v29  ;;  %v2115_v49 = vsel %vm4232_vm5, %v2113_v3, %v2114_v16 }
 0x1cf   : > { %v803_v23 = vpop.f32.mrf.mxu2  ;;  %v4409_v44 = vpack.c.b16 %v2201_v17, %v2200_v25 }
 0x1d0   : > { %v841_v45 = vadd.f32 %v803_v23, %v644_v0  ;;  %v1542_v26 = vpop.f32.mrf.mxu3 }
 0x1d1   : > { %v645_v27 = vpop.f32.mrf.mxu1 }
 0x1d2   : > { %v1580_v46 = vadd.f32 %v1542_v26, %v841_v45  ;;  %v646_v41 = vadd.f32 %v645_v27, %v4641_v4  ;;  %v2203_v26 = vunpack.c.l.b16 %v2115_v49  ;;  %v4643_v27 = vld [vmem:[#allocation9_spill] sm:$0xff] }
 0x1d3   : > { %v1734_v24 = vpop.f32.mrf.mxu0 }
 0x1d4   : > { %v4406_v51 = vadd.f32 %v1732_v2, %v1580_v46 }
 0x1d7   : > { %v805_v33 = vpop.f32.mrf.mxu2 }
 0x1d8   : > { %v842_v1 = vadd.f32 %v805_v33, %v646_v41  ;;  %v1544_v18 = vpop.f32.mrf.mxu3  ;;  %v3764_v33 = vld [vmem:[%s3863_s24 + $0x88] sm:$0xf] }
 0x1d9   : > { %v648_v9 = vpop.f32.mrf.mxu1 }
 0x1da   : > { %v1581_v42 = vadd.f32 %v1544_v18, %v842_v1  ;;  %v649_v2 = vadd.f32 %v648_v9, %v4642_v52  ;;  %v2118_v1 = vrot.slane %v3764_v33, 5  ;;  %v1975_v18 = vld [vmem:[%s3863_s24 + $0x84] sm:$0xe]  ;;  %v4644_v52 = vld [vmem:[#allocation10_spill] sm:$0xff]  ;;  %v3766_v33 = vld [vmem:[%s3863_s24 + $0x94] sm:$0xf] }
 0x1db   : > { %v1737_v19 = vpop.f32.mrf.mxu0 }
 0x1dc   : > { %1886 = vmatmul.bf16.gmra.mxu1 %v4101_v15  ;;  %2337 = vmatmul.bf16.gmra.mxu2 %v4371_v7  ;;  %v4415_v61 = vadd.f32 %v1734_v24, %v1581_v42  ;;  %v2112_v7 = vsel %vm4232_vm5, %v3320_v40, %v2111_v39  ;;  %v3321_v42 = vrot.slane %v1975_v18, 9  ;;  %v2121_v39 = vrot.slane %v3765_v5, 5 }
 0x1dd   : > { %2527 = vmatmul.bf16.gmra.mxu3 %v4390_v29  ;;  %v2202_v45 = vunpack.c.l.b16 %v2112_v7 }
 0x1de   : > { %2717 = vmatmul.bf16.gmra.mxu0 %v4409_v44 }
 0x1df   : > { %v808_v22 = vpop.f32.mrf.mxu2  ;;  %v4428_v17 = vpack.c.b16 %v2203_v26, %v2202_v45 }
 0x1e0   : > { %v843_v0 = vadd.f32 %v808_v22, %v649_v2  ;;  %v1547_v43 = vpop.f32.mrf.mxu3 }
 0x1e1   : > { %v650_v56 = vpop.f32.mrf.mxu1 }
 0x1e2   : > { %v1582_v15 = vadd.f32 %v1547_v43, %v843_v0  ;;  %v651_v46 = vadd.f32 %v650_v56, %v4643_v27  ;;  %v3519_v56 = vld [vmem:[%s4450_s28] sm:$0xff]  }
 0x1e3   : > { %v1739_v54 = vpop.f32.mrf.mxu0  ;;  %v3520_v26 = vunpack.c.l.bf16 %v3519_v56 }
 0x1e4   : > { %v4425_v23 = vadd.f32 %v1737_v19, %v1582_v15  ;;  %v2120_v19 = vrot.slane %v2118_v1, 4  ;;  %v4645_v15 = vld [vmem:[#allocation11_spill] sm:$0xff] }
 0x1e6   : > { %v2122_v16 = vsel %vm4232_vm5, %v2120_v19, %v2121_v39  ;;  %v3767_v39 = vld [vmem:[%s3863_s24 + $0x98] sm:$0x1] }
 0x1e7   : > { %v810_v24 = vpop.f32.mrf.mxu2  ;;  %v2205_v0 = vunpack.c.l.b16 %v2122_v16 }
 0x1e8   : > { %v844_v34 = vadd.f32 %v810_v24, %v651_v46  ;;  %v1549_v8 = vpop.f32.mrf.mxu3 }
 0x1e9   : > { %v1852_v25 = vpop.f32.mrf.mxu1 }
 0x1ea   : > { %v1583_v4 = vadd.f32 %v1549_v8, %v844_v34  ;;  %v1932_v2 = vadd.f32 %v1852_v25, %v4644_v52  ;;  %v3521_v8 = vunpack.c.h.bf16 %v3519_v56  ;;  %v4646_v56 = vld [vmem:[#allocation12_spill] sm:$0xff] }
 0x1eb   : > { %v2683_v41 = vpop.f32.mrf.mxu0 }
 0x1ec   : > { %1891 = vmatmul.bf16.gmra.mxu1 %v4118_v53  ;;  %2342 = vmatmul.bf16.gmra.mxu2 %v4390_v29  ;;  %v4434_v9 = vadd.f32 %v1739_v54, %v1583_v4  ;;  %v2119_v29 = vsel %vm4232_vm5, %v3321_v42, %v2118_v1  ;;  %v1976_v4 = vld [vmem:[%s3863_s24 + $0x90] sm:$0xe]  ;;  %v2125_v1 = vrot.slane %v3766_v33, 5  ;;  %v3768_v33 = vld [vmem:[%s3863_s24 + $0xa0] sm:$0xf] }
 0x1ed   : > { %2532 = vmatmul.bf16.gmra.mxu3 %v4409_v44  ;;  %v2204_v22 = vunpack.c.l.b16 %v2119_v29  ;;  %v3322_v42 = vrot.slane %v1976_v4, 9  ;;  %v1977_v4 = vld [vmem:[%s3863_s24 + $0x9c] sm:$0xe] }
 0x1ee   : > { %2722 = vmatmul.bf16.gmra.mxu0 %v4428_v17  ;;  %v2127_v5 = vrot.slane %v2125_v1, 4 }
 0x1ef   : > { %v2303_v35 = vpop.f32.mrf.mxu2  ;;  %v4454_v46 = vpack.c.b16 %v2205_v0, %v2204_v22 }
 0x1f0   : > { %v2493_v40 = vpop.f32.mrf.mxu3  ;;  %v2383_v53 = vadd.f32 %v2303_v35, %v1932_v2  ;;  %v2128_v35 = vrot.slane %v3767_v39, 5  ;;  %v3769_v39 = vld [vmem:[%s3863_s24 + $0xa4] sm:$0x1] }
 0x1f1   : > { %v1854_v3 = vpop.f32.mrf.mxu1 }
 0x1f2   : > { %v2573_v43 = vadd.f32 %v2493_v40, %v2383_v53  ;;  %v1933_v54 = vadd.f32 %v1854_v3, %v4645_v15  ;;  %v2129_v29 = vsel %vm4232_vm5, %v2127_v5, %v2128_v35  ;;  %v2135_v35 = vrot.slane %v3769_v39, 5 }
 0x1f3   : > { %v2685_v58 = vpop.f32.mrf.mxu0  ;;  %v2207_v22 = vunpack.c.l.b16 %v2129_v29 }
 0x1f4   : > { %v2763_v24 = vadd.f32 %v2683_v41, %v2573_v43  ;;  %v3662_v43 = vld [vmem:[%s4450_s28 + $0x8] sm:$0xff]  }
 0x1f6   : > { %v2859_v19 = vadd.f32 %v3520_v26, %v2763_v24 }
 0x1f7   : > { %v2305_v7 = vpop.f32.mrf.mxu2 }
 0x1f8   : > { %v2384_v49 = vadd.f32 %v2305_v7, %v1933_v54  ;;  %v2495_v45 = vpop.f32.mrf.mxu3 }
 0x1f9   : > { %v1857_v27 = vpop.f32.mrf.mxu1 }
 0x1fa   : > { %v2574_v34 = vadd.f32 %v2495_v45, %v2384_v49  ;;  %v1934_v52 = vadd.f32 %v1857_v27, %v4134_v62  ;;  %v3524_v49 = vunpack.c.l.bf16 %v3662_v43 }
 0x1fb   : > { %v2688_v25 = vpop.f32.mrf.mxu0 }
 0x1fc   : > { %v2764_v18 = vadd.f32 %v2685_v58, %v2574_v34  ;;  %1896 = vmatmul.bf16.gmra.mxu1 %v4137_v20  ;;  %2347 = vmatmul.bf16.gmra.mxu2 %v4409_v44  ;;  %v2126_v58 = vsel %vm4232_vm5, %v3322_v42, %v2125_v1  ;;  %v3525_v34 = vunpack.c.h.bf16 %v3662_v43  ;;  %v2132_v1 = vrot.slane %v3768_v33, 5  ;;  %v4647_v42 = vld [vmem:[#allocation14_spill] sm:$0xff]  ;;  %v3663_v43 = vld [vmem:[%s4450_s28 + $0x10] sm:$0xff]  }
 0x1fd   : > { %2537 = vmatmul.bf16.gmra.mxu3 %v4428_v17  ;;  %v2206_v16 = vunpack.c.l.b16 %v2126_v58 }
 0x1fe   : > { %2727 = vmatmul.bf16.gmra.mxu0 %v4454_v46  ;;  %v2860_v41 = vadd.f32 %v3521_v8, %v2764_v18  ;;  %v2134_v5 = vrot.slane %v2132_v1, 4 }
 0x1ff   : > { %v2308_v20 = vpop.f32.mrf.mxu2  ;;  %v4478_v26 = vpack.c.b16 %v2207_v22, %v2206_v16 }
 0x200   : > { %v3585_v44 = vpack.c.bf16 %v2860_v41, %v2859_v19  ;;  %v2498_v2 = vpop.f32.mrf.mxu3  ;;  %v2385_v3 = vadd.f32 %v2308_v20, %v1934_v52  ;;  %v3323_v19 = vrot.slane %v1977_v4, 9  ;;  %v4648_v52 = vld [vmem:[#allocation13_spill] sm:$0xff]  ;;  %v2136_v29 = vsel %vm4232_vm5, %v2134_v5, %v2135_v35  ;;  %v3771_v35 = vld [vmem:[%s3863_s24 + $0xb0] sm:$0x1] }
 0x201   : > { %v1859_v40 = vpop.f32.mrf.mxu1  ;;  %v2209_v22 = vunpack.c.l.b16 %v2136_v29  ;;  %v3529_v4 = vunpack.c.h.bf16 %v3663_v43 }
 0x202   : > { %3586 = vst [vmem:[%s4468_s4] sm:$0xff] %v3585_v44   ;;  %v2575_v0 = vadd.f32 %v2498_v2, %v2385_v3  ;;  %v1935_v15 = vadd.f32 %v1859_v40, %v4646_v56  ;;  %v2133_v58 = vsel %vm4232_vm5, %v3323_v19, %v2132_v1  ;;  %v4649_v56 = vld [vmem:[#allocation15_spill] sm:$0xff]  ;;  %v1978_v1 = vld [vmem:[%s3863_s24 + $0xa8] sm:$0xe] }
 0x203   : > { %v2690_v53 = vpop.f32.mrf.mxu0  ;;  %v2208_v16 = vunpack.c.l.b16 %v2133_v58 }
 0x204   : > { %v2765_v27 = vadd.f32 %v2688_v25, %v2575_v0 }
 0x206   : > { %v2861_v41 = vadd.f32 %v3524_v49, %v2765_v27  ;;  %v3528_v49 = vunpack.c.l.bf16 %v3663_v43  ;;  %v4495_v27 = vpack.c.b16 %v2209_v22, %v2208_v16  ;;  %v3664_v43 = vld [vmem:[%s4450_s28 + $0x18] sm:$0xff]  }
 0x207   : > { %v2310_v62 = vpop.f32.mrf.mxu2 }
 0x208   : > { %v2386_v54 = vadd.f32 %v2310_v62, %v1935_v15  ;;  %v2500_v7 = vpop.f32.mrf.mxu3 }
 0x209   : > { %v1862_v45 = vpop.f32.mrf.mxu1 }
 0x20a   : > { %v2576_v24 = vadd.f32 %v2500_v7, %v2386_v54  ;;  %v1936_v2 = vadd.f32 %v1862_v45, %v4648_v52 }
 0x20b   : > { %v2693_v8 = vpop.f32.mrf.mxu0 }
 0x20c   : > { %v2766_v18 = vadd.f32 %v2690_v53, %v2576_v24  ;;  %1901 = vmatmul.bf16.gmra.mxu1 %v4647_v42  ;;  %2352 = vmatmul.bf16.gmra.mxu2 %v4428_v17 }
 0x20d   : > { %2542 = vmatmul.bf16.gmra.mxu3 %v4454_v46 }
 0x20e   : > { %2732 = vmatmul.bf16.gmra.mxu0 %v4478_v26  ;;  %v2862_v25 = vadd.f32 %v3525_v34, %v2766_v18  ;;  %v3770_v18 = vld [vmem:[%s3863_s24 + $0xac] sm:$0xf] }
 0x20f   : > { %v2313_v20 = vpop.f32.mrf.mxu2  ;;  %v2139_v42 = vrot.slane %v3770_v18, 5 }
 0x210   : > { %v3590_v44 = vpack.c.bf16 %v2862_v25, %v2861_v41  ;;  %v2503_v40 = vpop.f32.mrf.mxu3  ;;  %v2387_v53 = vadd.f32 %v2313_v20, %v1936_v2  ;;  %v4650_v41 = vld [vmem:[#allocation17_spill] sm:$0xff]  ;;  %v3324_v25 = vrot.slane %v1978_v1, 9  ;;  %v2142_v20 = vrot.slane %v3771_v35, 5  ;;  %v4651_v2 = vld [vmem:[#allocation16_spill] sm:$0xff] }
 0x211   : > { %v1864_v3 = vpop.f32.mrf.mxu1  ;;  %v2141_v39 = vrot.slane %v2139_v42, 4  ;;  %v3533_v1 = vunpack.c.h.bf16 %v3664_v43  ;;  %v3773_v35 = vld [vmem:[%s3863_s24 + $0xbc] sm:$0x1] }
 0x212   : > { %3677 = vst [vmem:[%s4468_s4 + $0x8] sm:$0xff] %v3590_v44   ;;  %v2577_v0 = vadd.f32 %v2503_v40, %v2387_v53  ;;  %v1937_v15 = vadd.f32 %v1864_v3, %v4649_v56  ;;  %v2140_v58 = vsel %vm4232_vm5, %v3324_v25, %v2139_v42  ;;  %v4652_v56 = vld [vmem:[#allocation18_spill] sm:$0xff]  ;;  %v1979_v42 = vld [vmem:[%s3863_s24 + $0xb4] sm:$0xe] }
 0x213   : > { %v2695_v17 = vpop.f32.mrf.mxu0  ;;  %v2143_v29 = vsel %vm4232_vm5, %v2141_v39, %v2142_v20  ;;  %v2210_v16 = vunpack.c.l.b16 %v2140_v58  ;;  %v2149_v20 = vrot.slane %v3773_v35, 5 }
 0x214   : > { %v2767_v24 = vadd.f32 %v2693_v8, %v2577_v0  ;;  %v2211_v22 = vunpack.c.l.b16 %v2143_v29 }
 0x216   : > { %v2863_v5 = vadd.f32 %v3528_v49, %v2767_v24  ;;  %v3532_v49 = vunpack.c.l.bf16 %v3664_v43  ;;  %v4512_v24 = vpack.c.b16 %v2211_v22, %v2210_v16  ;;  %v4654_v22 = vld [vmem:[#allocation20_spill] sm:$0xff]  ;;  %v3665_v43 = vld [vmem:[%s4450_s28 + $0x20] sm:$0xff]  }
 0x217   : > { %v2315_v62 = vpop.f32.mrf.mxu2 }
 0x218   : > { %v2388_v54 = vadd.f32 %v2315_v62, %v1937_v15  ;;  %v2505_v7 = vpop.f32.mrf.mxu3 }
 0x219   : > { %v1867_v45 = vpop.f32.mrf.mxu1 }
 0x21a   : > { %v2578_v34 = vadd.f32 %v2505_v7, %v2388_v54  ;;  %v1938_v40 = vadd.f32 %v1867_v45, %v4651_v2  ;;  %v4653_v2 = vld [vmem:[#allocation19_spill] sm:$0xff] }
 0x21b   : > { %v2698_v33 = vpop.f32.mrf.mxu0 }
 0x21c   : > { %v2768_v19 = vadd.f32 %v2695_v17, %v2578_v34  ;;  %1906 = vmatmul.bf16.gmra.mxu1 %v4650_v41  ;;  %2357 = vmatmul.bf16.gmra.mxu2 %v4454_v46 }
 0x21d   : > { %2547 = vmatmul.bf16.gmra.mxu3 %v4478_v26 }
 0x21e   : > { %2737 = vmatmul.bf16.gmra.mxu0 %v4495_v27  ;;  %v2864_v8 = vadd.f32 %v3529_v4, %v2768_v19  ;;  %v3772_v19 = vld [vmem:[%s3863_s24 + $0xb8] sm:$0xf] }
 0x21f   : > { %v2318_v44 = vpop.f32.mrf.mxu2  ;;  %v2146_v41 = vrot.slane %v3772_v19, 5  ;;  %v3537_v19 = vunpack.c.h.bf16 %v3665_v43 }
 0x220   : > { %v3595_v52 = vpack.c.bf16 %v2864_v8, %v2863_v5  ;;  %v2508_v3 = vpop.f32.mrf.mxu3  ;;  %v2389_v17 = vadd.f32 %v2318_v44, %v1938_v40  ;;  %v3325_v5 = vrot.slane %v1979_v42, 9 }
 0x221   : > { %v1869_v53 = vpop.f32.mrf.mxu1  ;;  %v2148_v39 = vrot.slane %v2146_v41, 4 }
 0x222   : > { %3678 = vst [vmem:[%s4468_s4 + $0x10] sm:$0xff] %v3595_v52   ;;  %v2579_v0 = vadd.f32 %v2508_v3, %v2389_v17  ;;  %v1939_v15 = vadd.f32 %v1869_v53, %v4652_v56  ;;  %v2147_v17 = vsel %vm4232_vm5, %v3325_v5, %v2146_v41 }
 0x223   : > { %v2700_v46 = vpop.f32.mrf.mxu0  ;;  %v2212_v58 = vunpack.c.l.b16 %v2147_v17 }
 0x224   : > { %v2769_v34 = vadd.f32 %v2698_v33, %v2579_v0 }
 0x226   : > { %v2865_v8 = vadd.f32 %v3532_v49, %v2769_v34  ;;  %v1980_v34 = vld [vmem:[%s3863_s24 + $0xc0] sm:$0xe] }
 0x227   : > { %v2320_v62 = vpop.f32.mrf.mxu2  ;;  %v3326_v5 = vrot.slane %v1980_v34, 9  ;;  %v898_v34 = vld [vmem:[%s3863_s24 + $0xd4] sm:$0x1] }
 0x228   : > { %v2390_v54 = vadd.f32 %v2320_v62, %v1939_v15  ;;  %v2510_v7 = vpop.f32.mrf.mxu3 }
 0x229   : > { %v1872_v45 = vpop.f32.mrf.mxu1 }
 0x22a   : > { %v2580_v4 = vadd.f32 %v2510_v7, %v2390_v54  ;;  %v1940_v40 = vadd.f32 %v1872_v45, %v4653_v2  ;;  %v3774_v54 = vld [vmem:[%s3863_s24 + $0xc4] sm:$0xf] }
 0x22b   : > { %v2703_v18 = vpop.f32.mrf.mxu0  ;;  %v2153_v7 = vrot.slane %v3774_v54, 5 }
 0x22c   : > { %v2770_v25 = vadd.f32 %v2700_v46, %v2580_v4  ;;  %1911 = vmatmul.bf16.gmra.mxu1 %v4200_v30  ;;  %2362 = vmatmul.bf16.gmra.mxu2 %v4478_v26  ;;  %v2150_v46 = vsel %vm4232_vm5, %v2148_v39, %v2149_v20  ;;  %v896_v20 = vld [vmem:[%s3863_s24 + $0xcc] sm:$0xf] }
 0x22d   : > { %2552 = vmatmul.bf16.gmra.mxu3 %v4495_v27  ;;  %v2213_v29 = vunpack.c.l.b16 %v2150_v46  ;;  %v1314_v17 = vshll.u32 %v896_v20, 16 }
 0x22e   : > { %2742 = vmatmul.bf16.gmra.mxu0 %v4512_v24  ;;  %v2866_v33 = vadd.f32 %v3533_v1, %v2770_v25  ;;  %v3536_v1 = vunpack.c.l.bf16 %v3665_v43  ;;  %v3666_v43 = vld [vmem:[%s4450_s28 + $0x28] sm:$0xff]  }
 0x22f   : > { %v2323_v44 = vpop.f32.mrf.mxu2  ;;  %v4530_v45 = vpack.c.b16 %v2213_v29, %v2212_v58 }
 0x230   : > { %v3600_v52 = vpack.c.bf16 %v2866_v33, %v2865_v8  ;;  %v2513_v3 = vpop.f32.mrf.mxu3  ;;  %v2391_v26 = vadd.f32 %v2323_v44, %v1940_v40  ;;  %v2155_v8 = vrot.slane %v2153_v7, 4  ;;  %v3775_v33 = vld [vmem:[%s3863_s24 + $0xc8] sm:$0x1]  ;;  %v4540_v44 = vld [vmem:[%s3863_s24 + $0xd0] sm:$0xf] }
 0x231   : > { %v1874_v30 = vpop.f32.mrf.mxu1  ;;  %v2156_v39 = vrot.slane %v3775_v33, 5  ;;  %v1320_v46 = vshll.u32 %v4540_v44, 16  ;;  %v1324_v58 = vshrl.u32 %v4540_v44, 16 }
 0x232   : > { %3679 = vst [vmem:[%s4468_s4 + $0x18] sm:$0xff] %v3600_v52   ;;  %v2581_v16 = vadd.f32 %v2513_v3, %v2391_v26  ;;  %v1941_v0 = vadd.f32 %v1874_v30, %v4654_v22  ;;  %v2154_v3 = vsel %vm4232_vm5, %v3326_v5, %v2153_v7 }
 0x233   : > { %v2705_v53 = vpop.f32.mrf.mxu0  ;;  %v2157_v30 = vsel %vm4232_vm5, %v2155_v8, %v2156_v39  ;;  %v2432_v22 = vunpack.c.l.b16 %v2154_v3  ;;  %v1326_v54 = vrot.slane %v1324_v58, 4  ;;  %v1330_v39 = vshll.u32 %v898_v34, 16 }
 0x234   : > { %v2771_v4 = vadd.f32 %v2703_v18, %v2581_v16 }
 0x235   : > { %v1332_v3 = vrot.slane %v1330_v39, 5 }
 0x236   : > { %v2867_v18 = vadd.f32 %v3536_v1, %v2771_v4  ;;  %v3540_v1 = vunpack.c.l.bf16 %v3666_v43 }
 0x237   : > { %v2325_v56 = vpop.f32.mrf.mxu2 }
 0x238   : > { %v2392_v15 = vadd.f32 %v2325_v56, %v1941_v0  ;;  %v2515_v62 = vpop.f32.mrf.mxu3  ;;  %v2433_v0 = vunpack.c.l.b16 %v2157_v30 }
 0x239   : > { %v1877_v49 = vpop.f32.mrf.mxu1 }
 0x23a   : > { %v2582_v42 = vadd.f32 %v2515_v62, %v2392_v15  ;;  %v1316_v15 = vrot.slane %v1314_v17, 5  ;;  %v1322_v62 = vrot.slane %v1320_v46, 5  ;;  %v2434_v5 = vpack.c.b16 %v2433_v0, %v2432_v22 }
 0x23b   : > { %v2708_v41 = vpop.f32.mrf.mxu0  ;;  %v2163_v17 = vrot.slane %v898_v34, 5 }
 0x23c   : > { %v2772_v25 = vadd.f32 %v2705_v53, %v2582_v42  ;;  %1916 = vmatmul.bf16.gmra.mxu1 %v4230_v6  ;;  %2367 = vmatmul.bf16.gmra.mxu2 %v4495_v27  ;;  %v4655_v6 = vld [vmem:[#allocation21_spill] sm:$0xff]  ;;  %v1311_v53 = vshrl.u32 %v896_v20, 16  ;;  %v1327_v33 = vor.u32 %v1326_v54, %v1322_v62  ;;  %v3541_v20 = vunpack.c.h.bf16 %v3666_v43 }
 0x23d   : > { %2557 = vmatmul.bf16.gmra.mxu3 %v4512_v24  ;;  %v1942_v40 = vadd.f32 %v1877_v49, %v4655_v6  ;;  %v2160_v6 = vrot.slane %v4540_v44, 5 }
 0x23e   : > { %2747 = vmatmul.bf16.gmra.mxu0 %v4530_v45  ;;  %v2868_v35 = vadd.f32 %v3537_v19, %v2772_v25  ;;  %v1313_v56 = vrot.slane %v1311_v53, 4 }
 0x23f   : > { %v2328_v52 = vpop.f32.mrf.mxu2  ;;  %v2162_v53 = vrot.slane %v2160_v6, 4 }
 0x240   : > { %v3605_v2 = vpack.c.bf16 %v2868_v35, %v2867_v18  ;;  %v2518_v27 = vpop.f32.mrf.mxu3  ;;  %v2393_v29 = vadd.f32 %v2328_v52, %v1942_v40  ;;  %v1317_v8 = vor.u32 %v1316_v15, %v1313_v56 }
 0x241   : > { %v1879_v26 = vpop.f32.mrf.mxu1  ;;  %v2164_v56 = vsel %vm4232_vm5, %v2162_v53, %v2163_v17 }
 0x242   : > { %3680 = vst [vmem:[%s4468_s4 + $0x20] sm:$0xff] %v3605_v2   ;;  %v2583_v7 = vadd.f32 %v2518_v27, %v2393_v29  ;;  %v1943_v49 = vadd.f32 %v1879_v26, %v4253_v50  ;;  %v1981_v2 = vld [vmem:[%s3863_s24 + $0xcc] sm:$0xe]  ;;  %v1318_v50 = vrot.slane %v1317_v8, 4  ;;  %v1328_v27 = vrot.slane %v1327_v33, 4 }
 0x243   : > { %v2710_v16 = vpop.f32.mrf.mxu0  ;;  %v3327_v30 = vrot.slane %v1981_v2, 9 }
 0x244   : > { %v2773_v18 = vadd.f32 %v2708_v41, %v2583_v7  ;;  %v2623_v7 = vunpack.c.l.b16 %v2164_v56 }
 0x245   : > { %v2161_v43 = vsel %vm4232_vm5, %v3327_v30, %v2160_v6 }
 0x246   : > { %v2869_v41 = vadd.f32 %v3540_v1, %v2773_v18  ;;  %v2622_v54 = vunpack.c.l.b16 %v2161_v43 }
 0x247   : > { %v2330_v4 = vpop.f32.mrf.mxu2 }
 0x248   : > { %v2394_v42 = vadd.f32 %v2330_v4, %v1943_v49  ;;  %v2520_v19 = vpop.f32.mrf.mxu3 }
 0x249   : > { %v1882_v25 = vpop.f32.mrf.mxu1 }
 0x24a   : > { %v2584_v35 = vadd.f32 %v2520_v19, %v2394_v42  ;;  %v1944_v44 = vadd.f32 %v1882_v25, %v4264_v38  ;;  %v2624_v25 = vpack.c.b16 %v2623_v7, %v2622_v54 }
 0x24b   : > { %v2713_v52 = vpop.f32.mrf.mxu0 }
 0x24c   : > { %v2774_v40 = vadd.f32 %v2710_v16, %v2584_v35  ;;  %1921 = vmatmul.bf16.gmra.mxu1 %v4268_v48  ;;  %2372 = vmatmul.bf16.gmra.mxu2 %v4512_v24  ;;  %v1323_v24 = vsel %vm3923_vm2, %v1318_v50, %v1322_v62  ;;  %v1333_v16 = vsel %vm3923_vm2, %v1328_v27, %v1332_v3  ;;  %v3667_v62 = vld [vmem:[%s4450_s28 + $0x30] sm:$0xff]  }
 0x24d   : > { %2562 = vmatmul.bf16.gmra.mxu3 %v4530_v45  ;;  %v1791_v15 = vunpack.c.l.b16 %v1323_v24  ;;  %v1792_v38 = vunpack.c.l.b16 %v1333_v16  ;;  %v3544_v33 = vunpack.c.l.bf16 %v3667_v62  ;;  %v3545_v10 = vunpack.c.h.bf16 %v3667_v62 }
 0x24e   : > { %2752 = vmatmul.bf16.gmra.mxu0 %v2434_v5  ;;  %v2870_v26 = vadd.f32 %v3541_v20, %v2774_v40 }
 0x24f   : > { %v2333_v46 = vpop.f32.mrf.mxu2  ;;  %v1793_v42 = vpack.c.b16 %v1792_v38, %v1791_v15 }
 0x250   : > { %v3610_v58 = vpack.c.bf16 %v2870_v26, %v2869_v41  ;;  %v2523_v48 = vpop.f32.mrf.mxu3  ;;  %v2395_v22 = vadd.f32 %v2333_v46, %v1944_v44  ;;  %v3668_v26 = vld [vmem:[%s4450_s28 + $0x38] sm:$0xff]  }
 0x251   : > { %v1884_v29 = vpop.f32.mrf.mxu1 }
 0x252   : > { %3681 = vst [vmem:[%s4468_s4 + $0x28] sm:$0xff] %v3610_v58   ;;  %v2585_v49 = vadd.f32 %v2523_v48, %v2395_v22  ;;  %v1945_v34 = vadd.f32 %v1884_v29, %v4271_v47  ;;  %v3548_v58 = vunpack.c.l.bf16 %v3668_v26  ;;  %v3549_v48 = vunpack.c.h.bf16 %v3668_v26 }
 0x253   : > { %v2715_v0 = vpop.f32.mrf.mxu0 }
 0x254   : > { %v2775_v8 = vadd.f32 %v2713_v52, %v2585_v49  ;;  %v3669_v49 = vld [vmem:[%s4450_s28 + $0x40] sm:$0xff]  }
 0x256   : > { %v2871_v47 = vadd.f32 %v3544_v33, %v2775_v8 }
 0x257   : > { %v2335_v4 = vpop.f32.mrf.mxu2 }
 0x258   : > { %v2396_v36 = vadd.f32 %v2335_v4, %v1945_v34  ;;  %v2525_v1 = vpop.f32.mrf.mxu3 }
 0x259   : > { %v1887_v19 = vpop.f32.mrf.mxu1 }
 0x25a   : > { %v2586_v39 = vadd.f32 %v2525_v1, %v2396_v36  ;;  %v1946_v40 = vadd.f32 %v1887_v19, %v4276_v13 }
 0x25b   : > { %v2718_v18 = vpop.f32.mrf.mxu0 }
 0x25c   : > { %v2776_v35 = vadd.f32 %v2715_v0, %v2586_v39  ;;  %1926 = vmatmul.bf16.gmra.mxu1 %v1793_v42  ;;  %2377 = vmatmul.bf16.gmra.mxu2 %v4530_v45  ;;  %v3552_v42 = vunpack.c.l.bf16 %v3669_v49 }
 0x25d   : > { %2567 = vmatmul.bf16.gmra.mxu3 %v2434_v5 }
 0x25e   : > { %2757 = vmatmul.bf16.gmra.mxu0 %v2624_v25  ;;  %v2872_v20 = vadd.f32 %v3545_v10, %v2776_v35  ;;  %v3553_v25 = vunpack.c.h.bf16 %v3669_v49 }
 0x25f   : > { %v2338_v2 = vpop.f32.mrf.mxu2 }
 0x260   : > { %v3615_v6 = vpack.c.bf16 %v2872_v20, %v2871_v47  ;;  %v2528_v50 = vpop.f32.mrf.mxu3  ;;  %v2397_v27 = vadd.f32 %v2338_v2, %v1946_v40 }
 0x261   : > { %v1889_v52 = vpop.f32.mrf.mxu1 }
 0x262   : > { %3682 = vst [vmem:[%s4468_s4 + $0x30] sm:$0xff] %v3615_v6   ;;  %v2587_v30 = vadd.f32 %v2528_v50, %v2397_v27  ;;  %v1947_v41 = vadd.f32 %v1889_v52, %v4282_v31  ;;  %v3670_v50 = vld [vmem:[%s4450_s28 + $0x48] sm:$0xff]  }
 0x263   : > { %v2720_v3 = vpop.f32.mrf.mxu0  ;;  %v3556_v26 = vunpack.c.l.bf16 %v3670_v50 }
 0x264   : > { %v2777_v46 = vadd.f32 %v2718_v18, %v2587_v30 }
 0x266   : > { %v2873_v24 = vadd.f32 %v3548_v58, %v2777_v46 }
 0x267   : > { %v2340_v53 = vpop.f32.mrf.mxu2 }
 0x268   : > { %v2398_v17 = vadd.f32 %v2340_v53, %v1947_v41  ;;  %v2530_v45 = vpop.f32.mrf.mxu3 }
 0x269   : > { %v1892_v5 = vpop.f32.mrf.mxu1 }
 0x26a   : > { %v2588_v44 = vadd.f32 %v2530_v45, %v2398_v17  ;;  %v1948_v43 = vadd.f32 %v1892_v5, %v4292_v14  ;;  %v3557_v17 = vunpack.c.h.bf16 %v3670_v50 }
 0x26b   : > { %v2723_v13 = vpop.f32.mrf.mxu0 }
 0x26c   : > { %v2778_v29 = vadd.f32 %v2720_v3, %v2588_v44 }
 0x26e   : > { %v2874_v16 = vadd.f32 %v3549_v48, %v2778_v29 }
 0x26f   : > { %v2343_v22 = vpop.f32.mrf.mxu2 }
 0x270   : > { %v3620_v0 = vpack.c.bf16 %v2874_v16, %v2873_v24  ;;  %v2533_v31 = vpop.f32.mrf.mxu3  ;;  %v2399_v15 = vadd.f32 %v2343_v22, %v1948_v43 }
 0x271   : > { %v1894_v56 = vpop.f32.mrf.mxu1 }
 0x272   : > { %3683 = vst [vmem:[%s4468_s4 + $0x38] sm:$0xff] %v3620_v0   ;;  %v2589_v54 = vadd.f32 %v2533_v31, %v2399_v15  ;;  %v1949_v7 = vadd.f32 %v1894_v56, %v4301_v28  ;;  %v3671_v0 = vld [vmem:[%s4450_s28 + $0x50] sm:$0xff]  }
 0x273   : > { %v2725_v38 = vpop.f32.mrf.mxu0  ;;  %v3561_v49 = vunpack.c.h.bf16 %v3671_v0 }
 0x274   : > { %v2779_v1 = vadd.f32 %v2723_v13, %v2589_v54  ;;  %v3560_v54 = vunpack.c.l.bf16 %v3671_v0 }
 0x276   : > { %v2875_v33 = vadd.f32 %v3552_v42, %v2779_v1 }
 0x277   : > { %v2345_v34 = vpop.f32.mrf.mxu2 }
 0x278   : > { %v2400_v62 = vadd.f32 %v2345_v34, %v1949_v7  ;;  %v2535_v4 = vpop.f32.mrf.mxu3 }
 0x279   : > { %v1897_v36 = vpop.f32.mrf.mxu1 }
 0x27a   : > { %v2590_v19 = vadd.f32 %v2535_v4, %v2400_v62  ;;  %v1950_v35 = vadd.f32 %v1897_v36, %v4311_v59 }
 0x27b   : > { %v2728_v14 = vpop.f32.mrf.mxu0 }
 0x27c   : > { %v2780_v8 = vadd.f32 %v2725_v38, %v2590_v19 }
 0x27e   : > { %v2876_v39 = vadd.f32 %v3553_v25, %v2780_v8 }
 0x27f   : > { %v2348_v10 = vpop.f32.mrf.mxu2 }
 0x280   : > { %v3625_v18 = vpack.c.bf16 %v2876_v39, %v2875_v33  ;;  %v2538_v28 = vpop.f32.mrf.mxu3  ;;  %v2401_v20 = vadd.f32 %v2348_v10, %v1950_v35  ;;  %v3672_v39 = vld [vmem:[%s4450_s28 + $0x58] sm:$0xff]  }
 0x281   : > { %v1899_v47 = vpop.f32.mrf.mxu1 }
 0x282   : > { %3684 = vst [vmem:[%s4468_s4 + $0x40] sm:$0xff] %v3625_v18   ;;  %v2591_v6 = vadd.f32 %v2538_v28, %v2401_v20  ;;  %v1951_v40 = vadd.f32 %v1899_v47, %v4320_v55  ;;  %v3564_v20 = vunpack.c.l.bf16 %v3672_v39 }
 0x283   : > { %v2730_v2 = vpop.f32.mrf.mxu0 }
 0x284   : > { %v2781_v41 = vadd.f32 %v2728_v14, %v2591_v6  ;;  %v3565_v6 = vunpack.c.h.bf16 %v3672_v39 }
 0x286   : > { %v2877_v5 = vadd.f32 %v3556_v26, %v2781_v41 }
 0x287   : > { %v2350_v52 = vpop.f32.mrf.mxu2 }
 0x288   : > { %v2402_v27 = vadd.f32 %v2350_v52, %v1951_v40  ;;  %v2540_v3 = vpop.f32.mrf.mxu3 }
 0x289   : > { %v1902_v30 = vpop.f32.mrf.mxu1 }
 0x28a   : > { %v2592_v53 = vadd.f32 %v2540_v3, %v2402_v27  ;;  %v1952_v48 = vadd.f32 %v1902_v30, %v4330_v37 }
 0x28b   : > { %v2733_v59 = vpop.f32.mrf.mxu0 }
 0x28c   : > { %v2782_v45 = vadd.f32 %v2730_v2, %v2592_v53 }
 0x28e   : > { %v2878_v46 = vadd.f32 %v3557_v17, %v2782_v45  ;;  %v3673_v45 = vld [vmem:[%s4450_s28 + $0x60] sm:$0xff]  }
 0x28f   : > { %v2353_v58 = vpop.f32.mrf.mxu2 }
 0x290   : > { %v3630_v44 = vpack.c.bf16 %v2878_v46, %v2877_v5  ;;  %v2543_v55 = vpop.f32.mrf.mxu3  ;;  %v2403_v29 = vadd.f32 %v2353_v58, %v1952_v48 }
 0x291   : > { %v1904_v13 = vpop.f32.mrf.mxu1 }
 0x292   : > { %3685 = vst [vmem:[%s4468_s4 + $0x48] sm:$0xff] %v3630_v44   ;;  %v2593_v16 = vadd.f32 %v2543_v55, %v2403_v29  ;;  %v1953_v22 = vadd.f32 %v1904_v13, %v4339_v32  ;;  %v3568_v55 = vunpack.c.l.bf16 %v3673_v45  ;;  %v3569_v29 = vunpack.c.h.bf16 %v3673_v45 }
 0x293   : > { %v2735_v24 = vpop.f32.mrf.mxu0 }
 0x294   : > { %v2783_v38 = vadd.f32 %v2733_v59, %v2593_v16 }
 0x296   : > { %v2879_v62 = vadd.f32 %v3560_v54, %v2783_v38 }
 0x297   : > { %v2355_v43 = vpop.f32.mrf.mxu2 }
 0x298   : > { %v2404_v31 = vadd.f32 %v2355_v43, %v1953_v22  ;;  %v2545_v56 = vpop.f32.mrf.mxu3 }
 0x299   : > { %v1907_v15 = vpop.f32.mrf.mxu1 }
 0x29a   : > { %v2594_v7 = vadd.f32 %v2545_v56, %v2404_v31  ;;  %v1954_v42 = vadd.f32 %v1907_v15, %v4349_v12 }
 0x29b   : > { %v2738_v37 = vpop.f32.mrf.mxu0 }
 0x29c   : > { %v2784_v34 = vadd.f32 %v2735_v24, %v2594_v7 }
 0x29e   : > { %v2880_v4 = vadd.f32 %v3561_v49, %v2784_v34  ;;  %v3674_v49 = vld [vmem:[%s4450_s28 + $0x68] sm:$0xff]  }
 0x29f   : > { %v2358_v36 = vpop.f32.mrf.mxu2 }
 0x2a0   : > { %v3635_v1 = vpack.c.bf16 %v2880_v4, %v2879_v62  ;;  %v2548_v32 = vpop.f32.mrf.mxu3  ;;  %v2405_v25 = vadd.f32 %v2358_v36, %v1954_v42 }
 0x2a1   : > { %v1909_v19 = vpop.f32.mrf.mxu1 }
 0x2a2   : > { %3686 = vst [vmem:[%s4468_s4 + $0x50] sm:$0xff] %v3635_v1   ;;  %v2595_v8 = vadd.f32 %v2548_v32, %v2405_v25  ;;  %v1955_v33 = vadd.f32 %v1909_v19, %v4358_v57  ;;  %v3572_v1 = vunpack.c.l.bf16 %v3674_v49  ;;  %v3573_v32 = vunpack.c.h.bf16 %v3674_v49 }
 0x2a3   : > { %v2740_v14 = vpop.f32.mrf.mxu0 }
 0x2a4   : > { %v2785_v47 = vadd.f32 %v2738_v37, %v2595_v8 }
 0x2a6   : > { %v2881_v50 = vadd.f32 %v3564_v20, %v2785_v47  ;;  %v3675_v47 = vld [vmem:[%s4450_s28 + $0x70] sm:$0xff]  }
 0x2a7   : > { %v2360_v10 = vpop.f32.mrf.mxu2 }
 0x2a8   : > { %v2406_v18 = vadd.f32 %v2360_v10, %v1955_v33  ;;  %v2550_v35 = vpop.f32.mrf.mxu3 }
 0x2a9   : > { %v1912_v28 = vpop.f32.mrf.mxu1 }
 0x2aa   : > { %v2596_v2 = vadd.f32 %v2550_v35, %v2406_v18  ;;  %v1956_v30 = vadd.f32 %v1912_v28, %v4368_v60 }
 0x2ab   : > { %v2743_v12 = vpop.f32.mrf.mxu0 }
 0x2ac   : > { %v2786_v40 = vadd.f32 %v2740_v14, %v2596_v2 }
 0x2ae   : > { %v2882_v52 = vadd.f32 %v3565_v6, %v2786_v40 }
 0x2af   : > { %v2363_v27 = vpop.f32.mrf.mxu2 }
 0x2b0   : > { %v3640_v3 = vpack.c.bf16 %v2882_v52, %v2881_v50  ;;  %v2553_v57 = vpop.f32.mrf.mxu3  ;;  %v2407_v26 = vadd.f32 %v2363_v27, %v1956_v30  ;;  %v3576_v52 = vunpack.c.l.bf16 %v3675_v47 }
 0x2b1   : > { %v1914_v41 = vpop.f32.mrf.mxu1 }
 0x2b2   : > { %3687 = vst [vmem:[%s4468_s4 + $0x58] sm:$0xff] %v3640_v3   ;;  %v2597_v17 = vadd.f32 %v2553_v57, %v2407_v26  ;;  %v1957_v59 = vadd.f32 %v1914_v41, %v4377_v11  ;;  %v3577_v3 = vunpack.c.h.bf16 %v3675_v47 }
 0x2b3   : > { %v2745_v53 = vpop.f32.mrf.mxu0 }
 0x2b4   : > { %v2787_v48 = vadd.f32 %v2743_v12, %v2597_v17 }
 0x2b6   : > { %v2883_v16 = vadd.f32 %v3568_v55, %v2787_v48 }
 0x2b7   : > { %v2365_v5 = vpop.f32.mrf.mxu2 }
 0x2b8   : > { %v2408_v46 = vadd.f32 %v2365_v5, %v1957_v59  ;;  %v2555_v58 = vpop.f32.mrf.mxu3 }
 0x2b9   : > { %v1917_v44 = vpop.f32.mrf.mxu1 }
 0x2ba   : > { %v2598_v13 = vadd.f32 %v2555_v58, %v2408_v46  ;;  %v1958_v31 = vadd.f32 %v1917_v44, %v4387_v21  ;;  %v3676_v58 = vld [vmem:[%s4450_s28 + $0x78] sm:$0xff]  }
 0x2bb   : > { %v2748_v60 = vpop.f32.mrf.mxu0 }
 0x2bc   : > { %v2788_v24 = vadd.f32 %v2745_v53, %v2598_v13 }
 0x2be   : > { %v2884_v22 = vadd.f32 %v3569_v29, %v2788_v24  ;;  %v3580_v29 = vunpack.c.l.bf16 %v3676_v58  ;;  %v3581_v24 = vunpack.c.h.bf16 %v3676_v58 }
 0x2bf   : > { %v2368_v0 = vpop.f32.mrf.mxu2 }
 0x2c0   : > { %v3645_v43 = vpack.c.bf16 %v2884_v22, %v2883_v16  ;;  %v2558_v11 = vpop.f32.mrf.mxu3  ;;  %v2409_v15 = vadd.f32 %v2368_v0, %v1958_v31 }
 0x2c1   : > { %v1919_v56 = vpop.f32.mrf.mxu1 }
 0x2c2   : > { %3688 = vst [vmem:[%s4468_s4 + $0x60] sm:$0xff] %v3645_v43   ;;  %v2599_v54 = vadd.f32 %v2558_v11, %v2409_v15  ;;  %v1959_v7 = vadd.f32 %v1919_v56, %v4396_v63 }
 0x2c3   : > { %v2750_v38 = vpop.f32.mrf.mxu0 }
 0x2c4   : > { %v2789_v36 = vadd.f32 %v2748_v60, %v2599_v54 }
 0x2c6   : > { %v2885_v25 = vadd.f32 %v3572_v1, %v2789_v36 }
 0x2c7   : > { %v2370_v37 = vpop.f32.mrf.mxu2 }
 0x2c8   : > { %v2410_v34 = vadd.f32 %v2370_v37, %v1959_v7  ;;  %v2560_v62 = vpop.f32.mrf.mxu3 }
 0x2c9   : > { %v1922_v4 = vpop.f32.mrf.mxu1 }
 0x2ca   : > { %v2600_v42 = vadd.f32 %v2560_v62, %v2410_v34  ;;  %v1960_v39 = vadd.f32 %v1922_v4, %v4406_v51 }
 0x2cb   : > { %v2753_v19 = vpop.f32.mrf.mxu0 }
 0x2cc   : > { %v2790_v21 = vadd.f32 %v2750_v38, %v2600_v42 }
 0x2ce   : > { %v2886_v14 = vadd.f32 %v3573_v32, %v2790_v21 }
 0x2cf   : > { %v2373_v8 = vpop.f32.mrf.mxu2 }
 0x2d0   : > { %v3650_v33 = vpack.c.bf16 %v2886_v14, %v2885_v25  ;;  %v2563_v63 = vpop.f32.mrf.mxu3  ;;  %v2411_v18 = vadd.f32 %v2373_v8, %v1960_v39 }
 0x2d1   : > { %v1924_v10 = vpop.f32.mrf.mxu1 }
 0x2d2   : > { %3689 = vst [vmem:[%s4468_s4 + $0x68] sm:$0xff] %v3650_v33   ;;  %v2601_v35 = vadd.f32 %v2563_v63, %v2411_v18  ;;  %v1961_v28 = vadd.f32 %v1924_v10, %v4415_v61 }
 0x2d3   : > { %v2755_v20 = vpop.f32.mrf.mxu0 }
 0x2d4   : > { %v2791_v50 = vadd.f32 %v2753_v19, %v2601_v35 }
 0x2d6   : > { %v2887_v30 = vadd.f32 %v3576_v52, %v2791_v50 }
 0x2d7   : > { %v2375_v2 = vpop.f32.mrf.mxu2 }
 0x2d8   : > { %v2412_v6 = vadd.f32 %v2375_v2, %v1961_v28  ;;  %v2565_v12 = vpop.f32.mrf.mxu3 }
 0x2d9   : > { %v1927_v40 = vpop.f32.mrf.mxu1 }
 0x2da   : > { %v2602_v27 = vadd.f32 %v2565_v12, %v2412_v6  ;;  %v1962_v53 = vadd.f32 %v1927_v40, %v4425_v23 }
 0x2db   : > { %v2758_v17 = vpop.f32.mrf.mxu0 }
 0x2dc   : > { %v2792_v51 = vadd.f32 %v2755_v20, %v2602_v27 }
 0x2de   : > { %v2888_v57 = vadd.f32 %v3577_v3, %v2792_v51 }
 0x2df   : > { %v2378_v41 = vpop.f32.mrf.mxu2 }
 0x2e0   : > { %v3655_v26 = vpack.c.bf16 %v2888_v57, %v2887_v30  ;;  %v2568_v61 = vpop.f32.mrf.mxu3  ;;  %v2413_v59 = vadd.f32 %v2378_v41, %v1962_v53 }
 0x2e1   : > { %v1929_v45 = vpop.f32.mrf.mxu1 }
 0x2e2   : > { %3690 = vst [vmem:[%s4468_s4 + $0x70] sm:$0xff] %v3655_v26   ;;  %v2603_v5 = vadd.f32 %v2568_v61, %v2413_v59  ;;  %v1963_v46 = vadd.f32 %v1929_v45, %v4434_v9 }
 0x2e3   : > { %v2760_v16 = vpop.f32.mrf.mxu0 }
 0x2e4   : > { %v2793_v13 = vadd.f32 %v2758_v17, %v2603_v5 }
 0x2e6   : > { %v2889_v23 = vadd.f32 %v3580_v29, %v2793_v13 }
 0x2e7   : > { %v2380_v44 = vpop.f32.mrf.mxu2 }
 0x2e8   : > { %v2414_v48 = vadd.f32 %v2380_v44, %v1963_v46  ;;  %v2570_v55 = vpop.f32.mrf.mxu3 }
 0x2ea   : > { %v2604_v60 = vadd.f32 %v2570_v55, %v2414_v48 }
 0x2ec   : > { %v2794_v22 = vadd.f32 %v2760_v16, %v2604_v60 }
 0x2ee   : > { %v2890_v0 = vadd.f32 %v3581_v24, %v2794_v22 }
 0x2f0   : > { %v3660_v43 = vpack.c.bf16 %v2890_v0, %v2889_v23 }
 0x2f2   : > { %3691 = vst [vmem:[%s4468_s4 + $0x78] sm:$0xff] %v3660_v43  }
 0x2f3 PF: > { %s14_s12 = sadd.s32 1, %s3816_s12  }
 0x2f4   : > { %p11_p7 = scmp.ge.s32.totalorder %s14_s12, 4  }
 0x2f6   :  { %13 = sbr.rel (!%p11_p7) target bundleno = 1 (0x1), region = 78 }
 0x2fb   :  { %2976 = vsyncpa [#allocation3], 1 }
 0x2fc   :  { %2978 = vsyncpa [#allocation3 + $0x1], 1 }

// kernel: _lambda_.21
= control target key start
LH: loop header
LB: loop body
LE: loop exit
PB: predicated region body
PF: predicated region fallthrough
CT: control target
= control target key end

     0   :  { %11 = vsyncpa [#allocation3], 0  ;;  %s524_s24 = smov [#allocation2]   ;;  %s525_s26 = smov 64   ;;  %s697_s0 = inlined_call_operand.vmem [shape: bf16[128,128], index: 0, kind: input, shape index: {}]   ;;  %s698_s1 = inlined_call_operand.hbm [shape: bf16[128,128], index: 1, kind: input, shape index: {}]   ;;  %s699_s2 = inlined_call_operand.vmem [shape: f32[1,128], index: 2, kind: input, shape index: {}]   ;;  %s700_s3 = inlined_call_operand.vmem [shape: f32[1,128], index: 3, kind: input, shape index: {}]   ;;  %s701_s4 = inlined_call_operand.vmem [shape: f32[1,128], index: 4, kind: input, shape index: {}]   ;;  %s702_s5 = inlined_call_operand.vmem [shape: f32[1,128], index: 5, kind: input, shape index: {}]   ;;  %s703_s6 = inlined_call_operand.vmem [shape: bf16[128,128], index: 6, kind: output, shape index: {}]  }
   0x1   :  { %s18_s23 = sshll.u32 %s698_s1, 4  ;;  %s20_s25 = sshll.u32 %s524_s24, 4  ;;  %s19_s23 = int_to_ptr.hbm [resolvable:$true] %s18_s23  ;;  %s21_s25 = int_to_ptr.vmem [resolvable:$true] %s20_s25 }
   0x2   :  { %s526_s27 = smov 4  }
   0x3   :  { %26 = dma.hbm_to_vmem [thread:$0]  %s19_s23, 1024, %s21_s25, [#allocation3], %s525_s26, %s525_s26, %s526_s27  }
   0x4   :  { %522 = dma.done.wait [#allocation3], 1024  }
   0x5   :  { %523 = vsyncadd [#allocation3], 4294966272  ;;  %v380_v0 = vld [vmem:[#allocation2 + $0x38] sm:$0xff]  ;;  %v379_v1 = vld [vmem:[#allocation2 + $0x30] sm:$0xff] }
   0x6   :  { %199 = vmatpush.bf16.msra.mxu0 %v380_v0  ;;  %467 = vmatpush.bf16.msra.mxu1 %v380_v0  ;;  %v378_v2 = vld [vmem:[#allocation2 + $0x28] sm:$0xff]  ;;  %v382_v3 = vld [vmem:[%s697_s0] sm:$0xff]   ;;  %v454_v5 = vld [vmem:[%s697_s0 + $0x10] sm:$0xff]  }
   0x7   :  { %468 = vmatpush.bf16.msra.mxu2 %v380_v0  ;;  %469 = vmatpush.bf16.msra.mxu3 %v380_v0  ;;  %v377_v4 = vld [vmem:[#allocation2 + $0x20] sm:$0xff]  ;;  %v458_v7 = vld [vmem:[%s697_s0 + $0x30] sm:$0xff]   ;;  %v383_v8 = vunpack.c.l.bf16 %v382_v3  ;;  %v384_v9 = vunpack.c.h.bf16 %v382_v3  ;;  %v391_v11 = vunpack.c.l.bf16 %v454_v5  ;;  %v392_v12 = vunpack.c.h.bf16 %v454_v5  ;;  %v376_v15 = vld [vmem:[#allocation2 + $0x18] sm:$0xff] }
   0x8   :  { %v456_v6 = vld [vmem:[%s697_s0 + $0x20] sm:$0xff]   ;;  %v407_v16 = vunpack.c.l.bf16 %v458_v7  ;;  %v408_v17 = vunpack.c.h.bf16 %v458_v7  ;;  %v375_v25 = vld [vmem:[#allocation2 + $0x10] sm:$0xff]  ;;  %v374_v34 = vld [vmem:[#allocation2 + $0x8] sm:$0xff] }
   0x9   :  { %v580_v10 = vld [vmem:[%s699_s2] ss:$0 sm:$0xff]  ;;  %v399_v13 = vunpack.c.l.bf16 %v456_v6  ;;  %v400_v14 = vunpack.c.h.bf16 %v456_v6  ;;  %v453_v43 = vld [vmem:[%s697_s0 + $0x8] sm:$0xff]   ;;  %v455_v44 = vld [vmem:[%s697_s0 + $0x18] sm:$0xff]  }
   0xa   :  { %200 = vmatpush.bf16.msra.mxu0 %v379_v1  ;;  %470 = vmatpush.bf16.msra.mxu1 %v379_v1  ;;  %v76_v18 = vmul.f32 %v580_v10, %v383_v8  ;;  %v77_v19 = vmul.f32 %v580_v10, %v384_v9  ;;  %v587_v20 = vld [vmem:[%s700_s3] ss:$0 sm:$0xff]  ;;  %v80_v21 = vmul.f32 %v580_v10, %v391_v11  ;;  %v457_v48 = vld [vmem:[%s697_s0 + $0x28] sm:$0xff]   ;;  %v459_v49 = vld [vmem:[%s697_s0 + $0x38] sm:$0xff]   ;;  %v387_v51 = vunpack.c.l.bf16 %v453_v43 }
   0xb   :  { %471 = vmatpush.bf16.msra.mxu2 %v379_v1  ;;  %472 = vmatpush.bf16.msra.mxu3 %v379_v1  ;;  %v81_v22 = vmul.f32 %v580_v10, %v392_v12  ;;  %v84_v23 = vmul.f32 %v580_v10, %v399_v13  ;;  %v85_v24 = vmul.f32 %v580_v10, %v400_v14  ;;  %v373_v45 = vld [vmem:[#allocation2] sm:$0xff]  ;;  %v388_v52 = vunpack.c.h.bf16 %v453_v43 }
   0xc   :  { %v88_v26 = vmul.f32 %v580_v10, %v407_v16  ;;  %v89_v27 = vmul.f32 %v580_v10, %v408_v17  ;;  %v95_v28 = vadd.f32 %v587_v20, %v76_v18  ;;  %v96_v29 = vadd.f32 %v587_v20, %v77_v19 }
   0xd   :  { %v99_v30 = vadd.f32 %v587_v20, %v80_v21  ;;  %v100_v31 = vadd.f32 %v587_v20, %v81_v22  ;;  %v103_v32 = vadd.f32 %v587_v20, %v84_v23  ;;  %v104_v33 = vadd.f32 %v587_v20, %v85_v24 }
   0xe   :  { %201 = vmatpush.bf16.msra.mxu0 %v378_v2  ;;  %473 = vmatpush.bf16.msra.mxu1 %v378_v2  ;;  %v107_v35 = vadd.f32 %v587_v20, %v88_v26  ;;  %v108_v36 = vadd.f32 %v587_v20, %v89_v27  ;;  %v111_v37 = vmax.f32 %v95_v28, 0.0  ;;  %v112_v38 = vmax.f32 %v96_v29, 0.0 }
   0xf   :  { %474 = vmatpush.bf16.msra.mxu2 %v378_v2  ;;  %475 = vmatpush.bf16.msra.mxu3 %v378_v2  ;;  %v115_v39 = vmax.f32 %v99_v30, 0.0  ;;  %v116_v40 = vmax.f32 %v100_v31, 0.0  ;;  %v119_v41 = vmax.f32 %v103_v32, 0.0  ;;  %v120_v42 = vmax.f32 %v104_v33, 0.0  ;;  %v640_v30 = vld [vmem:[%s702_s5] ss:$0 sm:$0xff] }
  0x10   :  { %v123_v46 = vmax.f32 %v107_v35, 0.0  ;;  %v124_v47 = vmax.f32 %v108_v36, 0.0  ;;  %v127_v50 = vpack.c.bf16 %v112_v38, %v111_v37  ;;  %v395_v53 = vunpack.c.l.bf16 %v455_v44 }
  0x11   :  { %v129_v54 = vpack.c.bf16 %v116_v40, %v115_v39  ;;  %v131_v55 = vpack.c.bf16 %v120_v42, %v119_v41  ;;  %v396_v56 = vunpack.c.h.bf16 %v455_v44  ;;  %v403_v57 = vunpack.c.l.bf16 %v457_v48 }
  0x12   :  { %202 = vmatpush.bf16.msra.mxu0 %v377_v4  ;;  %476 = vmatpush.bf16.msra.mxu1 %v377_v4  ;;  %v133_v58 = vpack.c.bf16 %v124_v47, %v123_v46  ;;  %v404_v59 = vunpack.c.h.bf16 %v457_v48  ;;  %v411_v60 = vunpack.c.l.bf16 %v459_v49  ;;  %v412_v61 = vunpack.c.h.bf16 %v459_v49 }
  0x13   :  { %477 = vmatpush.bf16.msra.mxu2 %v377_v4  ;;  %478 = vmatpush.bf16.msra.mxu3 %v377_v4  ;;  %v78_v62 = vmul.f32 %v580_v10, %v387_v51  ;;  %v79_v63 = vmul.f32 %v580_v10, %v388_v52  ;;  %v82_v0 = vmul.f32 %v580_v10, %v395_v53 }
  0x14   :  { %v83_v1 = vmul.f32 %v580_v10, %v396_v56  ;;  %v86_v2 = vmul.f32 %v580_v10, %v403_v57  ;;  %v87_v3 = vmul.f32 %v580_v10, %v404_v59  ;;  %v90_v4 = vmul.f32 %v580_v10, %v411_v60 }
  0x15   :  { %v91_v5 = vmul.f32 %v580_v10, %v412_v61  ;;  %v97_v6 = vadd.f32 %v587_v20, %v78_v62  ;;  %v98_v7 = vadd.f32 %v587_v20, %v79_v63  ;;  %v101_v8 = vadd.f32 %v587_v20, %v82_v0 }
  0x16   :  { %203 = vmatpush.bf16.msra.mxu0 %v376_v15  ;;  %479 = vmatpush.bf16.msra.mxu1 %v376_v15  ;;  %v102_v9 = vadd.f32 %v587_v20, %v83_v1  ;;  %v105_v11 = vadd.f32 %v587_v20, %v86_v2  ;;  %v106_v12 = vadd.f32 %v587_v20, %v87_v3 }
  0x17   :  { %480 = vmatpush.bf16.msra.mxu2 %v376_v15  ;;  %481 = vmatpush.bf16.msra.mxu3 %v376_v15  ;;  %v109_v13 = vadd.f32 %v587_v20, %v90_v4  ;;  %v110_v14 = vadd.f32 %v587_v20, %v91_v5  ;;  %v113_v15 = vmax.f32 %v97_v6, 0.0  ;;  %v114_v16 = vmax.f32 %v98_v7, 0.0  ;;  %v634_v20 = vld [vmem:[%s701_s4] ss:$0 sm:$0xff] }
  0x18   :  { %v117_v17 = vmax.f32 %v101_v8, 0.0  ;;  %v118_v10 = vmax.f32 %v102_v9, 0.0  ;;  %v121_v18 = vmax.f32 %v105_v11, 0.0  ;;  %v122_v19 = vmax.f32 %v106_v12, 0.0 }
  0x19   :  { %v125_v21 = vmax.f32 %v109_v13, 0.0  ;;  %v126_v22 = vmax.f32 %v110_v14, 0.0  ;;  %v128_v23 = vpack.c.bf16 %v114_v16, %v113_v15 }
  0x1a   :  { %204 = vmatpush.bf16.msra.mxu0 %v375_v25  ;;  %482 = vmatpush.bf16.msra.mxu1 %v375_v25  ;;  %v130_v24 = vpack.c.bf16 %v118_v10, %v117_v17 }
  0x1b   :  { %483 = vmatpush.bf16.msra.mxu2 %v375_v25  ;;  %484 = vmatpush.bf16.msra.mxu3 %v375_v25  ;;  %v132_v25 = vpack.c.bf16 %v122_v19, %v121_v18  ;;  %v134_v26 = vpack.c.bf16 %v126_v22, %v125_v21 }
  0x1e   :  { %205 = vmatpush.bf16.msra.mxu0 %v374_v34  ;;  %485 = vmatpush.bf16.msra.mxu1 %v374_v34 }
  0x1f   :  { %486 = vmatpush.bf16.msra.mxu2 %v374_v34  ;;  %487 = vmatpush.bf16.msra.mxu3 %v374_v34 }
  0x22   :  { %206 = vmatpush.bf16.msra.mxu0 %v373_v45  ;;  %488 = vmatpush.bf16.msra.mxu1 %v373_v45 }
  0x23   :  { %489 = vmatpush.bf16.msra.mxu2 %v373_v45  ;;  %490 = vmatpush.bf16.msra.mxu3 %v373_v45 }
  0x25   :  { %207 = vmatmul.bf16.vlgmr.msra.gmra.mxu0 %v127_v50  ;;  %217 = vmatmul.bf16.vlgmr.msra.gmra.mxu1 %v129_v54 }
  0x26   :  { %227 = vmatmul.bf16.vlgmr.msra.gmra.mxu2 %v131_v55  ;;  %237 = vmatmul.bf16.vlgmr.msra.gmra.mxu3 %v133_v58 }
  0x35   :  { %212 = vmatmul.bf16.gmra.mxu0 %v128_v23  ;;  %222 = vmatmul.bf16.gmra.mxu1 %v130_v24 }
  0x36   :  { %232 = vmatmul.bf16.gmra.mxu2 %v132_v25  ;;  %242 = vmatmul.bf16.gmra.mxu3 %v134_v26 }
  0xa2   :  { %v208_v27 = vpop.f32.mrf.mxu0  ;;  %v218_v28 = vpop.f32.mrf.mxu1 }
  0xa3   :  { %v252_v29 = vmul.f32 %v634_v20, %v208_v27  ;;  %v256_v31 = vmul.f32 %v634_v20, %v218_v28 }
  0xa5   :  { %v272_v36 = vadd.f32 %v640_v30, %v252_v29  ;;  %v276_v37 = vadd.f32 %v640_v30, %v256_v31 }
  0xa7   :  { %v288_v44 = vmax.f32 %v272_v36, 0.0  ;;  %v292_v45 = vmax.f32 %v276_v37, 0.0 }
  0xa9   :  { %v228_v32 = vpop.f32.mrf.mxu2  ;;  %v238_v33 = vpop.f32.mrf.mxu3 }
  0xaa   :  { %v210_v34 = vpop.f32.mrf.mxu0  ;;  %v220_v35 = vpop.f32.mrf.mxu1  ;;  %v260_v42 = vmul.f32 %v634_v20, %v228_v32  ;;  %v264_v43 = vmul.f32 %v634_v20, %v238_v33 }
  0xab   :  { %v253_v38 = vmul.f32 %v634_v20, %v210_v34  ;;  %v257_v39 = vmul.f32 %v634_v20, %v220_v35 }
  0xac   :  { %v280_v52 = vadd.f32 %v640_v30, %v260_v42  ;;  %v284_v53 = vadd.f32 %v640_v30, %v264_v43 }
  0xad   :  { %v273_v40 = vadd.f32 %v640_v30, %v253_v38  ;;  %v277_v41 = vadd.f32 %v640_v30, %v257_v39 }
  0xae   :  { %v296_v60 = vmax.f32 %v280_v52, 0.0  ;;  %v300_v61 = vmax.f32 %v284_v53, 0.0 }
  0xaf   :  { %v289_v46 = vmax.f32 %v273_v40, 0.0  ;;  %v293_v47 = vmax.f32 %v277_v41, 0.0 }
  0xb1   :  { %v416_v48 = vpack.c.bf16 %v289_v46, %v288_v44  ;;  %v426_v49 = vpack.c.bf16 %v293_v47, %v292_v45  ;;  %v230_v50 = vpop.f32.mrf.mxu2  ;;  %v240_v51 = vpop.f32.mrf.mxu3 }
  0xb2   :  { %v261_v54 = vmul.f32 %v634_v20, %v230_v50  ;;  %v265_v55 = vmul.f32 %v634_v20, %v240_v51  ;;  %v213_v56 = vpop.f32.mrf.mxu0  ;;  %v223_v57 = vpop.f32.mrf.mxu1 }
  0xb3   :  { %417 = vst [vmem:[%s703_s6] sm:$0xff] %v416_v48   ;;  %v254_v0 = vmul.f32 %v634_v20, %v213_v56  ;;  %v258_v1 = vmul.f32 %v634_v20, %v223_v57 }
  0xb4   :  { %461 = vst [vmem:[%s703_s6 + $0x10] sm:$0xff] %v426_v49   ;;  %v281_v58 = vadd.f32 %v640_v30, %v261_v54  ;;  %v285_v59 = vadd.f32 %v640_v30, %v265_v55 }
  0xb5   :  { %v274_v8 = vadd.f32 %v640_v30, %v254_v0  ;;  %v278_v9 = vadd.f32 %v640_v30, %v258_v1 }
  0xb6   :  { %v297_v62 = vmax.f32 %v281_v58, 0.0  ;;  %v301_v63 = vmax.f32 %v285_v59, 0.0 }
  0xb7   :  { %v290_v17 = vmax.f32 %v274_v8, 0.0  ;;  %v294_v10 = vmax.f32 %v278_v9, 0.0 }
  0xb8   :  { %v436_v2 = vpack.c.bf16 %v297_v62, %v296_v60  ;;  %v446_v3 = vpack.c.bf16 %v301_v63, %v300_v61 }
  0xb9   :  { %v233_v4 = vpop.f32.mrf.mxu2  ;;  %v243_v5 = vpop.f32.mrf.mxu3 }
  0xba   :  { %463 = vst [vmem:[%s703_s6 + $0x20] sm:$0xff] %v436_v2   ;;  %v215_v6 = vpop.f32.mrf.mxu0  ;;  %v225_v7 = vpop.f32.mrf.mxu1  ;;  %v262_v15 = vmul.f32 %v634_v20, %v233_v4  ;;  %v266_v16 = vmul.f32 %v634_v20, %v243_v5 }
  0xbb   :  { %465 = vst [vmem:[%s703_s6 + $0x30] sm:$0xff] %v446_v3   ;;  %v255_v11 = vmul.f32 %v634_v20, %v215_v6  ;;  %v259_v12 = vmul.f32 %v634_v20, %v225_v7 }
  0xbc   :  { %v282_v25 = vadd.f32 %v640_v30, %v262_v15  ;;  %v286_v26 = vadd.f32 %v640_v30, %v266_v16 }
  0xbd   :  { %v275_v13 = vadd.f32 %v640_v30, %v255_v11  ;;  %v279_v14 = vadd.f32 %v640_v30, %v259_v12 }
  0xbe   :  { %v298_v32 = vmax.f32 %v282_v25, 0.0  ;;  %v302_v33 = vmax.f32 %v286_v26, 0.0 }
  0xbf   :  { %v291_v18 = vmax.f32 %v275_v13, 0.0  ;;  %v295_v19 = vmax.f32 %v279_v14, 0.0 }
  0xc1   :  { %v421_v21 = vpack.c.bf16 %v291_v18, %v290_v17  ;;  %v431_v22 = vpack.c.bf16 %v295_v19, %v294_v10  ;;  %v235_v23 = vpop.f32.mrf.mxu2  ;;  %v245_v24 = vpop.f32.mrf.mxu3 }
  0xc2   :  { %v263_v27 = vmul.f32 %v634_v20, %v235_v23  ;;  %v267_v28 = vmul.f32 %v634_v20, %v245_v24 }
  0xc3   :  { %460 = vst [vmem:[%s703_s6 + $0x8] sm:$0xff] %v421_v21  }
  0xc4   :  { %462 = vst [vmem:[%s703_s6 + $0x18] sm:$0xff] %v431_v22   ;;  %v283_v29 = vadd.f32 %v640_v30, %v263_v27  ;;  %v287_v31 = vadd.f32 %v640_v30, %v267_v28 }
  0xc6   :  { %v299_v34 = vmax.f32 %v283_v29, 0.0  ;;  %v303_v35 = vmax.f32 %v287_v31, 0.0 }
  0xc8   :  { %v441_v36 = vpack.c.bf16 %v299_v34, %v298_v32  ;;  %v451_v37 = vpack.c.bf16 %v303_v35, %v302_v33 }
  0xca   :  { %464 = vst [vmem:[%s703_s6 + $0x28] sm:$0xff] %v441_v36  }
  0xcb   :  { %466 = vst [vmem:[%s703_s6 + $0x38] sm:$0xff] %v451_v37  }
  0xcc   :  { %340 = vsyncpa [#allocation3], 1 }

// kernel: _lambda_.25
= control target key start
LH: loop header
LB: loop body
LE: loop exit
PB: predicated region body
PF: predicated region fallthrough
CT: control target
= control target key end

     0   :  { %s299_s0 = inlined_call_operand.vmem [shape: bf16[128,128], index: 0, kind: input, shape index: {}]   ;;  %s300_s1 = inlined_call_operand.vmem [shape: f32[1,128], index: 1, kind: input, shape index: {}]   ;;  %s301_s2 = inlined_call_operand.vmem [shape: f32[1,128], index: 2, kind: input, shape index: {}]   ;;  %s302_s3 = inlined_call_operand.hbm [shape: f32[128,128], index: 3, kind: output, shape index: {}]  }
   0x1   :  { %v138_v0 = vld [vmem:[%s299_s0] sm:$0xff]   ;;  %v169_v5 = vld [vmem:[%s299_s0 + $0x8] sm:$0xff]   ;;  %v170_v8 = vld [vmem:[%s299_s0 + $0x10] sm:$0xff]  }
   0x2   :  { %v139_v1 = vunpack.c.l.bf16 %v138_v0  ;;  %v236_v2 = vld [vmem:[%s300_s1] ss:$0 sm:$0xff]  ;;  %v140_v4 = vunpack.c.h.bf16 %v138_v0  ;;  %v143_v6 = vunpack.c.l.bf16 %v169_v5  ;;  %v144_v7 = vunpack.c.h.bf16 %v169_v5  ;;  %v171_v9 = vld [vmem:[%s299_s0 + $0x18] sm:$0xff]  }
   0x3   :  { %v241_v3 = vld [vmem:[%s301_s2] ss:$0 sm:$0xff]  ;;  %v147_v12 = vunpack.c.l.bf16 %v170_v8  ;;  %v148_v13 = vunpack.c.h.bf16 %v170_v8  ;;  %v151_v16 = vunpack.c.l.bf16 %v171_v9  ;;  %v152_v17 = vunpack.c.h.bf16 %v171_v9 }
   0x4   :  { %v52_v10 = vmul.f32 %v236_v2, %v139_v1  ;;  %v53_v11 = vmul.f32 %v236_v2, %v140_v4  ;;  %v54_v14 = vmul.f32 %v236_v2, %v143_v6  ;;  %v55_v15 = vmul.f32 %v236_v2, %v144_v7 }
   0x5   :  { %8 = vsyncpa [#allocation3], 0  ;;  %v56_v20 = vmul.f32 %v236_v2, %v147_v12  ;;  %v57_v21 = vmul.f32 %v236_v2, %v148_v13  ;;  %v58_v24 = vmul.f32 %v236_v2, %v151_v16  ;;  %v59_v25 = vmul.f32 %v236_v2, %v152_v17  ;;  %v172_v26 = vld [vmem:[%s299_s0 + $0x20] sm:$0xff]   ;;  %v173_v31 = vld [vmem:[%s299_s0 + $0x28] sm:$0xff]   ;;  %s125_s6 = sshll.u32 %s302_s3, 4  ;;  %s208_s7 = smov 128   ;;  %s126_s6 = int_to_ptr.hbm [resolvable:$true] %s125_s6 }
   0x6   :  { %v71_v18 = vadd.f32 %v241_v3, %v52_v10  ;;  %v72_v19 = vadd.f32 %v241_v3, %v53_v11  ;;  %v73_v22 = vadd.f32 %v241_v3, %v54_v14  ;;  %v74_v23 = vadd.f32 %v241_v3, %v55_v15  ;;  %v174_v36 = vld [vmem:[%s299_s0 + $0x30] sm:$0xff]   ;;  %v175_v41 = vld [vmem:[%s299_s0 + $0x38] sm:$0xff]   ;;  %s207_s0 = smov [#allocation2]   ;;  %s209_s8 = smov 8  }
   0x7   :  { %v75_v29 = vadd.f32 %v241_v3, %v56_v20  ;;  %v76_v30 = vadd.f32 %v241_v3, %v57_v21  ;;  %v77_v34 = vadd.f32 %v241_v3, %v58_v24  ;;  %v78_v35 = vadd.f32 %v241_v3, %v59_v25  ;;  %s123_s30 = sshll.u32 %s207_s0, 4  ;;  %s124_s30 = int_to_ptr.vmem [resolvable:$true] %s123_s30 }
   0x8   :  { %v87_v27 = vmax.f32 %v71_v18, 0.0  ;;  %v88_v28 = vmax.f32 %v72_v19, 0.0  ;;  %v89_v32 = vmax.f32 %v73_v22, 0.0  ;;  %v90_v33 = vmax.f32 %v74_v23, 0.0 }
   0x9   :  { %v91_v37 = vmax.f32 %v75_v29, 0.0  ;;  %v92_v38 = vmax.f32 %v76_v30, 0.0  ;;  %v155_v39 = vunpack.c.l.bf16 %v172_v26  ;;  %v156_v40 = vunpack.c.h.bf16 %v172_v26 }
   0xa   :  { %103 = vst [vmem:[#allocation2] sm:$0xff] %v87_v27  ;;  %v93_v42 = vmax.f32 %v77_v34, 0.0  ;;  %v94_v43 = vmax.f32 %v78_v35, 0.0  ;;  %v159_v44 = vunpack.c.l.bf16 %v173_v31  ;;  %v160_v45 = vunpack.c.h.bf16 %v173_v31 }
   0xb   :  { %104 = vst [vmem:[#allocation2 + $0x8] sm:$0xff] %v88_v28  ;;  %v60_v46 = vmul.f32 %v236_v2, %v155_v39  ;;  %v61_v47 = vmul.f32 %v236_v2, %v156_v40  ;;  %v163_v48 = vunpack.c.l.bf16 %v174_v36  ;;  %v164_v49 = vunpack.c.h.bf16 %v174_v36 }
   0xc   :  { %105 = vst [vmem:[#allocation2 + $0x10] sm:$0xff] %v89_v32  ;;  %v62_v50 = vmul.f32 %v236_v2, %v159_v44  ;;  %v63_v51 = vmul.f32 %v236_v2, %v160_v45  ;;  %v167_v52 = vunpack.c.l.bf16 %v175_v41  ;;  %v168_v53 = vunpack.c.h.bf16 %v175_v41 }
   0xd   :  { %106 = vst [vmem:[#allocation2 + $0x18] sm:$0xff] %v90_v33  ;;  %v79_v54 = vadd.f32 %v241_v3, %v60_v46  ;;  %v80_v55 = vadd.f32 %v241_v3, %v61_v47  ;;  %v64_v56 = vmul.f32 %v236_v2, %v163_v48  ;;  %v65_v57 = vmul.f32 %v236_v2, %v164_v49 }
   0xe   :  { %107 = vst [vmem:[#allocation2 + $0x20] sm:$0xff] %v91_v37  ;;  %v81_v58 = vadd.f32 %v241_v3, %v62_v50  ;;  %v82_v59 = vadd.f32 %v241_v3, %v63_v51  ;;  %v66_v60 = vmul.f32 %v236_v2, %v167_v52  ;;  %v67_v61 = vmul.f32 %v236_v2, %v168_v53 }
   0xf   :  { %108 = vst [vmem:[#allocation2 + $0x28] sm:$0xff] %v92_v38  ;;  %v95_v62 = vmax.f32 %v79_v54, 0.0  ;;  %v96_v63 = vmax.f32 %v80_v55, 0.0  ;;  %v83_v0 = vadd.f32 %v241_v3, %v64_v56  ;;  %v84_v1 = vadd.f32 %v241_v3, %v65_v57 }
  0x10   :  { %109 = vst [vmem:[#allocation2 + $0x30] sm:$0xff] %v93_v42  ;;  %v97_v4 = vmax.f32 %v81_v58, 0.0  ;;  %v98_v5 = vmax.f32 %v82_v59, 0.0  ;;  %v85_v6 = vadd.f32 %v241_v3, %v66_v60  ;;  %v86_v7 = vadd.f32 %v241_v3, %v67_v61 }
  0x11   :  { %110 = vst [vmem:[#allocation2 + $0x38] sm:$0xff] %v94_v43  ;;  %v99_v8 = vmax.f32 %v83_v0, 0.0  ;;  %v100_v9 = vmax.f32 %v84_v1, 0.0 }
  0x12   :  { %111 = vst [vmem:[#allocation2 + $0x40] sm:$0xff] %v95_v62  ;;  %v101_v2 = vmax.f32 %v85_v6, 0.0  ;;  %v102_v10 = vmax.f32 %v86_v7, 0.0 }
  0x13   :  { %112 = vst [vmem:[#allocation2 + $0x48] sm:$0xff] %v96_v63 }
  0x14   :  { %113 = vst [vmem:[#allocation2 + $0x50] sm:$0xff] %v97_v4 }
  0x15   :  { %114 = vst [vmem:[#allocation2 + $0x58] sm:$0xff] %v98_v5 }
  0x16   :  { %115 = vst [vmem:[#allocation2 + $0x60] sm:$0xff] %v99_v8 }
  0x17   :  { %116 = vst [vmem:[#allocation2 + $0x68] sm:$0xff] %v100_v9 }
  0x18   :  { %117 = vst [vmem:[#allocation2 + $0x70] sm:$0xff] %v101_v2 }
  0x19   :  { %118 = vst [vmem:[#allocation2 + $0x78] sm:$0xff] %v102_v10 }
  0x1a   :  { %131 = dma.vmem_to_hbm [thread:$0]  %s124_s30, 2048, %s126_s6, [#allocation3], %s208_s7, %s208_s7, %s209_s8  }
  0x1b   :  { %205 = dma.done.wait [#allocation3], 2048  }
  0x1c   :  { %206 = vsyncadd [#allocation3], 4294965248 }
  0x1d   :  { %136 = vsyncpa [#allocation3], 1 }

// kernel: _lambda_.22
= control target key start
LH: loop header
LB: loop body
LE: loop exit
PB: predicated region body
PF: predicated region fallthrough
CT: control target
= control target key end

     0   :  { %8 = vsyncpa [#allocation3], 0  ;;  %s2099_s12 = smov 0   ;;  %s2388_s0 = inlined_call_operand.vmem [shape: bf16[2,10,10,128], index: 0, kind: input, shape index: {}]   ;;  %s2389_s1 = inlined_call_operand.hbm [shape: bf16[3,3,128,128], index: 1, kind: input, shape index: {}]   ;;  %s2390_s2 = inlined_call_operand.vmem [shape: bf16[2,64,128], index: 2, kind: input, shape index: {}]   ;;  %s2391_s3 = inlined_call_operand.vmem [shape: bf16[2,64,128], index: 3, kind: output, shape index: {}]  }
   0x1 LB: > { %s129_s15 = sshll.u32 %s2389_s1, 4  ;;  %s1568_s16 = sadd.s32 4294967295, %s2074_s12   ;;  %s2074_s12 = sphi %s2099_s12, %s14_s12   ;;  %s130_s15 = int_to_ptr.hbm [resolvable:$true] %s129_s15 }
   0x2   : > { %p1570_p0 = scmp.ge.s32.totalorder %s2074_s12, 1  ;;  %p118_p1 = scmp.lt.s32.totalorder %s2074_s12, 3 }
   0x3   : > { %p2021_p2 = scmp.eq.s32.totalorder %s1568_s16, 0  ;;  %s2076_s17 = smov [#allocation2]  }
   0x4   : > { %p119_p3 = pnand %p1570_p0, %p118_p1  ;;  %s131_s18 = sshll.u32 %s2076_s17, 4  ;;  %s132_s18 = int_to_ptr.vmem [resolvable:$true] %s131_s18 }
   0x5   : > { %s2077_s19 = smov 64   ;;  %s2078_s20 = smov 4  }
   0x6   : > { %p2017_p4 = pneg %p119_p3  ;;  %163 = sbr.rel (%p119_p3) target bundleno = 335 (0x14f), region = 32 }
   0x8   : > { %p2018_p5 = pnand %p2021_p2, %p2017_p4 }
   0xa   : > { %2020 = dma.hbm_to_vmem [thread:$0]  (!%p2018_p5), %s130_s15, 9216, %s132_s18, [#allocation3], %s2077_s19, %s2077_s19, %s2078_s20  }
   0xb   : > { %2069 = dma.done.wait (%p2021_p2), [#allocation3], 9216  }
   0xc   : > { %2071 = vsyncadd (%p2021_p2), [#allocation3], 4294958080  ;;  %p193_p6 = scmp.lt.s32.totalorder %s1568_s16, 1  ;;  %v1897_v0 = vld [vmem:[#allocation2 + $0xf8] sm:$0xff]  ;;  %v1896_v2 = vld [vmem:[#allocation2 + $0xf0] sm:$0xff]  ;;  %vm1072_vm3 = vcmask 1042432  }
   0xd   : > { %v1905_v1 = vld [vmem:[#allocation2 + $0x1b8] sm:$0xff]  ;;  %1996 = vmatpush.bf16.msra.mxu1 %v1897_v0  ;;  %323 = vmatpush.bf16.msra.mxu0 %v1897_v0  ;;  %v1904_v3 = vld [vmem:[#allocation2 + $0x1b0] sm:$0xff]  ;;  %v1895_v6 = vld [vmem:[#allocation2 + $0xe8] sm:$0xff]  ;;  %vm565_vm0 = vsmask.f32 3328  ;;  %vm1073_vm4 = vcmask 1046532  }
   0xe   : > { %508 = vmatpush.bf16.msra.mxu2 %v1905_v1  ;;  %v1913_v4 = vld [vmem:[#allocation2 + $0x78] sm:$0xff]  ;;  %s2397_s16 = smov (!%p193_p6, %s1568_s16), 1  ;;  %v1912_v5 = vld [vmem:[#allocation2 + $0x70] sm:$0xff]  ;;  %v1903_v7 = vld [vmem:[#allocation2 + $0x1a8] sm:$0xff]  ;;  %vm566_vm1 = vsmask.f32 7440 }
   0xf   : > { %789 = vmatpush.bf16.msra.mxu3 %v1913_v4  ;;  %s2012_s21 = smul.u32 80, %s2397_s16  ;;  %v1911_v8 = vld [vmem:[#allocation2 + $0x68] sm:$0xff]  ;;  %v1894_v9 = vld [vmem:[#allocation2 + $0xe0] sm:$0xff]  ;;  %v1893_v17 = vld [vmem:[#allocation2 + $0xd8] sm:$0xff]  ;;  %s1880_s25 = sshll.u32 %s2397_s16, 5 }
  0x10   : > { %v1902_v10 = vld [vmem:[#allocation2 + $0x1a0] sm:$0xff]  ;;  %v1901_v21 = vld [vmem:[#allocation2 + $0x198] sm:$0xff]  ;;  %v1892_v30 = vld [vmem:[#allocation2 + $0xd0] sm:$0xff]  ;;  %s2360_s28 = scalar_lea.vmem %s2390_s2, %s1880_s25  ;;  %s2366_s4 = scalar_lea.vmem %s2391_s3, %s1880_s25 }
  0x11   : > { %1997 = vmatpush.bf16.msra.mxu1 %v1896_v2  ;;  %324 = vmatpush.bf16.msra.mxu0 %v1896_v2  ;;  %s2116_s24 = scalar_lea.vmem %s2388_s0, %s2012_s21  ;;  %v1910_v13 = vld [vmem:[#allocation2 + $0x60] sm:$0xff]  ;;  %v1909_v25 = vld [vmem:[#allocation2 + $0x58] sm:$0xff]  ;;  %v1900_v31 = vld [vmem:[#allocation2 + $0x190] sm:$0xff] }
  0x12   : > { %509 = vmatpush.bf16.msra.mxu2 %v1904_v3  ;;  %v545_v11 = vld [vmem:[%s2116_s24] sm:$0xf]  ;;  %v547_v12 = vld [vmem:[%s2116_s24 + $0x8] sm:$0xf]  ;;  %v2121_v14 = vld [vmem:[%s2116_s24 + $0x4] sm:$0x1] }
  0x13   : > { %790 = vmatpush.bf16.msra.mxu3 %v1912_v5  ;;  %v569_v15 = vshrl.u32 %v545_v11, 16  ;;  %v572_v16 = vshll.u32 %v545_v11, 16  ;;  %v2124_v18 = vld [vmem:[%s2116_s24 + $0xc] sm:$0x1]  ;;  %v583_v19 = vshrl.u32 %v547_v12, 16  ;;  %v586_v20 = vshll.u32 %v547_v12, 16  ;;  %vm2139_vm2 = vmor %vm565_vm0, %vm566_vm1 }
  0x14   : > { %v578_v24 = vshll.u32 %v2121_v14, 16  ;;  %v592_v29 = vshll.u32 %v2124_v18, 16  ;;  %v2129_v32 = vld [vmem:[%s2116_s24 + $0x28] sm:$0xf]  ;;  %v2132_v34 = vld [vmem:[%s2116_s24 + $0x30] sm:$0xf]  ;;  %vm2270_vm5 = vmor %vm1072_vm3, %vm1073_vm4 }
  0x15   : > { %1998 = vmatpush.bf16.msra.mxu1 %v1895_v6  ;;  %325 = vmatpush.bf16.msra.mxu0 %v1895_v6  ;;  %v571_v22 = vrot.slane %v569_v15, 4  ;;  %v574_v23 = vrot.slane %v572_v16, 5  ;;  %v585_v27 = vrot.slane %v583_v19, 4  ;;  %v588_v28 = vrot.slane %v586_v20, 5  ;;  %v2135_v35 = vld [vmem:[%s2116_s24 + $0x8] sm:$0xf] }
  0x16   : > { %510 = vmatpush.bf16.msra.mxu2 %v1903_v7  ;;  %v210_v36 = vld [vmem:[%s2116_s24 + $0x10] sm:$0xf]  ;;  %v580_v39 = vrot.slane %v578_v24, 5  ;;  %v594_v41 = vrot.slane %v592_v29, 5  ;;  %v1891_v42 = vld [vmem:[#allocation2 + $0xc8] sm:$0xff]  ;;  %v263_v46 = vunpack.c.l.b16 %v2129_v32  ;;  %v264_v47 = vunpack.c.l.b16 %v2132_v34  ;;  %v1890_v55 = vld [vmem:[#allocation2 + $0xc0] sm:$0xff] }
  0x17   : > { %791 = vmatpush.bf16.msra.mxu3 %v1911_v8  ;;  %v575_v26 = vor.u32 %v574_v23, %v571_v22  ;;  %v589_v33 = vor.u32 %v588_v28, %v585_v27  ;;  %v1908_v37 = vld [vmem:[#allocation2 + $0x50] sm:$0xff]  ;;  %v1899_v44 = vld [vmem:[#allocation2 + $0x188] sm:$0xff]  ;;  %v2144_v45 = vld [vmem:[%s2116_s24 + $0x18] sm:$0xf]  ;;  %v259_v48 = vunpack.c.l.b16 %v2135_v35  ;;  %v260_v49 = vunpack.c.l.b16 %v210_v36 }
  0x18   : > { %v1907_v50 = vld [vmem:[#allocation2 + $0x48] sm:$0xff]  ;;  %v549_v53 = vld [vmem:[%s2116_s24 + $0x10] sm:$0xf]  ;;  %v551_v54 = vld [vmem:[%s2116_s24 + $0x18] sm:$0xf]  ;;  %v261_v56 = vunpack.c.l.b16 %v2144_v45  ;;  %v269_v63 = vpack.c.b16 %v264_v47, %v263_v46 }
  0x19   : > { %1999 = vmatpush.bf16.msra.mxu1 %v1894_v9  ;;  %326 = vmatpush.bf16.msra.mxu0 %v1894_v9  ;;  %v576_v38 = vrot.slane %v575_v26, 4  ;;  %v590_v40 = vrot.slane %v589_v33, 4  ;;  %v597_v57 = vshrl.u32 %v549_v53, 16  ;;  %v600_v58 = vshll.u32 %v549_v53, 16  ;;  %v1889_v60 = vld [vmem:[#allocation2 + $0x38] sm:$0xff]  ;;  %v1898_v61 = vld [vmem:[#allocation2 + $0x180] sm:$0xff] }
  0x1a   : > { %511 = vmatpush.bf16.msra.mxu2 %v1902_v10  ;;  %v611_v59 = vshrl.u32 %v551_v54, 16  ;;  %v614_v62 = vshll.u32 %v551_v54, 16  ;;  %v267_v0 = vpack.c.b16 %v260_v49, %v259_v48  ;;  %v1921_v1 = vld [vmem:[#allocation2 + $0x138] sm:$0xff]  ;;  %v2166_v9 = vpack.c.b16 %v261_v56, %v260_v49  ;;  %v1906_v10 = vld [vmem:[#allocation2 + $0x40] sm:$0xff]  ;;  %v2169_v11 = vld [vmem:[%s2116_s24 + $0x14] sm:$0x1] }
  0x1b   : > { %792 = vmatpush.bf16.msra.mxu3 %v1910_v13  ;;  %v581_v51 = vsel %vm2139_vm2, %v576_v38, %v580_v39  ;;  %v595_v52 = vsel %vm2139_vm2, %v590_v40, %v594_v41  ;;  %v1937_v2 = vld [vmem:[#allocation2 + $0xb8] sm:$0xff]  ;;  %v599_v5 = vrot.slane %v597_v57, 4  ;;  %v602_v6 = vrot.slane %v600_v58, 5  ;;  %v1888_v13 = vld [vmem:[#allocation2 + $0x30] sm:$0xff]  ;;  %v1887_v24 = vld [vmem:[#allocation2 + $0x28] sm:$0xff] }
  0x1c   : > { %v725_v3 = vunpack.c.l.b16 %v581_v51  ;;  %v2162_v4 = vunpack.c.l.b16 %v595_v52  ;;  %v613_v7 = vrot.slane %v611_v59, 4  ;;  %v616_v8 = vrot.slane %v614_v62, 5  ;;  %v2172_v12 = vld [vmem:[%s2116_s24 + $0x1c] sm:$0x1]  ;;  %v1920_v16 = vld [vmem:[#allocation2 + $0x130] sm:$0xff]  ;;  %v1935_v29 = vld [vmem:[#allocation2 + $0xa8] sm:$0xff] }
  0x1d   : > { %2000 = vmatpush.bf16.msra.mxu1 %v1893_v17  ;;  %327 = vmatpush.bf16.msra.mxu0 %v1893_v17  ;;  %v1945_v15 = vld [vmem:[#allocation2 + $0x178] sm:$0xff]  ;;  %v1936_v19 = vld [vmem:[#allocation2 + $0xb0] sm:$0xff]  ;;  %v603_v20 = vor.u32 %v602_v6, %v599_v5  ;;  %v620_v23 = vshll.u32 %v2172_v12, 16  ;;  %v2182_v28 = vld [vmem:[%s2116_s24 + $0x40] sm:$0xf] }
  0x1e   : > { %512 = vmatpush.bf16.msra.mxu2 %v1901_v21  ;;  %v733_v17 = vpack.c.b16 %v2162_v4, %v725_v3  ;;  %v606_v21 = vshll.u32 %v2169_v11, 16  ;;  %v617_v22 = vor.u32 %v616_v8, %v613_v7  ;;  %v1944_v26 = vld [vmem:[#allocation2 + $0x170] sm:$0xff]  ;;  %v2179_v27 = vld [vmem:[%s2116_s24 + $0x38] sm:$0xf]  ;;  %v1886_v38 = vld [vmem:[#allocation2 + $0x20] sm:$0xff]  ;;  %v266_v41 = vunpack.c.l.b16 %v2182_v28 }
  0x1f   : > { %793 = vmatpush.bf16.msra.mxu3 %v1909_v25  ;;  %v1919_v25 = vld [vmem:[#allocation2 + $0x128] sm:$0xff]  ;;  %v265_v40 = vunpack.c.l.b16 %v2179_v27  ;;  %v1934_v49 = vld [vmem:[#allocation2 + $0xa0] sm:$0xff]  ;;  %v1885_v59 = vld [vmem:[#allocation2 + $0x18] sm:$0xff] }
  0x20   : > { %v608_v33 = vrot.slane %v606_v21, 5  ;;  %v618_v36 = vrot.slane %v617_v22, 4  ;;  %v1943_v39 = vld [vmem:[#allocation2 + $0x168] sm:$0xff]  ;;  %v553_v52 = vld [vmem:[%s2116_s24 + $0x20] sm:$0xf]  ;;  %v1917_v62 = vld [vmem:[#allocation2 + $0x118] sm:$0xff] }
  0x21   : > { %2001 = vmatpush.bf16.msra.mxu1 %v1892_v30  ;;  %328 = vmatpush.bf16.msra.mxu0 %v1892_v30  ;;  %v212_v30 = vld [vmem:[%s2116_s24 + $0x20] sm:$0xf]  ;;  %v555_v53 = vld [vmem:[%s2116_s24 + $0x28] sm:$0xf]  ;;  %v625_v54 = vshrl.u32 %v553_v52, 16  ;;  %v1884_v45 = vld [vmem:[#allocation2 + $0x10] sm:$0xff] }
  0x22   : > { %513 = vmatpush.bf16.msra.mxu2 %v1900_v31  ;;  %v604_v31 = vrot.slane %v603_v20, 4  ;;  %v639_v57 = vshrl.u32 %v555_v53, 16  ;;  %v642_v58 = vshll.u32 %v555_v53, 16  ;;  %v2208_v7 = vld [vmem:[%s2116_s24 + $0x24] sm:$0x1]  ;;  %v1932_v20 = vld [vmem:[#allocation2 + $0x90] sm:$0xff] }
  0x23   : > { %794 = vmatpush.bf16.msra.mxu3 %v1908_v37  ;;  %v622_v37 = vrot.slane %v620_v23, 5  ;;  %v2211_v8 = vld [vmem:[%s2116_s24 + $0x2c] sm:$0x1]  ;;  %v634_v32 = vshll.u32 %v2208_v7, 16  ;;  %v1941_v22 = vld [vmem:[#allocation2 + $0x158] sm:$0xff]  ;;  %v1940_v27 = vld [vmem:[#allocation2 + $0x150] sm:$0xff] }
  0x24   : > { %v641_v3 = vrot.slane %v639_v57, 4  ;;  %v644_v5 = vrot.slane %v642_v58, 5  ;;  %v1915_v21 = vld [vmem:[#allocation2 + $0x108] sm:$0xff]  ;;  %v208_v23 = vld [vmem:[%s2116_s24] sm:$0xf]  ;;  %v2236_v57 = vpack.c.b16 %v265_v40, %v264_v47 }
  0x25   : > { %2002 = vmatpush.bf16.msra.mxu1 %v1891_v42  ;;  %329 = vmatpush.bf16.msra.mxu0 %v1891_v42  ;;  %v1918_v42 = vld [vmem:[#allocation2 + $0x120] sm:$0xff]  ;;  %v623_v51 = vsel %vm2139_vm2, %v618_v36, %v622_v37  ;;  %v1931_v34 = vld [vmem:[#allocation2 + $0x88] sm:$0xff] }
  0x26   : > { %514 = vmatpush.bf16.msra.mxu2 %v1899_v44  ;;  %v262_v44 = vunpack.c.l.b16 %v212_v30  ;;  %v1882_v30 = vld [vmem:[#allocation2] sm:$0xff] }
  0x27   : > { %795 = vmatpush.bf16.msra.mxu3 %v1907_v50  ;;  %v609_v50 = vsel %vm2139_vm2, %v604_v31, %v608_v33  ;;  %v353_v31 = vunpack.c.l.b16 %v208_v23  ;;  %v1929_v33 = vld [vmem:[#allocation2 + $0x1f8] sm:$0xff]  ;;  %v1914_v36 = vld [vmem:[#allocation2 + $0x100] sm:$0xff] }
  0x28   : > { %v2205_v6 = vpack.c.b16 %v263_v46, %v262_v44  ;;  %v645_v46 = vor.u32 %v644_v5, %v641_v3  ;;  %v1938_v28 = vld [vmem:[#allocation2 + $0x140] sm:$0xff] }
  0x29   : > { %2003 = vmatpush.bf16.msra.mxu1 %v1890_v55  ;;  %330 = vmatpush.bf16.msra.mxu0 %v1890_v55  ;;  %v628_v55 = vshll.u32 %v553_v52, 16  ;;  %v354_v53 = vpack.c.b16 %v259_v48, %v353_v31 }
  0x2a   : > { %515 = vmatpush.bf16.msra.mxu2 %v1898_v61  ;;  %v268_v61 = vpack.c.b16 %v262_v44, %v261_v56  ;;  %v1916_v56 = vld [vmem:[#allocation2 + $0x110] sm:$0xff]  ;;  %v559_v44 = vld [vmem:[%s2116_s24 + $0x38] sm:$0xf] }
  0x2b   : > { %796 = vmatpush.bf16.msra.mxu3 %v1906_v10  ;;  %v670_v52 = vshll.u32 %v559_v44, 16 }
  0x2c   : > { %341 = vmatmul.bf16.vlgmr.msra.gmra.mxu1 %v269_v63  ;;  %331 = vmatmul.bf16.vlgmr.msra.gmra.mxu0 %v267_v0  ;;  %v2199_v63 = vunpack.c.l.b16 %v609_v50  ;;  %v2201_v0 = vunpack.c.l.b16 %v623_v51  ;;  %v667_v51 = vshrl.u32 %v559_v44, 16  ;;  %v1081_v44 = vrot.slane %v2124_v18, 5 }
  0x2d   : > { %410 = vmatpush.bf16.msrb.mxu1 %v1889_v60  ;;  %900 = vmatpush.bf16.msrb.mxu0 %v1921_v1  ;;  %v270_v60 = vpack.c.b16 %v266_v41, %v265_v40  ;;  %v627_v1 = vrot.slane %v625_v54, 4  ;;  %v1928_v54 = vld [vmem:[#allocation2 + $0x1f0] sm:$0xff]  ;;  %v1085_v18 = vrot.slane %v2169_v11, 5 }
  0x2e   : > { %1196 = vmatpush.bf16.msrb.mxu2 %v1937_v2  ;;  %797 = vmatmul.bf16.vlgmr.msra.gmra.mxu3 %v733_v17  ;;  %v630_v2 = vrot.slane %v628_v55, 5  ;;  %v2215_v10 = vpack.c.b16 %v2201_v0, %v2199_v63  ;;  %v1942_v17 = vld [vmem:[#allocation2 + $0x160] sm:$0xff]  ;;  %v844_v55 = vpack.c.b16 %v2199_v63, %v2162_v4  ;;  %v669_v48 = vrot.slane %v667_v51, 4  ;;  %v1927_v4 = vld [vmem:[#allocation2 + $0x1e8] sm:$0xff]  ;;  %v1948_v51 = vld [vmem:[#allocation2 + $0x210] sm:$0xff] }
  0x2f   : > { %516 = vmatmul.bf16.vlgmr.msra.gmra.mxu2 %v2166_v9  ;;  %1307 = vmatpush.bf16.msrb.mxu3 %v1945_v15 }
  0x30   : > { %v631_v15 = vor.u32 %v630_v2, %v627_v1  ;;  %v2241_v1 = vld [vmem:[%s2116_s24 + $0x34] sm:$0x1]  ;;  %v2244_v2 = vld [vmem:[%s2116_s24 + $0x3c] sm:$0x1] }
  0x31   : > { %411 = vmatpush.bf16.msrb.mxu1 %v1888_v13  ;;  %901 = vmatpush.bf16.msrb.mxu0 %v1920_v16  ;;  %v1933_v13 = vld [vmem:[#allocation2 + $0x98] sm:$0xff]  ;;  %v648_v16 = vshll.u32 %v2211_v8, 16  ;;  %v662_v63 = vshll.u32 %v2241_v1, 16  ;;  %v676_v5 = vshll.u32 %v2244_v2, 16 }
  0x32   : > { %1197 = vmatpush.bf16.msrb.mxu2 %v1936_v19  ;;  %v1883_v19 = vld [vmem:[#allocation2 + $0x8] sm:$0xff] }
  0x33   : > { %1308 = vmatpush.bf16.msrb.mxu3 %v1944_v26  ;;  %v646_v26 = vrot.slane %v645_v46, 4  ;;  %v664_v46 = vrot.slane %v662_v63, 5 }
  0x35   : > { %412 = vmatpush.bf16.msrb.mxu1 %v1887_v24  ;;  %902 = vmatpush.bf16.msrb.mxu0 %v1919_v25  ;;  %v632_v24 = vrot.slane %v631_v15, 4  ;;  %v636_v25 = vrot.slane %v634_v32, 5  ;;  %v1926_v15 = vld [vmem:[#allocation2 + $0x1e0] sm:$0xff] }
  0x36   : > { %1198 = vmatpush.bf16.msrb.mxu2 %v1935_v29  ;;  %v650_v29 = vrot.slane %v648_v16, 5 }
  0x37   : > { %1309 = vmatpush.bf16.msrb.mxu3 %v1943_v39  ;;  %v637_v37 = vsel %vm2139_vm2, %v632_v24, %v636_v25  ;;  %v1953_v39 = vld [vmem:[#allocation2 + $0x238] sm:$0xff]  ;;  %v1924_v25 = vld [vmem:[#allocation2 + $0x1d0] sm:$0xff] }
  0x38   : > { %v729_v58 = vunpack.c.l.b16 %v637_v37 }
  0x39   : > { %413 = vmatpush.bf16.msrb.mxu1 %v1886_v38  ;;  %903 = vmatpush.bf16.msrb.mxu0 %v1918_v42  ;;  %v651_v38 = vsel %vm2139_vm2, %v646_v26, %v650_v29  ;;  %v557_v42 = vld [vmem:[%s2116_s24 + $0x30] sm:$0xf] }
  0x3a   : > { %1199 = vmatpush.bf16.msrb.mxu2 %v1934_v49  ;;  %v653_v49 = vshrl.u32 %v557_v42, 16  ;;  %v656_v50 = vshll.u32 %v557_v42, 16  ;;  %v845_v26 = vpack.c.b16 %v729_v58, %v2201_v0 }
  0x3b   : > { %1310 = vmatpush.bf16.msrb.mxu3 %v1942_v17  ;;  %v678_v17 = vrot.slane %v676_v5, 5  ;;  %v1045_v5 = vld [vmem:[%s2116_s24 + $0x18] sm:$0xe] }
  0x3c   : > { %346 = vmatmul.bf16.gmra.mxu1 %v270_v60  ;;  %336 = vmatmul.bf16.gmra.mxu0 %v268_v61  ;;  %v1952_v60 = vld [vmem:[#allocation2 + $0x230] sm:$0xff]  ;;  %v655_v35 = vrot.slane %v653_v49, 4  ;;  %v658_v61 = vrot.slane %v656_v50, 5 }
  0x3d   : > { %414 = vmatpush.bf16.msrb.mxu1 %v1885_v59  ;;  %904 = vmatpush.bf16.msrb.mxu0 %v1917_v62  ;;  %v2238_v59 = vunpack.c.l.b16 %v651_v38  ;;  %v672_v62 = vrot.slane %v670_v52, 5  ;;  %v1077_v38 = vrot.slane %v2121_v14, 5  ;;  %v1044_v50 = vld [vmem:[%s2116_s24 + $0x10] sm:$0xe]  ;;  %v1922_v52 = vld [vmem:[#allocation2 + $0x1c0] sm:$0xff] }
  0x3e   : > { %1200 = vmatpush.bf16.msrb.mxu2 %v1933_v13  ;;  %802 = vmatmul.bf16.gmra.mxu3 %v2215_v10  ;;  %v659_v40 = vor.u32 %v658_v61, %v655_v35  ;;  %v1939_v13 = vld [vmem:[#allocation2 + $0x148] sm:$0xff] }
  0x3f   : > { %521 = vmatmul.bf16.gmra.mxu2 %v2205_v6  ;;  %1311 = vmatpush.bf16.msrb.mxu3 %v1941_v22  ;;  %v2247_v47 = vpack.c.b16 %v2238_v59, %v729_v58  ;;  %v673_v3 = vor.u32 %v672_v62, %v669_v48 }
  0x40   : > { %v660_v32 = vrot.slane %v659_v40, 4 }
  0x41   : > { %415 = vmatpush.bf16.msrb.mxu1 %v1884_v45  ;;  %905 = vmatpush.bf16.msrb.mxu0 %v1916_v56  ;;  %v1951_v45 = vld [vmem:[#allocation2 + $0x228] sm:$0xff]  ;;  %v1930_v56 = vld [vmem:[#allocation2 + $0x80] sm:$0xff]  ;;  %v674_v16 = vrot.slane %v673_v3, 4 }
  0x42   : > { %1201 = vmatpush.bf16.msrb.mxu2 %v1932_v20  ;;  %v217_v20 = vld [vmem:[%s2116_s24 + $0x48] sm:$0xf]  ;;  %v665_v23 = vsel %vm2139_vm2, %v660_v32, %v664_v46  ;;  %v1775_v32 = vrot.slane %v1045_v5, 9  ;;  %v1046_v46 = vld [vmem:[%s2116_s24 + $0x20] sm:$0xe] }
  0x43   : > { %1312 = vmatpush.bf16.msrb.mxu3 %v1940_v27  ;;  %v457_v22 = vunpack.c.l.b16 %v217_v20  ;;  %v679_v24 = vsel %vm2139_vm2, %v674_v16, %v678_v17  ;;  %v731_v29 = vunpack.c.l.b16 %v665_v23  ;;  %v1776_v17 = vrot.slane %v1046_v46, 9 }
  0x45   : > { %416 = vmatpush.bf16.msrb.mxu1 %v1883_v19  ;;  %906 = vmatpush.bf16.msrb.mxu0 %v1915_v21  ;;  %v1950_v19 = vld [vmem:[#allocation2 + $0x220] sm:$0xff]  ;;  %v1925_v21 = vld [vmem:[#allocation2 + $0x1d8] sm:$0xff]  ;;  %v458_v31 = vpack.c.b16 %v457_v22, %v266_v41  ;;  %v846_v11 = vpack.c.b16 %v731_v29, %v2238_v59  ;;  %v1089_v59 = vrot.slane %v2172_v12, 5 }
  0x46   : > { %1202 = vmatpush.bf16.msrb.mxu2 %v1931_v34  ;;  %v1949_v41 = vld [vmem:[#allocation2 + $0x218] sm:$0xff]  ;;  %v2286_v34 = vld [vmem:[%s2116_s24 + $0x44] sm:$0x1] }
  0x47   : > { %1313 = vmatpush.bf16.msrb.mxu3 %v1939_v13  ;;  %v690_v3 = vshll.u32 %v2286_v34, 16 }
  0x49   : > { %417 = vmatpush.bf16.msrb.mxu1 %v1882_v30  ;;  %907 = vmatpush.bf16.msrb.mxu0 %v1914_v36  ;;  %v2259_v30 = vunpack.c.l.b16 %v679_v24  ;;  %v1043_v36 = vld [vmem:[%s2116_s24 + $0x8] sm:$0xe] }
  0x4a   : > { %1203 = vmatpush.bf16.msrb.mxu2 %v1930_v56  ;;  %v1773_v49 = vrot.slane %v1043_v36, 9  ;;  %v1946_v56 = vld [vmem:[#allocation2 + $0x200] sm:$0xff]  ;;  %v1101_v36 = vrot.slane %v2241_v1, 5  ;;  %v1105_v1 = vrot.slane %v2244_v2, 5 }
  0x4b   : > { %v2267_v37 = vpack.c.b16 %v2259_v30, %v731_v29  ;;  %1314 = vmatpush.bf16.msrb.mxu3 %v1938_v28  ;;  %v1097_v29 = vrot.slane %v2211_v8, 5  ;;  %v1049_v28 = vld [vmem:[%s2116_s24 + $0x38] sm:$0xe] }
  0x4c   : > { %418 = vmatmul.bf16.vlgmr.msrb.gmra.mxu1 %v354_v53  ;;  %908 = vmatmul.bf16.vlgmr.msrb.gmra.mxu0 %v844_v55  ;;  %v1774_v55 = vrot.slane %v1044_v50, 9  ;;  %v1082_v58 = vsel %vm2270_vm5, %v1773_v49, %v1081_v44  ;;  %v1050_v44 = vld [vmem:[%s2116_s24 + $0x40] sm:$0xe] }
  0x4d   : > { %1005 = vmatpush.bf16.msra.mxu1 %v1929_v33  ;;  %1412 = vmatpush.bf16.msra.mxu0 %v1953_v39  ;;  %v1042_v33 = vld [vmem:[%s2116_s24] sm:$0xe]  ;;  %v1133_v61 = vunpack.c.l.b16 %v1082_v58  ;;  %v1780_v49 = vrot.slane %v1050_v44, 9  ;;  %v563_v58 = vld [vmem:[%s2116_s24 + $0x48] sm:$0xf] }
  0x4e   : > { %807 = vmatmul.bf16.gmra.mxu3 %v2247_v47  ;;  %2004 = vmatpush.bf16.msra.mxu2 %v1953_v39  ;;  %v1772_v0 = vrot.slane %v1042_v33, 9  ;;  %v1923_v39 = vld [vmem:[#allocation2 + $0x1c8] sm:$0xff] }
  0x4f   : > { %526 = vmatmul.bf16.gmra.mxu2 %v2236_v57 }
  0x50   : > { %v1078_v14 = vsel %vm2270_vm5, %v1772_v0, %v1077_v38 }
  0x51   : > { %1006 = vmatpush.bf16.msra.mxu1 %v1928_v54  ;;  %1413 = vmatpush.bf16.msra.mxu0 %v1952_v60  ;;  %v1132_v35 = vunpack.c.l.b16 %v1078_v14 }
  0x52   : > { %2005 = vmatpush.bf16.msra.mxu2 %v1952_v60  ;;  %v1947_v60 = vld [vmem:[#allocation2 + $0x208] sm:$0xff] }
  0x53   : > { %v1140_v40 = vpack.c.b16 %v1133_v61, %v1132_v35  ;;  %v698_v35 = vshll.u32 %v563_v58, 16 }
  0x55   : > { %1007 = vmatpush.bf16.msra.mxu1 %v1927_v4  ;;  %1414 = vmatpush.bf16.msra.mxu0 %v1951_v45  ;;  %v1086_v4 = vsel %vm2270_vm5, %v1774_v55, %v1085_v18 }
  0x56   : > { %2006 = vmatpush.bf16.msra.mxu2 %v1951_v45  ;;  %v1134_v27 = vunpack.c.l.b16 %v1086_v4  ;;  %v700_v4 = vrot.slane %v698_v35, 5 }
  0x58   : > { %v1251_v45 = vpack.c.b16 %v1134_v27, %v1133_v61 }
  0x59   : > { %1008 = vmatpush.bf16.msra.mxu1 %v1926_v15  ;;  %1415 = vmatpush.bf16.msra.mxu0 %v1950_v19  ;;  %v692_v15 = vrot.slane %v690_v3, 5 }
  0x5a   : > { %2007 = vmatpush.bf16.msra.mxu2 %v1950_v19  ;;  %v1090_v19 = vsel %vm2270_vm5, %v1775_v32, %v1089_v59 }
  0x5c   : > { %423 = vmatmul.bf16.gmra.mxu1 %v2166_v9  ;;  %913 = vmatmul.bf16.gmra.mxu0 %v845_v26  ;;  %v561_v9 = vld [vmem:[%s2116_s24 + $0x40] sm:$0xf] }
  0x5d   : > { %1009 = vmatpush.bf16.msra.mxu1 %v1925_v21  ;;  %1416 = vmatpush.bf16.msra.mxu0 %v1949_v41  ;;  %v681_v53 = vshrl.u32 %v561_v9, 16  ;;  %v684_v54 = vshll.u32 %v561_v9, 16  ;;  %v1135_v21 = vunpack.c.l.b16 %v1090_v19  ;;  %v1109_v9 = vrot.slane %v2286_v34, 5 }
  0x5e   : > { %812 = vmatmul.bf16.gmra.mxu3 %v2267_v37  ;;  %2008 = vmatpush.bf16.msra.mxu2 %v1949_v41  ;;  %v1779_v41 = vrot.slane %v1049_v28, 9 }
  0x5f   : > { %531 = vmatmul.bf16.gmra.mxu2 %v458_v31  ;;  %v683_v48 = vrot.slane %v681_v53, 4  ;;  %v686_v62 = vrot.slane %v684_v54, 5  ;;  %v1141_v24 = vpack.c.b16 %v1135_v21, %v1134_v27  ;;  %v1048_v31 = vld [vmem:[%s2116_s24 + $0x30] sm:$0xe]  ;;  %v564_v53 = vld [vmem:[%s2116_s24 + $0x4c] sm:$0x1] }
  0x60   : > { %v1778_v33 = vrot.slane %v1048_v31, 9  ;;  %v1106_v50 = vsel %vm2270_vm5, %v1779_v41, %v1105_v1  ;;  %v1051_v54 = vld [vmem:[%s2116_s24 + $0x48] sm:$0xe]  ;;  %v1113_v18 = vrot.slane %v564_v53, 5 }
  0x61   : > { %1010 = vmatpush.bf16.msra.mxu1 %v1924_v25  ;;  %1417 = vmatpush.bf16.msra.mxu0 %v1948_v51  ;;  %v687_v63 = vor.u32 %v686_v62, %v683_v48  ;;  %v1047_v25 = vld [vmem:[%s2116_s24 + $0x28] sm:$0xe]  ;;  %v1781_v55 = vrot.slane %v1051_v54, 9 }
  0x62   : > { %2009 = vmatpush.bf16.msra.mxu2 %v1948_v51  ;;  %v1777_v26 = vrot.slane %v1047_v25, 9  ;;  %v1102_v38 = vsel %vm2270_vm5, %v1778_v33, %v1101_v36  ;;  %v1139_v51 = vunpack.c.l.b16 %v1106_v50 }
  0x63   : > { %v688_v13 = vrot.slane %v687_v63, 4  ;;  %v1114_v61 = vsel %vm2270_vm5, %v1781_v55, %v1113_v18 }
  0x64   : > { %v1361_v48 = vunpack.c.l.b16 %v1114_v61 }
  0x65   : > { %1011 = vmatpush.bf16.msra.mxu1 %v1923_v39  ;;  %1418 = vmatpush.bf16.msra.mxu0 %v1947_v60  ;;  %v693_v16 = vsel %vm2139_vm2, %v688_v13, %v692_v15 }
  0x66   : > { %2010 = vmatpush.bf16.msra.mxu2 %v1947_v60  ;;  %v2299_v20 = vunpack.c.l.b16 %v693_v16  ;;  %v695_v60 = vshrl.u32 %v563_v58, 16 }
  0x68   : > { %v847_v22 = vpack.c.b16 %v2299_v20, %v2259_v30  ;;  %v1098_v30 = vsel %vm2270_vm5, %v1777_v26, %v1097_v29  ;;  %v697_v62 = vrot.slane %v695_v60, 4 }
  0x69   : > { %1012 = vmatpush.bf16.msra.mxu1 %v1922_v52  ;;  %1419 = vmatpush.bf16.msra.mxu0 %v1946_v56  ;;  %v1137_v0 = vunpack.c.l.b16 %v1098_v30 }
  0x6a   : > { %2011 = vmatpush.bf16.msra.mxu2 %v1946_v56 }
  0x6c   : > { %428 = vmatmul.bf16.gmra.mxu1 %v2205_v6  ;;  %918 = vmatmul.bf16.gmra.mxu0 %v846_v11  ;;  %v1093_v6 = vrot.slane %v2208_v7, 5 }
  0x6e   : > { %1315 = vmatmul.bf16.vlgmr.msrb.gmra.mxu3 %v1251_v45  ;;  %v1094_v12 = vsel %vm2270_vm5, %v1776_v17, %v1093_v6 }
  0x6f   : > { %1204 = vmatmul.bf16.vlgmr.msrb.gmra.mxu2 %v1140_v40  ;;  %v1136_v23 = vunpack.c.l.b16 %v1094_v12  ;;  %v701_v40 = vor.u32 %v700_v4, %v697_v62 }
  0x71   : > { %v1252_v7 = vpack.c.b16 %v1136_v23, %v1135_v21  ;;  %v1142_v39 = vpack.c.b16 %v1137_v0, %v1136_v23  ;;  %v702_v63 = vrot.slane %v701_v40, 4 }
  0x7c   : > { %433 = vmatmul.bf16.gmra.mxu1 %v2236_v57  ;;  %923 = vmatmul.bf16.gmra.mxu0 %v847_v22  ;;  %v1138_v57 = vunpack.c.l.b16 %v1102_v38 }
  0x7e   : > { %1320 = vmatmul.bf16.gmra.mxu3 %v1252_v7  ;;  %v1253_v8 = vpack.c.b16 %v1138_v57, %v1137_v0  ;;  %v1143_v14 = vpack.c.b16 %v1139_v51, %v1138_v57 }
  0x7f   : > { %1209 = vmatmul.bf16.gmra.mxu2 %v1141_v24 }
  0x8c   : > { %1013 = vmatmul.bf16.vlgmr.msra.gmra.mxu1 %v2215_v10  ;;  %1420 = vmatmul.bf16.vlgmr.msra.gmra.mxu0 %v1141_v24  ;;  %v1110_v10 = vsel %vm2270_vm5, %v1780_v49, %v1109_v9 }
  0x8d   : > { %v1250_v52 = vunpack.c.l.b16 %v1110_v10 }
  0x8e   : > { %1325 = vmatmul.bf16.gmra.mxu3 %v1253_v8 }
  0x8f   : > { %1214 = vmatmul.bf16.gmra.mxu2 %v1142_v39  ;;  %v1254_v2 = vpack.c.b16 %v1250_v52, %v1139_v51  ;;  %v1362_v27 = vpack.c.b16 %v1361_v48, %v1250_v52 }
  0x9c   : > { %1018 = vmatmul.bf16.gmra.mxu1 %v2247_v47  ;;  %1425 = vmatmul.bf16.gmra.mxu0 %v1142_v39  ;;  %v704_v47 = vshll.u32 %v564_v53, 16 }
  0x9e   : > { %1330 = vmatmul.bf16.gmra.mxu3 %v1254_v2  ;;  %v706_v3 = vrot.slane %v704_v47, 5 }
  0x9f   : > { %1219 = vmatmul.bf16.gmra.mxu2 %v1143_v14 }
  0xa0   : > { %v707_v42 = vsel %vm2139_vm2, %v702_v63, %v706_v3 }
  0xa1   : > { %v954_v15 = vunpack.c.l.b16 %v707_v42 }
  0xa3   : > { %v955_v32 = vpack.c.b16 %v954_v15, %v2299_v20 }
  0xa9   : > { %v342_v34 = vpop.f32.mrf.mxu1  ;;  %v332_v11 = vpop.f32.mrf.mxu0 }
  0xac   : > { %1023 = vmatmul.bf16.gmra.mxu1 %v2267_v37  ;;  %1430 = vmatmul.bf16.gmra.mxu0 %v1143_v14 }
  0xaf   : > { %1435 = vmatmul.bf16.vlgmr.msra.gmra.mxu2 %v1362_v27 }
  0xb1   : > { %v344_v45 = vpop.f32.mrf.mxu1  ;;  %v334_v56 = vpop.f32.mrf.mxu0 }
  0xb2   : > { %v517_v5 = vpop.f32.mrf.mxu2  ;;  %v798_v13 = vpop.f32.mrf.mxu3 }
  0xb9   : > { %v347_v46 = vpop.f32.mrf.mxu1  ;;  %v337_v16 = vpop.f32.mrf.mxu0 }
  0xba   : > { %v519_v59 = vpop.f32.mrf.mxu2  ;;  %v2333_v17 = vpop.f32.mrf.mxu3 }
  0xbc   : > { %1028 = vmatmul.bf16.gmra.mxu1 %v955_v32 }
  0xc1   : > { %v349_v6 = vpop.f32.mrf.mxu1  ;;  %v339_v19 = vpop.f32.mrf.mxu0 }
  0xc2   : > { %v522_v37 = vpop.f32.mrf.mxu2  ;;  %v803_v21 = vpop.f32.mrf.mxu3 }
  0xc9   : > { %v419_v22 = vpop.f32.mrf.mxu1  ;;  %v909_v23 = vpop.f32.mrf.mxu0 }
  0xca   : > { %v524_v12 = vpop.f32.mrf.mxu2  ;;  %v420_v24 = vadd.f32 %v419_v22, %v332_v11  ;;  %v2335_v25 = vpop.f32.mrf.mxu3 }
  0xcc   : > { %v537_v43 = vadd.f32 %v517_v5, %v420_v24  ;;  %v1955_v24 = vld [vmem:[%s2360_s28] sm:$0xff]  }
  0xce   : > { %v818_v7 = vadd.f32 %v798_v13, %v537_v43 }
  0xd0   : > { %v929_v26 = vadd.f32 %v909_v23, %v818_v7 }
  0xd1   : > { %v421_v29 = vpop.f32.mrf.mxu1  ;;  %v911_v31 = vpop.f32.mrf.mxu0 }
  0xd2   : > { %v527_v20 = vpop.f32.mrf.mxu2  ;;  %v422_v33 = vadd.f32 %v421_v29, %v334_v56  ;;  %v808_v30 = vpop.f32.mrf.mxu3  ;;  %v1956_v29 = vunpack.c.l.bf16 %v1955_v24 }
  0xd4   : > { %v538_v36 = vadd.f32 %v519_v59, %v422_v33  ;;  %v1957_v33 = vunpack.c.h.bf16 %v1955_v24 }
  0xd9   : > { %v424_v38 = vpop.f32.mrf.mxu1  ;;  %v914_v57 = vpop.f32.mrf.mxu0 }
  0xda   : > { %v529_v0 = vpop.f32.mrf.mxu2  ;;  %v425_v39 = vadd.f32 %v424_v38, %v337_v16  ;;  %v2337_v44 = vpop.f32.mrf.mxu3 }
  0xdc   : > { %v539_v28 = vadd.f32 %v522_v37, %v425_v39 }
  0xde   : > { %v820_v8 = vadd.f32 %v803_v21, %v539_v28 }
  0xe0   : > { %v931_v41 = vadd.f32 %v914_v57, %v820_v8 }
  0xe1   : > { %v426_v49 = vpop.f32.mrf.mxu1  ;;  %v2339_v9 = vpop.f32.mrf.mxu0 }
  0xe2   : > { %v532_v1 = vpop.f32.mrf.mxu2  ;;  %v427_v50 = vadd.f32 %v426_v49, %v339_v19  ;;  %v813_v54 = vpop.f32.mrf.mxu3 }
  0xe4   : > { %v540_v51 = vadd.f32 %v524_v12, %v427_v50 }
  0xe6   : > { %v821_v39 = vadd.f32 %v2335_v25, %v540_v51 }
  0xe8   : > { %v932_v50 = vadd.f32 %v2339_v9, %v821_v39 }
  0xe9   : > { %v429_v52 = vpop.f32.mrf.mxu1  ;;  %v919_v14 = vpop.f32.mrf.mxu0 }
  0xea   : > { %v534_v10 = vpop.f32.mrf.mxu2  ;;  %v430_v53 = vadd.f32 %v429_v52, %v342_v34  ;;  %v2347_v62 = vpop.f32.mrf.mxu3 }
  0xec   : > { %v541_v2 = vadd.f32 %v527_v20, %v430_v53 }
  0xee   : > { %v822_v55 = vadd.f32 %v808_v30, %v541_v2 }
  0xf0   : > { %v2341_v18 = vadd.f32 %v919_v14, %v822_v55 }
  0xf1   : > { %v431_v60 = vpop.f32.mrf.mxu1  ;;  %v2343_v35 = vpop.f32.mrf.mxu0 }
  0xf2   : > { %v1205_v58 = vpop.f32.mrf.mxu2  ;;  %v432_v61 = vadd.f32 %v431_v60, %v344_v45  ;;  %v1316_v63 = vpop.f32.mrf.mxu3 }
  0xf4   : > { %v2345_v48 = vadd.f32 %v529_v0, %v432_v61 }
  0xf9   : > { %v434_v11 = vpop.f32.mrf.mxu1  ;;  %v924_v27 = vpop.f32.mrf.mxu0 }
  0xfa   : > { %v1207_v4 = vpop.f32.mrf.mxu2  ;;  %v435_v40 = vadd.f32 %v434_v11, %v347_v46  ;;  %v1318_v15 = vpop.f32.mrf.mxu3  ;;  %v819_v46 = vadd.f32 %v2333_v17, %v538_v36 }
  0xfc   : > { %v543_v34 = vadd.f32 %v532_v1, %v435_v40  ;;  %v930_v21 = vadd.f32 %v911_v31, %v819_v46 }
  0xfe   : > { %v824_v47 = vadd.f32 %v813_v54, %v543_v34  ;;  %v823_v34 = vadd.f32 %v2337_v44, %v2345_v48 }
 0x100   : > { %v2349_v3 = vadd.f32 %v924_v27, %v824_v47 }
 0x101   : > { %v436_v56 = vpop.f32.mrf.mxu1  ;;  %v2351_v42 = vpop.f32.mrf.mxu0 }
 0x102   : > { %v1210_v5 = vpop.f32.mrf.mxu2  ;;  %v437_v13 = vadd.f32 %v436_v56, %v349_v6  ;;  %v1321_v43 = vpop.f32.mrf.mxu3 }
 0x104   : > { %v2353_v45 = vadd.f32 %v534_v10, %v437_v13 }
 0x106   : > { %v825_v24 = vadd.f32 %v2347_v62, %v2353_v45 }
 0x109   : > { %v1014_v32 = vpop.f32.mrf.mxu1  ;;  %v1421_v59 = vpop.f32.mrf.mxu0 }
 0x10a   : > { %v1034_v16 = vadd.f32 %v1014_v32, %v929_v26  ;;  %v1212_v37 = vpop.f32.mrf.mxu2  ;;  %v1323_v8 = vpop.f32.mrf.mxu3 }
 0x10c   : > { %v1225_v19 = vadd.f32 %v1205_v58, %v1034_v16  ;;  %v1991_v16 = vld [vmem:[%s2360_s28 + $0x10] sm:$0xff]  }
 0x10e   : > { %v1336_v22 = vadd.f32 %v1316_v63, %v1225_v19 }
 0x110   : > { %v1441_v20 = vadd.f32 %v1421_v59, %v1336_v22 }
 0x111   : > { %v1016_v12 = vpop.f32.mrf.mxu1  ;;  %v1423_v6 = vpop.f32.mrf.mxu0 }
 0x112   : > { %v1035_v23 = vadd.f32 %v1016_v12, %v930_v21  ;;  %v1215_v26 = vpop.f32.mrf.mxu2  ;;  %v1465_v0 = vadd.f32 %v1956_v29, %v1441_v20  ;;  %v1326_v61 = vpop.f32.mrf.mxu3  ;;  %v1965_v12 = vunpack.c.h.bf16 %v1991_v16  ;;  %v936_v20 = vadd.f32 %v2351_v42, %v825_v24 }
 0x114   : > { %v1226_v7 = vadd.f32 %v1207_v4, %v1035_v23 }
 0x116   : > { %v1337_v17 = vadd.f32 %v1318_v15, %v1226_v7 }
 0x118   : > { %v1442_v36 = vadd.f32 %v1423_v6, %v1337_v17 }
 0x119   : > { %v1019_v31 = vpop.f32.mrf.mxu1  ;;  %v1426_v30 = vpop.f32.mrf.mxu0 }
 0x11a   : > { %v1466_v38 = vadd.f32 %v1957_v33, %v1442_v36  ;;  %v1036_v57 = vadd.f32 %v1019_v31, %v931_v41  ;;  %v1217_v49 = vpop.f32.mrf.mxu2  ;;  %v1990_v41 = vld [vmem:[%s2360_s28 + $0x8] sm:$0xff]   ;;  %v1328_v56 = vpop.f32.mrf.mxu3  ;;  %v1992_v36 = vld [vmem:[%s2360_s28 + $0x18] sm:$0xff]  }
 0x11b   : > { %v1960_v55 = vunpack.c.l.bf16 %v1990_v41  ;;  %v1961_v60 = vunpack.c.h.bf16 %v1990_v41 }
 0x11c   : > { %v1973_v28 = vpack.c.bf16 %v1466_v38, %v1465_v0  ;;  %v1227_v1 = vadd.f32 %v1210_v5, %v1036_v57  ;;  %v934_v5 = vadd.f32 %v2343_v35, %v823_v34  ;;  %v1968_v38 = vunpack.c.l.bf16 %v1992_v36 }
 0x11d   : > { %v1969_v57 = vunpack.c.h.bf16 %v1992_v36 }
 0x11e   : > { %1974 = vst [vmem:[%s2366_s4] sm:$0xff] %v1973_v28   ;;  %v1338_v14 = vadd.f32 %v1321_v43, %v1227_v1 }
 0x120   : > { %v1443_v2 = vadd.f32 %v1426_v30, %v1338_v14 }
 0x121   : > { %v1021_v10 = vpop.f32.mrf.mxu1  ;;  %v1428_v52 = vpop.f32.mrf.mxu0 }
 0x122   : > { %v1037_v53 = vadd.f32 %v1021_v10, %v932_v50  ;;  %v1220_v51 = vpop.f32.mrf.mxu2  ;;  %v1467_v11 = vadd.f32 %v1960_v55, %v1443_v2  ;;  %v1331_v23 = vpop.f32.mrf.mxu3 }
 0x124   : > { %v1228_v54 = vadd.f32 %v1212_v37, %v1037_v53 }
 0x126   : > { %v1339_v58 = vadd.f32 %v1323_v8, %v1228_v54 }
 0x128   : > { %v1444_v25 = vadd.f32 %v1428_v52, %v1339_v58 }
 0x129   : > { %v1024_v4 = vpop.f32.mrf.mxu1  ;;  %v1431_v40 = vpop.f32.mrf.mxu0 }
 0x12a   : > { %v1468_v27 = vadd.f32 %v1961_v60, %v1444_v25  ;;  %v1038_v9 = vadd.f32 %v1024_v4, %v2341_v18  ;;  %v1222_v59 = vpop.f32.mrf.mxu2  ;;  %v1964_v18 = vunpack.c.l.bf16 %v1991_v16  ;;  %v1333_v30 = vpop.f32.mrf.mxu3 }
 0x12c   : > { %v1978_v47 = vpack.c.bf16 %v1468_v27, %v1467_v11  ;;  %v1229_v63 = vadd.f32 %v1215_v26, %v1038_v9 }
 0x12e   : > { %1993 = vst [vmem:[%s2366_s4 + $0x8] sm:$0xff] %v1978_v47   ;;  %v1340_v15 = vadd.f32 %v1326_v61, %v1229_v63 }
 0x130   : > { %v1445_v19 = vadd.f32 %v1431_v40, %v1340_v15 }
 0x131   : > { %v1026_v13 = vpop.f32.mrf.mxu1  ;;  %v1433_v46 = vpop.f32.mrf.mxu0 }
 0x132   : > { %v1039_v32 = vadd.f32 %v1026_v13, %v934_v5  ;;  %v1469_v6 = vadd.f32 %v1964_v18, %v1445_v19  ;;  %v1436_v7 = vpop.f32.mrf.mxu2 }
 0x134   : > { %v1230_v37 = vadd.f32 %v1217_v49, %v1039_v32 }
 0x136   : > { %v1341_v21 = vadd.f32 %v1328_v56, %v1230_v37 }
 0x138   : > { %v1446_v44 = vadd.f32 %v1433_v46, %v1341_v21 }
 0x139   : > { %v1029_v48 = vpop.f32.mrf.mxu1 }
 0x13a   : > { %v1470_v22 = vadd.f32 %v1965_v12, %v1446_v44  ;;  %v1040_v35 = vadd.f32 %v1029_v48, %v2349_v3  ;;  %v1438_v39 = vpop.f32.mrf.mxu2 }
 0x13c   : > { %v1983_v43 = vpack.c.bf16 %v1470_v22, %v1469_v6  ;;  %v1231_v26 = vadd.f32 %v1220_v51, %v1040_v35 }
 0x13e   : > { %1994 = vst [vmem:[%s2366_s4 + $0x10] sm:$0xff] %v1983_v43   ;;  %v1342_v17 = vadd.f32 %v1331_v23, %v1231_v26 }
 0x140   : > { %v1447_v0 = vadd.f32 %v1436_v7, %v1342_v17 }
 0x141   : > { %v1031_v29 = vpop.f32.mrf.mxu1 }
 0x142   : > { %v1041_v33 = vadd.f32 %v1031_v29, %v936_v20  ;;  %v1471_v62 = vadd.f32 %v1968_v38, %v1447_v0 }
 0x144   : > { %v1232_v31 = vadd.f32 %v1222_v59, %v1041_v33 }
 0x146   : > { %v1343_v3 = vadd.f32 %v1333_v30, %v1232_v31 }
 0x148   : > { %v1448_v28 = vadd.f32 %v1438_v39, %v1343_v3 }
 0x14a   : > { %v1472_v45 = vadd.f32 %v1969_v57, %v1448_v28 }
 0x14c   : > { %v1988_v8 = vpack.c.bf16 %v1472_v45, %v1471_v62 }
 0x14e   : > { %1995 = vst [vmem:[%s2366_s4 + $0x18] sm:$0xff] %v1988_v8  }
 0x14f PF: > { %s14_s12 = sadd.s32 1, %s2074_s12  }
 0x150   : > { %p11_p7 = scmp.ge.s32.totalorder %s14_s12, 4  }
 0x152   :  { %13 = sbr.rel (!%p11_p7) target bundleno = 1 (0x1), region = 78 }
 0x157   :  { %1510 = vsyncpa [#allocation3], 1 }
 0x158   :  { %1512 = vsyncpa [#allocation3 + $0x1], 1 }

</bundles_post_ra>
